<compile_context>
chip_gen: v7x
topology: tpu7x:2x2x1
jax: 0.10.0
libtpu: 0.0.40
codegen_flags: <defaults>
</compile_context>

<pallas_src>
import jax
import jax.numpy as jnp
from jax import lax
from jax.experimental import pallas as pl
from jax.experimental.pallas import tpu as pltpu


# --------------------------------------------------------------------------
# Module configuration (defaults of the PyTorch Conv2Plus1D)
# --------------------------------------------------------------------------
IN_CHANNELS = 3
OUT_CHANNELS = 3
KERNEL_SIZE = (3, 3, 3)        # (temporal, spatial, spatial)
STRIDE = (1, 1, 1)
PADDING = (0, 0, 0)
DILATION = (1, 1, 1)
# TODO(synk): non-unit stride/dilation/padding not wired into the kernel (module defaults are 1/0).


def calculate_hidden_channels(kernel_size, in_channels, out_channels):
    temporal = kernel_size[0]
    spatial = (kernel_size[1] + kernel_size[2]) // 2
    return int(
        temporal * spatial ** 2 * in_channels * out_channels
        / (spatial ** 2 * in_channels + temporal * out_channels)
    )


HIDDEN_CHANNELS = calculate_hidden_channels(KERNEL_SIZE, IN_CHANNELS, OUT_CHANNELS)


def _multi_tensorcore():
    """True on chips with >1 TensorCore per chip (v7x, and v4/v5p megacore)."""
    try:
        kind = jax.devices()[0].device_kind.lower()
    except Exception:
        return False
    return any(tag in kind for tag in ("v7", "v5p", "v4"))


# --------------------------------------------------------------------------
# Fused Pallas kernel (spatial conv + ReLU + temporal conv), NB batches / step
# --------------------------------------------------------------------------
def _make_fused_kernel(NB, C, T, H, W, HID, OUT, KT, KH, KW):
    HW = H * W

    def kernel(x_ref, ws_ref, bs_ref, wt_ref, bt_ref, o_ref):
        # x_ref : (NB, C*T, HW)     VMEM  — spatial positions flattened on lanes
        # ws_ref: (KH*KW*C*HID,)    SMEM  — spatial conv weights (kh, kw, c, hid)
        # bs_ref: (HID,)            SMEM
        # wt_ref: (KT*HID*OUT,)     SMEM  — temporal conv weights (k, hid, out)
        # bt_ref: (OUT,)            SMEM
        # o_ref : (NB, OUT, T, HW)  VMEM  — lane/sublane-dense output slab
        #                                   (rows t >= T-KT+1 are garbage, cropped
        #                                    by the wrapper)
        for nb in range(NB):
            # ---- 2D spatial conv + bias + ReLU (VPU broadcast-FMA) ----------
            hid = [jnp.full((T, HW), bs_ref[o], jnp.float32) for o in range(HID)]
            for c in range(C):
                xc = x_ref[nb, c * T:(c + 1) * T, :]          # (T, HW), one channel
                for kh in range(KH):
                    for kw in range(KW):
                        s = kh * W + kw
                        # xs[t, p] = xc[t, (p + s) % HW]; wrapped lanes only hit
                        # spatial positions that the wrapper crops.
                        xs = xc if s == 0 else pltpu.roll(xc, HW - s, axis=1)
                        base = ((kh * KW + kw) * C + c) * HID
                        for o in range(HID):
                            hid[o] = hid[o] + ws_ref[base + o] * xs
            hid = [jnp.maximum(h, 0.0) for h in hid]

            # ---- 1D temporal conv + bias ------------------------------------
            acc = [jnp.full((T, HW), bt_ref[oc], jnp.float32) for oc in range(OUT)]
            for k in range(KT):
                for h in range(HID):
                    # seg[t] = hid[h][(t + k) % T]; wrapped rows (t >= To) are
                    # garbage and cropped by the wrapper.
                    seg = hid[h] if k == 0 else pltpu.roll(hid[h], T - k, axis=0)
                    base = (k * HID + h) * OUT
                    for oc in range(OUT):
                        acc[oc] = acc[oc] + wt_ref[base + oc] * seg

            for oc in range(OUT):
                o_ref[nb, oc] = acc[oc]            # full aligned (T, HW) store

    return kernel


# --------------------------------------------------------------------------
# Wrapper
# --------------------------------------------------------------------------
def conv2plus1d_forward(x, w_s, b_s, w_t, b_t):
    """Full (2+1)D block.

    x  : (B, C, T, H, W) float32  (PyTorch NCTHW)
    w_s: (KH, KW, C, HID)   -- PyTorch Conv2d weight (HID, C, KH, KW) transposed
    b_s: (HID,)
    w_t: (KT, HID, OUT)     -- PyTorch Conv1d weight (OUT, HID, KT) transposed
    b_t: (OUT,)
    returns (B, OUT, T', H', W') float32
    """
    B, C, T, H, W = x.shape
    KH, KW, _, HID = w_s.shape
    KT, _, OUT = w_t.shape
    Ho, Wo = H - KH + 1, W - KW + 1
    To = T - KT + 1
    HW = H * W

    # Flatten (H, W) onto the lane axis (free contiguous reshape, no pad).
    x_f = x.reshape(B, C * T, HW).astype(jnp.float32)

    ws_flat = w_s.reshape(-1).astype(jnp.float32)        # (KH*KW*C*HID,)
    bs_flat = b_s.reshape(-1).astype(jnp.float32)        # (HID,)
    wt_flat = w_t.reshape(-1).astype(jnp.float32)        # (KT*HID*OUT,)
    bt_flat = b_t.reshape(-1).astype(jnp.float32)        # (OUT,)

    # 2-TC chips (v7x): one batch element per grid step, one per TensorCore.
    # Single-TC chips (v5e/v6e): merge all batches into one grid step to avoid
    # the per-step fixed overhead.
    NB = 1 if (_multi_tensorcore() and B > 1) else B
    n_steps = B // NB

    kernel = _make_fused_kernel(NB, C, T, H, W, HID, OUT, KT, KH, KW)
    smem_spec = pl.BlockSpec(memory_space=pltpu.MemorySpace.SMEM)

    out = pl.pallas_call(
        kernel,
        out_shape=jax.ShapeDtypeStruct((B, OUT, T, HW), jnp.float32),
        grid=(n_steps,),
        in_specs=[
            pl.BlockSpec((NB, C * T, HW), lambda b: (b, 0, 0)),
            smem_spec,   # ws
            smem_spec,   # bs
            smem_spec,   # wt
            smem_spec,   # bt
        ],
        out_specs=pl.BlockSpec((NB, OUT, T, HW), lambda b: (b, 0, 0, 0)),
        compiler_params=pltpu.CompilerParams(
            dimension_semantics=("parallel",)),
    )(x_f, ws_flat, bs_flat, wt_flat, bt_flat)

    # Un-flatten the lane axis and crop the invalid (wrapped) boundary positions.
    # TODO(synk): if the consumer accepts the lane-dense slab, this crop copy can
    # be fused into the consumer instead.
    return out.reshape(B, OUT, T, H, W)[:, :, :To, :Ho, :Wo]


# --------------------------------------------------------------------------
# Pure-JAX reference (for verification)
# --------------------------------------------------------------------------
def conv2plus1d_reference(x, w_s, b_s, w_t, b_t):
    B, C, T, H, W = x.shape
    KH, KW, _, HID = w_s.shape
    KT, _, OUT = w_t.shape
    Ho, Wo = H - KH + 1, W - KW + 1
    To = T - KT + 1

    x_s = jnp.transpose(x, (0, 2, 3, 4, 1)).reshape(B * T, H, W, C)
    y_s = lax.conv_general_dilated(
        x_s, w_s, window_strides=(1, 1), padding="VALID",
        dimension_numbers=("NHWC", "HWIO", "NHWC")) + b_s
    y_s = jnp.maximum(y_s, 0.0)

    y_s = y_s.reshape(B, T, Ho, Wo, HID)
    x_t = jnp.transpose(y_s, (0, 2, 3, 1, 4)).reshape(B * Ho * Wo, T, HID)
    y_t = lax.conv_general_dilated(
        x_t, w_t, window_strides=(1,), padding="VALID",
        dimension_numbers=("NWC", "WIO", "NWC")) + b_t

    y = y_t.reshape(B, Ho, Wo, To, OUT)
    return jnp.transpose(y, (0, 4, 3, 1, 2))              # (B, OUT, T', H', W')


# --------------------------------------------------------------------------
# Main
# --------------------------------------------------------------------------
if __name__ == "__main__":
    key = jax.random.PRNGKey(0)
    k_x, k_ws, k_bs, k_wt, k_bt = jax.random.split(key, 5)

    B, C, T, H, W = 2, IN_CHANNELS, 8, 16, 16
    KT, KH, KW = KERNEL_SIZE
    HID = HIDDEN_CHANNELS

    # Deterministic synthetic parameters (shapes match nn.Conv2d / nn.Conv1d).
    w_s = jax.random.normal(k_ws, (KH, KW, C, HID), jnp.float32) * 0.1
    b_s = jax.random.normal(k_bs, (HID,), jnp.float32) * 0.1
    w_t = jax.random.normal(k_wt, (KT, HID, OUT_CHANNELS), jnp.float32) * 0.1
    b_t = jax.random.normal(k_bt, (OUT_CHANNELS,), jnp.float32) * 0.1

    x = jax.random.normal(k_x, (B, C, T, H, W), jnp.float32)

    fwd = jax.jit(conv2plus1d_forward)
    out = jax.block_until_ready(fwd(x, w_s, b_s, w_t, b_t))
    ref = jax.block_until_ready(conv2plus1d_reference(x, w_s, b_s, w_t, b_t))

    assert out.shape == (B, OUT_CHANNELS, T - KT + 1, H - KH + 1, W - KW + 1), out.shape
    assert jnp.allclose(out, ref, atol=1e-4, rtol=1e-4), float(jnp.max(jnp.abs(out - ref)))

    print("KERNEL_OK")
</pallas_src>

<mosaic_0001>
module attributes {stable_mosaic.version = 11 : i64} {
  func.func @kernel(%arg0: i32, %arg1: memref<2x24x256xf32, #tpu.memory_space<vmem>>, %arg2: memref<162xf32, #tpu.memory_space<smem>>, %arg3: memref<6xf32, #tpu.memory_space<smem>>, %arg4: memref<54xf32, #tpu.memory_space<smem>>, %arg5: memref<3xf32, #tpu.memory_space<smem>>, %arg6: memref<2x3x8x256xf32, #tpu.memory_space<vmem>>) attributes {dimension_semantics = [#tpu.dimension_semantics<parallel>], iteration_bounds = array<i64: 1>, scalar_prefetch = 0 : i64, scratch_operands = 0 : i64, tpu.core_type = #tpu.core_type<tc>, window_params = [{transform_indices = @transform_0, window_bounds = array<i64: 2, 24, 256>}, {transform_indices = @transform_1, window_bounds = array<i64: 162>}, {transform_indices = @transform_2, window_bounds = array<i64: 6>}, {transform_indices = @transform_3, window_bounds = array<i64: 54>}, {transform_indices = @transform_4, window_bounds = array<i64: 3>}, {transform_indices = @transform_5, window_bounds = array<i64: 2, 3, 8, 256>}]} {
    %c0 = arith.constant 0 : index
    %0 = memref.load %arg3[%c0] : memref<6xf32, #tpu.memory_space<smem>>
    %1 = vector.broadcast %0 : f32 to vector<8x256xf32>
    %c1 = arith.constant 1 : index
    %2 = memref.load %arg3[%c1] : memref<6xf32, #tpu.memory_space<smem>>
    %3 = vector.broadcast %2 : f32 to vector<8x256xf32>
    %c2 = arith.constant 2 : index
    %4 = memref.load %arg3[%c2] : memref<6xf32, #tpu.memory_space<smem>>
    %5 = vector.broadcast %4 : f32 to vector<8x256xf32>
    %c3 = arith.constant 3 : index
    %6 = memref.load %arg3[%c3] : memref<6xf32, #tpu.memory_space<smem>>
    %7 = vector.broadcast %6 : f32 to vector<8x256xf32>
    %c4 = arith.constant 4 : index
    %8 = memref.load %arg3[%c4] : memref<6xf32, #tpu.memory_space<smem>>
    %9 = vector.broadcast %8 : f32 to vector<8x256xf32>
    %c5 = arith.constant 5 : index
    %10 = memref.load %arg3[%c5] : memref<6xf32, #tpu.memory_space<smem>>
    %11 = vector.broadcast %10 : f32 to vector<8x256xf32>
    %c0_0 = arith.constant 0 : index
    %c0_1 = arith.constant 0 : index
    %c0_2 = arith.constant 0 : index
    %12 = vector.load %arg1[%c0_0, %c0_1, %c0_2] : memref<2x24x256xf32, #tpu.memory_space<vmem>>, vector<1x8x256xf32>
    %13 = vector.shape_cast %12 : vector<1x8x256xf32> to vector<8x256xf32>
    %c0_3 = arith.constant 0 : index
    %14 = memref.load %arg2[%c0_3] : memref<162xf32, #tpu.memory_space<smem>>
    %15 = vector.broadcast %14 : f32 to vector<8x256xf32>
    %16 = arith.mulf %15, %13 : vector<8x256xf32>
    %17 = arith.addf %1, %16 : vector<8x256xf32>
    %c1_4 = arith.constant 1 : index
    %18 = memref.load %arg2[%c1_4] : memref<162xf32, #tpu.memory_space<smem>>
    %19 = vector.broadcast %18 : f32 to vector<8x256xf32>
    %20 = arith.mulf %19, %13 : vector<8x256xf32>
    %21 = arith.addf %3, %20 : vector<8x256xf32>
    %c2_5 = arith.constant 2 : index
    %22 = memref.load %arg2[%c2_5] : memref<162xf32, #tpu.memory_space<smem>>
    %23 = vector.broadcast %22 : f32 to vector<8x256xf32>
    %24 = arith.mulf %23, %13 : vector<8x256xf32>
    %25 = arith.addf %5, %24 : vector<8x256xf32>
    %c3_6 = arith.constant 3 : index
    %26 = memref.load %arg2[%c3_6] : memref<162xf32, #tpu.memory_space<smem>>
    %27 = vector.broadcast %26 : f32 to vector<8x256xf32>
    %28 = arith.mulf %27, %13 : vector<8x256xf32>
    %29 = arith.addf %7, %28 : vector<8x256xf32>
    %c4_7 = arith.constant 4 : index
    %30 = memref.load %arg2[%c4_7] : memref<162xf32, #tpu.memory_space<smem>>
    %31 = vector.broadcast %30 : f32 to vector<8x256xf32>
    %32 = arith.mulf %31, %13 : vector<8x256xf32>
    %33 = arith.addf %9, %32 : vector<8x256xf32>
    %c5_8 = arith.constant 5 : index
    %34 = memref.load %arg2[%c5_8] : memref<162xf32, #tpu.memory_space<smem>>
    %35 = vector.broadcast %34 : f32 to vector<8x256xf32>
    %36 = arith.mulf %35, %13 : vector<8x256xf32>
    %37 = arith.addf %11, %36 : vector<8x256xf32>
    %c255_i32 = arith.constant 255 : i32
    %38 = tpu.dynamic_rotate %13 by %c255_i32 dim 1 : vector<8x256xf32>, i32 -> vector<8x256xf32>
    %c18 = arith.constant 18 : index
    %39 = memref.load %arg2[%c18] : memref<162xf32, #tpu.memory_space<smem>>
    %40 = vector.broadcast %39 : f32 to vector<8x256xf32>
    %41 = arith.mulf %40, %38 : vector<8x256xf32>
    %42 = arith.addf %17, %41 : vector<8x256xf32>
    %c19 = arith.constant 19 : index
    %43 = memref.load %arg2[%c19] : memref<162xf32, #tpu.memory_space<smem>>
    %44 = vector.broadcast %43 : f32 to vector<8x256xf32>
    %45 = arith.mulf %44, %38 : vector<8x256xf32>
    %46 = arith.addf %21, %45 : vector<8x256xf32>
    %c20 = arith.constant 20 : index
    %47 = memref.load %arg2[%c20] : memref<162xf32, #tpu.memory_space<smem>>
    %48 = vector.broadcast %47 : f32 to vector<8x256xf32>
    %49 = arith.mulf %48, %38 : vector<8x256xf32>
    %50 = arith.addf %25, %49 : vector<8x256xf32>
    %c21 = arith.constant 21 : index
    %51 = memref.load %arg2[%c21] : memref<162xf32, #tpu.memory_space<smem>>
    %52 = vector.broadcast %51 : f32 to vector<8x256xf32>
    %53 = arith.mulf %52, %38 : vector<8x256xf32>
    %54 = arith.addf %29, %53 : vector<8x256xf32>
    %c22 = arith.constant 22 : index
    %55 = memref.load %arg2[%c22] : memref<162xf32, #tpu.memory_space<smem>>
    %56 = vector.broadcast %55 : f32 to vector<8x256xf32>
    %57 = arith.mulf %56, %38 : vector<8x256xf32>
    %58 = arith.addf %33, %57 : vector<8x256xf32>
    %c23 = arith.constant 23 : index
    %59 = memref.load %arg2[%c23] : memref<162xf32, #tpu.memory_space<smem>>
    %60 = vector.broadcast %59 : f32 to vector<8x256xf32>
    %61 = arith.mulf %60, %38 : vector<8x256xf32>
    %62 = arith.addf %37, %61 : vector<8x256xf32>
    %c254_i32 = arith.constant 254 : i32
    %63 = tpu.dynamic_rotate %13 by %c254_i32 dim 1 : vector<8x256xf32>, i32 -> vector<8x256xf32>
    %c36 = arith.constant 36 : index
    %64 = memref.load %arg2[%c36] : memref<162xf32, #tpu.memory_space<smem>>
    %65 = vector.broadcast %64 : f32 to vector<8x256xf32>
    %66 = arith.mulf %65, %63 : vector<8x256xf32>
    %67 = arith.addf %42, %66 : vector<8x256xf32>
    %c37 = arith.constant 37 : index
    %68 = memref.load %arg2[%c37] : memref<162xf32, #tpu.memory_space<smem>>
    %69 = vector.broadcast %68 : f32 to vector<8x256xf32>
    %70 = arith.mulf %69, %63 : vector<8x256xf32>
    %71 = arith.addf %46, %70 : vector<8x256xf32>
    %c38 = arith.constant 38 : index
    %72 = memref.load %arg2[%c38] : memref<162xf32, #tpu.memory_space<smem>>
    %73 = vector.broadcast %72 : f32 to vector<8x256xf32>
    %74 = arith.mulf %73, %63 : vector<8x256xf32>
    %75 = arith.addf %50, %74 : vector<8x256xf32>
    %c39 = arith.constant 39 : index
    %76 = memref.load %arg2[%c39] : memref<162xf32, #tpu.memory_space<smem>>
    %77 = vector.broadcast %76 : f32 to vector<8x256xf32>
    %78 = arith.mulf %77, %63 : vector<8x256xf32>
    %79 = arith.addf %54, %78 : vector<8x256xf32>
    %c40 = arith.constant 40 : index
    %80 = memref.load %arg2[%c40] : memref<162xf32, #tpu.memory_space<smem>>
    %81 = vector.broadcast %80 : f32 to vector<8x256xf32>
    %82 = arith.mulf %81, %63 : vector<8x256xf32>
    %83 = arith.addf %58, %82 : vector<8x256xf32>
    %c41 = arith.constant 41 : index
    %84 = memref.load %arg2[%c41] : memref<162xf32, #tpu.memory_space<smem>>
    %85 = vector.broadcast %84 : f32 to vector<8x256xf32>
    %86 = arith.mulf %85, %63 : vector<8x256xf32>
    %87 = arith.addf %62, %86 : vector<8x256xf32>
    %c240_i32 = arith.constant 240 : i32
    %88 = tpu.dynamic_rotate %13 by %c240_i32 dim 1 : vector<8x256xf32>, i32 -> vector<8x256xf32>
    %c54 = arith.constant 54 : index
    %89 = memref.load %arg2[%c54] : memref<162xf32, #tpu.memory_space<smem>>
    %90 = vector.broadcast %89 : f32 to vector<8x256xf32>
    %91 = arith.mulf %90, %88 : vector<8x256xf32>
    %92 = arith.addf %67, %91 : vector<8x256xf32>
    %c55 = arith.constant 55 : index
    %93 = memref.load %arg2[%c55] : memref<162xf32, #tpu.memory_space<smem>>
    %94 = vector.broadcast %93 : f32 to vector<8x256xf32>
    %95 = arith.mulf %94, %88 : vector<8x256xf32>
    %96 = arith.addf %71, %95 : vector<8x256xf32>
    %c56 = arith.constant 56 : index
    %97 = memref.load %arg2[%c56] : memref<162xf32, #tpu.memory_space<smem>>
    %98 = vector.broadcast %97 : f32 to vector<8x256xf32>
    %99 = arith.mulf %98, %88 : vector<8x256xf32>
    %100 = arith.addf %75, %99 : vector<8x256xf32>
    %c57 = arith.constant 57 : index
    %101 = memref.load %arg2[%c57] : memref<162xf32, #tpu.memory_space<smem>>
    %102 = vector.broadcast %101 : f32 to vector<8x256xf32>
    %103 = arith.mulf %102, %88 : vector<8x256xf32>
    %104 = arith.addf %79, %103 : vector<8x256xf32>
    %c58 = arith.constant 58 : index
    %105 = memref.load %arg2[%c58] : memref<162xf32, #tpu.memory_space<smem>>
    %106 = vector.broadcast %105 : f32 to vector<8x256xf32>
    %107 = arith.mulf %106, %88 : vector<8x256xf32>
    %108 = arith.addf %83, %107 : vector<8x256xf32>
    %c59 = arith.constant 59 : index
    %109 = memref.load %arg2[%c59] : memref<162xf32, #tpu.memory_space<smem>>
    %110 = vector.broadcast %109 : f32 to vector<8x256xf32>
    %111 = arith.mulf %110, %88 : vector<8x256xf32>
    %112 = arith.addf %87, %111 : vector<8x256xf32>
    %c239_i32 = arith.constant 239 : i32
    %113 = tpu.dynamic_rotate %13 by %c239_i32 dim 1 : vector<8x256xf32>, i32 -> vector<8x256xf32>
    %c72 = arith.constant 72 : index
    %114 = memref.load %arg2[%c72] : memref<162xf32, #tpu.memory_space<smem>>
    %115 = vector.broadcast %114 : f32 to vector<8x256xf32>
    %116 = arith.mulf %115, %113 : vector<8x256xf32>
    %117 = arith.addf %92, %116 : vector<8x256xf32>
    %c73 = arith.constant 73 : index
    %118 = memref.load %arg2[%c73] : memref<162xf32, #tpu.memory_space<smem>>
    %119 = vector.broadcast %118 : f32 to vector<8x256xf32>
    %120 = arith.mulf %119, %113 : vector<8x256xf32>
    %121 = arith.addf %96, %120 : vector<8x256xf32>
    %c74 = arith.constant 74 : index
    %122 = memref.load %arg2[%c74] : memref<162xf32, #tpu.memory_space<smem>>
    %123 = vector.broadcast %122 : f32 to vector<8x256xf32>
    %124 = arith.mulf %123, %113 : vector<8x256xf32>
    %125 = arith.addf %100, %124 : vector<8x256xf32>
    %c75 = arith.constant 75 : index
    %126 = memref.load %arg2[%c75] : memref<162xf32, #tpu.memory_space<smem>>
    %127 = vector.broadcast %126 : f32 to vector<8x256xf32>
    %128 = arith.mulf %127, %113 : vector<8x256xf32>
    %129 = arith.addf %104, %128 : vector<8x256xf32>
    %c76 = arith.constant 76 : index
    %130 = memref.load %arg2[%c76] : memref<162xf32, #tpu.memory_space<smem>>
    %131 = vector.broadcast %130 : f32 to vector<8x256xf32>
    %132 = arith.mulf %131, %113 : vector<8x256xf32>
    %133 = arith.addf %108, %132 : vector<8x256xf32>
    %c77 = arith.constant 77 : index
    %134 = memref.load %arg2[%c77] : memref<162xf32, #tpu.memory_space<smem>>
    %135 = vector.broadcast %134 : f32 to vector<8x256xf32>
    %136 = arith.mulf %135, %113 : vector<8x256xf32>
    %137 = arith.addf %112, %136 : vector<8x256xf32>
    %c238_i32 = arith.constant 238 : i32
    %138 = tpu.dynamic_rotate %13 by %c238_i32 dim 1 : vector<8x256xf32>, i32 -> vector<8x256xf32>
    %c90 = arith.constant 90 : index
    %139 = memref.load %arg2[%c90] : memref<162xf32, #tpu.memory_space<smem>>
    %140 = vector.broadcast %139 : f32 to vector<8x256xf32>
    %141 = arith.mulf %140, %138 : vector<8x256xf32>
    %142 = arith.addf %117, %141 : vector<8x256xf32>
    %c91 = arith.constant 91 : index
    %143 = memref.load %arg2[%c91] : memref<162xf32, #tpu.memory_space<smem>>
    %144 = vector.broadcast %143 : f32 to vector<8x256xf32>
    %145 = arith.mulf %144, %138 : vector<8x256xf32>
    %146 = arith.addf %121, %145 : vector<8x256xf32>
    %c92 = arith.constant 92 : index
    %147 = memref.load %arg2[%c92] : memref<162xf32, #tpu.memory_space<smem>>
    %148 = vector.broadcast %147 : f32 to vector<8x256xf32>
    %149 = arith.mulf %148, %138 : vector<8x256xf32>
    %150 = arith.addf %125, %149 : vector<8x256xf32>
    %c93 = arith.constant 93 : index
    %151 = memref.load %arg2[%c93] : memref<162xf32, #tpu.memory_space<smem>>
    %152 = vector.broadcast %151 : f32 to vector<8x256xf32>
    %153 = arith.mulf %152, %138 : vector<8x256xf32>
    %154 = arith.addf %129, %153 : vector<8x256xf32>
    %c94 = arith.constant 94 : index
    %155 = memref.load %arg2[%c94] : memref<162xf32, #tpu.memory_space<smem>>
    %156 = vector.broadcast %155 : f32 to vector<8x256xf32>
    %157 = arith.mulf %156, %138 : vector<8x256xf32>
    %158 = arith.addf %133, %157 : vector<8x256xf32>
    %c95 = arith.constant 95 : index
    %159 = memref.load %arg2[%c95] : memref<162xf32, #tpu.memory_space<smem>>
    %160 = vector.broadcast %159 : f32 to vector<8x256xf32>
    %161 = arith.mulf %160, %138 : vector<8x256xf32>
    %162 = arith.addf %137, %161 : vector<8x256xf32>
    %c224_i32 = arith.constant 224 : i32
    %163 = tpu.dynamic_rotate %13 by %c224_i32 dim 1 : vector<8x256xf32>, i32 -> vector<8x256xf32>
    %c108 = arith.constant 108 : index
    %164 = memref.load %arg2[%c108] : memref<162xf32, #tpu.memory_space<smem>>
    %165 = vector.broadcast %164 : f32 to vector<8x256xf32>
    %166 = arith.mulf %165, %163 : vector<8x256xf32>
    %167 = arith.addf %142, %166 : vector<8x256xf32>
    %c109 = arith.constant 109 : index
    %168 = memref.load %arg2[%c109] : memref<162xf32, #tpu.memory_space<smem>>
    %169 = vector.broadcast %168 : f32 to vector<8x256xf32>
    %170 = arith.mulf %169, %163 : vector<8x256xf32>
    %171 = arith.addf %146, %170 : vector<8x256xf32>
    %c110 = arith.constant 110 : index
    %172 = memref.load %arg2[%c110] : memref<162xf32, #tpu.memory_space<smem>>
    %173 = vector.broadcast %172 : f32 to vector<8x256xf32>
    %174 = arith.mulf %173, %163 : vector<8x256xf32>
    %175 = arith.addf %150, %174 : vector<8x256xf32>
    %c111 = arith.constant 111 : index
    %176 = memref.load %arg2[%c111] : memref<162xf32, #tpu.memory_space<smem>>
    %177 = vector.broadcast %176 : f32 to vector<8x256xf32>
    %178 = arith.mulf %177, %163 : vector<8x256xf32>
    %179 = arith.addf %154, %178 : vector<8x256xf32>
    %c112 = arith.constant 112 : index
    %180 = memref.load %arg2[%c112] : memref<162xf32, #tpu.memory_space<smem>>
    %181 = vector.broadcast %180 : f32 to vector<8x256xf32>
    %182 = arith.mulf %181, %163 : vector<8x256xf32>
    %183 = arith.addf %158, %182 : vector<8x256xf32>
    %c113 = arith.constant 113 : index
    %184 = memref.load %arg2[%c113] : memref<162xf32, #tpu.memory_space<smem>>
    %185 = vector.broadcast %184 : f32 to vector<8x256xf32>
    %186 = arith.mulf %185, %163 : vector<8x256xf32>
    %187 = arith.addf %162, %186 : vector<8x256xf32>
    %c223_i32 = arith.constant 223 : i32
    %188 = tpu.dynamic_rotate %13 by %c223_i32 dim 1 : vector<8x256xf32>, i32 -> vector<8x256xf32>
    %c126 = arith.constant 126 : index
    %189 = memref.load %arg2[%c126] : memref<162xf32, #tpu.memory_space<smem>>
    %190 = vector.broadcast %189 : f32 to vector<8x256xf32>
    %191 = arith.mulf %190, %188 : vector<8x256xf32>
    %192 = arith.addf %167, %191 : vector<8x256xf32>
    %c127 = arith.constant 127 : index
    %193 = memref.load %arg2[%c127] : memref<162xf32, #tpu.memory_space<smem>>
    %194 = vector.broadcast %193 : f32 to vector<8x256xf32>
    %195 = arith.mulf %194, %188 : vector<8x256xf32>
    %196 = arith.addf %171, %195 : vector<8x256xf32>
    %c128 = arith.constant 128 : index
    %197 = memref.load %arg2[%c128] : memref<162xf32, #tpu.memory_space<smem>>
    %198 = vector.broadcast %197 : f32 to vector<8x256xf32>
    %199 = arith.mulf %198, %188 : vector<8x256xf32>
    %200 = arith.addf %175, %199 : vector<8x256xf32>
    %c129 = arith.constant 129 : index
    %201 = memref.load %arg2[%c129] : memref<162xf32, #tpu.memory_space<smem>>
    %202 = vector.broadcast %201 : f32 to vector<8x256xf32>
    %203 = arith.mulf %202, %188 : vector<8x256xf32>
    %204 = arith.addf %179, %203 : vector<8x256xf32>
    %c130 = arith.constant 130 : index
    %205 = memref.load %arg2[%c130] : memref<162xf32, #tpu.memory_space<smem>>
    %206 = vector.broadcast %205 : f32 to vector<8x256xf32>
    %207 = arith.mulf %206, %188 : vector<8x256xf32>
    %208 = arith.addf %183, %207 : vector<8x256xf32>
    %c131 = arith.constant 131 : index
    %209 = memref.load %arg2[%c131] : memref<162xf32, #tpu.memory_space<smem>>
    %210 = vector.broadcast %209 : f32 to vector<8x256xf32>
    %211 = arith.mulf %210, %188 : vector<8x256xf32>
    %212 = arith.addf %187, %211 : vector<8x256xf32>
    %c222_i32 = arith.constant 222 : i32
    %213 = tpu.dynamic_rotate %13 by %c222_i32 dim 1 : vector<8x256xf32>, i32 -> vector<8x256xf32>
    %c144 = arith.constant 144 : index
    %214 = memref.load %arg2[%c144] : memref<162xf32, #tpu.memory_space<smem>>
    %215 = vector.broadcast %214 : f32 to vector<8x256xf32>
    %216 = arith.mulf %215, %213 : vector<8x256xf32>
    %217 = arith.addf %192, %216 : vector<8x256xf32>
    %c145 = arith.constant 145 : index
    %218 = memref.load %arg2[%c145] : memref<162xf32, #tpu.memory_space<smem>>
    %219 = vector.broadcast %218 : f32 to vector<8x256xf32>
    %220 = arith.mulf %219, %213 : vector<8x256xf32>
    %221 = arith.addf %196, %220 : vector<8x256xf32>
    %c146 = arith.constant 146 : index
    %222 = memref.load %arg2[%c146] : memref<162xf32, #tpu.memory_space<smem>>
    %223 = vector.broadcast %222 : f32 to vector<8x256xf32>
    %224 = arith.mulf %223, %213 : vector<8x256xf32>
    %225 = arith.addf %200, %224 : vector<8x256xf32>
    %c147 = arith.constant 147 : index
    %226 = memref.load %arg2[%c147] : memref<162xf32, #tpu.memory_space<smem>>
    %227 = vector.broadcast %226 : f32 to vector<8x256xf32>
    %228 = arith.mulf %227, %213 : vector<8x256xf32>
    %229 = arith.addf %204, %228 : vector<8x256xf32>
    %c148 = arith.constant 148 : index
    %230 = memref.load %arg2[%c148] : memref<162xf32, #tpu.memory_space<smem>>
    %231 = vector.broadcast %230 : f32 to vector<8x256xf32>
    %232 = arith.mulf %231, %213 : vector<8x256xf32>
    %233 = arith.addf %208, %232 : vector<8x256xf32>
    %c149 = arith.constant 149 : index
    %234 = memref.load %arg2[%c149] : memref<162xf32, #tpu.memory_space<smem>>
    %235 = vector.broadcast %234 : f32 to vector<8x256xf32>
    %236 = arith.mulf %235, %213 : vector<8x256xf32>
    %237 = arith.addf %212, %236 : vector<8x256xf32>
    %c0_9 = arith.constant 0 : index
    %c8 = arith.constant 8 : index
    %c0_10 = arith.constant 0 : index
    %238 = vector.load %arg1[%c0_9, %c8, %c0_10] : memref<2x24x256xf32, #tpu.memory_space<vmem>>, vector<1x8x256xf32>
    %239 = vector.shape_cast %238 : vector<1x8x256xf32> to vector<8x256xf32>
    %c6 = arith.constant 6 : index
    %240 = memref.load %arg2[%c6] : memref<162xf32, #tpu.memory_space<smem>>
    %241 = vector.broadcast %240 : f32 to vector<8x256xf32>
    %242 = arith.mulf %241, %239 : vector<8x256xf32>
    %243 = arith.addf %217, %242 : vector<8x256xf32>
    %c7 = arith.constant 7 : index
    %244 = memref.load %arg2[%c7] : memref<162xf32, #tpu.memory_space<smem>>
    %245 = vector.broadcast %244 : f32 to vector<8x256xf32>
    %246 = arith.mulf %245, %239 : vector<8x256xf32>
    %247 = arith.addf %221, %246 : vector<8x256xf32>
    %c8_11 = arith.constant 8 : index
    %248 = memref.load %arg2[%c8_11] : memref<162xf32, #tpu.memory_space<smem>>
    %249 = vector.broadcast %248 : f32 to vector<8x256xf32>
    %250 = arith.mulf %249, %239 : vector<8x256xf32>
    %251 = arith.addf %225, %250 : vector<8x256xf32>
    %c9 = arith.constant 9 : index
    %252 = memref.load %arg2[%c9] : memref<162xf32, #tpu.memory_space<smem>>
    %253 = vector.broadcast %252 : f32 to vector<8x256xf32>
    %254 = arith.mulf %253, %239 : vector<8x256xf32>
    %255 = arith.addf %229, %254 : vector<8x256xf32>
    %c10 = arith.constant 10 : index
    %256 = memref.load %arg2[%c10] : memref<162xf32, #tpu.memory_space<smem>>
    %257 = vector.broadcast %256 : f32 to vector<8x256xf32>
    %258 = arith.mulf %257, %239 : vector<8x256xf32>
    %259 = arith.addf %233, %258 : vector<8x256xf32>
    %c11 = arith.constant 11 : index
    %260 = memref.load %arg2[%c11] : memref<162xf32, #tpu.memory_space<smem>>
    %261 = vector.broadcast %260 : f32 to vector<8x256xf32>
    %262 = arith.mulf %261, %239 : vector<8x256xf32>
    %263 = arith.addf %237, %262 : vector<8x256xf32>
    %c255_i32_12 = arith.constant 255 : i32
    %264 = tpu.dynamic_rotate %239 by %c255_i32_12 dim 1 : vector<8x256xf32>, i32 -> vector<8x256xf32>
    %c24 = arith.constant 24 : index
    %265 = memref.load %arg2[%c24] : memref<162xf32, #tpu.memory_space<smem>>
    %266 = vector.broadcast %265 : f32 to vector<8x256xf32>
    %267 = arith.mulf %266, %264 : vector<8x256xf32>
    %268 = arith.addf %243, %267 : vector<8x256xf32>
    %c25 = arith.constant 25 : index
    %269 = memref.load %arg2[%c25] : memref<162xf32, #tpu.memory_space<smem>>
    %270 = vector.broadcast %269 : f32 to vector<8x256xf32>
    %271 = arith.mulf %270, %264 : vector<8x256xf32>
    %272 = arith.addf %247, %271 : vector<8x256xf32>
    %c26 = arith.constant 26 : index
    %273 = memref.load %arg2[%c26] : memref<162xf32, #tpu.memory_space<smem>>
    %274 = vector.broadcast %273 : f32 to vector<8x256xf32>
    %275 = arith.mulf %274, %264 : vector<8x256xf32>
    %276 = arith.addf %251, %275 : vector<8x256xf32>
    %c27 = arith.constant 27 : index
    %277 = memref.load %arg2[%c27] : memref<162xf32, #tpu.memory_space<smem>>
    %278 = vector.broadcast %277 : f32 to vector<8x256xf32>
    %279 = arith.mulf %278, %264 : vector<8x256xf32>
    %280 = arith.addf %255, %279 : vector<8x256xf32>
    %c28 = arith.constant 28 : index
    %281 = memref.load %arg2[%c28] : memref<162xf32, #tpu.memory_space<smem>>
    %282 = vector.broadcast %281 : f32 to vector<8x256xf32>
    %283 = arith.mulf %282, %264 : vector<8x256xf32>
    %284 = arith.addf %259, %283 : vector<8x256xf32>
    %c29 = arith.constant 29 : index
    %285 = memref.load %arg2[%c29] : memref<162xf32, #tpu.memory_space<smem>>
    %286 = vector.broadcast %285 : f32 to vector<8x256xf32>
    %287 = arith.mulf %286, %264 : vector<8x256xf32>
    %288 = arith.addf %263, %287 : vector<8x256xf32>
    %c254_i32_13 = arith.constant 254 : i32
    %289 = tpu.dynamic_rotate %239 by %c254_i32_13 dim 1 : vector<8x256xf32>, i32 -> vector<8x256xf32>
    %c42 = arith.constant 42 : index
    %290 = memref.load %arg2[%c42] : memref<162xf32, #tpu.memory_space<smem>>
    %291 = vector.broadcast %290 : f32 to vector<8x256xf32>
    %292 = arith.mulf %291, %289 : vector<8x256xf32>
    %293 = arith.addf %268, %292 : vector<8x256xf32>
    %c43 = arith.constant 43 : index
    %294 = memref.load %arg2[%c43] : memref<162xf32, #tpu.memory_space<smem>>
    %295 = vector.broadcast %294 : f32 to vector<8x256xf32>
    %296 = arith.mulf %295, %289 : vector<8x256xf32>
    %297 = arith.addf %272, %296 : vector<8x256xf32>
    %c44 = arith.constant 44 : index
    %298 = memref.load %arg2[%c44] : memref<162xf32, #tpu.memory_space<smem>>
    %299 = vector.broadcast %298 : f32 to vector<8x256xf32>
    %300 = arith.mulf %299, %289 : vector<8x256xf32>
    %301 = arith.addf %276, %300 : vector<8x256xf32>
    %c45 = arith.constant 45 : index
    %302 = memref.load %arg2[%c45] : memref<162xf32, #tpu.memory_space<smem>>
    %303 = vector.broadcast %302 : f32 to vector<8x256xf32>
    %304 = arith.mulf %303, %289 : vector<8x256xf32>
    %305 = arith.addf %280, %304 : vector<8x256xf32>
    %c46 = arith.constant 46 : index
    %306 = memref.load %arg2[%c46] : memref<162xf32, #tpu.memory_space<smem>>
    %307 = vector.broadcast %306 : f32 to vector<8x256xf32>
    %308 = arith.mulf %307, %289 : vector<8x256xf32>
    %309 = arith.addf %284, %308 : vector<8x256xf32>
    %c47 = arith.constant 47 : index
    %310 = memref.load %arg2[%c47] : memref<162xf32, #tpu.memory_space<smem>>
    %311 = vector.broadcast %310 : f32 to vector<8x256xf32>
    %312 = arith.mulf %311, %289 : vector<8x256xf32>
    %313 = arith.addf %288, %312 : vector<8x256xf32>
    %c240_i32_14 = arith.constant 240 : i32
    %314 = tpu.dynamic_rotate %239 by %c240_i32_14 dim 1 : vector<8x256xf32>, i32 -> vector<8x256xf32>
    %c60 = arith.constant 60 : index
    %315 = memref.load %arg2[%c60] : memref<162xf32, #tpu.memory_space<smem>>
    %316 = vector.broadcast %315 : f32 to vector<8x256xf32>
    %317 = arith.mulf %316, %314 : vector<8x256xf32>
    %318 = arith.addf %293, %317 : vector<8x256xf32>
    %c61 = arith.constant 61 : index
    %319 = memref.load %arg2[%c61] : memref<162xf32, #tpu.memory_space<smem>>
    %320 = vector.broadcast %319 : f32 to vector<8x256xf32>
    %321 = arith.mulf %320, %314 : vector<8x256xf32>
    %322 = arith.addf %297, %321 : vector<8x256xf32>
    %c62 = arith.constant 62 : index
    %323 = memref.load %arg2[%c62] : memref<162xf32, #tpu.memory_space<smem>>
    %324 = vector.broadcast %323 : f32 to vector<8x256xf32>
    %325 = arith.mulf %324, %314 : vector<8x256xf32>
    %326 = arith.addf %301, %325 : vector<8x256xf32>
    %c63 = arith.constant 63 : index
    %327 = memref.load %arg2[%c63] : memref<162xf32, #tpu.memory_space<smem>>
    %328 = vector.broadcast %327 : f32 to vector<8x256xf32>
    %329 = arith.mulf %328, %314 : vector<8x256xf32>
    %330 = arith.addf %305, %329 : vector<8x256xf32>
    %c64 = arith.constant 64 : index
    %331 = memref.load %arg2[%c64] : memref<162xf32, #tpu.memory_space<smem>>
    %332 = vector.broadcast %331 : f32 to vector<8x256xf32>
    %333 = arith.mulf %332, %314 : vector<8x256xf32>
    %334 = arith.addf %309, %333 : vector<8x256xf32>
    %c65 = arith.constant 65 : index
    %335 = memref.load %arg2[%c65] : memref<162xf32, #tpu.memory_space<smem>>
    %336 = vector.broadcast %335 : f32 to vector<8x256xf32>
    %337 = arith.mulf %336, %314 : vector<8x256xf32>
    %338 = arith.addf %313, %337 : vector<8x256xf32>
    %c239_i32_15 = arith.constant 239 : i32
    %339 = tpu.dynamic_rotate %239 by %c239_i32_15 dim 1 : vector<8x256xf32>, i32 -> vector<8x256xf32>
    %c78 = arith.constant 78 : index
    %340 = memref.load %arg2[%c78] : memref<162xf32, #tpu.memory_space<smem>>
    %341 = vector.broadcast %340 : f32 to vector<8x256xf32>
    %342 = arith.mulf %341, %339 : vector<8x256xf32>
    %343 = arith.addf %318, %342 : vector<8x256xf32>
    %c79 = arith.constant 79 : index
    %344 = memref.load %arg2[%c79] : memref<162xf32, #tpu.memory_space<smem>>
    %345 = vector.broadcast %344 : f32 to vector<8x256xf32>
    %346 = arith.mulf %345, %339 : vector<8x256xf32>
    %347 = arith.addf %322, %346 : vector<8x256xf32>
    %c80 = arith.constant 80 : index
    %348 = memref.load %arg2[%c80] : memref<162xf32, #tpu.memory_space<smem>>
    %349 = vector.broadcast %348 : f32 to vector<8x256xf32>
    %350 = arith.mulf %349, %339 : vector<8x256xf32>
    %351 = arith.addf %326, %350 : vector<8x256xf32>
    %c81 = arith.constant 81 : index
    %352 = memref.load %arg2[%c81] : memref<162xf32, #tpu.memory_space<smem>>
    %353 = vector.broadcast %352 : f32 to vector<8x256xf32>
    %354 = arith.mulf %353, %339 : vector<8x256xf32>
    %355 = arith.addf %330, %354 : vector<8x256xf32>
    %c82 = arith.constant 82 : index
    %356 = memref.load %arg2[%c82] : memref<162xf32, #tpu.memory_space<smem>>
    %357 = vector.broadcast %356 : f32 to vector<8x256xf32>
    %358 = arith.mulf %357, %339 : vector<8x256xf32>
    %359 = arith.addf %334, %358 : vector<8x256xf32>
    %c83 = arith.constant 83 : index
    %360 = memref.load %arg2[%c83] : memref<162xf32, #tpu.memory_space<smem>>
    %361 = vector.broadcast %360 : f32 to vector<8x256xf32>
    %362 = arith.mulf %361, %339 : vector<8x256xf32>
    %363 = arith.addf %338, %362 : vector<8x256xf32>
    %c238_i32_16 = arith.constant 238 : i32
    %364 = tpu.dynamic_rotate %239 by %c238_i32_16 dim 1 : vector<8x256xf32>, i32 -> vector<8x256xf32>
    %c96 = arith.constant 96 : index
    %365 = memref.load %arg2[%c96] : memref<162xf32, #tpu.memory_space<smem>>
    %366 = vector.broadcast %365 : f32 to vector<8x256xf32>
    %367 = arith.mulf %366, %364 : vector<8x256xf32>
    %368 = arith.addf %343, %367 : vector<8x256xf32>
    %c97 = arith.constant 97 : index
    %369 = memref.load %arg2[%c97] : memref<162xf32, #tpu.memory_space<smem>>
    %370 = vector.broadcast %369 : f32 to vector<8x256xf32>
    %371 = arith.mulf %370, %364 : vector<8x256xf32>
    %372 = arith.addf %347, %371 : vector<8x256xf32>
    %c98 = arith.constant 98 : index
    %373 = memref.load %arg2[%c98] : memref<162xf32, #tpu.memory_space<smem>>
    %374 = vector.broadcast %373 : f32 to vector<8x256xf32>
    %375 = arith.mulf %374, %364 : vector<8x256xf32>
    %376 = arith.addf %351, %375 : vector<8x256xf32>
    %c99 = arith.constant 99 : index
    %377 = memref.load %arg2[%c99] : memref<162xf32, #tpu.memory_space<smem>>
    %378 = vector.broadcast %377 : f32 to vector<8x256xf32>
    %379 = arith.mulf %378, %364 : vector<8x256xf32>
    %380 = arith.addf %355, %379 : vector<8x256xf32>
    %c100 = arith.constant 100 : index
    %381 = memref.load %arg2[%c100] : memref<162xf32, #tpu.memory_space<smem>>
    %382 = vector.broadcast %381 : f32 to vector<8x256xf32>
    %383 = arith.mulf %382, %364 : vector<8x256xf32>
    %384 = arith.addf %359, %383 : vector<8x256xf32>
    %c101 = arith.constant 101 : index
    %385 = memref.load %arg2[%c101] : memref<162xf32, #tpu.memory_space<smem>>
    %386 = vector.broadcast %385 : f32 to vector<8x256xf32>
    %387 = arith.mulf %386, %364 : vector<8x256xf32>
    %388 = arith.addf %363, %387 : vector<8x256xf32>
    %c224_i32_17 = arith.constant 224 : i32
    %389 = tpu.dynamic_rotate %239 by %c224_i32_17 dim 1 : vector<8x256xf32>, i32 -> vector<8x256xf32>
    %c114 = arith.constant 114 : index
    %390 = memref.load %arg2[%c114] : memref<162xf32, #tpu.memory_space<smem>>
    %391 = vector.broadcast %390 : f32 to vector<8x256xf32>
    %392 = arith.mulf %391, %389 : vector<8x256xf32>
    %393 = arith.addf %368, %392 : vector<8x256xf32>
    %c115 = arith.constant 115 : index
    %394 = memref.load %arg2[%c115] : memref<162xf32, #tpu.memory_space<smem>>
    %395 = vector.broadcast %394 : f32 to vector<8x256xf32>
    %396 = arith.mulf %395, %389 : vector<8x256xf32>
    %397 = arith.addf %372, %396 : vector<8x256xf32>
    %c116 = arith.constant 116 : index
    %398 = memref.load %arg2[%c116] : memref<162xf32, #tpu.memory_space<smem>>
    %399 = vector.broadcast %398 : f32 to vector<8x256xf32>
    %400 = arith.mulf %399, %389 : vector<8x256xf32>
    %401 = arith.addf %376, %400 : vector<8x256xf32>
    %c117 = arith.constant 117 : index
    %402 = memref.load %arg2[%c117] : memref<162xf32, #tpu.memory_space<smem>>
    %403 = vector.broadcast %402 : f32 to vector<8x256xf32>
    %404 = arith.mulf %403, %389 : vector<8x256xf32>
    %405 = arith.addf %380, %404 : vector<8x256xf32>
    %c118 = arith.constant 118 : index
    %406 = memref.load %arg2[%c118] : memref<162xf32, #tpu.memory_space<smem>>
    %407 = vector.broadcast %406 : f32 to vector<8x256xf32>
    %408 = arith.mulf %407, %389 : vector<8x256xf32>
    %409 = arith.addf %384, %408 : vector<8x256xf32>
    %c119 = arith.constant 119 : index
    %410 = memref.load %arg2[%c119] : memref<162xf32, #tpu.memory_space<smem>>
    %411 = vector.broadcast %410 : f32 to vector<8x256xf32>
    %412 = arith.mulf %411, %389 : vector<8x256xf32>
    %413 = arith.addf %388, %412 : vector<8x256xf32>
    %c223_i32_18 = arith.constant 223 : i32
    %414 = tpu.dynamic_rotate %239 by %c223_i32_18 dim 1 : vector<8x256xf32>, i32 -> vector<8x256xf32>
    %c132 = arith.constant 132 : index
    %415 = memref.load %arg2[%c132] : memref<162xf32, #tpu.memory_space<smem>>
    %416 = vector.broadcast %415 : f32 to vector<8x256xf32>
    %417 = arith.mulf %416, %414 : vector<8x256xf32>
    %418 = arith.addf %393, %417 : vector<8x256xf32>
    %c133 = arith.constant 133 : index
    %419 = memref.load %arg2[%c133] : memref<162xf32, #tpu.memory_space<smem>>
    %420 = vector.broadcast %419 : f32 to vector<8x256xf32>
    %421 = arith.mulf %420, %414 : vector<8x256xf32>
    %422 = arith.addf %397, %421 : vector<8x256xf32>
    %c134 = arith.constant 134 : index
    %423 = memref.load %arg2[%c134] : memref<162xf32, #tpu.memory_space<smem>>
    %424 = vector.broadcast %423 : f32 to vector<8x256xf32>
    %425 = arith.mulf %424, %414 : vector<8x256xf32>
    %426 = arith.addf %401, %425 : vector<8x256xf32>
    %c135 = arith.constant 135 : index
    %427 = memref.load %arg2[%c135] : memref<162xf32, #tpu.memory_space<smem>>
    %428 = vector.broadcast %427 : f32 to vector<8x256xf32>
    %429 = arith.mulf %428, %414 : vector<8x256xf32>
    %430 = arith.addf %405, %429 : vector<8x256xf32>
    %c136 = arith.constant 136 : index
    %431 = memref.load %arg2[%c136] : memref<162xf32, #tpu.memory_space<smem>>
    %432 = vector.broadcast %431 : f32 to vector<8x256xf32>
    %433 = arith.mulf %432, %414 : vector<8x256xf32>
    %434 = arith.addf %409, %433 : vector<8x256xf32>
    %c137 = arith.constant 137 : index
    %435 = memref.load %arg2[%c137] : memref<162xf32, #tpu.memory_space<smem>>
    %436 = vector.broadcast %435 : f32 to vector<8x256xf32>
    %437 = arith.mulf %436, %414 : vector<8x256xf32>
    %438 = arith.addf %413, %437 : vector<8x256xf32>
    %c222_i32_19 = arith.constant 222 : i32
    %439 = tpu.dynamic_rotate %239 by %c222_i32_19 dim 1 : vector<8x256xf32>, i32 -> vector<8x256xf32>
    %c150 = arith.constant 150 : index
    %440 = memref.load %arg2[%c150] : memref<162xf32, #tpu.memory_space<smem>>
    %441 = vector.broadcast %440 : f32 to vector<8x256xf32>
    %442 = arith.mulf %441, %439 : vector<8x256xf32>
    %443 = arith.addf %418, %442 : vector<8x256xf32>
    %c151 = arith.constant 151 : index
    %444 = memref.load %arg2[%c151] : memref<162xf32, #tpu.memory_space<smem>>
    %445 = vector.broadcast %444 : f32 to vector<8x256xf32>
    %446 = arith.mulf %445, %439 : vector<8x256xf32>
    %447 = arith.addf %422, %446 : vector<8x256xf32>
    %c152 = arith.constant 152 : index
    %448 = memref.load %arg2[%c152] : memref<162xf32, #tpu.memory_space<smem>>
    %449 = vector.broadcast %448 : f32 to vector<8x256xf32>
    %450 = arith.mulf %449, %439 : vector<8x256xf32>
    %451 = arith.addf %426, %450 : vector<8x256xf32>
    %c153 = arith.constant 153 : index
    %452 = memref.load %arg2[%c153] : memref<162xf32, #tpu.memory_space<smem>>
    %453 = vector.broadcast %452 : f32 to vector<8x256xf32>
    %454 = arith.mulf %453, %439 : vector<8x256xf32>
    %455 = arith.addf %430, %454 : vector<8x256xf32>
    %c154 = arith.constant 154 : index
    %456 = memref.load %arg2[%c154] : memref<162xf32, #tpu.memory_space<smem>>
    %457 = vector.broadcast %456 : f32 to vector<8x256xf32>
    %458 = arith.mulf %457, %439 : vector<8x256xf32>
    %459 = arith.addf %434, %458 : vector<8x256xf32>
    %c155 = arith.constant 155 : index
    %460 = memref.load %arg2[%c155] : memref<162xf32, #tpu.memory_space<smem>>
    %461 = vector.broadcast %460 : f32 to vector<8x256xf32>
    %462 = arith.mulf %461, %439 : vector<8x256xf32>
    %463 = arith.addf %438, %462 : vector<8x256xf32>
    %c0_20 = arith.constant 0 : index
    %c16 = arith.constant 16 : index
    %c0_21 = arith.constant 0 : index
    %464 = vector.load %arg1[%c0_20, %c16, %c0_21] : memref<2x24x256xf32, #tpu.memory_space<vmem>>, vector<1x8x256xf32>
    %465 = vector.shape_cast %464 : vector<1x8x256xf32> to vector<8x256xf32>
    %c12 = arith.constant 12 : index
    %466 = memref.load %arg2[%c12] : memref<162xf32, #tpu.memory_space<smem>>
    %467 = vector.broadcast %466 : f32 to vector<8x256xf32>
    %468 = arith.mulf %467, %465 : vector<8x256xf32>
    %469 = arith.addf %443, %468 : vector<8x256xf32>
    %c13 = arith.constant 13 : index
    %470 = memref.load %arg2[%c13] : memref<162xf32, #tpu.memory_space<smem>>
    %471 = vector.broadcast %470 : f32 to vector<8x256xf32>
    %472 = arith.mulf %471, %465 : vector<8x256xf32>
    %473 = arith.addf %447, %472 : vector<8x256xf32>
    %c14 = arith.constant 14 : index
    %474 = memref.load %arg2[%c14] : memref<162xf32, #tpu.memory_space<smem>>
    %475 = vector.broadcast %474 : f32 to vector<8x256xf32>
    %476 = arith.mulf %475, %465 : vector<8x256xf32>
    %477 = arith.addf %451, %476 : vector<8x256xf32>
    %c15 = arith.constant 15 : index
    %478 = memref.load %arg2[%c15] : memref<162xf32, #tpu.memory_space<smem>>
    %479 = vector.broadcast %478 : f32 to vector<8x256xf32>
    %480 = arith.mulf %479, %465 : vector<8x256xf32>
    %481 = arith.addf %455, %480 : vector<8x256xf32>
    %c16_22 = arith.constant 16 : index
    %482 = memref.load %arg2[%c16_22] : memref<162xf32, #tpu.memory_space<smem>>
    %483 = vector.broadcast %482 : f32 to vector<8x256xf32>
    %484 = arith.mulf %483, %465 : vector<8x256xf32>
    %485 = arith.addf %459, %484 : vector<8x256xf32>
    %c17 = arith.constant 17 : index
    %486 = memref.load %arg2[%c17] : memref<162xf32, #tpu.memory_space<smem>>
    %487 = vector.broadcast %486 : f32 to vector<8x256xf32>
    %488 = arith.mulf %487, %465 : vector<8x256xf32>
    %489 = arith.addf %463, %488 : vector<8x256xf32>
    %c255_i32_23 = arith.constant 255 : i32
    %490 = tpu.dynamic_rotate %465 by %c255_i32_23 dim 1 : vector<8x256xf32>, i32 -> vector<8x256xf32>
    %c30 = arith.constant 30 : index
    %491 = memref.load %arg2[%c30] : memref<162xf32, #tpu.memory_space<smem>>
    %492 = vector.broadcast %491 : f32 to vector<8x256xf32>
    %493 = arith.mulf %492, %490 : vector<8x256xf32>
    %494 = arith.addf %469, %493 : vector<8x256xf32>
    %c31 = arith.constant 31 : index
    %495 = memref.load %arg2[%c31] : memref<162xf32, #tpu.memory_space<smem>>
    %496 = vector.broadcast %495 : f32 to vector<8x256xf32>
    %497 = arith.mulf %496, %490 : vector<8x256xf32>
    %498 = arith.addf %473, %497 : vector<8x256xf32>
    %c32 = arith.constant 32 : index
    %499 = memref.load %arg2[%c32] : memref<162xf32, #tpu.memory_space<smem>>
    %500 = vector.broadcast %499 : f32 to vector<8x256xf32>
    %501 = arith.mulf %500, %490 : vector<8x256xf32>
    %502 = arith.addf %477, %501 : vector<8x256xf32>
    %c33 = arith.constant 33 : index
    %503 = memref.load %arg2[%c33] : memref<162xf32, #tpu.memory_space<smem>>
    %504 = vector.broadcast %503 : f32 to vector<8x256xf32>
    %505 = arith.mulf %504, %490 : vector<8x256xf32>
    %506 = arith.addf %481, %505 : vector<8x256xf32>
    %c34 = arith.constant 34 : index
    %507 = memref.load %arg2[%c34] : memref<162xf32, #tpu.memory_space<smem>>
    %508 = vector.broadcast %507 : f32 to vector<8x256xf32>
    %509 = arith.mulf %508, %490 : vector<8x256xf32>
    %510 = arith.addf %485, %509 : vector<8x256xf32>
    %c35 = arith.constant 35 : index
    %511 = memref.load %arg2[%c35] : memref<162xf32, #tpu.memory_space<smem>>
    %512 = vector.broadcast %511 : f32 to vector<8x256xf32>
    %513 = arith.mulf %512, %490 : vector<8x256xf32>
    %514 = arith.addf %489, %513 : vector<8x256xf32>
    %c254_i32_24 = arith.constant 254 : i32
    %515 = tpu.dynamic_rotate %465 by %c254_i32_24 dim 1 : vector<8x256xf32>, i32 -> vector<8x256xf32>
    %c48 = arith.constant 48 : index
    %516 = memref.load %arg2[%c48] : memref<162xf32, #tpu.memory_space<smem>>
    %517 = vector.broadcast %516 : f32 to vector<8x256xf32>
    %518 = arith.mulf %517, %515 : vector<8x256xf32>
    %519 = arith.addf %494, %518 : vector<8x256xf32>
    %c49 = arith.constant 49 : index
    %520 = memref.load %arg2[%c49] : memref<162xf32, #tpu.memory_space<smem>>
    %521 = vector.broadcast %520 : f32 to vector<8x256xf32>
    %522 = arith.mulf %521, %515 : vector<8x256xf32>
    %523 = arith.addf %498, %522 : vector<8x256xf32>
    %c50 = arith.constant 50 : index
    %524 = memref.load %arg2[%c50] : memref<162xf32, #tpu.memory_space<smem>>
    %525 = vector.broadcast %524 : f32 to vector<8x256xf32>
    %526 = arith.mulf %525, %515 : vector<8x256xf32>
    %527 = arith.addf %502, %526 : vector<8x256xf32>
    %c51 = arith.constant 51 : index
    %528 = memref.load %arg2[%c51] : memref<162xf32, #tpu.memory_space<smem>>
    %529 = vector.broadcast %528 : f32 to vector<8x256xf32>
    %530 = arith.mulf %529, %515 : vector<8x256xf32>
    %531 = arith.addf %506, %530 : vector<8x256xf32>
    %c52 = arith.constant 52 : index
    %532 = memref.load %arg2[%c52] : memref<162xf32, #tpu.memory_space<smem>>
    %533 = vector.broadcast %532 : f32 to vector<8x256xf32>
    %534 = arith.mulf %533, %515 : vector<8x256xf32>
    %535 = arith.addf %510, %534 : vector<8x256xf32>
    %c53 = arith.constant 53 : index
    %536 = memref.load %arg2[%c53] : memref<162xf32, #tpu.memory_space<smem>>
    %537 = vector.broadcast %536 : f32 to vector<8x256xf32>
    %538 = arith.mulf %537, %515 : vector<8x256xf32>
    %539 = arith.addf %514, %538 : vector<8x256xf32>
    %c240_i32_25 = arith.constant 240 : i32
    %540 = tpu.dynamic_rotate %465 by %c240_i32_25 dim 1 : vector<8x256xf32>, i32 -> vector<8x256xf32>
    %c66 = arith.constant 66 : index
    %541 = memref.load %arg2[%c66] : memref<162xf32, #tpu.memory_space<smem>>
    %542 = vector.broadcast %541 : f32 to vector<8x256xf32>
    %543 = arith.mulf %542, %540 : vector<8x256xf32>
    %544 = arith.addf %519, %543 : vector<8x256xf32>
    %c67 = arith.constant 67 : index
    %545 = memref.load %arg2[%c67] : memref<162xf32, #tpu.memory_space<smem>>
    %546 = vector.broadcast %545 : f32 to vector<8x256xf32>
    %547 = arith.mulf %546, %540 : vector<8x256xf32>
    %548 = arith.addf %523, %547 : vector<8x256xf32>
    %c68 = arith.constant 68 : index
    %549 = memref.load %arg2[%c68] : memref<162xf32, #tpu.memory_space<smem>>
    %550 = vector.broadcast %549 : f32 to vector<8x256xf32>
    %551 = arith.mulf %550, %540 : vector<8x256xf32>
    %552 = arith.addf %527, %551 : vector<8x256xf32>
    %c69 = arith.constant 69 : index
    %553 = memref.load %arg2[%c69] : memref<162xf32, #tpu.memory_space<smem>>
    %554 = vector.broadcast %553 : f32 to vector<8x256xf32>
    %555 = arith.mulf %554, %540 : vector<8x256xf32>
    %556 = arith.addf %531, %555 : vector<8x256xf32>
    %c70 = arith.constant 70 : index
    %557 = memref.load %arg2[%c70] : memref<162xf32, #tpu.memory_space<smem>>
    %558 = vector.broadcast %557 : f32 to vector<8x256xf32>
    %559 = arith.mulf %558, %540 : vector<8x256xf32>
    %560 = arith.addf %535, %559 : vector<8x256xf32>
    %c71 = arith.constant 71 : index
    %561 = memref.load %arg2[%c71] : memref<162xf32, #tpu.memory_space<smem>>
    %562 = vector.broadcast %561 : f32 to vector<8x256xf32>
    %563 = arith.mulf %562, %540 : vector<8x256xf32>
    %564 = arith.addf %539, %563 : vector<8x256xf32>
    %c239_i32_26 = arith.constant 239 : i32
    %565 = tpu.dynamic_rotate %465 by %c239_i32_26 dim 1 : vector<8x256xf32>, i32 -> vector<8x256xf32>
    %c84 = arith.constant 84 : index
    %566 = memref.load %arg2[%c84] : memref<162xf32, #tpu.memory_space<smem>>
    %567 = vector.broadcast %566 : f32 to vector<8x256xf32>
    %568 = arith.mulf %567, %565 : vector<8x256xf32>
    %569 = arith.addf %544, %568 : vector<8x256xf32>
    %c85 = arith.constant 85 : index
    %570 = memref.load %arg2[%c85] : memref<162xf32, #tpu.memory_space<smem>>
    %571 = vector.broadcast %570 : f32 to vector<8x256xf32>
    %572 = arith.mulf %571, %565 : vector<8x256xf32>
    %573 = arith.addf %548, %572 : vector<8x256xf32>
    %c86 = arith.constant 86 : index
    %574 = memref.load %arg2[%c86] : memref<162xf32, #tpu.memory_space<smem>>
    %575 = vector.broadcast %574 : f32 to vector<8x256xf32>
    %576 = arith.mulf %575, %565 : vector<8x256xf32>
    %577 = arith.addf %552, %576 : vector<8x256xf32>
    %c87 = arith.constant 87 : index
    %578 = memref.load %arg2[%c87] : memref<162xf32, #tpu.memory_space<smem>>
    %579 = vector.broadcast %578 : f32 to vector<8x256xf32>
    %580 = arith.mulf %579, %565 : vector<8x256xf32>
    %581 = arith.addf %556, %580 : vector<8x256xf32>
    %c88 = arith.constant 88 : index
    %582 = memref.load %arg2[%c88] : memref<162xf32, #tpu.memory_space<smem>>
    %583 = vector.broadcast %582 : f32 to vector<8x256xf32>
    %584 = arith.mulf %583, %565 : vector<8x256xf32>
    %585 = arith.addf %560, %584 : vector<8x256xf32>
    %c89 = arith.constant 89 : index
    %586 = memref.load %arg2[%c89] : memref<162xf32, #tpu.memory_space<smem>>
    %587 = vector.broadcast %586 : f32 to vector<8x256xf32>
    %588 = arith.mulf %587, %565 : vector<8x256xf32>
    %589 = arith.addf %564, %588 : vector<8x256xf32>
    %c238_i32_27 = arith.constant 238 : i32
    %590 = tpu.dynamic_rotate %465 by %c238_i32_27 dim 1 : vector<8x256xf32>, i32 -> vector<8x256xf32>
    %c102 = arith.constant 102 : index
    %591 = memref.load %arg2[%c102] : memref<162xf32, #tpu.memory_space<smem>>
    %592 = vector.broadcast %591 : f32 to vector<8x256xf32>
    %593 = arith.mulf %592, %590 : vector<8x256xf32>
    %594 = arith.addf %569, %593 : vector<8x256xf32>
    %c103 = arith.constant 103 : index
    %595 = memref.load %arg2[%c103] : memref<162xf32, #tpu.memory_space<smem>>
    %596 = vector.broadcast %595 : f32 to vector<8x256xf32>
    %597 = arith.mulf %596, %590 : vector<8x256xf32>
    %598 = arith.addf %573, %597 : vector<8x256xf32>
    %c104 = arith.constant 104 : index
    %599 = memref.load %arg2[%c104] : memref<162xf32, #tpu.memory_space<smem>>
    %600 = vector.broadcast %599 : f32 to vector<8x256xf32>
    %601 = arith.mulf %600, %590 : vector<8x256xf32>
    %602 = arith.addf %577, %601 : vector<8x256xf32>
    %c105 = arith.constant 105 : index
    %603 = memref.load %arg2[%c105] : memref<162xf32, #tpu.memory_space<smem>>
    %604 = vector.broadcast %603 : f32 to vector<8x256xf32>
    %605 = arith.mulf %604, %590 : vector<8x256xf32>
    %606 = arith.addf %581, %605 : vector<8x256xf32>
    %c106 = arith.constant 106 : index
    %607 = memref.load %arg2[%c106] : memref<162xf32, #tpu.memory_space<smem>>
    %608 = vector.broadcast %607 : f32 to vector<8x256xf32>
    %609 = arith.mulf %608, %590 : vector<8x256xf32>
    %610 = arith.addf %585, %609 : vector<8x256xf32>
    %c107 = arith.constant 107 : index
    %611 = memref.load %arg2[%c107] : memref<162xf32, #tpu.memory_space<smem>>
    %612 = vector.broadcast %611 : f32 to vector<8x256xf32>
    %613 = arith.mulf %612, %590 : vector<8x256xf32>
    %614 = arith.addf %589, %613 : vector<8x256xf32>
    %c224_i32_28 = arith.constant 224 : i32
    %615 = tpu.dynamic_rotate %465 by %c224_i32_28 dim 1 : vector<8x256xf32>, i32 -> vector<8x256xf32>
    %c120 = arith.constant 120 : index
    %616 = memref.load %arg2[%c120] : memref<162xf32, #tpu.memory_space<smem>>
    %617 = vector.broadcast %616 : f32 to vector<8x256xf32>
    %618 = arith.mulf %617, %615 : vector<8x256xf32>
    %619 = arith.addf %594, %618 : vector<8x256xf32>
    %c121 = arith.constant 121 : index
    %620 = memref.load %arg2[%c121] : memref<162xf32, #tpu.memory_space<smem>>
    %621 = vector.broadcast %620 : f32 to vector<8x256xf32>
    %622 = arith.mulf %621, %615 : vector<8x256xf32>
    %623 = arith.addf %598, %622 : vector<8x256xf32>
    %c122 = arith.constant 122 : index
    %624 = memref.load %arg2[%c122] : memref<162xf32, #tpu.memory_space<smem>>
    %625 = vector.broadcast %624 : f32 to vector<8x256xf32>
    %626 = arith.mulf %625, %615 : vector<8x256xf32>
    %627 = arith.addf %602, %626 : vector<8x256xf32>
    %c123 = arith.constant 123 : index
    %628 = memref.load %arg2[%c123] : memref<162xf32, #tpu.memory_space<smem>>
    %629 = vector.broadcast %628 : f32 to vector<8x256xf32>
    %630 = arith.mulf %629, %615 : vector<8x256xf32>
    %631 = arith.addf %606, %630 : vector<8x256xf32>
    %c124 = arith.constant 124 : index
    %632 = memref.load %arg2[%c124] : memref<162xf32, #tpu.memory_space<smem>>
    %633 = vector.broadcast %632 : f32 to vector<8x256xf32>
    %634 = arith.mulf %633, %615 : vector<8x256xf32>
    %635 = arith.addf %610, %634 : vector<8x256xf32>
    %c125 = arith.constant 125 : index
    %636 = memref.load %arg2[%c125] : memref<162xf32, #tpu.memory_space<smem>>
    %637 = vector.broadcast %636 : f32 to vector<8x256xf32>
    %638 = arith.mulf %637, %615 : vector<8x256xf32>
    %639 = arith.addf %614, %638 : vector<8x256xf32>
    %c223_i32_29 = arith.constant 223 : i32
    %640 = tpu.dynamic_rotate %465 by %c223_i32_29 dim 1 : vector<8x256xf32>, i32 -> vector<8x256xf32>
    %c138 = arith.constant 138 : index
    %641 = memref.load %arg2[%c138] : memref<162xf32, #tpu.memory_space<smem>>
    %642 = vector.broadcast %641 : f32 to vector<8x256xf32>
    %643 = arith.mulf %642, %640 : vector<8x256xf32>
    %644 = arith.addf %619, %643 : vector<8x256xf32>
    %c139 = arith.constant 139 : index
    %645 = memref.load %arg2[%c139] : memref<162xf32, #tpu.memory_space<smem>>
    %646 = vector.broadcast %645 : f32 to vector<8x256xf32>
    %647 = arith.mulf %646, %640 : vector<8x256xf32>
    %648 = arith.addf %623, %647 : vector<8x256xf32>
    %c140 = arith.constant 140 : index
    %649 = memref.load %arg2[%c140] : memref<162xf32, #tpu.memory_space<smem>>
    %650 = vector.broadcast %649 : f32 to vector<8x256xf32>
    %651 = arith.mulf %650, %640 : vector<8x256xf32>
    %652 = arith.addf %627, %651 : vector<8x256xf32>
    %c141 = arith.constant 141 : index
    %653 = memref.load %arg2[%c141] : memref<162xf32, #tpu.memory_space<smem>>
    %654 = vector.broadcast %653 : f32 to vector<8x256xf32>
    %655 = arith.mulf %654, %640 : vector<8x256xf32>
    %656 = arith.addf %631, %655 : vector<8x256xf32>
    %c142 = arith.constant 142 : index
    %657 = memref.load %arg2[%c142] : memref<162xf32, #tpu.memory_space<smem>>
    %658 = vector.broadcast %657 : f32 to vector<8x256xf32>
    %659 = arith.mulf %658, %640 : vector<8x256xf32>
    %660 = arith.addf %635, %659 : vector<8x256xf32>
    %c143 = arith.constant 143 : index
    %661 = memref.load %arg2[%c143] : memref<162xf32, #tpu.memory_space<smem>>
    %662 = vector.broadcast %661 : f32 to vector<8x256xf32>
    %663 = arith.mulf %662, %640 : vector<8x256xf32>
    %664 = arith.addf %639, %663 : vector<8x256xf32>
    %c222_i32_30 = arith.constant 222 : i32
    %665 = tpu.dynamic_rotate %465 by %c222_i32_30 dim 1 : vector<8x256xf32>, i32 -> vector<8x256xf32>
    %c156 = arith.constant 156 : index
    %666 = memref.load %arg2[%c156] : memref<162xf32, #tpu.memory_space<smem>>
    %667 = vector.broadcast %666 : f32 to vector<8x256xf32>
    %668 = arith.mulf %667, %665 : vector<8x256xf32>
    %669 = arith.addf %644, %668 : vector<8x256xf32>
    %c157 = arith.constant 157 : index
    %670 = memref.load %arg2[%c157] : memref<162xf32, #tpu.memory_space<smem>>
    %671 = vector.broadcast %670 : f32 to vector<8x256xf32>
    %672 = arith.mulf %671, %665 : vector<8x256xf32>
    %673 = arith.addf %648, %672 : vector<8x256xf32>
    %c158 = arith.constant 158 : index
    %674 = memref.load %arg2[%c158] : memref<162xf32, #tpu.memory_space<smem>>
    %675 = vector.broadcast %674 : f32 to vector<8x256xf32>
    %676 = arith.mulf %675, %665 : vector<8x256xf32>
    %677 = arith.addf %652, %676 : vector<8x256xf32>
    %c159 = arith.constant 159 : index
    %678 = memref.load %arg2[%c159] : memref<162xf32, #tpu.memory_space<smem>>
    %679 = vector.broadcast %678 : f32 to vector<8x256xf32>
    %680 = arith.mulf %679, %665 : vector<8x256xf32>
    %681 = arith.addf %656, %680 : vector<8x256xf32>
    %c160 = arith.constant 160 : index
    %682 = memref.load %arg2[%c160] : memref<162xf32, #tpu.memory_space<smem>>
    %683 = vector.broadcast %682 : f32 to vector<8x256xf32>
    %684 = arith.mulf %683, %665 : vector<8x256xf32>
    %685 = arith.addf %660, %684 : vector<8x256xf32>
    %c161 = arith.constant 161 : index
    %686 = memref.load %arg2[%c161] : memref<162xf32, #tpu.memory_space<smem>>
    %687 = vector.broadcast %686 : f32 to vector<8x256xf32>
    %688 = arith.mulf %687, %665 : vector<8x256xf32>
    %689 = arith.addf %664, %688 : vector<8x256xf32>
    %cst = arith.constant 0.000000e+00 : f32
    %690 = vector.broadcast %cst : f32 to vector<8x256xf32>
    %691 = arith.maximumf %669, %690 : vector<8x256xf32>
    %cst_31 = arith.constant 0.000000e+00 : f32
    %692 = vector.broadcast %cst_31 : f32 to vector<8x256xf32>
    %693 = arith.maximumf %673, %692 : vector<8x256xf32>
    %cst_32 = arith.constant 0.000000e+00 : f32
    %694 = vector.broadcast %cst_32 : f32 to vector<8x256xf32>
    %695 = arith.maximumf %677, %694 : vector<8x256xf32>
    %cst_33 = arith.constant 0.000000e+00 : f32
    %696 = vector.broadcast %cst_33 : f32 to vector<8x256xf32>
    %697 = arith.maximumf %681, %696 : vector<8x256xf32>
    %cst_34 = arith.constant 0.000000e+00 : f32
    %698 = vector.broadcast %cst_34 : f32 to vector<8x256xf32>
    %699 = arith.maximumf %685, %698 : vector<8x256xf32>
    %cst_35 = arith.constant 0.000000e+00 : f32
    %700 = vector.broadcast %cst_35 : f32 to vector<8x256xf32>
    %701 = arith.maximumf %689, %700 : vector<8x256xf32>
    %c0_36 = arith.constant 0 : index
    %702 = memref.load %arg5[%c0_36] : memref<3xf32, #tpu.memory_space<smem>>
    %703 = vector.broadcast %702 : f32 to vector<8x256xf32>
    %c1_37 = arith.constant 1 : index
    %704 = memref.load %arg5[%c1_37] : memref<3xf32, #tpu.memory_space<smem>>
    %705 = vector.broadcast %704 : f32 to vector<8x256xf32>
    %c2_38 = arith.constant 2 : index
    %706 = memref.load %arg5[%c2_38] : memref<3xf32, #tpu.memory_space<smem>>
    %707 = vector.broadcast %706 : f32 to vector<8x256xf32>
    %c0_39 = arith.constant 0 : index
    %708 = memref.load %arg4[%c0_39] : memref<54xf32, #tpu.memory_space<smem>>
    %709 = vector.broadcast %708 : f32 to vector<8x256xf32>
    %710 = arith.mulf %709, %691 : vector<8x256xf32>
    %711 = arith.addf %703, %710 : vector<8x256xf32>
    %c1_40 = arith.constant 1 : index
    %712 = memref.load %arg4[%c1_40] : memref<54xf32, #tpu.memory_space<smem>>
    %713 = vector.broadcast %712 : f32 to vector<8x256xf32>
    %714 = arith.mulf %713, %691 : vector<8x256xf32>
    %715 = arith.addf %705, %714 : vector<8x256xf32>
    %c2_41 = arith.constant 2 : index
    %716 = memref.load %arg4[%c2_41] : memref<54xf32, #tpu.memory_space<smem>>
    %717 = vector.broadcast %716 : f32 to vector<8x256xf32>
    %718 = arith.mulf %717, %691 : vector<8x256xf32>
    %719 = arith.addf %707, %718 : vector<8x256xf32>
    %c3_42 = arith.constant 3 : index
    %720 = memref.load %arg4[%c3_42] : memref<54xf32, #tpu.memory_space<smem>>
    %721 = vector.broadcast %720 : f32 to vector<8x256xf32>
    %722 = arith.mulf %721, %693 : vector<8x256xf32>
    %723 = arith.addf %711, %722 : vector<8x256xf32>
    %c4_43 = arith.constant 4 : index
    %724 = memref.load %arg4[%c4_43] : memref<54xf32, #tpu.memory_space<smem>>
    %725 = vector.broadcast %724 : f32 to vector<8x256xf32>
    %726 = arith.mulf %725, %693 : vector<8x256xf32>
    %727 = arith.addf %715, %726 : vector<8x256xf32>
    %c5_44 = arith.constant 5 : index
    %728 = memref.load %arg4[%c5_44] : memref<54xf32, #tpu.memory_space<smem>>
    %729 = vector.broadcast %728 : f32 to vector<8x256xf32>
    %730 = arith.mulf %729, %693 : vector<8x256xf32>
    %731 = arith.addf %719, %730 : vector<8x256xf32>
    %c6_45 = arith.constant 6 : index
    %732 = memref.load %arg4[%c6_45] : memref<54xf32, #tpu.memory_space<smem>>
    %733 = vector.broadcast %732 : f32 to vector<8x256xf32>
    %734 = arith.mulf %733, %695 : vector<8x256xf32>
    %735 = arith.addf %723, %734 : vector<8x256xf32>
    %c7_46 = arith.constant 7 : index
    %736 = memref.load %arg4[%c7_46] : memref<54xf32, #tpu.memory_space<smem>>
    %737 = vector.broadcast %736 : f32 to vector<8x256xf32>
    %738 = arith.mulf %737, %695 : vector<8x256xf32>
    %739 = arith.addf %727, %738 : vector<8x256xf32>
    %c8_47 = arith.constant 8 : index
    %740 = memref.load %arg4[%c8_47] : memref<54xf32, #tpu.memory_space<smem>>
    %741 = vector.broadcast %740 : f32 to vector<8x256xf32>
    %742 = arith.mulf %741, %695 : vector<8x256xf32>
    %743 = arith.addf %731, %742 : vector<8x256xf32>
    %c9_48 = arith.constant 9 : index
    %744 = memref.load %arg4[%c9_48] : memref<54xf32, #tpu.memory_space<smem>>
    %745 = vector.broadcast %744 : f32 to vector<8x256xf32>
    %746 = arith.mulf %745, %697 : vector<8x256xf32>
    %747 = arith.addf %735, %746 : vector<8x256xf32>
    %c10_49 = arith.constant 10 : index
    %748 = memref.load %arg4[%c10_49] : memref<54xf32, #tpu.memory_space<smem>>
    %749 = vector.broadcast %748 : f32 to vector<8x256xf32>
    %750 = arith.mulf %749, %697 : vector<8x256xf32>
    %751 = arith.addf %739, %750 : vector<8x256xf32>
    %c11_50 = arith.constant 11 : index
    %752 = memref.load %arg4[%c11_50] : memref<54xf32, #tpu.memory_space<smem>>
    %753 = vector.broadcast %752 : f32 to vector<8x256xf32>
    %754 = arith.mulf %753, %697 : vector<8x256xf32>
    %755 = arith.addf %743, %754 : vector<8x256xf32>
    %c12_51 = arith.constant 12 : index
    %756 = memref.load %arg4[%c12_51] : memref<54xf32, #tpu.memory_space<smem>>
    %757 = vector.broadcast %756 : f32 to vector<8x256xf32>
    %758 = arith.mulf %757, %699 : vector<8x256xf32>
    %759 = arith.addf %747, %758 : vector<8x256xf32>
    %c13_52 = arith.constant 13 : index
    %760 = memref.load %arg4[%c13_52] : memref<54xf32, #tpu.memory_space<smem>>
    %761 = vector.broadcast %760 : f32 to vector<8x256xf32>
    %762 = arith.mulf %761, %699 : vector<8x256xf32>
    %763 = arith.addf %751, %762 : vector<8x256xf32>
    %c14_53 = arith.constant 14 : index
    %764 = memref.load %arg4[%c14_53] : memref<54xf32, #tpu.memory_space<smem>>
    %765 = vector.broadcast %764 : f32 to vector<8x256xf32>
    %766 = arith.mulf %765, %699 : vector<8x256xf32>
    %767 = arith.addf %755, %766 : vector<8x256xf32>
    %c15_54 = arith.constant 15 : index
    %768 = memref.load %arg4[%c15_54] : memref<54xf32, #tpu.memory_space<smem>>
    %769 = vector.broadcast %768 : f32 to vector<8x256xf32>
    %770 = arith.mulf %769, %701 : vector<8x256xf32>
    %771 = arith.addf %759, %770 : vector<8x256xf32>
    %c16_55 = arith.constant 16 : index
    %772 = memref.load %arg4[%c16_55] : memref<54xf32, #tpu.memory_space<smem>>
    %773 = vector.broadcast %772 : f32 to vector<8x256xf32>
    %774 = arith.mulf %773, %701 : vector<8x256xf32>
    %775 = arith.addf %763, %774 : vector<8x256xf32>
    %c17_56 = arith.constant 17 : index
    %776 = memref.load %arg4[%c17_56] : memref<54xf32, #tpu.memory_space<smem>>
    %777 = vector.broadcast %776 : f32 to vector<8x256xf32>
    %778 = arith.mulf %777, %701 : vector<8x256xf32>
    %779 = arith.addf %767, %778 : vector<8x256xf32>
    %c7_i32 = arith.constant 7 : i32
    %780 = tpu.dynamic_rotate %691 by %c7_i32 dim 0 : vector<8x256xf32>, i32 -> vector<8x256xf32>
    %c18_57 = arith.constant 18 : index
    %781 = memref.load %arg4[%c18_57] : memref<54xf32, #tpu.memory_space<smem>>
    %782 = vector.broadcast %781 : f32 to vector<8x256xf32>
    %783 = arith.mulf %782, %780 : vector<8x256xf32>
    %784 = arith.addf %771, %783 : vector<8x256xf32>
    %c19_58 = arith.constant 19 : index
    %785 = memref.load %arg4[%c19_58] : memref<54xf32, #tpu.memory_space<smem>>
    %786 = vector.broadcast %785 : f32 to vector<8x256xf32>
    %787 = arith.mulf %786, %780 : vector<8x256xf32>
    %788 = arith.addf %775, %787 : vector<8x256xf32>
    %c20_59 = arith.constant 20 : index
    %789 = memref.load %arg4[%c20_59] : memref<54xf32, #tpu.memory_space<smem>>
    %790 = vector.broadcast %789 : f32 to vector<8x256xf32>
    %791 = arith.mulf %790, %780 : vector<8x256xf32>
    %792 = arith.addf %779, %791 : vector<8x256xf32>
    %c7_i32_60 = arith.constant 7 : i32
    %793 = tpu.dynamic_rotate %693 by %c7_i32_60 dim 0 : vector<8x256xf32>, i32 -> vector<8x256xf32>
    %c21_61 = arith.constant 21 : index
    %794 = memref.load %arg4[%c21_61] : memref<54xf32, #tpu.memory_space<smem>>
    %795 = vector.broadcast %794 : f32 to vector<8x256xf32>
    %796 = arith.mulf %795, %793 : vector<8x256xf32>
    %797 = arith.addf %784, %796 : vector<8x256xf32>
    %c22_62 = arith.constant 22 : index
    %798 = memref.load %arg4[%c22_62] : memref<54xf32, #tpu.memory_space<smem>>
    %799 = vector.broadcast %798 : f32 to vector<8x256xf32>
    %800 = arith.mulf %799, %793 : vector<8x256xf32>
    %801 = arith.addf %788, %800 : vector<8x256xf32>
    %c23_63 = arith.constant 23 : index
    %802 = memref.load %arg4[%c23_63] : memref<54xf32, #tpu.memory_space<smem>>
    %803 = vector.broadcast %802 : f32 to vector<8x256xf32>
    %804 = arith.mulf %803, %793 : vector<8x256xf32>
    %805 = arith.addf %792, %804 : vector<8x256xf32>
    %c7_i32_64 = arith.constant 7 : i32
    %806 = tpu.dynamic_rotate %695 by %c7_i32_64 dim 0 : vector<8x256xf32>, i32 -> vector<8x256xf32>
    %c24_65 = arith.constant 24 : index
    %807 = memref.load %arg4[%c24_65] : memref<54xf32, #tpu.memory_space<smem>>
    %808 = vector.broadcast %807 : f32 to vector<8x256xf32>
    %809 = arith.mulf %808, %806 : vector<8x256xf32>
    %810 = arith.addf %797, %809 : vector<8x256xf32>
    %c25_66 = arith.constant 25 : index
    %811 = memref.load %arg4[%c25_66] : memref<54xf32, #tpu.memory_space<smem>>
    %812 = vector.broadcast %811 : f32 to vector<8x256xf32>
    %813 = arith.mulf %812, %806 : vector<8x256xf32>
    %814 = arith.addf %801, %813 : vector<8x256xf32>
    %c26_67 = arith.constant 26 : index
    %815 = memref.load %arg4[%c26_67] : memref<54xf32, #tpu.memory_space<smem>>
    %816 = vector.broadcast %815 : f32 to vector<8x256xf32>
    %817 = arith.mulf %816, %806 : vector<8x256xf32>
    %818 = arith.addf %805, %817 : vector<8x256xf32>
    %c7_i32_68 = arith.constant 7 : i32
    %819 = tpu.dynamic_rotate %697 by %c7_i32_68 dim 0 : vector<8x256xf32>, i32 -> vector<8x256xf32>
    %c27_69 = arith.constant 27 : index
    %820 = memref.load %arg4[%c27_69] : memref<54xf32, #tpu.memory_space<smem>>
    %821 = vector.broadcast %820 : f32 to vector<8x256xf32>
    %822 = arith.mulf %821, %819 : vector<8x256xf32>
    %823 = arith.addf %810, %822 : vector<8x256xf32>
    %c28_70 = arith.constant 28 : index
    %824 = memref.load %arg4[%c28_70] : memref<54xf32, #tpu.memory_space<smem>>
    %825 = vector.broadcast %824 : f32 to vector<8x256xf32>
    %826 = arith.mulf %825, %819 : vector<8x256xf32>
    %827 = arith.addf %814, %826 : vector<8x256xf32>
    %c29_71 = arith.constant 29 : index
    %828 = memref.load %arg4[%c29_71] : memref<54xf32, #tpu.memory_space<smem>>
    %829 = vector.broadcast %828 : f32 to vector<8x256xf32>
    %830 = arith.mulf %829, %819 : vector<8x256xf32>
    %831 = arith.addf %818, %830 : vector<8x256xf32>
    %c7_i32_72 = arith.constant 7 : i32
    %832 = tpu.dynamic_rotate %699 by %c7_i32_72 dim 0 : vector<8x256xf32>, i32 -> vector<8x256xf32>
    %c30_73 = arith.constant 30 : index
    %833 = memref.load %arg4[%c30_73] : memref<54xf32, #tpu.memory_space<smem>>
    %834 = vector.broadcast %833 : f32 to vector<8x256xf32>
    %835 = arith.mulf %834, %832 : vector<8x256xf32>
    %836 = arith.addf %823, %835 : vector<8x256xf32>
    %c31_74 = arith.constant 31 : index
    %837 = memref.load %arg4[%c31_74] : memref<54xf32, #tpu.memory_space<smem>>
    %838 = vector.broadcast %837 : f32 to vector<8x256xf32>
    %839 = arith.mulf %838, %832 : vector<8x256xf32>
    %840 = arith.addf %827, %839 : vector<8x256xf32>
    %c32_75 = arith.constant 32 : index
    %841 = memref.load %arg4[%c32_75] : memref<54xf32, #tpu.memory_space<smem>>
    %842 = vector.broadcast %841 : f32 to vector<8x256xf32>
    %843 = arith.mulf %842, %832 : vector<8x256xf32>
    %844 = arith.addf %831, %843 : vector<8x256xf32>
    %c7_i32_76 = arith.constant 7 : i32
    %845 = tpu.dynamic_rotate %701 by %c7_i32_76 dim 0 : vector<8x256xf32>, i32 -> vector<8x256xf32>
    %c33_77 = arith.constant 33 : index
    %846 = memref.load %arg4[%c33_77] : memref<54xf32, #tpu.memory_space<smem>>
    %847 = vector.broadcast %846 : f32 to vector<8x256xf32>
    %848 = arith.mulf %847, %845 : vector<8x256xf32>
    %849 = arith.addf %836, %848 : vector<8x256xf32>
    %c34_78 = arith.constant 34 : index
    %850 = memref.load %arg4[%c34_78] : memref<54xf32, #tpu.memory_space<smem>>
    %851 = vector.broadcast %850 : f32 to vector<8x256xf32>
    %852 = arith.mulf %851, %845 : vector<8x256xf32>
    %853 = arith.addf %840, %852 : vector<8x256xf32>
    %c35_79 = arith.constant 35 : index
    %854 = memref.load %arg4[%c35_79] : memref<54xf32, #tpu.memory_space<smem>>
    %855 = vector.broadcast %854 : f32 to vector<8x256xf32>
    %856 = arith.mulf %855, %845 : vector<8x256xf32>
    %857 = arith.addf %844, %856 : vector<8x256xf32>
    %c6_i32 = arith.constant 6 : i32
    %858 = tpu.dynamic_rotate %691 by %c6_i32 dim 0 : vector<8x256xf32>, i32 -> vector<8x256xf32>
    %c36_80 = arith.constant 36 : index
    %859 = memref.load %arg4[%c36_80] : memref<54xf32, #tpu.memory_space<smem>>
    %860 = vector.broadcast %859 : f32 to vector<8x256xf32>
    %861 = arith.mulf %860, %858 : vector<8x256xf32>
    %862 = arith.addf %849, %861 : vector<8x256xf32>
    %c37_81 = arith.constant 37 : index
    %863 = memref.load %arg4[%c37_81] : memref<54xf32, #tpu.memory_space<smem>>
    %864 = vector.broadcast %863 : f32 to vector<8x256xf32>
    %865 = arith.mulf %864, %858 : vector<8x256xf32>
    %866 = arith.addf %853, %865 : vector<8x256xf32>
    %c38_82 = arith.constant 38 : index
    %867 = memref.load %arg4[%c38_82] : memref<54xf32, #tpu.memory_space<smem>>
    %868 = vector.broadcast %867 : f32 to vector<8x256xf32>
    %869 = arith.mulf %868, %858 : vector<8x256xf32>
    %870 = arith.addf %857, %869 : vector<8x256xf32>
    %c6_i32_83 = arith.constant 6 : i32
    %871 = tpu.dynamic_rotate %693 by %c6_i32_83 dim 0 : vector<8x256xf32>, i32 -> vector<8x256xf32>
    %c39_84 = arith.constant 39 : index
    %872 = memref.load %arg4[%c39_84] : memref<54xf32, #tpu.memory_space<smem>>
    %873 = vector.broadcast %872 : f32 to vector<8x256xf32>
    %874 = arith.mulf %873, %871 : vector<8x256xf32>
    %875 = arith.addf %862, %874 : vector<8x256xf32>
    %c40_85 = arith.constant 40 : index
    %876 = memref.load %arg4[%c40_85] : memref<54xf32, #tpu.memory_space<smem>>
    %877 = vector.broadcast %876 : f32 to vector<8x256xf32>
    %878 = arith.mulf %877, %871 : vector<8x256xf32>
    %879 = arith.addf %866, %878 : vector<8x256xf32>
    %c41_86 = arith.constant 41 : index
    %880 = memref.load %arg4[%c41_86] : memref<54xf32, #tpu.memory_space<smem>>
    %881 = vector.broadcast %880 : f32 to vector<8x256xf32>
    %882 = arith.mulf %881, %871 : vector<8x256xf32>
    %883 = arith.addf %870, %882 : vector<8x256xf32>
    %c6_i32_87 = arith.constant 6 : i32
    %884 = tpu.dynamic_rotate %695 by %c6_i32_87 dim 0 : vector<8x256xf32>, i32 -> vector<8x256xf32>
    %c42_88 = arith.constant 42 : index
    %885 = memref.load %arg4[%c42_88] : memref<54xf32, #tpu.memory_space<smem>>
    %886 = vector.broadcast %885 : f32 to vector<8x256xf32>
    %887 = arith.mulf %886, %884 : vector<8x256xf32>
    %888 = arith.addf %875, %887 : vector<8x256xf32>
    %c43_89 = arith.constant 43 : index
    %889 = memref.load %arg4[%c43_89] : memref<54xf32, #tpu.memory_space<smem>>
    %890 = vector.broadcast %889 : f32 to vector<8x256xf32>
    %891 = arith.mulf %890, %884 : vector<8x256xf32>
    %892 = arith.addf %879, %891 : vector<8x256xf32>
    %c44_90 = arith.constant 44 : index
    %893 = memref.load %arg4[%c44_90] : memref<54xf32, #tpu.memory_space<smem>>
    %894 = vector.broadcast %893 : f32 to vector<8x256xf32>
    %895 = arith.mulf %894, %884 : vector<8x256xf32>
    %896 = arith.addf %883, %895 : vector<8x256xf32>
    %c6_i32_91 = arith.constant 6 : i32
    %897 = tpu.dynamic_rotate %697 by %c6_i32_91 dim 0 : vector<8x256xf32>, i32 -> vector<8x256xf32>
    %c45_92 = arith.constant 45 : index
    %898 = memref.load %arg4[%c45_92] : memref<54xf32, #tpu.memory_space<smem>>
    %899 = vector.broadcast %898 : f32 to vector<8x256xf32>
    %900 = arith.mulf %899, %897 : vector<8x256xf32>
    %901 = arith.addf %888, %900 : vector<8x256xf32>
    %c46_93 = arith.constant 46 : index
    %902 = memref.load %arg4[%c46_93] : memref<54xf32, #tpu.memory_space<smem>>
    %903 = vector.broadcast %902 : f32 to vector<8x256xf32>
    %904 = arith.mulf %903, %897 : vector<8x256xf32>
    %905 = arith.addf %892, %904 : vector<8x256xf32>
    %c47_94 = arith.constant 47 : index
    %906 = memref.load %arg4[%c47_94] : memref<54xf32, #tpu.memory_space<smem>>
    %907 = vector.broadcast %906 : f32 to vector<8x256xf32>
    %908 = arith.mulf %907, %897 : vector<8x256xf32>
    %909 = arith.addf %896, %908 : vector<8x256xf32>
    %c6_i32_95 = arith.constant 6 : i32
    %910 = tpu.dynamic_rotate %699 by %c6_i32_95 dim 0 : vector<8x256xf32>, i32 -> vector<8x256xf32>
    %c48_96 = arith.constant 48 : index
    %911 = memref.load %arg4[%c48_96] : memref<54xf32, #tpu.memory_space<smem>>
    %912 = vector.broadcast %911 : f32 to vector<8x256xf32>
    %913 = arith.mulf %912, %910 : vector<8x256xf32>
    %914 = arith.addf %901, %913 : vector<8x256xf32>
    %c49_97 = arith.constant 49 : index
    %915 = memref.load %arg4[%c49_97] : memref<54xf32, #tpu.memory_space<smem>>
    %916 = vector.broadcast %915 : f32 to vector<8x256xf32>
    %917 = arith.mulf %916, %910 : vector<8x256xf32>
    %918 = arith.addf %905, %917 : vector<8x256xf32>
    %c50_98 = arith.constant 50 : index
    %919 = memref.load %arg4[%c50_98] : memref<54xf32, #tpu.memory_space<smem>>
    %920 = vector.broadcast %919 : f32 to vector<8x256xf32>
    %921 = arith.mulf %920, %910 : vector<8x256xf32>
    %922 = arith.addf %909, %921 : vector<8x256xf32>
    %c6_i32_99 = arith.constant 6 : i32
    %923 = tpu.dynamic_rotate %701 by %c6_i32_99 dim 0 : vector<8x256xf32>, i32 -> vector<8x256xf32>
    %c51_100 = arith.constant 51 : index
    %924 = memref.load %arg4[%c51_100] : memref<54xf32, #tpu.memory_space<smem>>
    %925 = vector.broadcast %924 : f32 to vector<8x256xf32>
    %926 = arith.mulf %925, %923 : vector<8x256xf32>
    %927 = arith.addf %914, %926 : vector<8x256xf32>
    %c52_101 = arith.constant 52 : index
    %928 = memref.load %arg4[%c52_101] : memref<54xf32, #tpu.memory_space<smem>>
    %929 = vector.broadcast %928 : f32 to vector<8x256xf32>
    %930 = arith.mulf %929, %923 : vector<8x256xf32>
    %931 = arith.addf %918, %930 : vector<8x256xf32>
    %c53_102 = arith.constant 53 : index
    %932 = memref.load %arg4[%c53_102] : memref<54xf32, #tpu.memory_space<smem>>
    %933 = vector.broadcast %932 : f32 to vector<8x256xf32>
    %934 = arith.mulf %933, %923 : vector<8x256xf32>
    %935 = arith.addf %922, %934 : vector<8x256xf32>
    %c0_103 = arith.constant 0 : index
    %c0_104 = arith.constant 0 : index
    %c0_105 = arith.constant 0 : index
    %c0_106 = arith.constant 0 : index
    %936 = vector.load %arg6[%c0_103, %c0_104, %c0_105, %c0_106] : memref<2x3x8x256xf32, #tpu.memory_space<vmem>>, vector<1x1x8x256xf32>
    %937 = vector.shape_cast %936 : vector<1x1x8x256xf32> to vector<8x256xf32>
    %938 = vector.shape_cast %927 : vector<8x256xf32> to vector<1x1x8x256xf32>
    tpu.vector_store %arg6[%c0_103, %c0_104, %c0_105, %c0_106], %938 {strides = array<i32>} : memref<2x3x8x256xf32, #tpu.memory_space<vmem>>, vector<1x1x8x256xf32>,
    %c0_107 = arith.constant 0 : index
    %c1_108 = arith.constant 1 : index
    %c0_109 = arith.constant 0 : index
    %c0_110 = arith.constant 0 : index
    %939 = vector.load %arg6[%c0_107, %c1_108, %c0_109, %c0_110] : memref<2x3x8x256xf32, #tpu.memory_space<vmem>>, vector<1x1x8x256xf32>
    %940 = vector.shape_cast %939 : vector<1x1x8x256xf32> to vector<8x256xf32>
    %941 = vector.shape_cast %931 : vector<8x256xf32> to vector<1x1x8x256xf32>
    tpu.vector_store %arg6[%c0_107, %c1_108, %c0_109, %c0_110], %941 {strides = array<i32>} : memref<2x3x8x256xf32, #tpu.memory_space<vmem>>, vector<1x1x8x256xf32>,
    %c0_111 = arith.constant 0 : index
    %c2_112 = arith.constant 2 : index
    %c0_113 = arith.constant 0 : index
    %c0_114 = arith.constant 0 : index
    %942 = vector.load %arg6[%c0_111, %c2_112, %c0_113, %c0_114] : memref<2x3x8x256xf32, #tpu.memory_space<vmem>>, vector<1x1x8x256xf32>
    %943 = vector.shape_cast %942 : vector<1x1x8x256xf32> to vector<8x256xf32>
    %944 = vector.shape_cast %935 : vector<8x256xf32> to vector<1x1x8x256xf32>
    tpu.vector_store %arg6[%c0_111, %c2_112, %c0_113, %c0_114], %944 {strides = array<i32>} : memref<2x3x8x256xf32, #tpu.memory_space<vmem>>, vector<1x1x8x256xf32>,
    %c0_115 = arith.constant 0 : index
    %945 = memref.load %arg3[%c0_115] : memref<6xf32, #tpu.memory_space<smem>>
    %946 = vector.broadcast %945 : f32 to vector<8x256xf32>
    %c1_116 = arith.constant 1 : index
    %947 = memref.load %arg3[%c1_116] : memref<6xf32, #tpu.memory_space<smem>>
    %948 = vector.broadcast %947 : f32 to vector<8x256xf32>
    %c2_117 = arith.constant 2 : index
    %949 = memref.load %arg3[%c2_117] : memref<6xf32, #tpu.memory_space<smem>>
    %950 = vector.broadcast %949 : f32 to vector<8x256xf32>
    %c3_118 = arith.constant 3 : index
    %951 = memref.load %arg3[%c3_118] : memref<6xf32, #tpu.memory_space<smem>>
    %952 = vector.broadcast %951 : f32 to vector<8x256xf32>
    %c4_119 = arith.constant 4 : index
    %953 = memref.load %arg3[%c4_119] : memref<6xf32, #tpu.memory_space<smem>>
    %954 = vector.broadcast %953 : f32 to vector<8x256xf32>
    %c5_120 = arith.constant 5 : index
    %955 = memref.load %arg3[%c5_120] : memref<6xf32, #tpu.memory_space<smem>>
    %956 = vector.broadcast %955 : f32 to vector<8x256xf32>
    %c1_121 = arith.constant 1 : index
    %c0_122 = arith.constant 0 : index
    %c0_123 = arith.constant 0 : index
    %957 = vector.load %arg1[%c1_121, %c0_122, %c0_123] : memref<2x24x256xf32, #tpu.memory_space<vmem>>, vector<1x8x256xf32>
    %958 = vector.shape_cast %957 : vector<1x8x256xf32> to vector<8x256xf32>
    %c0_124 = arith.constant 0 : index
    %959 = memref.load %arg2[%c0_124] : memref<162xf32, #tpu.memory_space<smem>>
    %960 = vector.broadcast %959 : f32 to vector<8x256xf32>
    %961 = arith.mulf %960, %958 : vector<8x256xf32>
    %962 = arith.addf %946, %961 : vector<8x256xf32>
    %c1_125 = arith.constant 1 : index
    %963 = memref.load %arg2[%c1_125] : memref<162xf32, #tpu.memory_space<smem>>
    %964 = vector.broadcast %963 : f32 to vector<8x256xf32>
    %965 = arith.mulf %964, %958 : vector<8x256xf32>
    %966 = arith.addf %948, %965 : vector<8x256xf32>
    %c2_126 = arith.constant 2 : index
    %967 = memref.load %arg2[%c2_126] : memref<162xf32, #tpu.memory_space<smem>>
    %968 = vector.broadcast %967 : f32 to vector<8x256xf32>
    %969 = arith.mulf %968, %958 : vector<8x256xf32>
    %970 = arith.addf %950, %969 : vector<8x256xf32>
    %c3_127 = arith.constant 3 : index
    %971 = memref.load %arg2[%c3_127] : memref<162xf32, #tpu.memory_space<smem>>
    %972 = vector.broadcast %971 : f32 to vector<8x256xf32>
    %973 = arith.mulf %972, %958 : vector<8x256xf32>
    %974 = arith.addf %952, %973 : vector<8x256xf32>
    %c4_128 = arith.constant 4 : index
    %975 = memref.load %arg2[%c4_128] : memref<162xf32, #tpu.memory_space<smem>>
    %976 = vector.broadcast %975 : f32 to vector<8x256xf32>
    %977 = arith.mulf %976, %958 : vector<8x256xf32>
    %978 = arith.addf %954, %977 : vector<8x256xf32>
    %c5_129 = arith.constant 5 : index
    %979 = memref.load %arg2[%c5_129] : memref<162xf32, #tpu.memory_space<smem>>
    %980 = vector.broadcast %979 : f32 to vector<8x256xf32>
    %981 = arith.mulf %980, %958 : vector<8x256xf32>
    %982 = arith.addf %956, %981 : vector<8x256xf32>
    %c255_i32_130 = arith.constant 255 : i32
    %983 = tpu.dynamic_rotate %958 by %c255_i32_130 dim 1 : vector<8x256xf32>, i32 -> vector<8x256xf32>
    %c18_131 = arith.constant 18 : index
    %984 = memref.load %arg2[%c18_131] : memref<162xf32, #tpu.memory_space<smem>>
    %985 = vector.broadcast %984 : f32 to vector<8x256xf32>
    %986 = arith.mulf %985, %983 : vector<8x256xf32>
    %987 = arith.addf %962, %986 : vector<8x256xf32>
    %c19_132 = arith.constant 19 : index
    %988 = memref.load %arg2[%c19_132] : memref<162xf32, #tpu.memory_space<smem>>
    %989 = vector.broadcast %988 : f32 to vector<8x256xf32>
    %990 = arith.mulf %989, %983 : vector<8x256xf32>
    %991 = arith.addf %966, %990 : vector<8x256xf32>
    %c20_133 = arith.constant 20 : index
    %992 = memref.load %arg2[%c20_133] : memref<162xf32, #tpu.memory_space<smem>>
    %993 = vector.broadcast %992 : f32 to vector<8x256xf32>
    %994 = arith.mulf %993, %983 : vector<8x256xf32>
    %995 = arith.addf %970, %994 : vector<8x256xf32>
    %c21_134 = arith.constant 21 : index
    %996 = memref.load %arg2[%c21_134] : memref<162xf32, #tpu.memory_space<smem>>
    %997 = vector.broadcast %996 : f32 to vector<8x256xf32>
    %998 = arith.mulf %997, %983 : vector<8x256xf32>
    %999 = arith.addf %974, %998 : vector<8x256xf32>
    %c22_135 = arith.constant 22 : index
    %1000 = memref.load %arg2[%c22_135] : memref<162xf32, #tpu.memory_space<smem>>
    %1001 = vector.broadcast %1000 : f32 to vector<8x256xf32>
    %1002 = arith.mulf %1001, %983 : vector<8x256xf32>
    %1003 = arith.addf %978, %1002 : vector<8x256xf32>
    %c23_136 = arith.constant 23 : index
    %1004 = memref.load %arg2[%c23_136] : memref<162xf32, #tpu.memory_space<smem>>
    %1005 = vector.broadcast %1004 : f32 to vector<8x256xf32>
    %1006 = arith.mulf %1005, %983 : vector<8x256xf32>
    %1007 = arith.addf %982, %1006 : vector<8x256xf32>
    %c254_i32_137 = arith.constant 254 : i32
    %1008 = tpu.dynamic_rotate %958 by %c254_i32_137 dim 1 : vector<8x256xf32>, i32 -> vector<8x256xf32>
    %c36_138 = arith.constant 36 : index
    %1009 = memref.load %arg2[%c36_138] : memref<162xf32, #tpu.memory_space<smem>>
    %1010 = vector.broadcast %1009 : f32 to vector<8x256xf32>
    %1011 = arith.mulf %1010, %1008 : vector<8x256xf32>
    %1012 = arith.addf %987, %1011 : vector<8x256xf32>
    %c37_139 = arith.constant 37 : index
    %1013 = memref.load %arg2[%c37_139] : memref<162xf32, #tpu.memory_space<smem>>
    %1014 = vector.broadcast %1013 : f32 to vector<8x256xf32>
    %1015 = arith.mulf %1014, %1008 : vector<8x256xf32>
    %1016 = arith.addf %991, %1015 : vector<8x256xf32>
    %c38_140 = arith.constant 38 : index
    %1017 = memref.load %arg2[%c38_140] : memref<162xf32, #tpu.memory_space<smem>>
    %1018 = vector.broadcast %1017 : f32 to vector<8x256xf32>
    %1019 = arith.mulf %1018, %1008 : vector<8x256xf32>
    %1020 = arith.addf %995, %1019 : vector<8x256xf32>
    %c39_141 = arith.constant 39 : index
    %1021 = memref.load %arg2[%c39_141] : memref<162xf32, #tpu.memory_space<smem>>
    %1022 = vector.broadcast %1021 : f32 to vector<8x256xf32>
    %1023 = arith.mulf %1022, %1008 : vector<8x256xf32>
    %1024 = arith.addf %999, %1023 : vector<8x256xf32>
    %c40_142 = arith.constant 40 : index
    %1025 = memref.load %arg2[%c40_142] : memref<162xf32, #tpu.memory_space<smem>>
    %1026 = vector.broadcast %1025 : f32 to vector<8x256xf32>
    %1027 = arith.mulf %1026, %1008 : vector<8x256xf32>
    %1028 = arith.addf %1003, %1027 : vector<8x256xf32>
    %c41_143 = arith.constant 41 : index
    %1029 = memref.load %arg2[%c41_143] : memref<162xf32, #tpu.memory_space<smem>>
    %1030 = vector.broadcast %1029 : f32 to vector<8x256xf32>
    %1031 = arith.mulf %1030, %1008 : vector<8x256xf32>
    %1032 = arith.addf %1007, %1031 : vector<8x256xf32>
    %c240_i32_144 = arith.constant 240 : i32
    %1033 = tpu.dynamic_rotate %958 by %c240_i32_144 dim 1 : vector<8x256xf32>, i32 -> vector<8x256xf32>
    %c54_145 = arith.constant 54 : index
    %1034 = memref.load %arg2[%c54_145] : memref<162xf32, #tpu.memory_space<smem>>
    %1035 = vector.broadcast %1034 : f32 to vector<8x256xf32>
    %1036 = arith.mulf %1035, %1033 : vector<8x256xf32>
    %1037 = arith.addf %1012, %1036 : vector<8x256xf32>
    %c55_146 = arith.constant 55 : index
    %1038 = memref.load %arg2[%c55_146] : memref<162xf32, #tpu.memory_space<smem>>
    %1039 = vector.broadcast %1038 : f32 to vector<8x256xf32>
    %1040 = arith.mulf %1039, %1033 : vector<8x256xf32>
    %1041 = arith.addf %1016, %1040 : vector<8x256xf32>
    %c56_147 = arith.constant 56 : index
    %1042 = memref.load %arg2[%c56_147] : memref<162xf32, #tpu.memory_space<smem>>
    %1043 = vector.broadcast %1042 : f32 to vector<8x256xf32>
    %1044 = arith.mulf %1043, %1033 : vector<8x256xf32>
    %1045 = arith.addf %1020, %1044 : vector<8x256xf32>
    %c57_148 = arith.constant 57 : index
    %1046 = memref.load %arg2[%c57_148] : memref<162xf32, #tpu.memory_space<smem>>
    %1047 = vector.broadcast %1046 : f32 to vector<8x256xf32>
    %1048 = arith.mulf %1047, %1033 : vector<8x256xf32>
    %1049 = arith.addf %1024, %1048 : vector<8x256xf32>
    %c58_149 = arith.constant 58 : index
    %1050 = memref.load %arg2[%c58_149] : memref<162xf32, #tpu.memory_space<smem>>
    %1051 = vector.broadcast %1050 : f32 to vector<8x256xf32>
    %1052 = arith.mulf %1051, %1033 : vector<8x256xf32>
    %1053 = arith.addf %1028, %1052 : vector<8x256xf32>
    %c59_150 = arith.constant 59 : index
    %1054 = memref.load %arg2[%c59_150] : memref<162xf32, #tpu.memory_space<smem>>
    %1055 = vector.broadcast %1054 : f32 to vector<8x256xf32>
    %1056 = arith.mulf %1055, %1033 : vector<8x256xf32>
    %1057 = arith.addf %1032, %1056 : vector<8x256xf32>
    %c239_i32_151 = arith.constant 239 : i32
    %1058 = tpu.dynamic_rotate %958 by %c239_i32_151 dim 1 : vector<8x256xf32>, i32 -> vector<8x256xf32>
    %c72_152 = arith.constant 72 : index
    %1059 = memref.load %arg2[%c72_152] : memref<162xf32, #tpu.memory_space<smem>>
    %1060 = vector.broadcast %1059 : f32 to vector<8x256xf32>
    %1061 = arith.mulf %1060, %1058 : vector<8x256xf32>
    %1062 = arith.addf %1037, %1061 : vector<8x256xf32>
    %c73_153 = arith.constant 73 : index
    %1063 = memref.load %arg2[%c73_153] : memref<162xf32, #tpu.memory_space<smem>>
    %1064 = vector.broadcast %1063 : f32 to vector<8x256xf32>
    %1065 = arith.mulf %1064, %1058 : vector<8x256xf32>
    %1066 = arith.addf %1041, %1065 : vector<8x256xf32>
    %c74_154 = arith.constant 74 : index
    %1067 = memref.load %arg2[%c74_154] : memref<162xf32, #tpu.memory_space<smem>>
    %1068 = vector.broadcast %1067 : f32 to vector<8x256xf32>
    %1069 = arith.mulf %1068, %1058 : vector<8x256xf32>
    %1070 = arith.addf %1045, %1069 : vector<8x256xf32>
    %c75_155 = arith.constant 75 : index
    %1071 = memref.load %arg2[%c75_155] : memref<162xf32, #tpu.memory_space<smem>>
    %1072 = vector.broadcast %1071 : f32 to vector<8x256xf32>
    %1073 = arith.mulf %1072, %1058 : vector<8x256xf32>
    %1074 = arith.addf %1049, %1073 : vector<8x256xf32>
    %c76_156 = arith.constant 76 : index
    %1075 = memref.load %arg2[%c76_156] : memref<162xf32, #tpu.memory_space<smem>>
    %1076 = vector.broadcast %1075 : f32 to vector<8x256xf32>
    %1077 = arith.mulf %1076, %1058 : vector<8x256xf32>
    %1078 = arith.addf %1053, %1077 : vector<8x256xf32>
    %c77_157 = arith.constant 77 : index
    %1079 = memref.load %arg2[%c77_157] : memref<162xf32, #tpu.memory_space<smem>>
    %1080 = vector.broadcast %1079 : f32 to vector<8x256xf32>
    %1081 = arith.mulf %1080, %1058 : vector<8x256xf32>
    %1082 = arith.addf %1057, %1081 : vector<8x256xf32>
    %c238_i32_158 = arith.constant 238 : i32
    %1083 = tpu.dynamic_rotate %958 by %c238_i32_158 dim 1 : vector<8x256xf32>, i32 -> vector<8x256xf32>
    %c90_159 = arith.constant 90 : index
    %1084 = memref.load %arg2[%c90_159] : memref<162xf32, #tpu.memory_space<smem>>
    %1085 = vector.broadcast %1084 : f32 to vector<8x256xf32>
    %1086 = arith.mulf %1085, %1083 : vector<8x256xf32>
    %1087 = arith.addf %1062, %1086 : vector<8x256xf32>
    %c91_160 = arith.constant 91 : index
    %1088 = memref.load %arg2[%c91_160] : memref<162xf32, #tpu.memory_space<smem>>
    %1089 = vector.broadcast %1088 : f32 to vector<8x256xf32>
    %1090 = arith.mulf %1089, %1083 : vector<8x256xf32>
    %1091 = arith.addf %1066, %1090 : vector<8x256xf32>
    %c92_161 = arith.constant 92 : index
    %1092 = memref.load %arg2[%c92_161] : memref<162xf32, #tpu.memory_space<smem>>
    %1093 = vector.broadcast %1092 : f32 to vector<8x256xf32>
    %1094 = arith.mulf %1093, %1083 : vector<8x256xf32>
    %1095 = arith.addf %1070, %1094 : vector<8x256xf32>
    %c93_162 = arith.constant 93 : index
    %1096 = memref.load %arg2[%c93_162] : memref<162xf32, #tpu.memory_space<smem>>
    %1097 = vector.broadcast %1096 : f32 to vector<8x256xf32>
    %1098 = arith.mulf %1097, %1083 : vector<8x256xf32>
    %1099 = arith.addf %1074, %1098 : vector<8x256xf32>
    %c94_163 = arith.constant 94 : index
    %1100 = memref.load %arg2[%c94_163] : memref<162xf32, #tpu.memory_space<smem>>
    %1101 = vector.broadcast %1100 : f32 to vector<8x256xf32>
    %1102 = arith.mulf %1101, %1083 : vector<8x256xf32>
    %1103 = arith.addf %1078, %1102 : vector<8x256xf32>
    %c95_164 = arith.constant 95 : index
    %1104 = memref.load %arg2[%c95_164] : memref<162xf32, #tpu.memory_space<smem>>
    %1105 = vector.broadcast %1104 : f32 to vector<8x256xf32>
    %1106 = arith.mulf %1105, %1083 : vector<8x256xf32>
    %1107 = arith.addf %1082, %1106 : vector<8x256xf32>
    %c224_i32_165 = arith.constant 224 : i32
    %1108 = tpu.dynamic_rotate %958 by %c224_i32_165 dim 1 : vector<8x256xf32>, i32 -> vector<8x256xf32>
    %c108_166 = arith.constant 108 : index
    %1109 = memref.load %arg2[%c108_166] : memref<162xf32, #tpu.memory_space<smem>>
    %1110 = vector.broadcast %1109 : f32 to vector<8x256xf32>
    %1111 = arith.mulf %1110, %1108 : vector<8x256xf32>
    %1112 = arith.addf %1087, %1111 : vector<8x256xf32>
    %c109_167 = arith.constant 109 : index
    %1113 = memref.load %arg2[%c109_167] : memref<162xf32, #tpu.memory_space<smem>>
    %1114 = vector.broadcast %1113 : f32 to vector<8x256xf32>
    %1115 = arith.mulf %1114, %1108 : vector<8x256xf32>
    %1116 = arith.addf %1091, %1115 : vector<8x256xf32>
    %c110_168 = arith.constant 110 : index
    %1117 = memref.load %arg2[%c110_168] : memref<162xf32, #tpu.memory_space<smem>>
    %1118 = vector.broadcast %1117 : f32 to vector<8x256xf32>
    %1119 = arith.mulf %1118, %1108 : vector<8x256xf32>
    %1120 = arith.addf %1095, %1119 : vector<8x256xf32>
    %c111_169 = arith.constant 111 : index
    %1121 = memref.load %arg2[%c111_169] : memref<162xf32, #tpu.memory_space<smem>>
    %1122 = vector.broadcast %1121 : f32 to vector<8x256xf32>
    %1123 = arith.mulf %1122, %1108 : vector<8x256xf32>
    %1124 = arith.addf %1099, %1123 : vector<8x256xf32>
    %c112_170 = arith.constant 112 : index
    %1125 = memref.load %arg2[%c112_170] : memref<162xf32, #tpu.memory_space<smem>>
    %1126 = vector.broadcast %1125 : f32 to vector<8x256xf32>
    %1127 = arith.mulf %1126, %1108 : vector<8x256xf32>
    %1128 = arith.addf %1103, %1127 : vector<8x256xf32>
    %c113_171 = arith.constant 113 : index
    %1129 = memref.load %arg2[%c113_171] : memref<162xf32, #tpu.memory_space<smem>>
    %1130 = vector.broadcast %1129 : f32 to vector<8x256xf32>
    %1131 = arith.mulf %1130, %1108 : vector<8x256xf32>
    %1132 = arith.addf %1107, %1131 : vector<8x256xf32>
    %c223_i32_172 = arith.constant 223 : i32
    %1133 = tpu.dynamic_rotate %958 by %c223_i32_172 dim 1 : vector<8x256xf32>, i32 -> vector<8x256xf32>
    %c126_173 = arith.constant 126 : index
    %1134 = memref.load %arg2[%c126_173] : memref<162xf32, #tpu.memory_space<smem>>
    %1135 = vector.broadcast %1134 : f32 to vector<8x256xf32>
    %1136 = arith.mulf %1135, %1133 : vector<8x256xf32>
    %1137 = arith.addf %1112, %1136 : vector<8x256xf32>
    %c127_174 = arith.constant 127 : index
    %1138 = memref.load %arg2[%c127_174] : memref<162xf32, #tpu.memory_space<smem>>
    %1139 = vector.broadcast %1138 : f32 to vector<8x256xf32>
    %1140 = arith.mulf %1139, %1133 : vector<8x256xf32>
    %1141 = arith.addf %1116, %1140 : vector<8x256xf32>
    %c128_175 = arith.constant 128 : index
    %1142 = memref.load %arg2[%c128_175] : memref<162xf32, #tpu.memory_space<smem>>
    %1143 = vector.broadcast %1142 : f32 to vector<8x256xf32>
    %1144 = arith.mulf %1143, %1133 : vector<8x256xf32>
    %1145 = arith.addf %1120, %1144 : vector<8x256xf32>
    %c129_176 = arith.constant 129 : index
    %1146 = memref.load %arg2[%c129_176] : memref<162xf32, #tpu.memory_space<smem>>
    %1147 = vector.broadcast %1146 : f32 to vector<8x256xf32>
    %1148 = arith.mulf %1147, %1133 : vector<8x256xf32>
    %1149 = arith.addf %1124, %1148 : vector<8x256xf32>
    %c130_177 = arith.constant 130 : index
    %1150 = memref.load %arg2[%c130_177] : memref<162xf32, #tpu.memory_space<smem>>
    %1151 = vector.broadcast %1150 : f32 to vector<8x256xf32>
    %1152 = arith.mulf %1151, %1133 : vector<8x256xf32>
    %1153 = arith.addf %1128, %1152 : vector<8x256xf32>
    %c131_178 = arith.constant 131 : index
    %1154 = memref.load %arg2[%c131_178] : memref<162xf32, #tpu.memory_space<smem>>
    %1155 = vector.broadcast %1154 : f32 to vector<8x256xf32>
    %1156 = arith.mulf %1155, %1133 : vector<8x256xf32>
    %1157 = arith.addf %1132, %1156 : vector<8x256xf32>
    %c222_i32_179 = arith.constant 222 : i32
    %1158 = tpu.dynamic_rotate %958 by %c222_i32_179 dim 1 : vector<8x256xf32>, i32 -> vector<8x256xf32>
    %c144_180 = arith.constant 144 : index
    %1159 = memref.load %arg2[%c144_180] : memref<162xf32, #tpu.memory_space<smem>>
    %1160 = vector.broadcast %1159 : f32 to vector<8x256xf32>
    %1161 = arith.mulf %1160, %1158 : vector<8x256xf32>
    %1162 = arith.addf %1137, %1161 : vector<8x256xf32>
    %c145_181 = arith.constant 145 : index
    %1163 = memref.load %arg2[%c145_181] : memref<162xf32, #tpu.memory_space<smem>>
    %1164 = vector.broadcast %1163 : f32 to vector<8x256xf32>
    %1165 = arith.mulf %1164, %1158 : vector<8x256xf32>
    %1166 = arith.addf %1141, %1165 : vector<8x256xf32>
    %c146_182 = arith.constant 146 : index
    %1167 = memref.load %arg2[%c146_182] : memref<162xf32, #tpu.memory_space<smem>>
    %1168 = vector.broadcast %1167 : f32 to vector<8x256xf32>
    %1169 = arith.mulf %1168, %1158 : vector<8x256xf32>
    %1170 = arith.addf %1145, %1169 : vector<8x256xf32>
    %c147_183 = arith.constant 147 : index
    %1171 = memref.load %arg2[%c147_183] : memref<162xf32, #tpu.memory_space<smem>>
    %1172 = vector.broadcast %1171 : f32 to vector<8x256xf32>
    %1173 = arith.mulf %1172, %1158 : vector<8x256xf32>
    %1174 = arith.addf %1149, %1173 : vector<8x256xf32>
    %c148_184 = arith.constant 148 : index
    %1175 = memref.load %arg2[%c148_184] : memref<162xf32, #tpu.memory_space<smem>>
    %1176 = vector.broadcast %1175 : f32 to vector<8x256xf32>
    %1177 = arith.mulf %1176, %1158 : vector<8x256xf32>
    %1178 = arith.addf %1153, %1177 : vector<8x256xf32>
    %c149_185 = arith.constant 149 : index
    %1179 = memref.load %arg2[%c149_185] : memref<162xf32, #tpu.memory_space<smem>>
    %1180 = vector.broadcast %1179 : f32 to vector<8x256xf32>
    %1181 = arith.mulf %1180, %1158 : vector<8x256xf32>
    %1182 = arith.addf %1157, %1181 : vector<8x256xf32>
    %c1_186 = arith.constant 1 : index
    %c8_187 = arith.constant 8 : index
    %c0_188 = arith.constant 0 : index
    %1183 = vector.load %arg1[%c1_186, %c8_187, %c0_188] : memref<2x24x256xf32, #tpu.memory_space<vmem>>, vector<1x8x256xf32>
    %1184 = vector.shape_cast %1183 : vector<1x8x256xf32> to vector<8x256xf32>
    %c6_189 = arith.constant 6 : index
    %1185 = memref.load %arg2[%c6_189] : memref<162xf32, #tpu.memory_space<smem>>
    %1186 = vector.broadcast %1185 : f32 to vector<8x256xf32>
    %1187 = arith.mulf %1186, %1184 : vector<8x256xf32>
    %1188 = arith.addf %1162, %1187 : vector<8x256xf32>
    %c7_190 = arith.constant 7 : index
    %1189 = memref.load %arg2[%c7_190] : memref<162xf32, #tpu.memory_space<smem>>
    %1190 = vector.broadcast %1189 : f32 to vector<8x256xf32>
    %1191 = arith.mulf %1190, %1184 : vector<8x256xf32>
    %1192 = arith.addf %1166, %1191 : vector<8x256xf32>
    %c8_191 = arith.constant 8 : index
    %1193 = memref.load %arg2[%c8_191] : memref<162xf32, #tpu.memory_space<smem>>
    %1194 = vector.broadcast %1193 : f32 to vector<8x256xf32>
    %1195 = arith.mulf %1194, %1184 : vector<8x256xf32>
    %1196 = arith.addf %1170, %1195 : vector<8x256xf32>
    %c9_192 = arith.constant 9 : index
    %1197 = memref.load %arg2[%c9_192] : memref<162xf32, #tpu.memory_space<smem>>
    %1198 = vector.broadcast %1197 : f32 to vector<8x256xf32>
    %1199 = arith.mulf %1198, %1184 : vector<8x256xf32>
    %1200 = arith.addf %1174, %1199 : vector<8x256xf32>
    %c10_193 = arith.constant 10 : index
    %1201 = memref.load %arg2[%c10_193] : memref<162xf32, #tpu.memory_space<smem>>
    %1202 = vector.broadcast %1201 : f32 to vector<8x256xf32>
    %1203 = arith.mulf %1202, %1184 : vector<8x256xf32>
    %1204 = arith.addf %1178, %1203 : vector<8x256xf32>
    %c11_194 = arith.constant 11 : index
    %1205 = memref.load %arg2[%c11_194] : memref<162xf32, #tpu.memory_space<smem>>
    %1206 = vector.broadcast %1205 : f32 to vector<8x256xf32>
    %1207 = arith.mulf %1206, %1184 : vector<8x256xf32>
    %1208 = arith.addf %1182, %1207 : vector<8x256xf32>
    %c255_i32_195 = arith.constant 255 : i32
    %1209 = tpu.dynamic_rotate %1184 by %c255_i32_195 dim 1 : vector<8x256xf32>, i32 -> vector<8x256xf32>
    %c24_196 = arith.constant 24 : index
    %1210 = memref.load %arg2[%c24_196] : memref<162xf32, #tpu.memory_space<smem>>
    %1211 = vector.broadcast %1210 : f32 to vector<8x256xf32>
    %1212 = arith.mulf %1211, %1209 : vector<8x256xf32>
    %1213 = arith.addf %1188, %1212 : vector<8x256xf32>
    %c25_197 = arith.constant 25 : index
    %1214 = memref.load %arg2[%c25_197] : memref<162xf32, #tpu.memory_space<smem>>
    %1215 = vector.broadcast %1214 : f32 to vector<8x256xf32>
    %1216 = arith.mulf %1215, %1209 : vector<8x256xf32>
    %1217 = arith.addf %1192, %1216 : vector<8x256xf32>
    %c26_198 = arith.constant 26 : index
    %1218 = memref.load %arg2[%c26_198] : memref<162xf32, #tpu.memory_space<smem>>
    %1219 = vector.broadcast %1218 : f32 to vector<8x256xf32>
    %1220 = arith.mulf %1219, %1209 : vector<8x256xf32>
    %1221 = arith.addf %1196, %1220 : vector<8x256xf32>
    %c27_199 = arith.constant 27 : index
    %1222 = memref.load %arg2[%c27_199] : memref<162xf32, #tpu.memory_space<smem>>
    %1223 = vector.broadcast %1222 : f32 to vector<8x256xf32>
    %1224 = arith.mulf %1223, %1209 : vector<8x256xf32>
    %1225 = arith.addf %1200, %1224 : vector<8x256xf32>
    %c28_200 = arith.constant 28 : index
    %1226 = memref.load %arg2[%c28_200] : memref<162xf32, #tpu.memory_space<smem>>
    %1227 = vector.broadcast %1226 : f32 to vector<8x256xf32>
    %1228 = arith.mulf %1227, %1209 : vector<8x256xf32>
    %1229 = arith.addf %1204, %1228 : vector<8x256xf32>
    %c29_201 = arith.constant 29 : index
    %1230 = memref.load %arg2[%c29_201] : memref<162xf32, #tpu.memory_space<smem>>
    %1231 = vector.broadcast %1230 : f32 to vector<8x256xf32>
    %1232 = arith.mulf %1231, %1209 : vector<8x256xf32>
    %1233 = arith.addf %1208, %1232 : vector<8x256xf32>
    %c254_i32_202 = arith.constant 254 : i32
    %1234 = tpu.dynamic_rotate %1184 by %c254_i32_202 dim 1 : vector<8x256xf32>, i32 -> vector<8x256xf32>
    %c42_203 = arith.constant 42 : index
    %1235 = memref.load %arg2[%c42_203] : memref<162xf32, #tpu.memory_space<smem>>
    %1236 = vector.broadcast %1235 : f32 to vector<8x256xf32>
    %1237 = arith.mulf %1236, %1234 : vector<8x256xf32>
    %1238 = arith.addf %1213, %1237 : vector<8x256xf32>
    %c43_204 = arith.constant 43 : index
    %1239 = memref.load %arg2[%c43_204] : memref<162xf32, #tpu.memory_space<smem>>
    %1240 = vector.broadcast %1239 : f32 to vector<8x256xf32>
    %1241 = arith.mulf %1240, %1234 : vector<8x256xf32>
    %1242 = arith.addf %1217, %1241 : vector<8x256xf32>
    %c44_205 = arith.constant 44 : index
    %1243 = memref.load %arg2[%c44_205] : memref<162xf32, #tpu.memory_space<smem>>
    %1244 = vector.broadcast %1243 : f32 to vector<8x256xf32>
    %1245 = arith.mulf %1244, %1234 : vector<8x256xf32>
    %1246 = arith.addf %1221, %1245 : vector<8x256xf32>
    %c45_206 = arith.constant 45 : index
    %1247 = memref.load %arg2[%c45_206] : memref<162xf32, #tpu.memory_space<smem>>
    %1248 = vector.broadcast %1247 : f32 to vector<8x256xf32>
    %1249 = arith.mulf %1248, %1234 : vector<8x256xf32>
    %1250 = arith.addf %1225, %1249 : vector<8x256xf32>
    %c46_207 = arith.constant 46 : index
    %1251 = memref.load %arg2[%c46_207] : memref<162xf32, #tpu.memory_space<smem>>
    %1252 = vector.broadcast %1251 : f32 to vector<8x256xf32>
    %1253 = arith.mulf %1252, %1234 : vector<8x256xf32>
    %1254 = arith.addf %1229, %1253 : vector<8x256xf32>
    %c47_208 = arith.constant 47 : index
    %1255 = memref.load %arg2[%c47_208] : memref<162xf32, #tpu.memory_space<smem>>
    %1256 = vector.broadcast %1255 : f32 to vector<8x256xf32>
    %1257 = arith.mulf %1256, %1234 : vector<8x256xf32>
    %1258 = arith.addf %1233, %1257 : vector<8x256xf32>
    %c240_i32_209 = arith.constant 240 : i32
    %1259 = tpu.dynamic_rotate %1184 by %c240_i32_209 dim 1 : vector<8x256xf32>, i32 -> vector<8x256xf32>
    %c60_210 = arith.constant 60 : index
    %1260 = memref.load %arg2[%c60_210] : memref<162xf32, #tpu.memory_space<smem>>
    %1261 = vector.broadcast %1260 : f32 to vector<8x256xf32>
    %1262 = arith.mulf %1261, %1259 : vector<8x256xf32>
    %1263 = arith.addf %1238, %1262 : vector<8x256xf32>
    %c61_211 = arith.constant 61 : index
    %1264 = memref.load %arg2[%c61_211] : memref<162xf32, #tpu.memory_space<smem>>
    %1265 = vector.broadcast %1264 : f32 to vector<8x256xf32>
    %1266 = arith.mulf %1265, %1259 : vector<8x256xf32>
    %1267 = arith.addf %1242, %1266 : vector<8x256xf32>
    %c62_212 = arith.constant 62 : index
    %1268 = memref.load %arg2[%c62_212] : memref<162xf32, #tpu.memory_space<smem>>
    %1269 = vector.broadcast %1268 : f32 to vector<8x256xf32>
    %1270 = arith.mulf %1269, %1259 : vector<8x256xf32>
    %1271 = arith.addf %1246, %1270 : vector<8x256xf32>
    %c63_213 = arith.constant 63 : index
    %1272 = memref.load %arg2[%c63_213] : memref<162xf32, #tpu.memory_space<smem>>
    %1273 = vector.broadcast %1272 : f32 to vector<8x256xf32>
    %1274 = arith.mulf %1273, %1259 : vector<8x256xf32>
    %1275 = arith.addf %1250, %1274 : vector<8x256xf32>
    %c64_214 = arith.constant 64 : index
    %1276 = memref.load %arg2[%c64_214] : memref<162xf32, #tpu.memory_space<smem>>
    %1277 = vector.broadcast %1276 : f32 to vector<8x256xf32>
    %1278 = arith.mulf %1277, %1259 : vector<8x256xf32>
    %1279 = arith.addf %1254, %1278 : vector<8x256xf32>
    %c65_215 = arith.constant 65 : index
    %1280 = memref.load %arg2[%c65_215] : memref<162xf32, #tpu.memory_space<smem>>
    %1281 = vector.broadcast %1280 : f32 to vector<8x256xf32>
    %1282 = arith.mulf %1281, %1259 : vector<8x256xf32>
    %1283 = arith.addf %1258, %1282 : vector<8x256xf32>
    %c239_i32_216 = arith.constant 239 : i32
    %1284 = tpu.dynamic_rotate %1184 by %c239_i32_216 dim 1 : vector<8x256xf32>, i32 -> vector<8x256xf32>
    %c78_217 = arith.constant 78 : index
    %1285 = memref.load %arg2[%c78_217] : memref<162xf32, #tpu.memory_space<smem>>
    %1286 = vector.broadcast %1285 : f32 to vector<8x256xf32>
    %1287 = arith.mulf %1286, %1284 : vector<8x256xf32>
    %1288 = arith.addf %1263, %1287 : vector<8x256xf32>
    %c79_218 = arith.constant 79 : index
    %1289 = memref.load %arg2[%c79_218] : memref<162xf32, #tpu.memory_space<smem>>
    %1290 = vector.broadcast %1289 : f32 to vector<8x256xf32>
    %1291 = arith.mulf %1290, %1284 : vector<8x256xf32>
    %1292 = arith.addf %1267, %1291 : vector<8x256xf32>
    %c80_219 = arith.constant 80 : index
    %1293 = memref.load %arg2[%c80_219] : memref<162xf32, #tpu.memory_space<smem>>
    %1294 = vector.broadcast %1293 : f32 to vector<8x256xf32>
    %1295 = arith.mulf %1294, %1284 : vector<8x256xf32>
    %1296 = arith.addf %1271, %1295 : vector<8x256xf32>
    %c81_220 = arith.constant 81 : index
    %1297 = memref.load %arg2[%c81_220] : memref<162xf32, #tpu.memory_space<smem>>
    %1298 = vector.broadcast %1297 : f32 to vector<8x256xf32>
    %1299 = arith.mulf %1298, %1284 : vector<8x256xf32>
    %1300 = arith.addf %1275, %1299 : vector<8x256xf32>
    %c82_221 = arith.constant 82 : index
    %1301 = memref.load %arg2[%c82_221] : memref<162xf32, #tpu.memory_space<smem>>
    %1302 = vector.broadcast %1301 : f32 to vector<8x256xf32>
    %1303 = arith.mulf %1302, %1284 : vector<8x256xf32>
    %1304 = arith.addf %1279, %1303 : vector<8x256xf32>
    %c83_222 = arith.constant 83 : index
    %1305 = memref.load %arg2[%c83_222] : memref<162xf32, #tpu.memory_space<smem>>
    %1306 = vector.broadcast %1305 : f32 to vector<8x256xf32>
    %1307 = arith.mulf %1306, %1284 : vector<8x256xf32>
    %1308 = arith.addf %1283, %1307 : vector<8x256xf32>
    %c238_i32_223 = arith.constant 238 : i32
    %1309 = tpu.dynamic_rotate %1184 by %c238_i32_223 dim 1 : vector<8x256xf32>, i32 -> vector<8x256xf32>
    %c96_224 = arith.constant 96 : index
    %1310 = memref.load %arg2[%c96_224] : memref<162xf32, #tpu.memory_space<smem>>
    %1311 = vector.broadcast %1310 : f32 to vector<8x256xf32>
    %1312 = arith.mulf %1311, %1309 : vector<8x256xf32>
    %1313 = arith.addf %1288, %1312 : vector<8x256xf32>
    %c97_225 = arith.constant 97 : index
    %1314 = memref.load %arg2[%c97_225] : memref<162xf32, #tpu.memory_space<smem>>
    %1315 = vector.broadcast %1314 : f32 to vector<8x256xf32>
    %1316 = arith.mulf %1315, %1309 : vector<8x256xf32>
    %1317 = arith.addf %1292, %1316 : vector<8x256xf32>
    %c98_226 = arith.constant 98 : index
    %1318 = memref.load %arg2[%c98_226] : memref<162xf32, #tpu.memory_space<smem>>
    %1319 = vector.broadcast %1318 : f32 to vector<8x256xf32>
    %1320 = arith.mulf %1319, %1309 : vector<8x256xf32>
    %1321 = arith.addf %1296, %1320 : vector<8x256xf32>
    %c99_227 = arith.constant 99 : index
    %1322 = memref.load %arg2[%c99_227] : memref<162xf32, #tpu.memory_space<smem>>
    %1323 = vector.broadcast %1322 : f32 to vector<8x256xf32>
    %1324 = arith.mulf %1323, %1309 : vector<8x256xf32>
    %1325 = arith.addf %1300, %1324 : vector<8x256xf32>
    %c100_228 = arith.constant 100 : index
    %1326 = memref.load %arg2[%c100_228] : memref<162xf32, #tpu.memory_space<smem>>
    %1327 = vector.broadcast %1326 : f32 to vector<8x256xf32>
    %1328 = arith.mulf %1327, %1309 : vector<8x256xf32>
    %1329 = arith.addf %1304, %1328 : vector<8x256xf32>
    %c101_229 = arith.constant 101 : index
    %1330 = memref.load %arg2[%c101_229] : memref<162xf32, #tpu.memory_space<smem>>
    %1331 = vector.broadcast %1330 : f32 to vector<8x256xf32>
    %1332 = arith.mulf %1331, %1309 : vector<8x256xf32>
    %1333 = arith.addf %1308, %1332 : vector<8x256xf32>
    %c224_i32_230 = arith.constant 224 : i32
    %1334 = tpu.dynamic_rotate %1184 by %c224_i32_230 dim 1 : vector<8x256xf32>, i32 -> vector<8x256xf32>
    %c114_231 = arith.constant 114 : index
    %1335 = memref.load %arg2[%c114_231] : memref<162xf32, #tpu.memory_space<smem>>
    %1336 = vector.broadcast %1335 : f32 to vector<8x256xf32>
    %1337 = arith.mulf %1336, %1334 : vector<8x256xf32>
    %1338 = arith.addf %1313, %1337 : vector<8x256xf32>
    %c115_232 = arith.constant 115 : index
    %1339 = memref.load %arg2[%c115_232] : memref<162xf32, #tpu.memory_space<smem>>
    %1340 = vector.broadcast %1339 : f32 to vector<8x256xf32>
    %1341 = arith.mulf %1340, %1334 : vector<8x256xf32>
    %1342 = arith.addf %1317, %1341 : vector<8x256xf32>
    %c116_233 = arith.constant 116 : index
    %1343 = memref.load %arg2[%c116_233] : memref<162xf32, #tpu.memory_space<smem>>
    %1344 = vector.broadcast %1343 : f32 to vector<8x256xf32>
    %1345 = arith.mulf %1344, %1334 : vector<8x256xf32>
    %1346 = arith.addf %1321, %1345 : vector<8x256xf32>
    %c117_234 = arith.constant 117 : index
    %1347 = memref.load %arg2[%c117_234] : memref<162xf32, #tpu.memory_space<smem>>
    %1348 = vector.broadcast %1347 : f32 to vector<8x256xf32>
    %1349 = arith.mulf %1348, %1334 : vector<8x256xf32>
    %1350 = arith.addf %1325, %1349 : vector<8x256xf32>
    %c118_235 = arith.constant 118 : index
    %1351 = memref.load %arg2[%c118_235] : memref<162xf32, #tpu.memory_space<smem>>
    %1352 = vector.broadcast %1351 : f32 to vector<8x256xf32>
    %1353 = arith.mulf %1352, %1334 : vector<8x256xf32>
    %1354 = arith.addf %1329, %1353 : vector<8x256xf32>
    %c119_236 = arith.constant 119 : index
    %1355 = memref.load %arg2[%c119_236] : memref<162xf32, #tpu.memory_space<smem>>
    %1356 = vector.broadcast %1355 : f32 to vector<8x256xf32>
    %1357 = arith.mulf %1356, %1334 : vector<8x256xf32>
    %1358 = arith.addf %1333, %1357 : vector<8x256xf32>
    %c223_i32_237 = arith.constant 223 : i32
    %1359 = tpu.dynamic_rotate %1184 by %c223_i32_237 dim 1 : vector<8x256xf32>, i32 -> vector<8x256xf32>
    %c132_238 = arith.constant 132 : index
    %1360 = memref.load %arg2[%c132_238] : memref<162xf32, #tpu.memory_space<smem>>
    %1361 = vector.broadcast %1360 : f32 to vector<8x256xf32>
    %1362 = arith.mulf %1361, %1359 : vector<8x256xf32>
    %1363 = arith.addf %1338, %1362 : vector<8x256xf32>
    %c133_239 = arith.constant 133 : index
    %1364 = memref.load %arg2[%c133_239] : memref<162xf32, #tpu.memory_space<smem>>
    %1365 = vector.broadcast %1364 : f32 to vector<8x256xf32>
    %1366 = arith.mulf %1365, %1359 : vector<8x256xf32>
    %1367 = arith.addf %1342, %1366 : vector<8x256xf32>
    %c134_240 = arith.constant 134 : index
    %1368 = memref.load %arg2[%c134_240] : memref<162xf32, #tpu.memory_space<smem>>
    %1369 = vector.broadcast %1368 : f32 to vector<8x256xf32>
    %1370 = arith.mulf %1369, %1359 : vector<8x256xf32>
    %1371 = arith.addf %1346, %1370 : vector<8x256xf32>
    %c135_241 = arith.constant 135 : index
    %1372 = memref.load %arg2[%c135_241] : memref<162xf32, #tpu.memory_space<smem>>
    %1373 = vector.broadcast %1372 : f32 to vector<8x256xf32>
    %1374 = arith.mulf %1373, %1359 : vector<8x256xf32>
    %1375 = arith.addf %1350, %1374 : vector<8x256xf32>
    %c136_242 = arith.constant 136 : index
    %1376 = memref.load %arg2[%c136_242] : memref<162xf32, #tpu.memory_space<smem>>
    %1377 = vector.broadcast %1376 : f32 to vector<8x256xf32>
    %1378 = arith.mulf %1377, %1359 : vector<8x256xf32>
    %1379 = arith.addf %1354, %1378 : vector<8x256xf32>
    %c137_243 = arith.constant 137 : index
    %1380 = memref.load %arg2[%c137_243] : memref<162xf32, #tpu.memory_space<smem>>
    %1381 = vector.broadcast %1380 : f32 to vector<8x256xf32>
    %1382 = arith.mulf %1381, %1359 : vector<8x256xf32>
    %1383 = arith.addf %1358, %1382 : vector<8x256xf32>
    %c222_i32_244 = arith.constant 222 : i32
    %1384 = tpu.dynamic_rotate %1184 by %c222_i32_244 dim 1 : vector<8x256xf32>, i32 -> vector<8x256xf32>
    %c150_245 = arith.constant 150 : index
    %1385 = memref.load %arg2[%c150_245] : memref<162xf32, #tpu.memory_space<smem>>
    %1386 = vector.broadcast %1385 : f32 to vector<8x256xf32>
    %1387 = arith.mulf %1386, %1384 : vector<8x256xf32>
    %1388 = arith.addf %1363, %1387 : vector<8x256xf32>
    %c151_246 = arith.constant 151 : index
    %1389 = memref.load %arg2[%c151_246] : memref<162xf32, #tpu.memory_space<smem>>
    %1390 = vector.broadcast %1389 : f32 to vector<8x256xf32>
    %1391 = arith.mulf %1390, %1384 : vector<8x256xf32>
    %1392 = arith.addf %1367, %1391 : vector<8x256xf32>
    %c152_247 = arith.constant 152 : index
    %1393 = memref.load %arg2[%c152_247] : memref<162xf32, #tpu.memory_space<smem>>
    %1394 = vector.broadcast %1393 : f32 to vector<8x256xf32>
    %1395 = arith.mulf %1394, %1384 : vector<8x256xf32>
    %1396 = arith.addf %1371, %1395 : vector<8x256xf32>
    %c153_248 = arith.constant 153 : index
    %1397 = memref.load %arg2[%c153_248] : memref<162xf32, #tpu.memory_space<smem>>
    %1398 = vector.broadcast %1397 : f32 to vector<8x256xf32>
    %1399 = arith.mulf %1398, %1384 : vector<8x256xf32>
    %1400 = arith.addf %1375, %1399 : vector<8x256xf32>
    %c154_249 = arith.constant 154 : index
    %1401 = memref.load %arg2[%c154_249] : memref<162xf32, #tpu.memory_space<smem>>
    %1402 = vector.broadcast %1401 : f32 to vector<8x256xf32>
    %1403 = arith.mulf %1402, %1384 : vector<8x256xf32>
    %1404 = arith.addf %1379, %1403 : vector<8x256xf32>
    %c155_250 = arith.constant 155 : index
    %1405 = memref.load %arg2[%c155_250] : memref<162xf32, #tpu.memory_space<smem>>
    %1406 = vector.broadcast %1405 : f32 to vector<8x256xf32>
    %1407 = arith.mulf %1406, %1384 : vector<8x256xf32>
    %1408 = arith.addf %1383, %1407 : vector<8x256xf32>
    %c1_251 = arith.constant 1 : index
    %c16_252 = arith.constant 16 : index
    %c0_253 = arith.constant 0 : index
    %1409 = vector.load %arg1[%c1_251, %c16_252, %c0_253] : memref<2x24x256xf32, #tpu.memory_space<vmem>>, vector<1x8x256xf32>
    %1410 = vector.shape_cast %1409 : vector<1x8x256xf32> to vector<8x256xf32>
    %c12_254 = arith.constant 12 : index
    %1411 = memref.load %arg2[%c12_254] : memref<162xf32, #tpu.memory_space<smem>>
    %1412 = vector.broadcast %1411 : f32 to vector<8x256xf32>
    %1413 = arith.mulf %1412, %1410 : vector<8x256xf32>
    %1414 = arith.addf %1388, %1413 : vector<8x256xf32>
    %c13_255 = arith.constant 13 : index
    %1415 = memref.load %arg2[%c13_255] : memref<162xf32, #tpu.memory_space<smem>>
    %1416 = vector.broadcast %1415 : f32 to vector<8x256xf32>
    %1417 = arith.mulf %1416, %1410 : vector<8x256xf32>
    %1418 = arith.addf %1392, %1417 : vector<8x256xf32>
    %c14_256 = arith.constant 14 : index
    %1419 = memref.load %arg2[%c14_256] : memref<162xf32, #tpu.memory_space<smem>>
    %1420 = vector.broadcast %1419 : f32 to vector<8x256xf32>
    %1421 = arith.mulf %1420, %1410 : vector<8x256xf32>
    %1422 = arith.addf %1396, %1421 : vector<8x256xf32>
    %c15_257 = arith.constant 15 : index
    %1423 = memref.load %arg2[%c15_257] : memref<162xf32, #tpu.memory_space<smem>>
    %1424 = vector.broadcast %1423 : f32 to vector<8x256xf32>
    %1425 = arith.mulf %1424, %1410 : vector<8x256xf32>
    %1426 = arith.addf %1400, %1425 : vector<8x256xf32>
    %c16_258 = arith.constant 16 : index
    %1427 = memref.load %arg2[%c16_258] : memref<162xf32, #tpu.memory_space<smem>>
    %1428 = vector.broadcast %1427 : f32 to vector<8x256xf32>
    %1429 = arith.mulf %1428, %1410 : vector<8x256xf32>
    %1430 = arith.addf %1404, %1429 : vector<8x256xf32>
    %c17_259 = arith.constant 17 : index
    %1431 = memref.load %arg2[%c17_259] : memref<162xf32, #tpu.memory_space<smem>>
    %1432 = vector.broadcast %1431 : f32 to vector<8x256xf32>
    %1433 = arith.mulf %1432, %1410 : vector<8x256xf32>
    %1434 = arith.addf %1408, %1433 : vector<8x256xf32>
    %c255_i32_260 = arith.constant 255 : i32
    %1435 = tpu.dynamic_rotate %1410 by %c255_i32_260 dim 1 : vector<8x256xf32>, i32 -> vector<8x256xf32>
    %c30_261 = arith.constant 30 : index
    %1436 = memref.load %arg2[%c30_261] : memref<162xf32, #tpu.memory_space<smem>>
    %1437 = vector.broadcast %1436 : f32 to vector<8x256xf32>
    %1438 = arith.mulf %1437, %1435 : vector<8x256xf32>
    %1439 = arith.addf %1414, %1438 : vector<8x256xf32>
    %c31_262 = arith.constant 31 : index
    %1440 = memref.load %arg2[%c31_262] : memref<162xf32, #tpu.memory_space<smem>>
    %1441 = vector.broadcast %1440 : f32 to vector<8x256xf32>
    %1442 = arith.mulf %1441, %1435 : vector<8x256xf32>
    %1443 = arith.addf %1418, %1442 : vector<8x256xf32>
    %c32_263 = arith.constant 32 : index
    %1444 = memref.load %arg2[%c32_263] : memref<162xf32, #tpu.memory_space<smem>>
    %1445 = vector.broadcast %1444 : f32 to vector<8x256xf32>
    %1446 = arith.mulf %1445, %1435 : vector<8x256xf32>
    %1447 = arith.addf %1422, %1446 : vector<8x256xf32>
    %c33_264 = arith.constant 33 : index
    %1448 = memref.load %arg2[%c33_264] : memref<162xf32, #tpu.memory_space<smem>>
    %1449 = vector.broadcast %1448 : f32 to vector<8x256xf32>
    %1450 = arith.mulf %1449, %1435 : vector<8x256xf32>
    %1451 = arith.addf %1426, %1450 : vector<8x256xf32>
    %c34_265 = arith.constant 34 : index
    %1452 = memref.load %arg2[%c34_265] : memref<162xf32, #tpu.memory_space<smem>>
    %1453 = vector.broadcast %1452 : f32 to vector<8x256xf32>
    %1454 = arith.mulf %1453, %1435 : vector<8x256xf32>
    %1455 = arith.addf %1430, %1454 : vector<8x256xf32>
    %c35_266 = arith.constant 35 : index
    %1456 = memref.load %arg2[%c35_266] : memref<162xf32, #tpu.memory_space<smem>>
    %1457 = vector.broadcast %1456 : f32 to vector<8x256xf32>
    %1458 = arith.mulf %1457, %1435 : vector<8x256xf32>
    %1459 = arith.addf %1434, %1458 : vector<8x256xf32>
    %c254_i32_267 = arith.constant 254 : i32
    %1460 = tpu.dynamic_rotate %1410 by %c254_i32_267 dim 1 : vector<8x256xf32>, i32 -> vector<8x256xf32>
    %c48_268 = arith.constant 48 : index
    %1461 = memref.load %arg2[%c48_268] : memref<162xf32, #tpu.memory_space<smem>>
    %1462 = vector.broadcast %1461 : f32 to vector<8x256xf32>
    %1463 = arith.mulf %1462, %1460 : vector<8x256xf32>
    %1464 = arith.addf %1439, %1463 : vector<8x256xf32>
    %c49_269 = arith.constant 49 : index
    %1465 = memref.load %arg2[%c49_269] : memref<162xf32, #tpu.memory_space<smem>>
    %1466 = vector.broadcast %1465 : f32 to vector<8x256xf32>
    %1467 = arith.mulf %1466, %1460 : vector<8x256xf32>
    %1468 = arith.addf %1443, %1467 : vector<8x256xf32>
    %c50_270 = arith.constant 50 : index
    %1469 = memref.load %arg2[%c50_270] : memref<162xf32, #tpu.memory_space<smem>>
    %1470 = vector.broadcast %1469 : f32 to vector<8x256xf32>
    %1471 = arith.mulf %1470, %1460 : vector<8x256xf32>
    %1472 = arith.addf %1447, %1471 : vector<8x256xf32>
    %c51_271 = arith.constant 51 : index
    %1473 = memref.load %arg2[%c51_271] : memref<162xf32, #tpu.memory_space<smem>>
    %1474 = vector.broadcast %1473 : f32 to vector<8x256xf32>
    %1475 = arith.mulf %1474, %1460 : vector<8x256xf32>
    %1476 = arith.addf %1451, %1475 : vector<8x256xf32>
    %c52_272 = arith.constant 52 : index
    %1477 = memref.load %arg2[%c52_272] : memref<162xf32, #tpu.memory_space<smem>>
    %1478 = vector.broadcast %1477 : f32 to vector<8x256xf32>
    %1479 = arith.mulf %1478, %1460 : vector<8x256xf32>
    %1480 = arith.addf %1455, %1479 : vector<8x256xf32>
    %c53_273 = arith.constant 53 : index
    %1481 = memref.load %arg2[%c53_273] : memref<162xf32, #tpu.memory_space<smem>>
    %1482 = vector.broadcast %1481 : f32 to vector<8x256xf32>
    %1483 = arith.mulf %1482, %1460 : vector<8x256xf32>
    %1484 = arith.addf %1459, %1483 : vector<8x256xf32>
    %c240_i32_274 = arith.constant 240 : i32
    %1485 = tpu.dynamic_rotate %1410 by %c240_i32_274 dim 1 : vector<8x256xf32>, i32 -> vector<8x256xf32>
    %c66_275 = arith.constant 66 : index
    %1486 = memref.load %arg2[%c66_275] : memref<162xf32, #tpu.memory_space<smem>>
    %1487 = vector.broadcast %1486 : f32 to vector<8x256xf32>
    %1488 = arith.mulf %1487, %1485 : vector<8x256xf32>
    %1489 = arith.addf %1464, %1488 : vector<8x256xf32>
    %c67_276 = arith.constant 67 : index
    %1490 = memref.load %arg2[%c67_276] : memref<162xf32, #tpu.memory_space<smem>>
    %1491 = vector.broadcast %1490 : f32 to vector<8x256xf32>
    %1492 = arith.mulf %1491, %1485 : vector<8x256xf32>
    %1493 = arith.addf %1468, %1492 : vector<8x256xf32>
    %c68_277 = arith.constant 68 : index
    %1494 = memref.load %arg2[%c68_277] : memref<162xf32, #tpu.memory_space<smem>>
    %1495 = vector.broadcast %1494 : f32 to vector<8x256xf32>
    %1496 = arith.mulf %1495, %1485 : vector<8x256xf32>
    %1497 = arith.addf %1472, %1496 : vector<8x256xf32>
    %c69_278 = arith.constant 69 : index
    %1498 = memref.load %arg2[%c69_278] : memref<162xf32, #tpu.memory_space<smem>>
    %1499 = vector.broadcast %1498 : f32 to vector<8x256xf32>
    %1500 = arith.mulf %1499, %1485 : vector<8x256xf32>
    %1501 = arith.addf %1476, %1500 : vector<8x256xf32>
    %c70_279 = arith.constant 70 : index
    %1502 = memref.load %arg2[%c70_279] : memref<162xf32, #tpu.memory_space<smem>>
    %1503 = vector.broadcast %1502 : f32 to vector<8x256xf32>
    %1504 = arith.mulf %1503, %1485 : vector<8x256xf32>
    %1505 = arith.addf %1480, %1504 : vector<8x256xf32>
    %c71_280 = arith.constant 71 : index
    %1506 = memref.load %arg2[%c71_280] : memref<162xf32, #tpu.memory_space<smem>>
    %1507 = vector.broadcast %1506 : f32 to vector<8x256xf32>
    %1508 = arith.mulf %1507, %1485 : vector<8x256xf32>
    %1509 = arith.addf %1484, %1508 : vector<8x256xf32>
    %c239_i32_281 = arith.constant 239 : i32
    %1510 = tpu.dynamic_rotate %1410 by %c239_i32_281 dim 1 : vector<8x256xf32>, i32 -> vector<8x256xf32>
    %c84_282 = arith.constant 84 : index
    %1511 = memref.load %arg2[%c84_282] : memref<162xf32, #tpu.memory_space<smem>>
    %1512 = vector.broadcast %1511 : f32 to vector<8x256xf32>
    %1513 = arith.mulf %1512, %1510 : vector<8x256xf32>
    %1514 = arith.addf %1489, %1513 : vector<8x256xf32>
    %c85_283 = arith.constant 85 : index
    %1515 = memref.load %arg2[%c85_283] : memref<162xf32, #tpu.memory_space<smem>>
    %1516 = vector.broadcast %1515 : f32 to vector<8x256xf32>
    %1517 = arith.mulf %1516, %1510 : vector<8x256xf32>
    %1518 = arith.addf %1493, %1517 : vector<8x256xf32>
    %c86_284 = arith.constant 86 : index
    %1519 = memref.load %arg2[%c86_284] : memref<162xf32, #tpu.memory_space<smem>>
    %1520 = vector.broadcast %1519 : f32 to vector<8x256xf32>
    %1521 = arith.mulf %1520, %1510 : vector<8x256xf32>
    %1522 = arith.addf %1497, %1521 : vector<8x256xf32>
    %c87_285 = arith.constant 87 : index
    %1523 = memref.load %arg2[%c87_285] : memref<162xf32, #tpu.memory_space<smem>>
    %1524 = vector.broadcast %1523 : f32 to vector<8x256xf32>
    %1525 = arith.mulf %1524, %1510 : vector<8x256xf32>
    %1526 = arith.addf %1501, %1525 : vector<8x256xf32>
    %c88_286 = arith.constant 88 : index
    %1527 = memref.load %arg2[%c88_286] : memref<162xf32, #tpu.memory_space<smem>>
    %1528 = vector.broadcast %1527 : f32 to vector<8x256xf32>
    %1529 = arith.mulf %1528, %1510 : vector<8x256xf32>
    %1530 = arith.addf %1505, %1529 : vector<8x256xf32>
    %c89_287 = arith.constant 89 : index
    %1531 = memref.load %arg2[%c89_287] : memref<162xf32, #tpu.memory_space<smem>>
    %1532 = vector.broadcast %1531 : f32 to vector<8x256xf32>
    %1533 = arith.mulf %1532, %1510 : vector<8x256xf32>
    %1534 = arith.addf %1509, %1533 : vector<8x256xf32>
    %c238_i32_288 = arith.constant 238 : i32
    %1535 = tpu.dynamic_rotate %1410 by %c238_i32_288 dim 1 : vector<8x256xf32>, i32 -> vector<8x256xf32>
    %c102_289 = arith.constant 102 : index
    %1536 = memref.load %arg2[%c102_289] : memref<162xf32, #tpu.memory_space<smem>>
    %1537 = vector.broadcast %1536 : f32 to vector<8x256xf32>
    %1538 = arith.mulf %1537, %1535 : vector<8x256xf32>
    %1539 = arith.addf %1514, %1538 : vector<8x256xf32>
    %c103_290 = arith.constant 103 : index
    %1540 = memref.load %arg2[%c103_290] : memref<162xf32, #tpu.memory_space<smem>>
    %1541 = vector.broadcast %1540 : f32 to vector<8x256xf32>
    %1542 = arith.mulf %1541, %1535 : vector<8x256xf32>
    %1543 = arith.addf %1518, %1542 : vector<8x256xf32>
    %c104_291 = arith.constant 104 : index
    %1544 = memref.load %arg2[%c104_291] : memref<162xf32, #tpu.memory_space<smem>>
    %1545 = vector.broadcast %1544 : f32 to vector<8x256xf32>
    %1546 = arith.mulf %1545, %1535 : vector<8x256xf32>
    %1547 = arith.addf %1522, %1546 : vector<8x256xf32>
    %c105_292 = arith.constant 105 : index
    %1548 = memref.load %arg2[%c105_292] : memref<162xf32, #tpu.memory_space<smem>>
    %1549 = vector.broadcast %1548 : f32 to vector<8x256xf32>
    %1550 = arith.mulf %1549, %1535 : vector<8x256xf32>
    %1551 = arith.addf %1526, %1550 : vector<8x256xf32>
    %c106_293 = arith.constant 106 : index
    %1552 = memref.load %arg2[%c106_293] : memref<162xf32, #tpu.memory_space<smem>>
    %1553 = vector.broadcast %1552 : f32 to vector<8x256xf32>
    %1554 = arith.mulf %1553, %1535 : vector<8x256xf32>
    %1555 = arith.addf %1530, %1554 : vector<8x256xf32>
    %c107_294 = arith.constant 107 : index
    %1556 = memref.load %arg2[%c107_294] : memref<162xf32, #tpu.memory_space<smem>>
    %1557 = vector.broadcast %1556 : f32 to vector<8x256xf32>
    %1558 = arith.mulf %1557, %1535 : vector<8x256xf32>
    %1559 = arith.addf %1534, %1558 : vector<8x256xf32>
    %c224_i32_295 = arith.constant 224 : i32
    %1560 = tpu.dynamic_rotate %1410 by %c224_i32_295 dim 1 : vector<8x256xf32>, i32 -> vector<8x256xf32>
    %c120_296 = arith.constant 120 : index
    %1561 = memref.load %arg2[%c120_296] : memref<162xf32, #tpu.memory_space<smem>>
    %1562 = vector.broadcast %1561 : f32 to vector<8x256xf32>
    %1563 = arith.mulf %1562, %1560 : vector<8x256xf32>
    %1564 = arith.addf %1539, %1563 : vector<8x256xf32>
    %c121_297 = arith.constant 121 : index
    %1565 = memref.load %arg2[%c121_297] : memref<162xf32, #tpu.memory_space<smem>>
    %1566 = vector.broadcast %1565 : f32 to vector<8x256xf32>
    %1567 = arith.mulf %1566, %1560 : vector<8x256xf32>
    %1568 = arith.addf %1543, %1567 : vector<8x256xf32>
    %c122_298 = arith.constant 122 : index
    %1569 = memref.load %arg2[%c122_298] : memref<162xf32, #tpu.memory_space<smem>>
    %1570 = vector.broadcast %1569 : f32 to vector<8x256xf32>
    %1571 = arith.mulf %1570, %1560 : vector<8x256xf32>
    %1572 = arith.addf %1547, %1571 : vector<8x256xf32>
    %c123_299 = arith.constant 123 : index
    %1573 = memref.load %arg2[%c123_299] : memref<162xf32, #tpu.memory_space<smem>>
    %1574 = vector.broadcast %1573 : f32 to vector<8x256xf32>
    %1575 = arith.mulf %1574, %1560 : vector<8x256xf32>
    %1576 = arith.addf %1551, %1575 : vector<8x256xf32>
    %c124_300 = arith.constant 124 : index
    %1577 = memref.load %arg2[%c124_300] : memref<162xf32, #tpu.memory_space<smem>>
    %1578 = vector.broadcast %1577 : f32 to vector<8x256xf32>
    %1579 = arith.mulf %1578, %1560 : vector<8x256xf32>
    %1580 = arith.addf %1555, %1579 : vector<8x256xf32>
    %c125_301 = arith.constant 125 : index
    %1581 = memref.load %arg2[%c125_301] : memref<162xf32, #tpu.memory_space<smem>>
    %1582 = vector.broadcast %1581 : f32 to vector<8x256xf32>
    %1583 = arith.mulf %1582, %1560 : vector<8x256xf32>
    %1584 = arith.addf %1559, %1583 : vector<8x256xf32>
    %c223_i32_302 = arith.constant 223 : i32
    %1585 = tpu.dynamic_rotate %1410 by %c223_i32_302 dim 1 : vector<8x256xf32>, i32 -> vector<8x256xf32>
    %c138_303 = arith.constant 138 : index
    %1586 = memref.load %arg2[%c138_303] : memref<162xf32, #tpu.memory_space<smem>>
    %1587 = vector.broadcast %1586 : f32 to vector<8x256xf32>
    %1588 = arith.mulf %1587, %1585 : vector<8x256xf32>
    %1589 = arith.addf %1564, %1588 : vector<8x256xf32>
    %c139_304 = arith.constant 139 : index
    %1590 = memref.load %arg2[%c139_304] : memref<162xf32, #tpu.memory_space<smem>>
    %1591 = vector.broadcast %1590 : f32 to vector<8x256xf32>
    %1592 = arith.mulf %1591, %1585 : vector<8x256xf32>
    %1593 = arith.addf %1568, %1592 : vector<8x256xf32>
    %c140_305 = arith.constant 140 : index
    %1594 = memref.load %arg2[%c140_305] : memref<162xf32, #tpu.memory_space<smem>>
    %1595 = vector.broadcast %1594 : f32 to vector<8x256xf32>
    %1596 = arith.mulf %1595, %1585 : vector<8x256xf32>
    %1597 = arith.addf %1572, %1596 : vector<8x256xf32>
    %c141_306 = arith.constant 141 : index
    %1598 = memref.load %arg2[%c141_306] : memref<162xf32, #tpu.memory_space<smem>>
    %1599 = vector.broadcast %1598 : f32 to vector<8x256xf32>
    %1600 = arith.mulf %1599, %1585 : vector<8x256xf32>
    %1601 = arith.addf %1576, %1600 : vector<8x256xf32>
    %c142_307 = arith.constant 142 : index
    %1602 = memref.load %arg2[%c142_307] : memref<162xf32, #tpu.memory_space<smem>>
    %1603 = vector.broadcast %1602 : f32 to vector<8x256xf32>
    %1604 = arith.mulf %1603, %1585 : vector<8x256xf32>
    %1605 = arith.addf %1580, %1604 : vector<8x256xf32>
    %c143_308 = arith.constant 143 : index
    %1606 = memref.load %arg2[%c143_308] : memref<162xf32, #tpu.memory_space<smem>>
    %1607 = vector.broadcast %1606 : f32 to vector<8x256xf32>
    %1608 = arith.mulf %1607, %1585 : vector<8x256xf32>
    %1609 = arith.addf %1584, %1608 : vector<8x256xf32>
    %c222_i32_309 = arith.constant 222 : i32
    %1610 = tpu.dynamic_rotate %1410 by %c222_i32_309 dim 1 : vector<8x256xf32>, i32 -> vector<8x256xf32>
    %c156_310 = arith.constant 156 : index
    %1611 = memref.load %arg2[%c156_310] : memref<162xf32, #tpu.memory_space<smem>>
    %1612 = vector.broadcast %1611 : f32 to vector<8x256xf32>
    %1613 = arith.mulf %1612, %1610 : vector<8x256xf32>
    %1614 = arith.addf %1589, %1613 : vector<8x256xf32>
    %c157_311 = arith.constant 157 : index
    %1615 = memref.load %arg2[%c157_311] : memref<162xf32, #tpu.memory_space<smem>>
    %1616 = vector.broadcast %1615 : f32 to vector<8x256xf32>
    %1617 = arith.mulf %1616, %1610 : vector<8x256xf32>
    %1618 = arith.addf %1593, %1617 : vector<8x256xf32>
    %c158_312 = arith.constant 158 : index
    %1619 = memref.load %arg2[%c158_312] : memref<162xf32, #tpu.memory_space<smem>>
    %1620 = vector.broadcast %1619 : f32 to vector<8x256xf32>
    %1621 = arith.mulf %1620, %1610 : vector<8x256xf32>
    %1622 = arith.addf %1597, %1621 : vector<8x256xf32>
    %c159_313 = arith.constant 159 : index
    %1623 = memref.load %arg2[%c159_313] : memref<162xf32, #tpu.memory_space<smem>>
    %1624 = vector.broadcast %1623 : f32 to vector<8x256xf32>
    %1625 = arith.mulf %1624, %1610 : vector<8x256xf32>
    %1626 = arith.addf %1601, %1625 : vector<8x256xf32>
    %c160_314 = arith.constant 160 : index
    %1627 = memref.load %arg2[%c160_314] : memref<162xf32, #tpu.memory_space<smem>>
    %1628 = vector.broadcast %1627 : f32 to vector<8x256xf32>
    %1629 = arith.mulf %1628, %1610 : vector<8x256xf32>
    %1630 = arith.addf %1605, %1629 : vector<8x256xf32>
    %c161_315 = arith.constant 161 : index
    %1631 = memref.load %arg2[%c161_315] : memref<162xf32, #tpu.memory_space<smem>>
    %1632 = vector.broadcast %1631 : f32 to vector<8x256xf32>
    %1633 = arith.mulf %1632, %1610 : vector<8x256xf32>
    %1634 = arith.addf %1609, %1633 : vector<8x256xf32>
    %cst_316 = arith.constant 0.000000e+00 : f32
    %1635 = vector.broadcast %cst_316 : f32 to vector<8x256xf32>
    %1636 = arith.maximumf %1614, %1635 : vector<8x256xf32>
    %cst_317 = arith.constant 0.000000e+00 : f32
    %1637 = vector.broadcast %cst_317 : f32 to vector<8x256xf32>
    %1638 = arith.maximumf %1618, %1637 : vector<8x256xf32>
    %cst_318 = arith.constant 0.000000e+00 : f32
    %1639 = vector.broadcast %cst_318 : f32 to vector<8x256xf32>
    %1640 = arith.maximumf %1622, %1639 : vector<8x256xf32>
    %cst_319 = arith.constant 0.000000e+00 : f32
    %1641 = vector.broadcast %cst_319 : f32 to vector<8x256xf32>
    %1642 = arith.maximumf %1626, %1641 : vector<8x256xf32>
    %cst_320 = arith.constant 0.000000e+00 : f32
    %1643 = vector.broadcast %cst_320 : f32 to vector<8x256xf32>
    %1644 = arith.maximumf %1630, %1643 : vector<8x256xf32>
    %cst_321 = arith.constant 0.000000e+00 : f32
    %1645 = vector.broadcast %cst_321 : f32 to vector<8x256xf32>
    %1646 = arith.maximumf %1634, %1645 : vector<8x256xf32>
    %c0_322 = arith.constant 0 : index
    %1647 = memref.load %arg5[%c0_322] : memref<3xf32, #tpu.memory_space<smem>>
    %1648 = vector.broadcast %1647 : f32 to vector<8x256xf32>
    %c1_323 = arith.constant 1 : index
    %1649 = memref.load %arg5[%c1_323] : memref<3xf32, #tpu.memory_space<smem>>
    %1650 = vector.broadcast %1649 : f32 to vector<8x256xf32>
    %c2_324 = arith.constant 2 : index
    %1651 = memref.load %arg5[%c2_324] : memref<3xf32, #tpu.memory_space<smem>>
    %1652 = vector.broadcast %1651 : f32 to vector<8x256xf32>
    %c0_325 = arith.constant 0 : index
    %1653 = memref.load %arg4[%c0_325] : memref<54xf32, #tpu.memory_space<smem>>
    %1654 = vector.broadcast %1653 : f32 to vector<8x256xf32>
    %1655 = arith.mulf %1654, %1636 : vector<8x256xf32>
    %1656 = arith.addf %1648, %1655 : vector<8x256xf32>
    %c1_326 = arith.constant 1 : index
    %1657 = memref.load %arg4[%c1_326] : memref<54xf32, #tpu.memory_space<smem>>
    %1658 = vector.broadcast %1657 : f32 to vector<8x256xf32>
    %1659 = arith.mulf %1658, %1636 : vector<8x256xf32>
    %1660 = arith.addf %1650, %1659 : vector<8x256xf32>
    %c2_327 = arith.constant 2 : index
    %1661 = memref.load %arg4[%c2_327] : memref<54xf32, #tpu.memory_space<smem>>
    %1662 = vector.broadcast %1661 : f32 to vector<8x256xf32>
    %1663 = arith.mulf %1662, %1636 : vector<8x256xf32>
    %1664 = arith.addf %1652, %1663 : vector<8x256xf32>
    %c3_328 = arith.constant 3 : index
    %1665 = memref.load %arg4[%c3_328] : memref<54xf32, #tpu.memory_space<smem>>
    %1666 = vector.broadcast %1665 : f32 to vector<8x256xf32>
    %1667 = arith.mulf %1666, %1638 : vector<8x256xf32>
    %1668 = arith.addf %1656, %1667 : vector<8x256xf32>
    %c4_329 = arith.constant 4 : index
    %1669 = memref.load %arg4[%c4_329] : memref<54xf32, #tpu.memory_space<smem>>
    %1670 = vector.broadcast %1669 : f32 to vector<8x256xf32>
    %1671 = arith.mulf %1670, %1638 : vector<8x256xf32>
    %1672 = arith.addf %1660, %1671 : vector<8x256xf32>
    %c5_330 = arith.constant 5 : index
    %1673 = memref.load %arg4[%c5_330] : memref<54xf32, #tpu.memory_space<smem>>
    %1674 = vector.broadcast %1673 : f32 to vector<8x256xf32>
    %1675 = arith.mulf %1674, %1638 : vector<8x256xf32>
    %1676 = arith.addf %1664, %1675 : vector<8x256xf32>
    %c6_331 = arith.constant 6 : index
    %1677 = memref.load %arg4[%c6_331] : memref<54xf32, #tpu.memory_space<smem>>
    %1678 = vector.broadcast %1677 : f32 to vector<8x256xf32>
    %1679 = arith.mulf %1678, %1640 : vector<8x256xf32>
    %1680 = arith.addf %1668, %1679 : vector<8x256xf32>
    %c7_332 = arith.constant 7 : index
    %1681 = memref.load %arg4[%c7_332] : memref<54xf32, #tpu.memory_space<smem>>
    %1682 = vector.broadcast %1681 : f32 to vector<8x256xf32>
    %1683 = arith.mulf %1682, %1640 : vector<8x256xf32>
    %1684 = arith.addf %1672, %1683 : vector<8x256xf32>
    %c8_333 = arith.constant 8 : index
    %1685 = memref.load %arg4[%c8_333] : memref<54xf32, #tpu.memory_space<smem>>
    %1686 = vector.broadcast %1685 : f32 to vector<8x256xf32>
    %1687 = arith.mulf %1686, %1640 : vector<8x256xf32>
    %1688 = arith.addf %1676, %1687 : vector<8x256xf32>
    %c9_334 = arith.constant 9 : index
    %1689 = memref.load %arg4[%c9_334] : memref<54xf32, #tpu.memory_space<smem>>
    %1690 = vector.broadcast %1689 : f32 to vector<8x256xf32>
    %1691 = arith.mulf %1690, %1642 : vector<8x256xf32>
    %1692 = arith.addf %1680, %1691 : vector<8x256xf32>
    %c10_335 = arith.constant 10 : index
    %1693 = memref.load %arg4[%c10_335] : memref<54xf32, #tpu.memory_space<smem>>
    %1694 = vector.broadcast %1693 : f32 to vector<8x256xf32>
    %1695 = arith.mulf %1694, %1642 : vector<8x256xf32>
    %1696 = arith.addf %1684, %1695 : vector<8x256xf32>
    %c11_336 = arith.constant 11 : index
    %1697 = memref.load %arg4[%c11_336] : memref<54xf32, #tpu.memory_space<smem>>
    %1698 = vector.broadcast %1697 : f32 to vector<8x256xf32>
    %1699 = arith.mulf %1698, %1642 : vector<8x256xf32>
    %1700 = arith.addf %1688, %1699 : vector<8x256xf32>
    %c12_337 = arith.constant 12 : index
    %1701 = memref.load %arg4[%c12_337] : memref<54xf32, #tpu.memory_space<smem>>
    %1702 = vector.broadcast %1701 : f32 to vector<8x256xf32>
    %1703 = arith.mulf %1702, %1644 : vector<8x256xf32>
    %1704 = arith.addf %1692, %1703 : vector<8x256xf32>
    %c13_338 = arith.constant 13 : index
    %1705 = memref.load %arg4[%c13_338] : memref<54xf32, #tpu.memory_space<smem>>
    %1706 = vector.broadcast %1705 : f32 to vector<8x256xf32>
    %1707 = arith.mulf %1706, %1644 : vector<8x256xf32>
    %1708 = arith.addf %1696, %1707 : vector<8x256xf32>
    %c14_339 = arith.constant 14 : index
    %1709 = memref.load %arg4[%c14_339] : memref<54xf32, #tpu.memory_space<smem>>
    %1710 = vector.broadcast %1709 : f32 to vector<8x256xf32>
    %1711 = arith.mulf %1710, %1644 : vector<8x256xf32>
    %1712 = arith.addf %1700, %1711 : vector<8x256xf32>
    %c15_340 = arith.constant 15 : index
    %1713 = memref.load %arg4[%c15_340] : memref<54xf32, #tpu.memory_space<smem>>
    %1714 = vector.broadcast %1713 : f32 to vector<8x256xf32>
    %1715 = arith.mulf %1714, %1646 : vector<8x256xf32>
    %1716 = arith.addf %1704, %1715 : vector<8x256xf32>
    %c16_341 = arith.constant 16 : index
    %1717 = memref.load %arg4[%c16_341] : memref<54xf32, #tpu.memory_space<smem>>
    %1718 = vector.broadcast %1717 : f32 to vector<8x256xf32>
    %1719 = arith.mulf %1718, %1646 : vector<8x256xf32>
    %1720 = arith.addf %1708, %1719 : vector<8x256xf32>
    %c17_342 = arith.constant 17 : index
    %1721 = memref.load %arg4[%c17_342] : memref<54xf32, #tpu.memory_space<smem>>
    %1722 = vector.broadcast %1721 : f32 to vector<8x256xf32>
    %1723 = arith.mulf %1722, %1646 : vector<8x256xf32>
    %1724 = arith.addf %1712, %1723 : vector<8x256xf32>
    %c7_i32_343 = arith.constant 7 : i32
    %1725 = tpu.dynamic_rotate %1636 by %c7_i32_343 dim 0 : vector<8x256xf32>, i32 -> vector<8x256xf32>
    %c18_344 = arith.constant 18 : index
    %1726 = memref.load %arg4[%c18_344] : memref<54xf32, #tpu.memory_space<smem>>
    %1727 = vector.broadcast %1726 : f32 to vector<8x256xf32>
    %1728 = arith.mulf %1727, %1725 : vector<8x256xf32>
    %1729 = arith.addf %1716, %1728 : vector<8x256xf32>
    %c19_345 = arith.constant 19 : index
    %1730 = memref.load %arg4[%c19_345] : memref<54xf32, #tpu.memory_space<smem>>
    %1731 = vector.broadcast %1730 : f32 to vector<8x256xf32>
    %1732 = arith.mulf %1731, %1725 : vector<8x256xf32>
    %1733 = arith.addf %1720, %1732 : vector<8x256xf32>
    %c20_346 = arith.constant 20 : index
    %1734 = memref.load %arg4[%c20_346] : memref<54xf32, #tpu.memory_space<smem>>
    %1735 = vector.broadcast %1734 : f32 to vector<8x256xf32>
    %1736 = arith.mulf %1735, %1725 : vector<8x256xf32>
    %1737 = arith.addf %1724, %1736 : vector<8x256xf32>
    %c7_i32_347 = arith.constant 7 : i32
    %1738 = tpu.dynamic_rotate %1638 by %c7_i32_347 dim 0 : vector<8x256xf32>, i32 -> vector<8x256xf32>
    %c21_348 = arith.constant 21 : index
    %1739 = memref.load %arg4[%c21_348] : memref<54xf32, #tpu.memory_space<smem>>
    %1740 = vector.broadcast %1739 : f32 to vector<8x256xf32>
    %1741 = arith.mulf %1740, %1738 : vector<8x256xf32>
    %1742 = arith.addf %1729, %1741 : vector<8x256xf32>
    %c22_349 = arith.constant 22 : index
    %1743 = memref.load %arg4[%c22_349] : memref<54xf32, #tpu.memory_space<smem>>
    %1744 = vector.broadcast %1743 : f32 to vector<8x256xf32>
    %1745 = arith.mulf %1744, %1738 : vector<8x256xf32>
    %1746 = arith.addf %1733, %1745 : vector<8x256xf32>
    %c23_350 = arith.constant 23 : index
    %1747 = memref.load %arg4[%c23_350] : memref<54xf32, #tpu.memory_space<smem>>
    %1748 = vector.broadcast %1747 : f32 to vector<8x256xf32>
    %1749 = arith.mulf %1748, %1738 : vector<8x256xf32>
    %1750 = arith.addf %1737, %1749 : vector<8x256xf32>
    %c7_i32_351 = arith.constant 7 : i32
    %1751 = tpu.dynamic_rotate %1640 by %c7_i32_351 dim 0 : vector<8x256xf32>, i32 -> vector<8x256xf32>
    %c24_352 = arith.constant 24 : index
    %1752 = memref.load %arg4[%c24_352] : memref<54xf32, #tpu.memory_space<smem>>
    %1753 = vector.broadcast %1752 : f32 to vector<8x256xf32>
    %1754 = arith.mulf %1753, %1751 : vector<8x256xf32>
    %1755 = arith.addf %1742, %1754 : vector<8x256xf32>
    %c25_353 = arith.constant 25 : index
    %1756 = memref.load %arg4[%c25_353] : memref<54xf32, #tpu.memory_space<smem>>
    %1757 = vector.broadcast %1756 : f32 to vector<8x256xf32>
    %1758 = arith.mulf %1757, %1751 : vector<8x256xf32>
    %1759 = arith.addf %1746, %1758 : vector<8x256xf32>
    %c26_354 = arith.constant 26 : index
    %1760 = memref.load %arg4[%c26_354] : memref<54xf32, #tpu.memory_space<smem>>
    %1761 = vector.broadcast %1760 : f32 to vector<8x256xf32>
    %1762 = arith.mulf %1761, %1751 : vector<8x256xf32>
    %1763 = arith.addf %1750, %1762 : vector<8x256xf32>
    %c7_i32_355 = arith.constant 7 : i32
    %1764 = tpu.dynamic_rotate %1642 by %c7_i32_355 dim 0 : vector<8x256xf32>, i32 -> vector<8x256xf32>
    %c27_356 = arith.constant 27 : index
    %1765 = memref.load %arg4[%c27_356] : memref<54xf32, #tpu.memory_space<smem>>
    %1766 = vector.broadcast %1765 : f32 to vector<8x256xf32>
    %1767 = arith.mulf %1766, %1764 : vector<8x256xf32>
    %1768 = arith.addf %1755, %1767 : vector<8x256xf32>
    %c28_357 = arith.constant 28 : index
    %1769 = memref.load %arg4[%c28_357] : memref<54xf32, #tpu.memory_space<smem>>
    %1770 = vector.broadcast %1769 : f32 to vector<8x256xf32>
    %1771 = arith.mulf %1770, %1764 : vector<8x256xf32>
    %1772 = arith.addf %1759, %1771 : vector<8x256xf32>
    %c29_358 = arith.constant 29 : index
    %1773 = memref.load %arg4[%c29_358] : memref<54xf32, #tpu.memory_space<smem>>
    %1774 = vector.broadcast %1773 : f32 to vector<8x256xf32>
    %1775 = arith.mulf %1774, %1764 : vector<8x256xf32>
    %1776 = arith.addf %1763, %1775 : vector<8x256xf32>
    %c7_i32_359 = arith.constant 7 : i32
    %1777 = tpu.dynamic_rotate %1644 by %c7_i32_359 dim 0 : vector<8x256xf32>, i32 -> vector<8x256xf32>
    %c30_360 = arith.constant 30 : index
    %1778 = memref.load %arg4[%c30_360] : memref<54xf32, #tpu.memory_space<smem>>
    %1779 = vector.broadcast %1778 : f32 to vector<8x256xf32>
    %1780 = arith.mulf %1779, %1777 : vector<8x256xf32>
    %1781 = arith.addf %1768, %1780 : vector<8x256xf32>
    %c31_361 = arith.constant 31 : index
    %1782 = memref.load %arg4[%c31_361] : memref<54xf32, #tpu.memory_space<smem>>
    %1783 = vector.broadcast %1782 : f32 to vector<8x256xf32>
    %1784 = arith.mulf %1783, %1777 : vector<8x256xf32>
    %1785 = arith.addf %1772, %1784 : vector<8x256xf32>
    %c32_362 = arith.constant 32 : index
    %1786 = memref.load %arg4[%c32_362] : memref<54xf32, #tpu.memory_space<smem>>
    %1787 = vector.broadcast %1786 : f32 to vector<8x256xf32>
    %1788 = arith.mulf %1787, %1777 : vector<8x256xf32>
    %1789 = arith.addf %1776, %1788 : vector<8x256xf32>
    %c7_i32_363 = arith.constant 7 : i32
    %1790 = tpu.dynamic_rotate %1646 by %c7_i32_363 dim 0 : vector<8x256xf32>, i32 -> vector<8x256xf32>
    %c33_364 = arith.constant 33 : index
    %1791 = memref.load %arg4[%c33_364] : memref<54xf32, #tpu.memory_space<smem>>
    %1792 = vector.broadcast %1791 : f32 to vector<8x256xf32>
    %1793 = arith.mulf %1792, %1790 : vector<8x256xf32>
    %1794 = arith.addf %1781, %1793 : vector<8x256xf32>
    %c34_365 = arith.constant 34 : index
    %1795 = memref.load %arg4[%c34_365] : memref<54xf32, #tpu.memory_space<smem>>
    %1796 = vector.broadcast %1795 : f32 to vector<8x256xf32>
    %1797 = arith.mulf %1796, %1790 : vector<8x256xf32>
    %1798 = arith.addf %1785, %1797 : vector<8x256xf32>
    %c35_366 = arith.constant 35 : index
    %1799 = memref.load %arg4[%c35_366] : memref<54xf32, #tpu.memory_space<smem>>
    %1800 = vector.broadcast %1799 : f32 to vector<8x256xf32>
    %1801 = arith.mulf %1800, %1790 : vector<8x256xf32>
    %1802 = arith.addf %1789, %1801 : vector<8x256xf32>
    %c6_i32_367 = arith.constant 6 : i32
    %1803 = tpu.dynamic_rotate %1636 by %c6_i32_367 dim 0 : vector<8x256xf32>, i32 -> vector<8x256xf32>
    %c36_368 = arith.constant 36 : index
    %1804 = memref.load %arg4[%c36_368] : memref<54xf32, #tpu.memory_space<smem>>
    %1805 = vector.broadcast %1804 : f32 to vector<8x256xf32>
    %1806 = arith.mulf %1805, %1803 : vector<8x256xf32>
    %1807 = arith.addf %1794, %1806 : vector<8x256xf32>
    %c37_369 = arith.constant 37 : index
    %1808 = memref.load %arg4[%c37_369] : memref<54xf32, #tpu.memory_space<smem>>
    %1809 = vector.broadcast %1808 : f32 to vector<8x256xf32>
    %1810 = arith.mulf %1809, %1803 : vector<8x256xf32>
    %1811 = arith.addf %1798, %1810 : vector<8x256xf32>
    %c38_370 = arith.constant 38 : index
    %1812 = memref.load %arg4[%c38_370] : memref<54xf32, #tpu.memory_space<smem>>
    %1813 = vector.broadcast %1812 : f32 to vector<8x256xf32>
    %1814 = arith.mulf %1813, %1803 : vector<8x256xf32>
    %1815 = arith.addf %1802, %1814 : vector<8x256xf32>
    %c6_i32_371 = arith.constant 6 : i32
    %1816 = tpu.dynamic_rotate %1638 by %c6_i32_371 dim 0 : vector<8x256xf32>, i32 -> vector<8x256xf32>
    %c39_372 = arith.constant 39 : index
    %1817 = memref.load %arg4[%c39_372] : memref<54xf32, #tpu.memory_space<smem>>
    %1818 = vector.broadcast %1817 : f32 to vector<8x256xf32>
    %1819 = arith.mulf %1818, %1816 : vector<8x256xf32>
    %1820 = arith.addf %1807, %1819 : vector<8x256xf32>
    %c40_373 = arith.constant 40 : index
    %1821 = memref.load %arg4[%c40_373] : memref<54xf32, #tpu.memory_space<smem>>
    %1822 = vector.broadcast %1821 : f32 to vector<8x256xf32>
    %1823 = arith.mulf %1822, %1816 : vector<8x256xf32>
    %1824 = arith.addf %1811, %1823 : vector<8x256xf32>
    %c41_374 = arith.constant 41 : index
    %1825 = memref.load %arg4[%c41_374] : memref<54xf32, #tpu.memory_space<smem>>
    %1826 = vector.broadcast %1825 : f32 to vector<8x256xf32>
    %1827 = arith.mulf %1826, %1816 : vector<8x256xf32>
    %1828 = arith.addf %1815, %1827 : vector<8x256xf32>
    %c6_i32_375 = arith.constant 6 : i32
    %1829 = tpu.dynamic_rotate %1640 by %c6_i32_375 dim 0 : vector<8x256xf32>, i32 -> vector<8x256xf32>
    %c42_376 = arith.constant 42 : index
    %1830 = memref.load %arg4[%c42_376] : memref<54xf32, #tpu.memory_space<smem>>
    %1831 = vector.broadcast %1830 : f32 to vector<8x256xf32>
    %1832 = arith.mulf %1831, %1829 : vector<8x256xf32>
    %1833 = arith.addf %1820, %1832 : vector<8x256xf32>
    %c43_377 = arith.constant 43 : index
    %1834 = memref.load %arg4[%c43_377] : memref<54xf32, #tpu.memory_space<smem>>
    %1835 = vector.broadcast %1834 : f32 to vector<8x256xf32>
    %1836 = arith.mulf %1835, %1829 : vector<8x256xf32>
    %1837 = arith.addf %1824, %1836 : vector<8x256xf32>
    %c44_378 = arith.constant 44 : index
    %1838 = memref.load %arg4[%c44_378] : memref<54xf32, #tpu.memory_space<smem>>
    %1839 = vector.broadcast %1838 : f32 to vector<8x256xf32>
    %1840 = arith.mulf %1839, %1829 : vector<8x256xf32>
    %1841 = arith.addf %1828, %1840 : vector<8x256xf32>
    %c6_i32_379 = arith.constant 6 : i32
    %1842 = tpu.dynamic_rotate %1642 by %c6_i32_379 dim 0 : vector<8x256xf32>, i32 -> vector<8x256xf32>
    %c45_380 = arith.constant 45 : index
    %1843 = memref.load %arg4[%c45_380] : memref<54xf32, #tpu.memory_space<smem>>
    %1844 = vector.broadcast %1843 : f32 to vector<8x256xf32>
    %1845 = arith.mulf %1844, %1842 : vector<8x256xf32>
    %1846 = arith.addf %1833, %1845 : vector<8x256xf32>
    %c46_381 = arith.constant 46 : index
    %1847 = memref.load %arg4[%c46_381] : memref<54xf32, #tpu.memory_space<smem>>
    %1848 = vector.broadcast %1847 : f32 to vector<8x256xf32>
    %1849 = arith.mulf %1848, %1842 : vector<8x256xf32>
    %1850 = arith.addf %1837, %1849 : vector<8x256xf32>
    %c47_382 = arith.constant 47 : index
    %1851 = memref.load %arg4[%c47_382] : memref<54xf32, #tpu.memory_space<smem>>
    %1852 = vector.broadcast %1851 : f32 to vector<8x256xf32>
    %1853 = arith.mulf %1852, %1842 : vector<8x256xf32>
    %1854 = arith.addf %1841, %1853 : vector<8x256xf32>
    %c6_i32_383 = arith.constant 6 : i32
    %1855 = tpu.dynamic_rotate %1644 by %c6_i32_383 dim 0 : vector<8x256xf32>, i32 -> vector<8x256xf32>
    %c48_384 = arith.constant 48 : index
    %1856 = memref.load %arg4[%c48_384] : memref<54xf32, #tpu.memory_space<smem>>
    %1857 = vector.broadcast %1856 : f32 to vector<8x256xf32>
    %1858 = arith.mulf %1857, %1855 : vector<8x256xf32>
    %1859 = arith.addf %1846, %1858 : vector<8x256xf32>
    %c49_385 = arith.constant 49 : index
    %1860 = memref.load %arg4[%c49_385] : memref<54xf32, #tpu.memory_space<smem>>
    %1861 = vector.broadcast %1860 : f32 to vector<8x256xf32>
    %1862 = arith.mulf %1861, %1855 : vector<8x256xf32>
    %1863 = arith.addf %1850, %1862 : vector<8x256xf32>
    %c50_386 = arith.constant 50 : index
    %1864 = memref.load %arg4[%c50_386] : memref<54xf32, #tpu.memory_space<smem>>
    %1865 = vector.broadcast %1864 : f32 to vector<8x256xf32>
    %1866 = arith.mulf %1865, %1855 : vector<8x256xf32>
    %1867 = arith.addf %1854, %1866 : vector<8x256xf32>
    %c6_i32_387 = arith.constant 6 : i32
    %1868 = tpu.dynamic_rotate %1646 by %c6_i32_387 dim 0 : vector<8x256xf32>, i32 -> vector<8x256xf32>
    %c51_388 = arith.constant 51 : index
    %1869 = memref.load %arg4[%c51_388] : memref<54xf32, #tpu.memory_space<smem>>
    %1870 = vector.broadcast %1869 : f32 to vector<8x256xf32>
    %1871 = arith.mulf %1870, %1868 : vector<8x256xf32>
    %1872 = arith.addf %1859, %1871 : vector<8x256xf32>
    %c52_389 = arith.constant 52 : index
    %1873 = memref.load %arg4[%c52_389] : memref<54xf32, #tpu.memory_space<smem>>
    %1874 = vector.broadcast %1873 : f32 to vector<8x256xf32>
    %1875 = arith.mulf %1874, %1868 : vector<8x256xf32>
    %1876 = arith.addf %1863, %1875 : vector<8x256xf32>
    %c53_390 = arith.constant 53 : index
    %1877 = memref.load %arg4[%c53_390] : memref<54xf32, #tpu.memory_space<smem>>
    %1878 = vector.broadcast %1877 : f32 to vector<8x256xf32>
    %1879 = arith.mulf %1878, %1868 : vector<8x256xf32>
    %1880 = arith.addf %1867, %1879 : vector<8x256xf32>
    %c1_391 = arith.constant 1 : index
    %c0_392 = arith.constant 0 : index
    %c0_393 = arith.constant 0 : index
    %c0_394 = arith.constant 0 : index
    %1881 = vector.load %arg6[%c1_391, %c0_392, %c0_393, %c0_394] : memref<2x3x8x256xf32, #tpu.memory_space<vmem>>, vector<1x1x8x256xf32>
    %1882 = vector.shape_cast %1881 : vector<1x1x8x256xf32> to vector<8x256xf32>
    %1883 = vector.shape_cast %1872 : vector<8x256xf32> to vector<1x1x8x256xf32>
    tpu.vector_store %arg6[%c1_391, %c0_392, %c0_393, %c0_394], %1883 {strides = array<i32>} : memref<2x3x8x256xf32, #tpu.memory_space<vmem>>, vector<1x1x8x256xf32>,
    %c1_395 = arith.constant 1 : index
    %c1_396 = arith.constant 1 : index
    %c0_397 = arith.constant 0 : index
    %c0_398 = arith.constant 0 : index
    %1884 = vector.load %arg6[%c1_395, %c1_396, %c0_397, %c0_398] : memref<2x3x8x256xf32, #tpu.memory_space<vmem>>, vector<1x1x8x256xf32>
    %1885 = vector.shape_cast %1884 : vector<1x1x8x256xf32> to vector<8x256xf32>
    %1886 = vector.shape_cast %1876 : vector<8x256xf32> to vector<1x1x8x256xf32>
    tpu.vector_store %arg6[%c1_395, %c1_396, %c0_397, %c0_398], %1886 {strides = array<i32>} : memref<2x3x8x256xf32, #tpu.memory_space<vmem>>, vector<1x1x8x256xf32>,
    %c1_399 = arith.constant 1 : index
    %c2_400 = arith.constant 2 : index
    %c0_401 = arith.constant 0 : index
    %c0_402 = arith.constant 0 : index
    %1887 = vector.load %arg6[%c1_399, %c2_400, %c0_401, %c0_402] : memref<2x3x8x256xf32, #tpu.memory_space<vmem>>, vector<1x1x8x256xf32>
    %1888 = vector.shape_cast %1887 : vector<1x1x8x256xf32> to vector<8x256xf32>
    %1889 = vector.shape_cast %1880 : vector<8x256xf32> to vector<1x1x8x256xf32>
    tpu.vector_store %arg6[%c1_399, %c2_400, %c0_401, %c0_402], %1889 {strides = array<i32>} : memref<2x3x8x256xf32, #tpu.memory_space<vmem>>, vector<1x1x8x256xf32>,
    return
  }
  func.func @transform_0(%arg0: i32) -> (i32, i32, i32) {
    %c0_i32 = arith.constant 0 : i32
    %c0_i32_0 = arith.constant 0 : i32
    %c0_i32_1 = arith.constant 0 : i32
    return %arg0, %c0_i32, %c0_i32_0 : i32, i32, i32
  }
  func.func @transform_1(%arg0: i32) -> i32 {
    %c0_i32 = arith.constant 0 : i32
    %c0_i32_0 = arith.constant 0 : i32
    return %c0_i32 : i32
  }
  func.func @transform_2(%arg0: i32) -> i32 {
    %c0_i32 = arith.constant 0 : i32
    %c0_i32_0 = arith.constant 0 : i32
    return %c0_i32 : i32
  }
  func.func @transform_3(%arg0: i32) -> i32 {
    %c0_i32 = arith.constant 0 : i32
    %c0_i32_0 = arith.constant 0 : i32
    return %c0_i32 : i32
  }
  func.func @transform_4(%arg0: i32) -> i32 {
    %c0_i32 = arith.constant 0 : i32
    %c0_i32_0 = arith.constant 0 : i32
    return %c0_i32 : i32
  }
  func.func @transform_5(%arg0: i32) -> (i32, i32, i32, i32) {
    %c0_i32 = arith.constant 0 : i32
    %c0_i32_0 = arith.constant 0 : i32
    %c0_i32_1 = arith.constant 0 : i32
    %c0_i32_2 = arith.constant 0 : i32
    return %arg0, %c0_i32, %c0_i32_0, %c0_i32_1 : i32, i32, i32, i32
  }
}

</mosaic_0001>

<bundles_post_ra>
// kernel: conv2plus1d_forward.1
= control target key start
LH: loop header
LB: loop body
LE: loop exit
PB: predicated region body
PF: predicated region fallthrough
CT: control target
= control target key end

     0   :  { %s7235_s0 = inlined_call_operand.vmem [shape: f32[2,24,256], index: 0, kind: input, shape index: {}]   ;;  %s7236_s1 = inlined_call_operand.vmem [shape: f32[162], index: 1, kind: input, shape index: {}]   ;;  %s7237_s2 = inlined_call_operand.vmem [shape: f32[6], index: 2, kind: input, shape index: {}]   ;;  %s7238_s3 = inlined_call_operand.vmem [shape: f32[54], index: 3, kind: input, shape index: {}]   ;;  %s7239_s4 = inlined_call_operand.vmem [shape: f32[3], index: 4, kind: input, shape index: {}]   ;;  %s7240_s5 = inlined_call_operand.vmem [shape: f32[2,3,8,256], index: 5, kind: output, shape index: {}]  }
   0x1   :  { %7434 = sst [smem:[#allocation107_spill]] %s7235_s0 }
   0x2   :  { %7435 = sst [smem:[#allocation108_spill]] %s7240_s5 }
   0x3   :  { %10 = vsyncpa [#allocation3], 0 }
   0x4   :  { %11 = vsyncpa [#allocation5], 0  ;;  %s31_s20 = sshll.u32 %s7237_s2, 4  ;;  %s32_s20 = int_to_ptr.vmem [resolvable:$true] %s31_s20 }
   0x5   :  { %12 = vsyncpa [#allocation8], 0  ;;  %s21_s23 = sshll.u32 %s7236_s1, 4  ;;  %s3577_s24 = scalar_lea.vmem %s32_s20, 16  ;;  %s22_s23 = int_to_ptr.vmem [resolvable:$true] %s21_s23 }
   0x6   :  { %p3578_p0 = scmp.ne.s32.totalorder %s32_s20, %s3577_s24  ;;  %p3582_p1 = scmp.lt.s32.totalorder %s32_s20, %s32_s20 }
   0x7   :  { %p3583_p2 = scmp.lt.s32.totalorder %s3577_s24, %s3577_s24 }
   0x9   :  { %p3584_p3 = por %p3583_p2, %p3582_p1 }
   0xb   :  { %p3585_p4 = pnand %p3584_p3, %p3578_p0 }
   0xd   :  { %3588 = shalt.err (!%p3585_p4)
}
   0xe   :  { %s3631_s25 = smov [#allocation4]   ;;  %s3589_s26 = scalar_lea.vmem %s22_s23, 32 }
   0xf   :  { %34 = dma.vmem_to_smem %s32_s20, 16, %s3631_s25, [#allocation5]  }
  0x10   :  { %p3590_p5 = scmp.ne.s32.totalorder %s22_s23, %s3589_s26  ;;  %p3594_p6 = scmp.lt.s32.totalorder %s22_s23, %s22_s23 }
  0x11   :  { %p3595_p7 = scmp.lt.s32.totalorder %s3589_s26, %s3589_s26 }
  0x13   :  { %p3596_p8 = por %p3595_p7, %p3594_p6 }
  0x15   :  { %p3597_p9 = pnand %p3596_p8, %p3590_p5 }
  0x17   :  { %3600 = shalt.err (!%p3597_p9)
}
  0x18   :  { %s3632_s2 = smov [#allocation2]   ;;  %s41_s28 = sshll.u32 %s7238_s3, 4  ;;  %s42_s28 = int_to_ptr.vmem [resolvable:$true] %s41_s28 }
  0x19   :  { %24 = dma.vmem_to_smem %s22_s23, 32, %s3632_s2, [#allocation3]  }
  0x1a   :  { %s51_s6 = sshll.u32 %s7239_s4, 4  ;;  %s3601_s7 = scalar_lea.vmem %s42_s28, 16  ;;  %s52_s6 = int_to_ptr.vmem [resolvable:$true] %s51_s6 }
  0x1b   :  { %p3602_p10 = scmp.ne.s32.totalorder %s42_s28, %s3601_s7  ;;  %p3606_p11 = scmp.lt.s32.totalorder %s42_s28, %s42_s28 }
  0x1c   :  { %p3607_p12 = scmp.lt.s32.totalorder %s3601_s7, %s3601_s7 }
  0x1e   :  { %p3608_p13 = por %p3607_p12, %p3606_p11 }
  0x20   :  { %p3609_p0 = pnand %p3608_p13, %p3602_p10 }
  0x22   :  { %3612 = shalt.err (!%p3609_p0)
}
  0x23   :  { %s3633_s8 = smov [#allocation6]   ;;  %s3613_s9 = scalar_lea.vmem %s52_s6, 16 }
  0x24   :  { %44 = dma.vmem_to_smem %s42_s28, 16, %s3633_s8, [#allocation5]  }
  0x25   :  { %p3614_p1 = scmp.ne.s32.totalorder %s52_s6, %s3613_s9  ;;  %p3618_p2 = scmp.lt.s32.totalorder %s52_s6, %s52_s6 }
  0x26   :  { %p3619_p3 = scmp.lt.s32.totalorder %s3613_s9, %s3613_s9 }
  0x28   :  { %p3620_p4 = por %p3619_p3, %p3618_p2 }
  0x2a   :  { %p3621_p5 = pnand %p3620_p4, %p3614_p1 }
  0x2c   :  { %3624 = shalt.err (!%p3621_p5)
}
  0x2d   :  { %s3634_s3 = smov [#allocation7]  }
  0x2e   :  { %54 = dma.vmem_to_smem %s52_s6, 16, %s3634_s3, [#allocation8]  }
  0x2f   :  { %3625 = dma.done.wait [#allocation3], 32  }
  0x30   :  { %3626 = vsyncadd [#allocation3], 4294967264 }
  0x31   :  { %3627 = dma.done.wait [#allocation5], 32  }
  0x32   :  { %3628 = vsyncadd [#allocation5], 4294967264 }
  0x33   :  { %3629 = dma.done.wait [#allocation8], 16  }
  0x34   :  { %3630 = vsyncadd [#allocation8], 4294967280 }
  0x35   :  { %67 = sfence }
  0x36   :  { %v3688_v0 = vld [vmem:[%s7235_s0] sm:$0xff]  ;;  %s7258_s11 = smov 126   ;;  %s7245_s12 = smov 127   ;;  %v3697_v1 = vld [vmem:[%s7235_s0 + $0x8] sm:$0xff]  ;;  %v3730_v2 = vld [vmem:[%s7235_s0 + $0x18] sm:$0xff]  ;;  %v122_v44 = vlaneseq }
  0x37   :  { %163 = vrot.lane.b32.xlu1 %v3688_v0, %s7258_s11  ;;  %118 = vrot.lane.b32.xlu0 %v3688_v0, %s7245_s12  ;;  %s7253_s15 = smov 112   ;;  %s7251_s16 = smov 111   ;;  %v3735_v3 = vld [vmem:[%s7235_s0 + $0x10] sm:$0xff]  ;;  %v3748_v4 = vld [vmem:[%s7235_s0 + $0x38] sm:$0xff] }
  0x38   :  { %s7249_s17 = smov 110   ;;  %s7247_s18 = smov 96   ;;  %v3753_v5 = vld [vmem:[%s7235_s0 + $0x30] sm:$0xff]  ;;  %v3898_v42 = vld [vmem:[%s7235_s0 + $0x48] sm:$0xff]  ;;  %v3903_v43 = vld [vmem:[%s7235_s0 + $0x40] sm:$0xff]  ;;  %v3982_v46 = vand.u32 127, %v122_v44 }
  0x39   :  { %s7243_s19 = smov 95   ;;  %s7241_s20 = smov 94  }
  0x3a   :  { %s82_s27 = sld [smem:[#allocation2]]  ;;  %s3108_s28 = sld [smem:[#allocation2 + $0x1]]  ;;  %7479 = vst [vmem:[#allocation54_spill] sm:$0xff] %v3982_v46  ;;  %vm167_vm0 = vcmp.lt.s32.totalorder %v3982_v46, 126  ;;  %vm124_vm1 = vcmp.lt.s32.totalorder %v3982_v46, 127  ;;  %vm210_vm2 = vcmp.lt.s32.totalorder %v3982_v46, 112 }
  0x3b   :  { %165 = vrot.lane.b32.xlu1 %v3697_v1, %s7258_s11  ;;  %120 = vrot.lane.b32.xlu0 %v3697_v1, %s7245_s12  ;;  %s3109_s29 = sld [smem:[#allocation2 + $0x2]]  ;;  %s3110_s30 = sld [smem:[#allocation2 + $0x3]]  ;;  %vm253_vm3 = vcmp.lt.s32.totalorder %v3982_v46, 111  ;;  %vm296_vm4 = vcmp.lt.s32.totalorder %v3982_v46, 110  ;;  %vm339_vm5 = vcmp.lt.s32.totalorder %v3982_v46, 96  ;;  %vm382_vm6 = vcmp.lt.s32.totalorder %v3982_v46, 95 }
  0x3c   :  { %s3111_s6 = sld [smem:[#allocation2 + $0x4]]  ;;  %s3112_s7 = sld [smem:[#allocation2 + $0x5]]  ;;  %vm425_vm7 = vcmp.lt.s32.totalorder %v3982_v46, 94 }
  0x3d   :  { %s68_s8 = sld [smem:[#allocation4]]  ;;  %s3103_s9 = sld [smem:[#allocation4 + $0x1]] }
  0x3e   :  { %s3104_s3 = sld [smem:[#allocation4 + $0x2]]  ;;  %s3105_s4 = sld [smem:[#allocation4 + $0x3]] }
  0x3f   :  { %208 = vrot.lane.b32.xlu1 %v3697_v1, %s7253_s15  ;;  %206 = vrot.lane.b32.xlu0 %v3688_v0, %s7253_s15  ;;  %s3777_s10 = sld [smem:[#allocation4 + $0x4]]  ;;  %s3779_s13 = sld [smem:[#allocation4 + $0x5]] }
  0x40   :  { %v3771_v6 = vstv %s82_s27  ;;  %v3773_v7 = vstv %s3108_s28  ;;  %s3861_s14 = sld [smem:[#allocation2 + $0x24]]  ;;  %s3872_s21 = sld [smem:[#allocation2 + $0x25]] }
  0x41   :  { %v3775_v8 = vstv %s3109_s29  ;;  %v3785_v9 = vstv %s3110_s30  ;;  %v1603_v15 = vmul.f32 %v3753_v5, %v3771_v6  ;;  %v1604_v16 = vmul.f32 %v3748_v4, %v3771_v6  ;;  %s3874_s22 = sld [smem:[#allocation2 + $0x26]]  ;;  %s3879_s23 = sld [smem:[#allocation2 + $0x27]] }
  0x42   :  { %v3787_v10 = vstv %s3111_s6  ;;  %v3789_v11 = vstv %s3112_s7  ;;  %v1609_v17 = vmul.f32 %v3753_v5, %v3773_v7  ;;  %v1610_v18 = vmul.f32 %v3748_v4, %v3773_v7  ;;  %s3881_s24 = sld [smem:[#allocation2 + $0x28]]  ;;  %s3883_s25 = sld [smem:[#allocation2 + $0x29]] }
  0x43   :  { %251 = vrot.lane.b32.xlu1 %v3697_v1, %s7251_s16  ;;  %249 = vrot.lane.b32.xlu0 %v3688_v0, %s7251_s16  ;;  %v3791_v12 = vstv %s68_s8  ;;  %v3793_v13 = vstv %s3103_s9  ;;  %v1615_v19 = vmul.f32 %v3753_v5, %v3775_v8  ;;  %v1616_v20 = vmul.f32 %v3748_v4, %v3775_v8  ;;  %s3885_s26 = sld [smem:[#allocation2 + $0x12]]  ;;  %s3891_s2 = sld [smem:[#allocation2 + $0x13]] }
  0x44   :  { %v3795_v14 = vstv %s3104_s3  ;;  %v1621_v21 = vmul.f32 %v3753_v5, %v3785_v9  ;;  %v1622_v22 = vmul.f32 %v3748_v4, %v3785_v9  ;;  %v3817_v23 = vstv %s3105_s4  ;;  %s3893_s1 = sld [smem:[#allocation2 + $0x14]]  ;;  %s3905_s6 = sld [smem:[#allocation2 + $0x15]] }
  0x45   :  { %v3820_v24 = vadd.f32 %v1603_v15, %v3791_v12  ;;  %v3823_v25 = vadd.f32 %v1604_v16, %v3791_v12  ;;  %v3826_v26 = vadd.f32 %v1609_v17, %v3793_v13  ;;  %v3829_v27 = vadd.f32 %v1610_v18, %v3793_v13  ;;  %s3907_s7 = sld [smem:[#allocation2 + $0x16]]  ;;  %s3909_s8 = sld [smem:[#allocation2 + $0x17]] }
  0x46   :  { %v3832_v28 = vadd.f32 %v1615_v19, %v3795_v14  ;;  %v3835_v29 = vadd.f32 %v1616_v20, %v3795_v14  ;;  %v3838_v30 = vadd.f32 %v1621_v21, %v3817_v23  ;;  %v3841_v31 = vadd.f32 %v1622_v22, %v3817_v23  ;;  %7444 = sst [smem:[#allocation20_spill]] %s3861_s14  ;;  %s3911_s9 = sld [smem:[#allocation2 + $0x36]] }
  0x47   :  { %294 = vrot.lane.b32.xlu1 %v3697_v1, %s7249_s17  ;;  %292 = vrot.lane.b32.xlu0 %v3688_v0, %s7249_s17  ;;  %7436 = vst [vmem:[#allocation12_spill] sm:$0xff] %v3820_v24  ;;  %7437 = vst [vmem:[#allocation13_spill] sm:$0xff] %v3823_v25  ;;  %v1627_v32 = vmul.f32 %v3753_v5, %v3787_v10  ;;  %v1628_v33 = vmul.f32 %v3748_v4, %v3787_v10  ;;  %v3850_v35 = vstv %s3777_s10  ;;  %7448 = sst [smem:[#allocation24_spill]] %s3872_s21  ;;  %s3913_s3 = sld [smem:[#allocation2 + $0x37]] }
  0x48   :  { %7438 = vst [vmem:[#allocation14_spill] sm:$0xff] %v3826_v26  ;;  %7439 = vst [vmem:[#allocation15_spill] sm:$0xff] %v3829_v27  ;;  %v1633_v34 = vmul.f32 %v3753_v5, %v3789_v11  ;;  %v3853_v36 = vstv %s3779_s13  ;;  %v1634_v37 = vmul.f32 %v3748_v4, %v3789_v11  ;;  %7449 = sst [smem:[#allocation25_spill]] %s3874_s22  ;;  %s3915_s4 = sld [smem:[#allocation2 + $0x38]]  ;;  %v85_v52 = vmul.f32 %v3771_v6, %v3697_v1 }
  0x49   :  { %7440 = vst [vmem:[#allocation16_spill] sm:$0xff] %v3832_v28  ;;  %7441 = vst [vmem:[#allocation17_spill] sm:$0xff] %v3835_v29  ;;  %v3864_v38 = vadd.f32 %v1627_v32, %v3850_v35  ;;  %v3867_v39 = vadd.f32 %v1628_v33, %v3850_v35  ;;  %7451 = sst [smem:[#allocation27_spill]] %s3879_s23  ;;  %s3921_s10 = sld [smem:[#allocation2 + $0x39]]  ;;  %v91_v53 = vmul.f32 %v3773_v7, %v3697_v1 }
  0x4a   :  { %7442 = vst [vmem:[#allocation18_spill] sm:$0xff] %v3838_v30  ;;  %7443 = vst [vmem:[#allocation19_spill] sm:$0xff] %v3841_v31  ;;  %v3870_v40 = vadd.f32 %v1633_v34, %v3853_v36  ;;  %v3877_v41 = vadd.f32 %v1634_v37, %v3853_v36  ;;  %7452 = sst [smem:[#allocation28_spill]] %s3881_s24  ;;  %s3923_s13 = sld [smem:[#allocation2 + $0x3a]]  ;;  %v97_v54 = vmul.f32 %v3775_v8, %v3697_v1 }
  0x4b   :  { %337 = vrot.lane.b32.xlu1 %v3697_v1, %s7247_s18  ;;  %335 = vrot.lane.b32.xlu0 %v3688_v0, %s7247_s18  ;;  %7445 = vst [vmem:[#allocation21_spill] sm:$0xff] %v3864_v38  ;;  %7446 = vst [vmem:[#allocation22_spill] sm:$0xff] %v3867_v39  ;;  %7453 = sst [smem:[#allocation29_spill]] %s3883_s25  ;;  %s3925_s27 = sld [smem:[#allocation2 + $0x3b]]  ;;  %v84_v55 = vmul.f32 %v3771_v6, %v3688_v0  ;;  %v90_v56 = vmul.f32 %v3773_v7, %v3688_v0 }
  0x4c   :  { %7447 = vst [vmem:[#allocation23_spill] sm:$0xff] %v3870_v40  ;;  %7450 = vst [vmem:[#allocation26_spill] sm:$0xff] %v3877_v41  ;;  %7454 = sst [smem:[#allocation30_spill]] %s3885_s26  ;;  %s3927_s28 = sld [smem:[#allocation2 + $0x48]]  ;;  %v103_v57 = vmul.f32 %v3785_v9, %v3697_v1  ;;  %v109_v58 = vmul.f32 %v3787_v10, %v3697_v1  ;;  %v96_v60 = vmul.f32 %v3775_v8, %v3688_v0 }
  0x4d   :  { %7455 = sst [smem:[#allocation31_spill]] %s3891_s2  ;;  %s3929_s29 = sld [smem:[#allocation2 + $0x49]]  ;;  %v4028_v61 = vmul.f32 %v3789_v11, %v3697_v1  ;;  %v108_v8 = vmul.f32 %v3787_v10, %v3688_v0  ;;  %v4054_v15 = vadd.f32 %v90_v56, %v3793_v13  ;;  %v4058_v16 = vmul.f32 %v3789_v11, %v3688_v0 }
  0x4e   :  { %7456 = sst [smem:[#allocation32_spill]] %s3893_s1  ;;  %s3931_s30 = sld [smem:[#allocation2 + $0x4a]]  ;;  %v4065_v10 = vadd.f32 %v91_v53, %v3793_v13  ;;  %v4071_v17 = vadd.f32 %v97_v54, %v3795_v14  ;;  %v4086_v11 = vadd.f32 %v103_v57, %v3817_v23 }
  0x4f   :  { %380 = vrot.lane.b32.xlu1 %v3697_v1, %s7243_s19  ;;  %378 = vrot.lane.b32.xlu0 %v3688_v0, %s7243_s19  ;;  %7457 = sst [smem:[#allocation33_spill]] %s3905_s6  ;;  %s3951_s5 = sld [smem:[#allocation2 + $0x5e]]  ;;  %v4141_v54 = vadd.f32 %v108_v8, %v3850_v35  ;;  %v4210_v6 = vadd.f32 %v4058_v16, %v3853_v36 }
  0x50   :  { %7458 = sst [smem:[#allocation34_spill]] %s3907_s7  ;;  %s3953_s0 = sld [smem:[#allocation2 + $0x5f]] }
  0x51   :  { %7459 = sst [smem:[#allocation35_spill]] %s3909_s8  ;;  %s4009_s25 = sld [smem:[#allocation2 + $0x92]] }
  0x52   :  { %7460 = sst [smem:[#allocation36_spill]] %s3911_s9  ;;  %s3995_s14 = sld [smem:[#allocation2 + $0x83]]  ;;  %v4098_v22 = vstv %s3927_s28 }
  0x53   :  { %423 = vrot.lane.b32.xlu1 %v3697_v1, %s7241_s20  ;;  %421 = vrot.lane.b32.xlu0 %v3688_v0, %s7241_s20  ;;  %7461 = sst [smem:[#allocation37_spill]] %s3913_s3  ;;  %s4018_s24 = sld [smem:[#allocation2 + $0x93]]  ;;  %v4048_v1 = vadd.f32 %v84_v55, %v3791_v12  ;;  %v4144_v55 = vadd.f32 %v109_v58, %v3850_v35 }
  0x54   :  { %7462 = sst [smem:[#allocation38_spill]] %s3915_s4  ;;  %s4020_s23 = sld [smem:[#allocation2 + $0x94]]  ;;  %v4108_v32 = vstv %s3931_s30 }
  0x55   :  { %7463 = sst [smem:[#allocation39_spill]] %s3921_s10  ;;  %s7483_s22 = smov 111  }
  0x56   :  { %7464 = sst [smem:[#allocation40_spill]] %s3923_s13  ;;  %s4034_s26 = sld [smem:[#allocation2 + $0x95]] }
  0x57   :  { %504 = vrot.lane.b32.xlu1 %v3730_v2, %s7245_s12  ;;  %502 = vrot.lane.b32.xlu0 %v3735_v3, %s7245_s12  ;;  %7465 = sst [smem:[#allocation41_spill]] %s3925_s27  ;;  %s4036_s21 = sld [smem:[#allocation2 + $0x6]] }
  0x58   :  { %7472 = sst [smem:[#allocation48_spill]] %s3951_s5  ;;  %s3965_s5 = sld [smem:[#allocation2 + $0x6f]]  ;;  %v4227_v59 = vstv %s3995_s14 }
  0x59   :  { %7473 = sst [smem:[#allocation49_spill]] %s3953_s0  ;;  %s3967_s0 = sld [smem:[#allocation2 + $0x70]]  ;;  %7516 = vst [vmem:[#allocation70_spill] sm:$0xff] %v4227_v59 }
  0x5a   :  { %7480 = sst [smem:[#allocation55_spill]] %s4009_s25  ;;  %s4060_s8 = sld [smem:[#allocation2 + $0x9]] }
  0x5b   :  { %546 = vrot.lane.b32.xlu1 %v3730_v2, %s7258_s11  ;;  %544 = vrot.lane.b32.xlu0 %v3735_v3, %s7258_s11  ;;  %7481 = sst [smem:[#allocation56_spill]] %s4018_s24  ;;  %s4045_s24 = sld [smem:[#allocation2 + $0x8]] }
  0x5c   :  { %7482 = sst [smem:[#allocation57_spill]] %s4020_s23  ;;  %s4043_s23 = sld [smem:[#allocation2 + $0x7]] }
  0x5d   :  { %7484 = sst [smem:[#allocation58_spill]] %s4034_s26  ;;  %s4062_s7 = sld [smem:[#allocation2 + $0xa]]  ;;  %v4217_v63 = vstv %s4036_s21 }
  0x5e   :  { %s4074_s6 = sld [smem:[#allocation2 + $0xb]]  ;;  %s4076_s1 = sld [smem:[#allocation2 + $0x18]]  ;;  %v4173_v58 = vstv %s3965_s5  ;;  %v4263_v45 = vmul.f32 %v4217_v63, %v3735_v3  ;;  %v4267_v41 = vmul.f32 %v4217_v63, %v3730_v2 }
  0x5f   :  { %1639 = vrot.lane.b32.xlu1 %v3748_v4, %s7245_s12  ;;  %1637 = vrot.lane.b32.xlu0 %v3753_v5, %s7245_s12  ;;  %7476 = sst [smem:[#allocation51_spill]] %s3967_s0  ;;  %s3986_s0 = sld [smem:[#allocation2 + $0x81]] }
  0x60   :  { %7485 = sst [smem:[#allocation59_spill]] %s4060_s8  ;;  %s4102_s25 = sld [smem:[#allocation2 + $0x1c]]  ;;  %7525 = vst [vmem:[#allocation77_spill] sm:$0xff] %v4263_v45  ;;  %7527 = vst [vmem:[#allocation78_spill] sm:$0xff] %v4267_v41  ;;  %v4396_v45 = vmul.f32 %v3903_v43, %v4217_v63 }
  0x61   :  { %s4092_s26 = sld [smem:[#allocation2 + $0x1a]]  ;;  %s7496_s4 = sld [smem:[#allocation48_spill]]  ;;  %v4236_v16 = vstv %s4045_s24 }
  0x62   :  { %s7497_s13 = sld [smem:[#allocation49_spill]]  ;;  %s4118_s27 = sld [smem:[#allocation2 + $0x2a]]  ;;  %v4220_v62 = vstv %s4043_s23  ;;  %v4287_v38 = vmul.f32 %v4236_v16, %v3735_v3  ;;  %v4299_v29 = vmul.f32 %v4236_v16, %v3730_v2  ;;  %7557 = vst [vmem:[#allocation95_spill] sm:$0xff] %v4396_v45 }
  0x63   :  { %1681 = vrot.lane.b32.xlu1 %v3748_v4, %s7258_s11  ;;  %1679 = vrot.lane.b32.xlu0 %v3753_v5, %s7258_s11  ;;  %7486 = sst [smem:[#allocation60_spill]] %s4062_s7  ;;  %s4170_s10 = sld [smem:[#allocation2 + $0x12]]  ;;  %v4271_v40 = vmul.f32 %v4220_v62, %v3735_v3  ;;  %v4283_v39 = vmul.f32 %v4220_v62, %v3730_v2 }
  0x64   :  { %7487 = sst [smem:[#allocation61_spill]] %s4074_s6  ;;  %s7500_s30 = sld [smem:[#allocation51_spill]]  ;;  %7532 = vst [vmem:[#allocation81_spill] sm:$0xff] %v4287_v38  ;;  %7534 = vst [vmem:[#allocation82_spill] sm:$0xff] %v4299_v29 }
  0x65   :  { %7488 = sst [smem:[#allocation62_spill]] %s4076_s1  ;;  %s4090_s1 = sld [smem:[#allocation2 + $0x19]]  ;;  %v4195_v18 = vstv %s3986_s0  ;;  %7528 = vst [vmem:[#allocation79_spill] sm:$0xff] %v4271_v40  ;;  %7531 = vst [vmem:[#allocation80_spill] sm:$0xff] %v4283_v39 }
  0x66   :  { %7509 = vst [vmem:[#allocation68_spill] sm:$0xff] %v4195_v18  ;;  %s4200_s5 = sld [smem:[#allocation2 + $0x15]]  ;;  %s7515_s0 = sld [smem:[#allocation58_spill]] }
  0x67   :  { %1723 = vrot.lane.b32.xlu1 %v3748_v4, %s7253_s15  ;;  %1721 = vrot.lane.b32.xlu0 %v3753_v5, %s7253_s15  ;;  %s3949_s15 = sld [smem:[#allocation2 + $0x5d]]  ;;  %v4150_v57 = vstv %s7496_s4  ;;  %s4184_s4 = sld [smem:[#allocation2 + $0x13]] }
  0x68   :  { %s7520_s21 = sld [smem:[#allocation60_spill]]  ;;  %s7522_s23 = sld [smem:[#allocation61_spill]] }
  0x69   :  { %s4273_s24 = sld [smem:[#allocation2 + $0x29]]  ;;  %s4330_s14 = sld [smem:[#allocation2 + $0x3b]] }
  0x6a   :  { %v4176_v21 = vstv %s7500_s30  ;;  %s4224_s30 = sld [smem:[#allocation2 + $0x24]] }
  0x6b   :  { %1765 = vrot.lane.b32.xlu1 %v3748_v4, %s7251_s16  ;;  %1763 = vrot.lane.b32.xlu0 %v3753_v5, %s7251_s16  ;;  %s3947_s16 = sld [smem:[#allocation2 + $0x5c]]  ;;  %7503 = vst [vmem:[#allocation63_spill] sm:$0xff] %v4176_v21 }
  0x6c   :  { %v4259_v47 = vstv %s7515_s0  ;;  %s4295_s0 = sld [smem:[#allocation2 + $0x38]] }
  0x6d   :  { %7471 = sst [smem:[#allocation47_spill]] %s3949_s15  ;;  %s3971_s15 = sld [smem:[#allocation2 + $0x7e]]  ;;  %7524 = vst [vmem:[#allocation76_spill] sm:$0xff] %v4259_v47 }
  0x6e   :  { %s7495_s3 = sld [smem:[#allocation47_spill]]  ;;  %v4290_v31 = vstv %s7520_s21  ;;  %v497_v30 = vstv %s7522_s23  ;;  %s4310_s21 = sld [smem:[#allocation2 + $0x39]] }
  0x6f   :  { %1807 = vrot.lane.b32.xlu1 %v3748_v4, %s7249_s17  ;;  %1805 = vrot.lane.b32.xlu0 %v3753_v5, %s7249_s17  ;;  %s3945_s17 = sld [smem:[#allocation2 + $0x5b]]  ;;  %s4312_s23 = sld [smem:[#allocation2 + $0x3a]]  ;;  %v4340_v29 = vmul.f32 %v4290_v31, %v3735_v3  ;;  %v4344_v39 = vmul.f32 %v4290_v31, %v3730_v2 }
  0x70   :  { %7542 = sst [smem:[#allocation47_spill]] %s4330_s14  ;;  %s7571_s14 = sld [smem:[#allocation25_spill]] }
  0x71   :  { %7470 = sst [smem:[#allocation46_spill]] %s3947_s16  ;;  %7543 = vst [vmem:[#allocation88_spill] sm:$0xff] %v4340_v29  ;;  %7544 = vst [vmem:[#allocation89_spill] sm:$0xff] %v4344_v39  ;;  %v4383_v39 = vmul.f32 %v497_v30, %v3735_v3  ;;  %v4386_v29 = vmul.f32 %v497_v30, %v3730_v2  ;;  %v4404_v30 = vmul.f32 %v3903_v43, %v4220_v62 }
  0x72   :  { %s3963_s16 = sld [smem:[#allocation2 + $0x6e]] }
  0x73   :  { %1849 = vrot.lane.b32.xlu1 %v3748_v4, %s7247_s18  ;;  %1847 = vrot.lane.b32.xlu0 %v3753_v5, %s7247_s18  ;;  %s3943_s18 = sld [smem:[#allocation2 + $0x5a]]  ;;  %s7494_s8 = sld [smem:[#allocation46_spill]]  ;;  %v4182_v19 = vstv %s3971_s15  ;;  %7555 = vst [vmem:[#allocation93_spill] sm:$0xff] %v4383_v39  ;;  %7556 = vst [vmem:[#allocation94_spill] sm:$0xff] %v4386_v29  ;;  %v4400_v39 = vmul.f32 %v3898_v42, %v4217_v63  ;;  %v4417_v63 = vmul.f32 %v3898_v42, %v4236_v16 }
  0x74   :  { %v4147_v56 = vstv %s7495_s3  ;;  %s4168_s3 = sld [smem:[#allocation2 + $0x2f]]  ;;  %7505 = vst [vmem:[#allocation65_spill] sm:$0xff] %v4182_v19  ;;  %s7511_s15 = sld [smem:[#allocation55_spill]]  ;;  %7559 = vst [vmem:[#allocation97_spill] sm:$0xff] %v4404_v30 }
  0x75   :  { %7469 = sst [smem:[#allocation45_spill]] %s3945_s17  ;;  %s3974_s17 = sld [smem:[#allocation2 + $0x7f]]  ;;  %7558 = vst [vmem:[#allocation96_spill] sm:$0xff] %v4400_v39  ;;  %7562 = vst [vmem:[#allocation100_spill] sm:$0xff] %v4417_v63 }
  0x76   :  { %s7492_s6 = sld [smem:[#allocation45_spill]]  ;;  %7538 = sst [smem:[#allocation46_spill]] %s4312_s23 }
  0x77   :  { %1891 = vrot.lane.b32.xlu1 %v3748_v4, %s7243_s19  ;;  %1889 = vrot.lane.b32.xlu0 %v3753_v5, %s7243_s19  ;;  %s3935_s19 = sld [smem:[#allocation2 + $0x4c]]  ;;  %7537 = sst [smem:[#allocation45_spill]] %s4310_s21 }
  0x78   :  { %v4166_v35 = vstv %s3963_s16  ;;  %s4202_s16 = sld [smem:[#allocation2 + $0x16]]  ;;  %s7569_s23 = sld [smem:[#allocation24_spill]] }
  0x79   :  { %7468 = sst [smem:[#allocation44_spill]] %s3943_s18  ;;  %s3976_s18 = sld [smem:[#allocation2 + $0x80]]  ;;  %v4130_v53 = vstv %s7494_s8 }
  0x7a   :  { %s7491_s9 = sld [smem:[#allocation44_spill]]  ;;  %s4152_s8 = sld [smem:[#allocation2 + $0x2d]]  ;;  %v4357_v25 = vstv %s4168_s3 }
  0x7b   :  { %1933 = vrot.lane.b32.xlu1 %v3748_v4, %s7241_s20  ;;  %1931 = vrot.lane.b32.xlu0 %v3753_v5, %s7241_s20  ;;  %s3933_s20 = sld [smem:[#allocation2 + $0x4b]]  ;;  %v102_v4 = vmul.f32 %v3785_v9, %v3688_v0  ;;  %v4051_v9 = vadd.f32 %v85_v52, %v3791_v12  ;;  %v4068_v12 = vadd.f32 %v96_v60, %v3795_v14  ;;  %v4157_v60 = vstv %s7497_s13  ;;  %s7512_s13 = sld [smem:[#allocation56_spill]] }
  0x7c   :  { %v4127_v52 = vstv %s7492_s6  ;;  %v4189_v14 = vstv %s3974_s17  ;;  %s7513_s17 = sld [smem:[#allocation57_spill]]  ;;  %v4214_v5 = vadd.f32 %v4028_v61, %v3853_v36  ;;  %v4243_v36 = vstv %s7511_s15  ;;  %s4275_s15 = sld [smem:[#allocation2 + $0x36]]  ;;  %7549 = vst [vmem:[#allocation92_spill] sm:$0xff] %v4357_v25 }
  0x7d   :  { %7467 = sst [smem:[#allocation43_spill]] %s3935_s19  ;;  %s3955_s19 = sld [smem:[#allocation2 + $0x6c]]  ;;  %v4083_v0 = vadd.f32 %v102_v4, %v3817_v23  ;;  %v4105_v23 = vstv %s3929_s29  ;;  %7507 = vst [vmem:[#allocation66_spill] sm:$0xff] %v4189_v14  ;;  %7519 = vst [vmem:[#allocation73_spill] sm:$0xff] %v4243_v36  ;;  %v4409_v25 = vmul.f32 %v3898_v42, %v4220_v62 }
  0x7e   :  { %s7490_s7 = sld [smem:[#allocation43_spill]]  ;;  %s7499_s29 = smov 110  }
  0x7f   :  { %2013 = vrot.lane.b32.xlu1 %v3898_v42, %s7245_s12  ;;  %2011 = vrot.lane.b32.xlu0 %v3903_v43, %s7245_s12  ;;  %s3941_s12 = sld [smem:[#allocation2 + $0x4d]]  ;;  %7533 = sst [smem:[#allocation44_spill]] %s4295_s0  ;;  %7560 = vst [vmem:[#allocation98_spill] sm:$0xff] %v4409_v25 }
  0x80   :  { %7478 = sst [smem:[#allocation53_spill]] %s3976_s18  ;;  %s3997_s18 = sld [smem:[#allocation2 + $0x90]]  ;;  %v4124_v44 = vstv %s7491_s9  ;;  %v4347_v38 = vstv %s4152_s8 }
  0x81   :  { %7466 = sst [smem:[#allocation42_spill]] %s3933_s20  ;;  %s7475_s20 = smov 112   ;;  %v4246_v61 = vstv %s7512_s13  ;;  %7545 = vst [vmem:[#allocation90_spill] sm:$0xff] %v4347_v38 }
  0x82   :  { %s7489_s2 = sld [smem:[#allocation42_spill]]  ;;  %s7502_s6 = sld [smem:[#allocation53_spill]]  ;;  %7521 = vst [vmem:[#allocation74_spill] sm:$0xff] %v4246_v61  ;;  %v4249_v49 = vstv %s7513_s17 }
  0x83   :  { %2055 = vrot.lane.b32.xlu1 %v3898_v42, %s7258_s11  ;;  %2053 = vrot.lane.b32.xlu0 %v3903_v43, %s7258_s11  ;;  %7474 = sst [smem:[#allocation50_spill]] %s3955_s19  ;;  %s3961_s11 = sld [smem:[#allocation2 + $0x6d]]  ;;  %7523 = vst [vmem:[#allocation75_spill] sm:$0xff] %v4249_v49 }
  0x84   :  { %s3969_s19 = sld [smem:[#allocation2 + $0x71]]  ;;  %7493 = sst [smem:[#allocation42_spill]] %s4092_s26  ;;  %v4114_v34 = vstv %s7490_s7 }
  0x85   :  { %s4116_s26 = sld [smem:[#allocation2 + $0x1d]]  ;;  %s7498_s28 = sld [smem:[#allocation50_spill]]  ;;  %v4121_v37 = vstv %s3941_s12 }
  0x86   :  { %s4134_s7 = sld [smem:[#allocation2 + $0x2c]]  ;;  %s4154_s9 = sld [smem:[#allocation2 + $0x2e]]  ;;  %v4230_v51 = vstv %s3997_s18 }
  0x87   :  { %588 = vrot.lane.b32.xlu1 %v3730_v2, %s7475_s20  ;;  %586 = vrot.lane.b32.xlu0 %v3735_v3, %s7475_s20  ;;  %7517 = vst [vmem:[#allocation71_spill] sm:$0xff] %v4230_v51  ;;  %s4254_s18 = sld [smem:[#allocation2 + $0x27]]  ;;  %s7529_s13 = smov 96  }
  0x88   :  { %v4111_v33 = vstv %s7489_s2  ;;  %s4132_s2 = sld [smem:[#allocation2 + $0x2b]]  ;;  %v4192_v13 = vstv %s7502_s6  ;;  %s4240_s6 = sld [smem:[#allocation2 + $0x26]] }
  0x89   :  { %v4163_v8 = vstv %s3961_s11  ;;  %s4186_s11 = sld [smem:[#allocation2 + $0x14]]  ;;  %7508 = vst [vmem:[#allocation67_spill] sm:$0xff] %v4192_v13  ;;  %s7530_s17 = sld [smem:[#allocation42_spill]] }
  0x8a   :  { %7477 = sst [smem:[#allocation52_spill]] %s3969_s19  ;;  %s3988_s19 = sld [smem:[#allocation2 + $0x82]] }
  0x8b   :  { %2097 = vrot.lane.b32.xlu1 %v3898_v42, %s7475_s20  ;;  %2095 = vrot.lane.b32.xlu0 %v3903_v43, %s7475_s20  ;;  %s4007_s20 = sld [smem:[#allocation2 + $0x91]]  ;;  %s7501_s12 = sld [smem:[#allocation52_spill]]  ;;  %v4160_v4 = vstv %s7498_s28 }
  0x8c   :  { %s7514_s28 = sld [smem:[#allocation59_spill]]  ;;  %v4328_v26 = vstv %s4134_s7  ;;  %v4350_v24 = vstv %s4154_s9  ;;  %s4364_s8 = sld [smem:[#allocation2 + $0x1b]] }
  0x8d   :  { %7541 = vst [vmem:[#allocation87_spill] sm:$0xff] %v4328_v26  ;;  %7546 = vst [vmem:[#allocation91_spill] sm:$0xff] %v4350_v24  ;;  %s4362_s7 = sld [smem:[#allocation2 + $0x1a]]  ;;  %s4370_s9 = sld [smem:[#allocation2 + $0x1c]]  ;;  %v4413_v26 = vmul.f32 %v3903_v43, %v4236_v16  ;;  %v4434_v16 = vmul.f32 %v3903_v43, %v4290_v31  ;;  %v4438_v24 = vmul.f32 %v3898_v42, %v4290_v31 }
  0x8e   :  { %s4372_s3 = sld [smem:[#allocation2 + $0x1d]]  ;;  %s7572_s21 = sld [smem:[#allocation27_spill]] }
  0x8f   :  { %630 = vrot.lane.b32.xlu1 %v3730_v2, %s7483_s22  ;;  %628 = vrot.lane.b32.xlu0 %v3735_v3, %s7483_s22  ;;  %7506 = sst [smem:[#allocation43_spill]] %s4186_s11  ;;  %s7554_s11 = smov 95   ;;  %7561 = vst [vmem:[#allocation99_spill] sm:$0xff] %v4413_v26  ;;  %7565 = vst [vmem:[#allocation103_spill] sm:$0xff] %v4434_v16 }
  0x90   :  { %v4198_v7 = vstv %s3988_s19  ;;  %s4222_s19 = sld [smem:[#allocation2 + $0x17]]  ;;  %7567 = vst [vmem:[#allocation104_spill] sm:$0xff] %v4438_v24  ;;  %s7573_s0 = sld [smem:[#allocation28_spill]] }
  0x91   :  { %v4179_v20 = vstv %s7501_s12  ;;  %7510 = vst [vmem:[#allocation69_spill] sm:$0xff] %v4198_v7  ;;  %v4233_v50 = vstv %s4007_s20  ;;  %s4238_s12 = sld [smem:[#allocation2 + $0x25]]  ;;  %s4256_s20 = sld [smem:[#allocation2 + $0x28]] }
  0x92   :  { %7504 = vst [vmem:[#allocation64_spill] sm:$0xff] %v4179_v20  ;;  %7518 = vst [vmem:[#allocation72_spill] sm:$0xff] %v4233_v50  ;;  %v4252_v48 = vstv %s7514_s28  ;;  %s4293_s28 = sld [smem:[#allocation2 + $0x37]]  ;;  %7551 = sst [smem:[#allocation51_spill]] %s4364_s8 }
  0x93   :  { %2139 = vrot.lane.b32.xlu1 %v3898_v42, %s7483_s22  ;;  %2137 = vrot.lane.b32.xlu0 %v3903_v43, %s7483_s22  ;;  %s4100_s22 = sld [smem:[#allocation2 + $0x1b]]  ;;  %v4303_v28 = vmul.f32 %v4252_v48, %v3735_v3  ;;  %v4307_v27 = vmul.f32 %v4252_v48, %v3730_v2  ;;  %7550 = sst [smem:[#allocation50_spill]] %s4362_s7  ;;  %v4430_v38 = vmul.f32 %v3898_v42, %v4252_v48 }
  0x94   :  { %7552 = sst [smem:[#allocation52_spill]] %s4370_s9  ;;  %s7580_s9 = sld [smem:[#allocation31_spill]] }
  0x95   :  { %7535 = vst [vmem:[#allocation83_spill] sm:$0xff] %v4303_v28  ;;  %7536 = vst [vmem:[#allocation84_spill] sm:$0xff] %v4307_v27  ;;  %v4322_v28 = vstv %s4118_s27  ;;  %v4325_v27 = vstv %s4132_s2  ;;  %s4352_s27 = sld [smem:[#allocation2 + $0x18]]  ;;  %s4354_s2 = sld [smem:[#allocation2 + $0x19]] }
  0x96   :  { %7539 = vst [vmem:[#allocation85_spill] sm:$0xff] %v4322_v28  ;;  %7540 = vst [vmem:[#allocation86_spill] sm:$0xff] %v4325_v27  ;;  %7553 = sst [smem:[#allocation53_spill]] %s4372_s3  ;;  %v4421_v28 = vmul.f32 %v3903_v43, %v4252_v48  ;;  %s7577_s3 = sld [smem:[#allocation30_spill]] }
  0x97   :  { %672 = vrot.lane.b32.xlu1 %v3730_v2, %s7499_s29  ;;  %670 = vrot.lane.b32.xlu0 %v3735_v3, %s7499_s29  ;;  %7564 = vst [vmem:[#allocation102_spill] sm:$0xff] %v4430_v38  ;;  %s7581_s8 = smov 94   ;;  %s7585_s7 = sld [smem:[#allocation32_spill]] }
  0x98   :  { %7563 = vst [vmem:[#allocation101_spill] sm:$0xff] %v4421_v28 }
  0x9a   :  { %v7594_v59 = vstv %s7580_s9  ;;  %s7610_s9 = sld [smem:[#allocation38_spill]] }
  0x9b   :  { %2181 = vrot.lane.b32.xlu1 %v3898_v42, %s7499_s29  ;;  %2179 = vrot.lane.b32.xlu0 %v3903_v43, %s7499_s29  ;;  %s4318_s29 = sld [smem:[#allocation2 + $0xb]]  ;;  %7547 = sst [smem:[#allocation48_spill]] %s4352_s27 }
  0x9c   :  { %7548 = sst [smem:[#allocation49_spill]] %s4354_s2  ;;  %s7574_s2 = sld [smem:[#allocation29_spill]]  ;;  %v7592_v36 = vstv %s7577_s3 }
  0x9d   :  { %v7596_v19 = vstv %s7585_s7  ;;  %s7607_s3 = smov 127   ;;  %s7611_s27 = sld [smem:[#allocation39_spill]] }
  0x9e   :  { %v7597_v21 = vmov %v7596_v19  ;;  %s5116_s7 = sld [smem:[#allocation2 + $0x52]] }
  0x9f   :  { %714 = vrot.lane.b32.xlu1 %v3730_v2, %s7529_s13  ;;  %712 = vrot.lane.b32.xlu0 %v3735_v3, %s7529_s13 }
  0xa1   :  { %v2006_v40 = vstv %s4318_s29  ;;  %s7566_s29 = sld [smem:[#allocation20_spill]] }
  0xa2   :  { %v4441_v28 = vmul.f32 %v3903_v43, %v2006_v40  ;;  %v4444_v62 = vmul.f32 %v3898_v42, %v2006_v40 }
  0xa3   :  { %2223 = vrot.lane.b32.xlu1 %v3898_v42, %s7529_s13  ;;  %2221 = vrot.lane.b32.xlu0 %v3903_v43, %s7529_s13 }
  0xa4   :  { %7568 = vst [vmem:[#allocation105_spill] sm:$0xff] %v4441_v28  ;;  %7570 = vst [vmem:[#allocation106_spill] sm:$0xff] %v4444_v62  ;;  %v7578_v62 = vstv %s7569_s23  ;;  %s7648_s23 = sld [smem:[#allocation62_spill]] }
  0xa5   :  { %v7579_v39 = vmov %v7578_v62 }
  0xa7   :  { %756 = vrot.lane.b32.xlu1 %v3730_v2, %s7554_s11  ;;  %754 = vrot.lane.b32.xlu0 %v3735_v3, %s7554_s11  ;;  %v7575_v26 = vstv %s7566_s29  ;;  %s7587_s29 = sld [smem:[#allocation33_spill]] }
  0xa8   :  { %v7576_v24 = vmov %v7575_v26 }
  0xa9   :  { %v164_v27 = vpop.permute.xlu1 %163  ;;  %v119_v41 = vpop.permute.xlu0 %118 }
  0xab   :  { %2265 = vrot.lane.b32.xlu1 %v3898_v42, %s7554_s11  ;;  %2263 = vrot.lane.b32.xlu0 %v3903_v43, %s7554_s11 }
  0xad   :  { %v166_v63 = vpop.permute.xlu1 %165  ;;  %v121_v16 = vpop.permute.xlu0 %120 }
  0xae   :  { %v168_v28 = vsel %vm167_vm0, %v164_v27, %v166_v63  ;;  %v169_v40 = vsel %vm167_vm0, %v166_v63, %v164_v27  ;;  %v125_v38 = vsel %vm124_vm1, %v119_v41, %v121_v16  ;;  %v126_v48 = vsel %vm124_vm1, %v121_v16, %v119_v41 }
  0xaf   :  { %v172_v31 = vmul.f32 %v7575_v26, %v168_v28  ;;  %v173_v25 = vmul.f32 %v7576_v24, %v169_v40  ;;  %v178_v30 = vmul.f32 %v7578_v62, %v168_v28  ;;  %v179_v27 = vmul.f32 %v7579_v39, %v169_v40  ;;  %798 = vrot.lane.b32.xlu1 %v3730_v2, %s7581_s8 }
  0xb0   :  { %v7582_v63 = vstv %s7571_s14  ;;  %v7584_v16 = vstv %s7572_s21  ;;  %796 = vrot.lane.b32.xlu0 %v3735_v3, %s7581_s8  ;;  %v7588_v2 = vstv %s7573_s0  ;;  %v129_v50 = vmul.f32 %v7592_v36, %v125_v38  ;;  %s7598_s14 = sld [smem:[#allocation34_spill]]  ;;  %s7601_s0 = sld [smem:[#allocation35_spill]] }
  0xb1   :  { %v184_v45 = vmul.f32 %v7582_v63, %v168_v28  ;;  %v7583_v29 = vmov %v7582_v63  ;;  %v190_v26 = vmul.f32 %v7584_v16, %v168_v28  ;;  %v7586_v47 = vmov %v7584_v16  ;;  %v209_v13 = vpop.permute.xlu1 %208  ;;  %v207_v14 = vpop.permute.xlu0 %206  ;;  %s7609_s21 = sld [smem:[#allocation37_spill]] }
  0xb2   :  { %v185_v41 = vmul.f32 %v7583_v29, %v169_v40  ;;  %v191_v24 = vmul.f32 %v7586_v47, %v169_v40  ;;  %v196_v39 = vmul.f32 %v7588_v2, %v168_v28  ;;  %v7589_v62 = vmov %v7588_v2 }
  0xb3   :  { %v197_v63 = vmul.f32 %v7589_v62, %v169_v40  ;;  %v7590_v29 = vstv %s7574_s2  ;;  %v7593_v47 = vmov %v7592_v36  ;;  %v135_v7 = vmul.f32 %v7594_v59, %v125_v38  ;;  %2307 = vrot.lane.b32.xlu1 %v3898_v42, %s7581_s8  ;;  %s7602_s2 = sld [smem:[#allocation107_spill]] }
  0xb4   :  { %v202_v49 = vmul.f32 %v7590_v29, %v168_v28  ;;  %v7591_v61 = vmov %v7590_v29  ;;  %v130_v51 = vmul.f32 %v7593_v47, %v126_v48  ;;  %v7595_v3 = vmov %v7594_v59  ;;  %2305 = vrot.lane.b32.xlu0 %v3903_v43, %s7581_s8 }
  0xb5   :  { %v203_v16 = vmul.f32 %v7591_v61, %v169_v40  ;;  %v136_v18 = vmul.f32 %v7595_v3, %v126_v48  ;;  %v141_v20 = vmul.f32 %v7596_v19, %v125_v38  ;;  %v142_v2 = vmul.f32 %v7597_v21, %v126_v48 }
  0xb6   :  { %v7599_v62 = vstv %s7587_s29  ;;  %v131_v59 = vadd.f32 %v129_v50, %v4048_v1  ;;  %v132_v36 = vadd.f32 %v130_v51, %v4051_v9  ;;  %v137_v40 = vadd.f32 %v135_v7, %v4054_v15  ;;  %s7619_s29 = sld [smem:[#allocation40_spill]] }
  0xb7   :  { %v147_v28 = vmul.f32 %v7599_v62, %v125_v38  ;;  %v7600_v29 = vmov %v7599_v62  ;;  %v138_v19 = vadd.f32 %v136_v18, %v4065_v10  ;;  %v143_v47 = vadd.f32 %v141_v20, %v4068_v12 }
  0xb8   :  { %v148_v61 = vmul.f32 %v7600_v29, %v126_v48  ;;  %v144_v42 = vadd.f32 %v142_v2, %v4071_v17  ;;  %v7603_v1 = vstv %s7598_s14  ;;  %v7605_v10 = vstv %s7601_s0  ;;  %s7608_s0 = sld [smem:[#allocation36_spill]]  ;;  %s7621_s14 = sld [smem:[#allocation41_spill]] }
  0xb9   :  { %v4517_v21 = vld [vmem:[%s7602_s2 + $0x28] sm:$0xff]  ;;  %v149_v50 = vadd.f32 %v147_v28, %v4083_v0  ;;  %v4526_v7 = vld [vmem:[%s7602_s2 + $0x20] sm:$0xff]  ;;  %v153_v43 = vmul.f32 %v7603_v1, %v125_v38  ;;  %v7604_v9 = vmov %v7603_v1  ;;  %v159_v18 = vmul.f32 %v7605_v10, %v125_v38  ;;  %v250_v1 = vpop.permute.xlu0 %249 }
  0xba   :  { %v150_v51 = vadd.f32 %v148_v61, %v4086_v11  ;;  %v154_v15 = vmul.f32 %v7604_v9, %v126_v48  ;;  %v7606_v3 = vmov %v7605_v10  ;;  %v174_v12 = vadd.f32 %v172_v31, %v131_v59  ;;  %878 = vrot.lane.b32.xlu1 %v4517_v21, %s7607_s3  ;;  %v252_v61 = vpop.permute.xlu1 %251  ;;  %876 = vrot.lane.b32.xlu0 %v4526_v7, %s7607_s3 }
  0xbb   :  { %v160_v62 = vmul.f32 %v7606_v3, %v126_v48  ;;  %v175_v20 = vadd.f32 %v173_v25, %v132_v36  ;;  %v180_v17 = vadd.f32 %v178_v30, %v137_v40  ;;  %v181_v2 = vadd.f32 %v179_v27, %v138_v19  ;;  %v4547_v25 = vld [vmem:[%s7602_s2 + $0x58] sm:$0xff] }
  0xbc   :  { %v155_v0 = vadd.f32 %v153_v43, %v4141_v54  ;;  %v156_v11 = vadd.f32 %v154_v15, %v4144_v55  ;;  %v161_v28 = vadd.f32 %v159_v18, %v4210_v6  ;;  %v186_v38 = vadd.f32 %v184_v45, %v143_v47 }
  0xbd   :  { %v162_v29 = vadd.f32 %v160_v62, %v4214_v5  ;;  %v187_v54 = vadd.f32 %v185_v41, %v144_v42  ;;  %v192_v55 = vadd.f32 %v190_v26, %v149_v50  ;;  %v193_v6 = vadd.f32 %v191_v24, %v150_v51  ;;  %v4552_v5 = vld [vmem:[%s7602_s2 + $0x50] sm:$0xff] }
  0xbe   :  { %v198_v30 = vadd.f32 %v196_v39, %v155_v0  ;;  %v199_v48 = vadd.f32 %v197_v63, %v156_v11  ;;  %v204_v31 = vadd.f32 %v202_v49, %v161_v28  ;;  %v211_v45 = vsel %vm210_vm2, %v207_v14, %v209_v13  ;;  %2387 = vrot.lane.b32.xlu1 %v4547_v25, %s7607_s3 }
  0xbf   :  { %v205_v27 = vadd.f32 %v203_v16, %v162_v29  ;;  %v212_v41 = vsel %vm210_vm2, %v209_v13, %v207_v14  ;;  %v254_v26 = vsel %vm253_vm3, %v250_v1, %v252_v61  ;;  %v255_v24 = vsel %vm253_vm3, %v252_v61, %v250_v1  ;;  %2385 = vrot.lane.b32.xlu0 %v4552_v5, %s7607_s3  ;;  %v295_v29 = vpop.permute.xlu1 %294  ;;  %v293_v61 = vpop.permute.xlu0 %292  ;;  %s7622_s3 = smov 126  }
  0xc0   :  { %v7612_v39 = vstv %s7608_s0  ;;  %v7614_v16 = vstv %s7609_s21  ;;  %v7616_v13 = vstv %s7610_s9  ;;  %v7618_v50 = vstv %s7611_s27  ;;  %s7627_s27 = smov 112   ;;  %s7628_s0 = smov 111  }
  0xc1   :  { %v215_v63 = vmul.f32 %v7612_v39, %v211_v45  ;;  %v7613_v59 = vmov %v7612_v39  ;;  %v221_v36 = vmul.f32 %v7614_v16, %v211_v45  ;;  %v7615_v40 = vmov %v7614_v16  ;;  %s7635_s21 = smov 110   ;;  %s5118_s9 = sld [smem:[#allocation2 + $0x53]] }
  0xc2   :  { %v216_v49 = vmul.f32 %v7613_v59, %v212_v41  ;;  %v222_v19 = vmul.f32 %v7615_v40, %v212_v41  ;;  %v227_v14 = vmul.f32 %v7616_v13, %v211_v45  ;;  %v7617_v47 = vmov %v7616_v13  ;;  %920 = vrot.lane.b32.xlu1 %v4517_v21, %s7622_s3 }
  0xc3   :  { %v228_v42 = vmul.f32 %v7617_v47, %v212_v41  ;;  %v233_v51 = vmul.f32 %v7618_v50, %v211_v45  ;;  %v7620_v43 = vmov %v7618_v50  ;;  %v217_v15 = vadd.f32 %v215_v63, %v174_v12  ;;  %918 = vrot.lane.b32.xlu0 %v4526_v7, %s7622_s3 }
  0xc4   :  { %v234_v9 = vmul.f32 %v7620_v43, %v212_v41  ;;  %v218_v10 = vadd.f32 %v216_v49, %v175_v20  ;;  %v223_v18 = vadd.f32 %v221_v36, %v180_v17  ;;  %v224_v3 = vadd.f32 %v222_v19, %v181_v2  ;;  %v336_v43 = vpop.permute.xlu0 %335 }
  0xc5   :  { %v229_v62 = vadd.f32 %v227_v14, %v186_v38  ;;  %v230_v0 = vadd.f32 %v228_v42, %v187_v54  ;;  %v235_v11 = vadd.f32 %v233_v51, %v192_v55  ;;  %v7623_v1 = vstv %s7619_s29  ;;  %v338_v51 = vpop.permute.xlu1 %337  ;;  %s5202_s29 = sld [smem:[#allocation2 + $0x60]] }
  0xc6   :  { %v236_v28 = vadd.f32 %v234_v9, %v193_v6  ;;  %v239_v39 = vmul.f32 %v7623_v1, %v211_v45  ;;  %v7624_v59 = vmov %v7623_v1  ;;  %v7625_v40 = vstv %s7621_s14  ;;  %2429 = vrot.lane.b32.xlu1 %v4547_v25, %s7622_s3  ;;  %s5204_s14 = sld [smem:[#allocation2 + $0x61]] }
  0xc7   :  { %v240_v16 = vmul.f32 %v7624_v59, %v212_v41  ;;  %v245_v13 = vmul.f32 %v7625_v40, %v211_v45  ;;  %v7626_v47 = vmov %v7625_v40  ;;  %v258_v20 = vmul.f32 %v4098_v22, %v254_v26  ;;  %2427 = vrot.lane.b32.xlu0 %v4552_v5, %s7622_s3  ;;  %s5206_s3 = sld [smem:[#allocation2 + $0x62]] }
  0xc8   :  { %v246_v12 = vmul.f32 %v7626_v47, %v212_v41  ;;  %v259_v17 = vmul.f32 %v4098_v22, %v255_v24  ;;  %v264_v2 = vmul.f32 %v4105_v23, %v254_v26  ;;  %v265_v38 = vmul.f32 %v4105_v23, %v255_v24 }
  0xc9   :  { %v241_v54 = vadd.f32 %v239_v39, %v198_v30  ;;  %v242_v55 = vadd.f32 %v240_v16, %v199_v48  ;;  %v247_v6 = vadd.f32 %v245_v13, %v204_v31  ;;  %v260_v49 = vadd.f32 %v258_v20, %v217_v15 }
  0xca   :  { %v248_v63 = vadd.f32 %v246_v12, %v205_v27  ;;  %v261_v36 = vadd.f32 %v259_v17, %v218_v10  ;;  %v266_v45 = vadd.f32 %v264_v2, %v223_v18  ;;  %v267_v19 = vadd.f32 %v265_v38, %v224_v3  ;;  %962 = vrot.lane.b32.xlu1 %v4517_v21, %s7627_s27 }
  0xcb   :  { %v270_v41 = vmul.f32 %v4108_v32, %v254_v26  ;;  %v271_v14 = vmul.f32 %v4108_v32, %v255_v24  ;;  %v276_v42 = vmul.f32 %v4111_v33, %v254_v26  ;;  %v277_v50 = vmul.f32 %v4111_v33, %v255_v24  ;;  %960 = vrot.lane.b32.xlu0 %v4526_v7, %s7627_s27 }
  0xcc   :  { %v282_v30 = vmul.f32 %v4114_v34, %v254_v26  ;;  %v283_v48 = vmul.f32 %v4114_v34, %v255_v24  ;;  %v288_v31 = vmul.f32 %v4121_v37, %v254_v26  ;;  %v289_v27 = vmul.f32 %v4121_v37, %v255_v24 }
  0xcd   :  { %v272_v9 = vadd.f32 %v270_v41, %v229_v62  ;;  %v273_v15 = vadd.f32 %v271_v14, %v230_v0  ;;  %v278_v10 = vadd.f32 %v276_v42, %v235_v11  ;;  %v279_v18 = vadd.f32 %v277_v50, %v236_v28  ;;  %v379_v41 = vpop.permute.xlu0 %378 }
  0xce   :  { %v284_v3 = vadd.f32 %v282_v30, %v241_v54  ;;  %v285_v1 = vadd.f32 %v283_v48, %v242_v55  ;;  %v290_v39 = vadd.f32 %v288_v31, %v247_v6  ;;  %v291_v59 = vadd.f32 %v289_v27, %v248_v63  ;;  %2471 = vrot.lane.b32.xlu1 %v4547_v25, %s7627_s27  ;;  %v381_v63 = vpop.permute.xlu1 %380 }
  0xcf   :  { %v297_v16 = vsel %vm296_vm4, %v293_v61, %v295_v29  ;;  %v298_v26 = vsel %vm296_vm4, %v295_v29, %v293_v61  ;;  %v340_v24 = vsel %vm339_vm5, %v336_v43, %v338_v51  ;;  %v341_v62 = vsel %vm339_vm5, %v338_v51, %v336_v43  ;;  %2469 = vrot.lane.b32.xlu0 %v4552_v5, %s7627_s27  ;;  %s5208_s27 = sld [smem:[#allocation2 + $0x63]] }
  0xd0   :  { %v301_v0 = vmul.f32 %v4124_v44, %v297_v16  ;;  %v302_v11 = vmul.f32 %v4124_v44, %v298_v26  ;;  %v307_v28 = vmul.f32 %v4127_v52, %v297_v16  ;;  %v308_v40 = vmul.f32 %v4127_v52, %v298_v26 }
  0xd1   :  { %v313_v13 = vmul.f32 %v4130_v53, %v297_v16  ;;  %v314_v29 = vmul.f32 %v4130_v53, %v298_v26  ;;  %v319_v61 = vmul.f32 %v4147_v56, %v297_v16  ;;  %v320_v47 = vmul.f32 %v4147_v56, %v298_v26 }
  0xd2   :  { %v303_v12 = vadd.f32 %v301_v0, %v260_v49  ;;  %v304_v20 = vadd.f32 %v302_v11, %v261_v36  ;;  %v309_v17 = vadd.f32 %v307_v28, %v266_v45  ;;  %v310_v2 = vadd.f32 %v308_v40, %v267_v19  ;;  %1004 = vrot.lane.b32.xlu1 %v4517_v21, %s7628_s0  ;;  %v7630_v0 = vld [vmem:[#allocation64_spill] sm:$0xff]  ;;  %v424_v40 = vpop.permute.xlu1 %423 }
  0xd3   :  { %v315_v38 = vadd.f32 %v313_v13, %v272_v9  ;;  %v316_v54 = vadd.f32 %v314_v29, %v273_v15  ;;  %v321_v55 = vadd.f32 %v319_v61, %v278_v10  ;;  %v322_v6 = vadd.f32 %v320_v47, %v279_v18  ;;  %1002 = vrot.lane.b32.xlu0 %v4526_v7, %s7628_s0  ;;  %v422_v13 = vpop.permute.xlu0 %421 }
  0xd4   :  { %v325_v14 = vmul.f32 %v4150_v57, %v297_v16  ;;  %v326_v42 = vmul.f32 %v4150_v57, %v298_v26  ;;  %v331_v49 = vmul.f32 %v4157_v60, %v297_v16  ;;  %v332_v36 = vmul.f32 %v4157_v60, %v298_v26 }
  0xd5   :  { %v344_v45 = vmul.f32 %v4160_v4, %v340_v24  ;;  %v345_v19 = vmul.f32 %v4160_v4, %v341_v62  ;;  %v350_v50 = vmul.f32 %v4163_v8, %v340_v24  ;;  %v351_v30 = vmul.f32 %v4163_v8, %v341_v62 }
  0xd6   :  { %v327_v48 = vadd.f32 %v325_v14, %v284_v3  ;;  %v328_v31 = vadd.f32 %v326_v42, %v285_v1  ;;  %v333_v27 = vadd.f32 %v331_v49, %v290_v39  ;;  %v334_v51 = vadd.f32 %v332_v36, %v291_v59  ;;  %v7629_v1 = vld [vmem:[#allocation63_spill] sm:$0xff]  ;;  %2513 = vrot.lane.b32.xlu1 %v4547_v25, %s7628_s0  ;;  %v7632_v49 = vld [vmem:[#allocation66_spill] sm:$0xff] }
  0xd7   :  { %v346_v43 = vadd.f32 %v344_v45, %v303_v12  ;;  %v347_v9 = vadd.f32 %v345_v19, %v304_v20  ;;  %v352_v15 = vadd.f32 %v350_v50, %v309_v17  ;;  %v353_v10 = vadd.f32 %v351_v30, %v310_v2  ;;  %2511 = vrot.lane.b32.xlu0 %v4552_v5, %s7628_s0  ;;  %v7633_v19 = vld [vmem:[#allocation67_spill] sm:$0xff]  ;;  %s5214_s0 = sld [smem:[#allocation2 + $0x64]] }
  0xd8   :  { %v356_v18 = vmul.f32 %v4166_v35, %v340_v24  ;;  %v357_v16 = vmul.f32 %v4166_v35, %v341_v62  ;;  %v362_v26 = vmul.f32 %v4173_v58, %v340_v24  ;;  %v363_v3 = vmul.f32 %v4173_v58, %v341_v62 }
  0xd9   :  { %v368_v39 = vmul.f32 %v7629_v1, %v340_v24  ;;  %v369_v59 = vmul.f32 %v7629_v1, %v341_v62  ;;  %v374_v11 = vmul.f32 %v7630_v0, %v340_v24  ;;  %v375_v28 = vmul.f32 %v7630_v0, %v341_v62 }
  0xda   :  { %v358_v29 = vadd.f32 %v356_v18, %v315_v38  ;;  %v359_v61 = vadd.f32 %v357_v16, %v316_v54  ;;  %v364_v47 = vadd.f32 %v362_v26, %v321_v55  ;;  %v365_v12 = vadd.f32 %v363_v3, %v322_v6  ;;  %v7631_v55 = vld [vmem:[#allocation65_spill] sm:$0xff]  ;;  %1046 = vrot.lane.b32.xlu1 %v4517_v21, %s7635_s21 }
  0xdb   :  { %v370_v20 = vadd.f32 %v368_v39, %v327_v48  ;;  %v371_v17 = vadd.f32 %v369_v59, %v328_v31  ;;  %v376_v2 = vadd.f32 %v374_v11, %v333_v27  ;;  %v377_v14 = vadd.f32 %v375_v28, %v334_v51  ;;  %v7634_v48 = vld [vmem:[#allocation68_spill] sm:$0xff]  ;;  %1044 = vrot.lane.b32.xlu0 %v4526_v7, %s7635_s21  ;;  %v7636_v59 = vld [vmem:[#allocation69_spill] sm:$0xff] }
  0xdc   :  { %v383_v24 = vsel %vm382_vm6, %v379_v41, %v381_v63  ;;  %v384_v62 = vsel %vm382_vm6, %v381_v63, %v379_v41  ;;  %v426_v38 = vsel %vm425_vm7, %v422_v13, %v424_v40  ;;  %v427_v54 = vsel %vm425_vm7, %v424_v40, %v422_v13  ;;  %v7637_v40 = vld [vmem:[#allocation70_spill] sm:$0xff] }
  0xdd   :  { %v387_v6 = vmul.f32 %v7631_v55, %v383_v24  ;;  %v388_v42 = vmul.f32 %v7631_v55, %v384_v62  ;;  %v393_v36 = vmul.f32 %v7632_v49, %v383_v24  ;;  %v394_v45 = vmul.f32 %v7632_v49, %v384_v62 }
  0xde   :  { %v399_v50 = vmul.f32 %v7633_v19, %v383_v24  ;;  %v400_v30 = vmul.f32 %v7633_v19, %v384_v62  ;;  %v405_v63 = vmul.f32 %v7634_v48, %v383_v24  ;;  %v406_v41 = vmul.f32 %v7634_v48, %v384_v62  ;;  %v7638_v19 = vld [vmem:[#allocation71_spill] sm:$0xff]  ;;  %2555 = vrot.lane.b32.xlu1 %v4547_v25, %s7635_s21 }
  0xdf   :  { %v389_v31 = vadd.f32 %v387_v6, %v346_v43  ;;  %v390_v27 = vadd.f32 %v388_v42, %v347_v9  ;;  %v395_v51 = vadd.f32 %v393_v36, %v352_v15  ;;  %v396_v18 = vadd.f32 %v394_v45, %v353_v10  ;;  %v7639_v15 = vld [vmem:[#allocation72_spill] sm:$0xff]  ;;  %v505_v42 = vpop.permute.xlu1 %504  ;;  %v503_v36 = vpop.permute.xlu0 %502  ;;  %2553 = vrot.lane.b32.xlu0 %v4552_v5, %s7635_s21  ;;  %s5216_s21 = sld [smem:[#allocation2 + $0x65]] }
  0xe0   :  { %v401_v16 = vadd.f32 %v399_v50, %v358_v29  ;;  %v402_v26 = vadd.f32 %v400_v30, %v359_v61  ;;  %v407_v3 = vadd.f32 %v405_v63, %v364_v47  ;;  %v408_v39 = vadd.f32 %v406_v41, %v365_v12  ;;  %v7640_v30 = vld [vmem:[#allocation73_spill] sm:$0xff] }
  0xe1   :  { %v411_v11 = vmul.f32 %v7636_v59, %v383_v24  ;;  %v412_v28 = vmul.f32 %v7636_v59, %v384_v62  ;;  %v417_v13 = vmul.f32 %v7637_v40, %v383_v24  ;;  %v418_v48 = vmul.f32 %v7637_v40, %v384_v62 }
  0xe2   :  { %v430_v43 = vmul.f32 %v7638_v19, %v426_v38  ;;  %v431_v9 = vmul.f32 %v7638_v19, %v427_v54  ;;  %v436_v10 = vmul.f32 %v7639_v15, %v426_v38  ;;  %v437_v6 = vmul.f32 %v7639_v15, %v427_v54  ;;  %v7641_v15 = vld [vmem:[#allocation74_spill] sm:$0xff]  ;;  %1088 = vrot.lane.b32.xlu1 %v4517_v21, %s7529_s13 }
  0xe3   :  { %v413_v29 = vadd.f32 %v411_v11, %v370_v20  ;;  %v414_v61 = vadd.f32 %v412_v28, %v371_v17  ;;  %v419_v47 = vadd.f32 %v417_v13, %v376_v2  ;;  %v420_v12 = vadd.f32 %v418_v48, %v377_v14  ;;  %v7642_v17 = vld [vmem:[#allocation75_spill] sm:$0xff]  ;;  %v7643_v48 = vld [vmem:[#allocation76_spill] sm:$0xff]  ;;  %1086 = vrot.lane.b32.xlu0 %v4526_v7, %s7529_s13  ;;  %v547_v59 = vpop.permute.xlu1 %546 }
  0xe4   :  { %v432_v24 = vadd.f32 %v430_v43, %v389_v31  ;;  %v433_v62 = vadd.f32 %v431_v9, %v390_v27  ;;  %v438_v45 = vadd.f32 %v436_v10, %v395_v51  ;;  %v439_v50 = vadd.f32 %v437_v6, %v396_v18  ;;  %v7644_v6 = vld [vmem:[#allocation77_spill] sm:$0xff] }
  0xe5   :  { %v442_v63 = vmul.f32 %v7640_v30, %v426_v38  ;;  %v443_v41 = vmul.f32 %v7640_v30, %v427_v54  ;;  %v448_v19 = vmul.f32 %v7641_v15, %v426_v38  ;;  %v449_v20 = vmul.f32 %v7641_v15, %v427_v54  ;;  %v7645_v15 = vld [vmem:[#allocation78_spill] sm:$0xff]  ;;  %v7646_v30 = vld [vmem:[#allocation79_spill] sm:$0xff] }
  0xe6   :  { %v454_v2 = vmul.f32 %v7642_v17, %v426_v38  ;;  %v455_v14 = vmul.f32 %v7642_v17, %v427_v54  ;;  %v460_v11 = vmul.f32 %v7643_v48, %v426_v38  ;;  %v461_v28 = vmul.f32 %v7643_v48, %v427_v54  ;;  %v7647_v48 = vld [vmem:[#allocation80_spill] sm:$0xff]  ;;  %2597 = vrot.lane.b32.xlu1 %v4547_v25, %s7529_s13 }
  0xe7   :  { %v444_v31 = vadd.f32 %v442_v63, %v401_v16  ;;  %v445_v27 = vadd.f32 %v443_v41, %v402_v26  ;;  %v450_v51 = vadd.f32 %v448_v19, %v407_v3  ;;  %v451_v18 = vadd.f32 %v449_v20, %v408_v39  ;;  %v545_v16 = vpop.permute.xlu0 %544  ;;  %v7649_v19 = vld [vmem:[#allocation81_spill] sm:$0xff]  ;;  %v7650_v3 = vld [vmem:[#allocation82_spill] sm:$0xff]  ;;  %2595 = vrot.lane.b32.xlu0 %v4552_v5, %s7529_s13  ;;  %s5074_s13 = sld [smem:[#allocation2 + $0x4e]] }
  0xe8   :  { %v456_v13 = vadd.f32 %v454_v2, %v413_v29  ;;  %v457_v43 = vadd.f32 %v455_v14, %v414_v61  ;;  %v462_v9 = vadd.f32 %v460_v11, %v419_v47  ;;  %v463_v10 = vadd.f32 %v461_v28, %v420_v12  ;;  %v7651_v29 = vld [vmem:[#allocation83_spill] sm:$0xff]  ;;  %v7652_v47 = vld [vmem:[#allocation84_spill] sm:$0xff]  ;;  %v7656_v63 = vld [vmem:[#allocation94_spill] sm:$0xff] }
  0xe9   :  { %v470_v17 = vadd.f32 %v7644_v6, %v432_v24  ;;  %v471_v38 = vadd.f32 %v7645_v15, %v433_v62  ;;  %v476_v54 = vadd.f32 %v7646_v30, %v438_v45  ;;  %v477_v40 = vadd.f32 %v7647_v48, %v439_v50  ;;  %v7653_v15 = vld [vmem:[#allocation88_spill] sm:$0xff]  ;;  %v7654_v62 = vld [vmem:[#allocation89_spill] sm:$0xff] }
  0xea   :  { %v482_v26 = vadd.f32 %v7649_v19, %v444_v31  ;;  %v483_v39 = vadd.f32 %v7650_v3, %v445_v27  ;;  %v488_v61 = vadd.f32 %v7651_v29, %v450_v51  ;;  %v489_v12 = vadd.f32 %v7652_v47, %v451_v18  ;;  %v7655_v50 = vld [vmem:[#allocation93_spill] sm:$0xff]  ;;  %1130 = vrot.lane.b32.xlu1 %v4517_v21, %s7554_s11 }
  0xeb   :  { %v494_v24 = vadd.f32 %v7653_v15, %v456_v13  ;;  %v495_v45 = vadd.f32 %v7654_v62, %v457_v43  ;;  %v500_v30 = vadd.f32 %v7655_v50, %v462_v9  ;;  %v501_v41 = vadd.f32 %v7656_v63, %v463_v10  ;;  %1128 = vrot.lane.b32.xlu0 %v4526_v7, %s7554_s11 }
  0xec   :  { %v506_v20 = vsel %vm124_vm1, %v503_v36, %v505_v42  ;;  %v507_v2 = vsel %vm124_vm1, %v505_v42, %v503_v36  ;;  %v548_v14 = vsel %vm167_vm0, %v545_v16, %v547_v59  ;;  %v549_v48 = vsel %vm167_vm0, %v547_v59, %v545_v16 }
  0xed   :  { %v7657_v11 = vstv %s7648_s23  ;;  %v7659_v51 = vstv %s4090_s1  ;;  %v7661_v9 = vstv %s7530_s17  ;;  %v7663_v42 = vstv %s4100_s22  ;;  %s7682_s22 = sld [smem:[#allocation43_spill]]  ;;  %s7730_s1 = sld [smem:[#allocation46_spill]] }
  0xee   :  { %v510_v28 = vmul.f32 %v7657_v11, %v506_v20  ;;  %v7658_v31 = vmov %v7657_v11  ;;  %v516_v18 = vmul.f32 %v7659_v51, %v506_v20  ;;  %v7660_v13 = vmov %v7659_v51  ;;  %v1638_v51 = vpop.permute.xlu0 %1637  ;;  %2639 = vrot.lane.b32.xlu1 %v4547_v25, %s7554_s11  ;;  %s5076_s17 = sld [smem:[#allocation2 + $0x4f]]  ;;  %s5258_s23 = sld [smem:[#allocation2 + $0x72]] }
  0xef   :  { %v511_v27 = vmul.f32 %v7658_v31, %v507_v2  ;;  %v517_v43 = vmul.f32 %v7660_v13, %v507_v2  ;;  %v522_v10 = vmul.f32 %v7661_v9, %v506_v20  ;;  %v7662_v6 = vmov %v7661_v9  ;;  %v1640_v31 = vpop.permute.xlu1 %1639  ;;  %2637 = vrot.lane.b32.xlu0 %v4552_v5, %s7554_s11  ;;  %s7757_s11 = sld [smem:[#allocation49_spill]] }
  0xf0   :  { %v523_v19 = vmul.f32 %v7662_v6, %v507_v2  ;;  %v528_v36 = vmul.f32 %v7663_v42, %v506_v20  ;;  %v7664_v3 = vmov %v7663_v42  ;;  %v512_v59 = vadd.f32 %v510_v28, %v470_v17  ;;  %v7670_v28 = vld [vmem:[#allocation86_spill] sm:$0xff] }
  0xf1   :  { %v529_v29 = vmul.f32 %v7664_v3, %v507_v2  ;;  %v513_v16 = vadd.f32 %v511_v27, %v471_v38  ;;  %v518_v47 = vadd.f32 %v516_v18, %v476_v54  ;;  %v519_v15 = vadd.f32 %v517_v43, %v477_v40  ;;  %v7669_v38 = vld [vmem:[#allocation85_spill] sm:$0xff] }
  0xf2   :  { %v524_v62 = vadd.f32 %v522_v10, %v482_v26  ;;  %v525_v50 = vadd.f32 %v523_v19, %v483_v39  ;;  %v530_v63 = vadd.f32 %v528_v36, %v488_v61  ;;  %v7665_v13 = vstv %s4102_s25  ;;  %v7675_v10 = vld [vmem:[#allocation87_spill] sm:$0xff]  ;;  %1172 = vrot.lane.b32.xlu1 %v4517_v21, %s7581_s8  ;;  %s7724_s25 = sld [smem:[#allocation44_spill]] }
  0xf3   :  { %v531_v11 = vadd.f32 %v529_v29, %v489_v12  ;;  %v534_v9 = vmul.f32 %v7665_v13, %v506_v20  ;;  %v7666_v6 = vmov %v7665_v13  ;;  %v7667_v3 = vstv %s4116_s26  ;;  %v7676_v29 = vld [vmem:[#allocation90_spill] sm:$0xff]  ;;  %1170 = vrot.lane.b32.xlu0 %v4526_v7, %s7581_s8  ;;  %s7725_s26 = sld [smem:[#allocation45_spill]] }
  0xf4   :  { %v535_v42 = vmul.f32 %v7666_v6, %v507_v2  ;;  %v540_v49 = vmul.f32 %v7667_v3, %v506_v20  ;;  %v7668_v55 = vmov %v7667_v3  ;;  %v552_v54 = vmul.f32 %v7669_v38, %v548_v14 }
  0xf5   :  { %v541_v17 = vmul.f32 %v7668_v55, %v507_v2  ;;  %v553_v40 = vmul.f32 %v7669_v38, %v549_v48  ;;  %v558_v27 = vmul.f32 %v7670_v28, %v548_v14  ;;  %v559_v26 = vmul.f32 %v7670_v28, %v549_v48 }
  0xf6   :  { %v536_v39 = vadd.f32 %v534_v9, %v494_v24  ;;  %v537_v61 = vadd.f32 %v535_v42, %v495_v45  ;;  %v542_v12 = vadd.f32 %v540_v49, %v500_v30  ;;  %v4766_v20 = vadd.f32 %v552_v54, %v512_v59  ;;  %v7677_v45 = vld [vmem:[#allocation91_spill] sm:$0xff]  ;;  %v7678_v59 = vld [vmem:[#allocation92_spill] sm:$0xff]  ;;  %2681 = vrot.lane.b32.xlu1 %v4547_v25, %s7581_s8 }
  0xf7   :  { %v543_v18 = vadd.f32 %v541_v17, %v501_v41  ;;  %v4768_v55 = vadd.f32 %v553_v40, %v513_v16  ;;  %v4770_v2 = vadd.f32 %v558_v27, %v518_v47  ;;  %v4772_v43 = vadd.f32 %v559_v26, %v519_v15  ;;  %v1682_v47 = vpop.permute.xlu1 %1681  ;;  %v1680_v15 = vpop.permute.xlu0 %1679  ;;  %2679 = vrot.lane.b32.xlu0 %v4552_v5, %s7581_s8  ;;  %v7697_v25 = vld [vmem:[#allocation13_spill] sm:$0xff]  ;;  %s5114_s8 = sld [smem:[#allocation2 + $0x51]] }
  0xf8   :  { %7671 = vst [vmem:[#allocation63_spill] sm:$0xff] %v4766_v20  ;;  %v564_v19 = vmul.f32 %v7675_v10, %v548_v14  ;;  %v565_v36 = vmul.f32 %v7675_v10, %v549_v48  ;;  %v570_v24 = vmul.f32 %v7676_v29, %v548_v14  ;;  %v571_v49 = vmul.f32 %v7676_v29, %v549_v48 }
  0xf9   :  { %7672 = vst [vmem:[#allocation64_spill] sm:$0xff] %v4768_v55  ;;  %7673 = vst [vmem:[#allocation77_spill] sm:$0xff] %v4770_v2  ;;  %v576_v30 = vmul.f32 %v7677_v45, %v548_v14  ;;  %v577_v41 = vmul.f32 %v7677_v45, %v549_v48  ;;  %v582_v13 = vmul.f32 %v7678_v59, %v548_v14  ;;  %v7688_v17 = vstv %s4170_s10  ;;  %s7733_s10 = sld [smem:[#allocation47_spill]] }
  0xfa   :  { %7674 = vst [vmem:[#allocation78_spill] sm:$0xff] %v4772_v43  ;;  %v583_v16 = vmul.f32 %v7678_v59, %v549_v48  ;;  %v4784_v9 = vadd.f32 %v564_v19, %v524_v62  ;;  %v4786_v6 = vadd.f32 %v565_v36, %v525_v50  ;;  %v4788_v42 = vadd.f32 %v570_v24, %v530_v63 }
  0xfb   :  { %v4790_v3 = vadd.f32 %v571_v49, %v531_v11  ;;  %v4794_v14 = vadd.f32 %v576_v30, %v536_v39  ;;  %v4796_v21 = vadd.f32 %v577_v41, %v537_v61  ;;  %v4798_v48 = vadd.f32 %v582_v13, %v542_v12  ;;  %v7696_v41 = vld [vmem:[#allocation12_spill] sm:$0xff]  ;;  %v1724_v5 = vpop.permute.xlu1 %1723 }
  0xfc   :  { %7679 = vst [vmem:[#allocation79_spill] sm:$0xff] %v4784_v9  ;;  %7680 = vst [vmem:[#allocation80_spill] sm:$0xff] %v4786_v6  ;;  %v4800_v62 = vadd.f32 %v583_v16, %v543_v18  ;;  %v1641_v50 = vsel %vm124_vm1, %v1638_v51, %v1640_v31  ;;  %v1642_v63 = vsel %vm124_vm1, %v1640_v31, %v1638_v51  ;;  %v7689_v40 = vmov %v7688_v17 }
  0xfd   :  { %7681 = vst [vmem:[#allocation81_spill] sm:$0xff] %v4788_v42  ;;  %7683 = vst [vmem:[#allocation82_spill] sm:$0xff] %v4790_v3  ;;  %v1683_v11 = vsel %vm167_vm0, %v1680_v15, %v1682_v47  ;;  %v1684_v7 = vsel %vm167_vm0, %v1682_v47, %v1680_v15  ;;  %v1645_v54 = vmul.f32 %v7688_v17, %v1641_v50  ;;  %v7690_v26 = vstv %s4184_s4  ;;  %v7698_v47 = vld [vmem:[#allocation14_spill] sm:$0xff]  ;;  %v7699_v17 = vld [vmem:[#allocation15_spill] sm:$0xff]  ;;  %s7756_s4 = sld [smem:[#allocation48_spill]] }
  0xfe   :  { %7684 = vst [vmem:[#allocation83_spill] sm:$0xff] %v4794_v14  ;;  %7685 = vst [vmem:[#allocation84_spill] sm:$0xff] %v4796_v21  ;;  %v1646_v27 = vmul.f32 %v7689_v40, %v1642_v63  ;;  %v1651_v39 = vmul.f32 %v7690_v26, %v1641_v50  ;;  %v7691_v61 = vmov %v7690_v26  ;;  %v7692_v18 = vstv %s7682_s22  ;;  %v7700_v26 = vld [vmem:[#allocation16_spill] sm:$0xff]  ;;  %v1722_v21 = vpop.permute.xlu0 %1721  ;;  %s5260_s22 = sld [smem:[#allocation2 + $0x73]] }
  0xff   :  { %7686 = vst [vmem:[#allocation88_spill] sm:$0xff] %v4798_v48  ;;  %7687 = vst [vmem:[#allocation89_spill] sm:$0xff] %v4800_v62  ;;  %v1652_v12 = vmul.f32 %v7691_v61, %v1642_v63  ;;  %v1657_v31 = vmul.f32 %v7692_v18, %v1641_v50  ;;  %v7693_v51 = vmov %v7692_v18  ;;  %v7694_v36 = vstv %s4200_s5  ;;  %v7701_v18 = vld [vmem:[#allocation17_spill] sm:$0xff]  ;;  %v7703_v62 = vld [vmem:[#allocation19_spill] sm:$0xff]  ;;  %s7760_s5 = sld [smem:[#allocation50_spill]] }
 0x100   :  { %v1658_v19 = vmul.f32 %v7693_v51, %v1642_v63  ;;  %v1663_v24 = vmul.f32 %v7694_v36, %v1641_v50  ;;  %v7695_v49 = vmov %v7694_v36  ;;  %v1647_v13 = vadd.f32 %v1645_v54, %v7696_v41  ;;  %v7702_v36 = vld [vmem:[#allocation18_spill] sm:$0xff] }
 0x101   :  { %v1664_v30 = vmul.f32 %v7695_v49, %v1642_v63  ;;  %v1648_v16 = vadd.f32 %v1646_v27, %v7697_v25  ;;  %v1653_v15 = vadd.f32 %v1651_v39, %v7698_v47  ;;  %v1654_v40 = vadd.f32 %v1652_v12, %v7699_v17 }
 0x102   :  { %v1659_v61 = vadd.f32 %v1657_v31, %v7700_v26  ;;  %v1660_v51 = vadd.f32 %v1658_v19, %v7701_v18  ;;  %v1665_v49 = vadd.f32 %v1663_v24, %v7702_v36  ;;  %v7704_v14 = vstv %s4202_s16  ;;  %v7712_v18 = vld [vmem:[#allocation21_spill] sm:$0xff]  ;;  %s7763_s16 = sld [smem:[#allocation51_spill]] }
 0x103   :  { %v1666_v48 = vadd.f32 %v1664_v30, %v7703_v62  ;;  %v1669_v54 = vmul.f32 %v7704_v14, %v1641_v50  ;;  %v7705_v41 = vmov %v7704_v14  ;;  %v7706_v25 = vstv %s4222_s19  ;;  %s7772_s19 = sld [smem:[#allocation52_spill]] }
 0x104   :  { %v1670_v27 = vmul.f32 %v7705_v41, %v1642_v63  ;;  %v1675_v39 = vmul.f32 %v7706_v25, %v1641_v50  ;;  %v7707_v47 = vmov %v7706_v25  ;;  %v7708_v31 = vstv %s4224_s30  ;;  %v7713_v41 = vld [vmem:[#allocation22_spill] sm:$0xff]  ;;  %v7714_v25 = vld [vmem:[#allocation23_spill] sm:$0xff]  ;;  %s7775_s30 = sld [smem:[#allocation53_spill]] }
 0x105   :  { %v1676_v12 = vmul.f32 %v7707_v47, %v1642_v63  ;;  %v1687_v19 = vmul.f32 %v7708_v31, %v1683_v11  ;;  %v7709_v17 = vmov %v7708_v31  ;;  %v7710_v62 = vstv %s4238_s12  ;;  %v7715_v63 = vld [vmem:[#allocation26_spill] sm:$0xff]  ;;  %s5018_s12 = sld [smem:[#allocation2 + $0x3c]] }
 0x106   :  { %v1688_v24 = vmul.f32 %v7709_v17, %v1684_v7  ;;  %v1693_v30 = vmul.f32 %v7710_v62, %v1683_v11  ;;  %v7711_v26 = vmov %v7710_v62  ;;  %v1671_v36 = vadd.f32 %v1669_v54, %v7712_v18 }
 0x107   :  { %v1694_v14 = vmul.f32 %v7711_v26, %v1684_v7  ;;  %v1672_v50 = vadd.f32 %v1670_v27, %v7713_v41  ;;  %v1677_v3 = vadd.f32 %v1675_v39, %v7714_v25  ;;  %v1678_v47 = vadd.f32 %v1676_v12, %v7715_v63 }
 0x108   :  { %v1689_v42 = vadd.f32 %v1687_v19, %v1647_v13  ;;  %v1690_v31 = vadd.f32 %v1688_v24, %v1648_v16  ;;  %v1695_v6 = vadd.f32 %v1693_v30, %v1653_v15  ;;  %v7716_v17 = vstv %s4240_s6  ;;  %v1766_v16 = vpop.permute.xlu1 %1765  ;;  %v1764_v15 = vpop.permute.xlu0 %1763  ;;  %s5020_s6 = sld [smem:[#allocation2 + $0x3d]] }
 0x109   :  { %v1696_v9 = vadd.f32 %v1694_v14, %v1654_v40  ;;  %v1699_v43 = vmul.f32 %v7716_v17, %v1683_v11  ;;  %v7717_v2 = vmov %v7716_v17  ;;  %v7718_v55 = vstv %s4254_s18  ;;  %s5030_s18 = sld [smem:[#allocation2 + $0x3e]] }
 0x10a   :  { %v1700_v62 = vmul.f32 %v7717_v2, %v1684_v7  ;;  %v1705_v20 = vmul.f32 %v7718_v55, %v1683_v11  ;;  %v7719_v26 = vmov %v7718_v55  ;;  %v7720_v45 = vstv %s4256_s20  ;;  %s5032_s20 = sld [smem:[#allocation2 + $0x3f]] }
 0x10b   :  { %v1706_v59 = vmul.f32 %v7719_v26, %v1684_v7  ;;  %v1711_v54 = vmul.f32 %v7720_v45, %v1683_v11  ;;  %v7721_v18 = vmov %v7720_v45  ;;  %v7722_v41 = vstv %s4273_s24  ;;  %s5038_s24 = sld [smem:[#allocation2 + $0x40]] }
 0x10c   :  { %v1712_v27 = vmul.f32 %v7721_v18, %v1684_v7  ;;  %v1717_v39 = vmul.f32 %v7722_v41, %v1683_v11  ;;  %v7723_v25 = vmov %v7722_v41  ;;  %v1701_v40 = vadd.f32 %v1699_v43, %v1659_v61 }
 0x10d   :  { %v1718_v13 = vmul.f32 %v7723_v25, %v1684_v7  ;;  %v1702_v2 = vadd.f32 %v1700_v62, %v1660_v51  ;;  %v1707_v55 = vadd.f32 %v1705_v20, %v1665_v49  ;;  %v1708_v12 = vadd.f32 %v1706_v59, %v1666_v48 }
 0x10e   :  { %v1713_v45 = vadd.f32 %v1711_v54, %v1671_v36  ;;  %v1714_v19 = vadd.f32 %v1712_v27, %v1672_v50  ;;  %v1719_v24 = vadd.f32 %v1717_v39, %v1677_v3  ;;  %v1725_v7 = vsel %vm210_vm2, %v1722_v21, %v1724_v5 }
 0x10f   :  { %v1720_v11 = vadd.f32 %v1718_v13, %v1678_v47  ;;  %v1726_v30 = vsel %vm210_vm2, %v1724_v5, %v1722_v21  ;;  %v1767_v43 = vsel %vm253_vm3, %v1764_v15, %v1766_v16  ;;  %v1768_v61 = vsel %vm253_vm3, %v1766_v16, %v1764_v15  ;;  %v1808_v15 = vpop.permute.xlu1 %1807 }
 0x110   :  { %v7726_v20 = vstv %s4275_s15  ;;  %v7728_v49 = vstv %s4293_s28  ;;  %v7731_v50 = vstv %s7724_s25  ;;  %v7734_v5 = vstv %s7725_s26  ;;  %s5040_s15 = sld [smem:[#allocation2 + $0x41]]  ;;  %s5112_s28 = sld [smem:[#allocation2 + $0x50]] }
 0x111   :  { %v1729_v51 = vmul.f32 %v7726_v20, %v1725_v7  ;;  %v7727_v59 = vmov %v7726_v20  ;;  %v1735_v14 = vmul.f32 %v7728_v49, %v1725_v7  ;;  %v7729_v3 = vmov %v7728_v49  ;;  %v1806_v20 = vpop.permute.xlu0 %1805  ;;  %s5296_s25 = sld [smem:[#allocation2 + $0x74]]  ;;  %s5298_s26 = sld [smem:[#allocation2 + $0x75]] }
 0x112   :  { %v1730_v48 = vmul.f32 %v7727_v59, %v1726_v30  ;;  %v1736_v36 = vmul.f32 %v7729_v3, %v1726_v30  ;;  %v1741_v63 = vmul.f32 %v7731_v50, %v1725_v7  ;;  %v7732_v47 = vmov %v7731_v50 }
 0x113   :  { %v1742_v21 = vmul.f32 %v7732_v47, %v1726_v30  ;;  %v1747_v17 = vmul.f32 %v7734_v5, %v1725_v7  ;;  %v7735_v62 = vmov %v7734_v5  ;;  %v1731_v54 = vadd.f32 %v1729_v51, %v1689_v42 }
 0x114   :  { %v1748_v26 = vmul.f32 %v7735_v62, %v1726_v30  ;;  %v1732_v18 = vadd.f32 %v1730_v48, %v1690_v31  ;;  %v1737_v27 = vadd.f32 %v1735_v14, %v1695_v6  ;;  %v1738_v41 = vadd.f32 %v1736_v36, %v1696_v9 }
 0x115   :  { %v1743_v39 = vadd.f32 %v1741_v63, %v1701_v40  ;;  %v1744_v25 = vadd.f32 %v1742_v21, %v1702_v2  ;;  %v1749_v13 = vadd.f32 %v1747_v17, %v1707_v55  ;;  %v7736_v59 = vstv %s7730_s1  ;;  %s5300_s1 = sld [smem:[#allocation2 + $0x76]] }
 0x116   :  { %v1750_v16 = vadd.f32 %v1748_v26, %v1708_v12  ;;  %v1753_v49 = vmul.f32 %v7736_v59, %v1725_v7  ;;  %v7737_v3 = vmov %v7736_v59  ;;  %v7738_v47 = vstv %s7733_s10  ;;  %s5302_s10 = sld [smem:[#allocation2 + $0x77]] }
 0x117   :  { %v1754_v50 = vmul.f32 %v7737_v3, %v1726_v30  ;;  %v1759_v29 = vmul.f32 %v7738_v47, %v1725_v7  ;;  %v7739_v10 = vmov %v7738_v47  ;;  %v1771_v62 = vmul.f32 %v1767_v43, %v4098_v22 }
 0x118   :  { %v1760_v5 = vmul.f32 %v7739_v10, %v1726_v30  ;;  %v1772_v42 = vmul.f32 %v1768_v61, %v4098_v22  ;;  %v1777_v9 = vmul.f32 %v1767_v43, %v4105_v23  ;;  %v1778_v6 = vmul.f32 %v1768_v61, %v4105_v23 }
 0x119   :  { %v1755_v31 = vadd.f32 %v1753_v49, %v1713_v45  ;;  %v1756_v40 = vadd.f32 %v1754_v50, %v1714_v19  ;;  %v1761_v2 = vadd.f32 %v1759_v29, %v1719_v24  ;;  %v1773_v12 = vadd.f32 %v1771_v62, %v1731_v54  ;;  %v1850_v19 = vpop.permute.xlu1 %1849  ;;  %v1848_v24 = vpop.permute.xlu0 %1847 }
 0x11a   :  { %v1762_v55 = vadd.f32 %v1760_v5, %v1720_v11  ;;  %v1774_v51 = vadd.f32 %v1772_v42, %v1732_v18  ;;  %v1779_v48 = vadd.f32 %v1777_v9, %v1737_v27  ;;  %v1780_v14 = vadd.f32 %v1778_v6, %v1738_v41 }
 0x11b   :  { %v1783_v7 = vmul.f32 %v1767_v43, %v4108_v32  ;;  %v1784_v10 = vmul.f32 %v1768_v61, %v4108_v32  ;;  %v1789_v30 = vmul.f32 %v1767_v43, %v4111_v33  ;;  %v1790_v22 = vmul.f32 %v1768_v61, %v4111_v33 }
 0x11c   :  { %v1795_v36 = vmul.f32 %v1767_v43, %v4114_v34  ;;  %v1796_v23 = vmul.f32 %v1768_v61, %v4114_v34  ;;  %v1801_v45 = vmul.f32 %v1767_v43, %v4121_v37  ;;  %v1802_v29 = vmul.f32 %v1768_v61, %v4121_v37 }
 0x11d   :  { %v1785_v11 = vadd.f32 %v1783_v7, %v1743_v39  ;;  %v1786_v63 = vadd.f32 %v1784_v10, %v1744_v25  ;;  %v1791_v21 = vadd.f32 %v1789_v30, %v1749_v13  ;;  %v1792_v17 = vadd.f32 %v1790_v22, %v1750_v16  ;;  %v1892_v62 = vpop.permute.xlu1 %1891  ;;  %v1890_v42 = vpop.permute.xlu0 %1889 }
 0x11e   :  { %v1797_v26 = vadd.f32 %v1795_v36, %v1755_v31  ;;  %v1798_v32 = vadd.f32 %v1796_v23, %v1756_v40  ;;  %v1803_v54 = vadd.f32 %v1801_v45, %v1761_v2  ;;  %v1804_v18 = vadd.f32 %v1802_v29, %v1762_v55 }
 0x11f   :  { %v1809_v33 = vsel %vm296_vm4, %v1806_v20, %v1808_v15  ;;  %v1810_v34 = vsel %vm296_vm4, %v1808_v15, %v1806_v20  ;;  %v1851_v43 = vsel %vm339_vm5, %v1848_v24, %v1850_v19  ;;  %v1852_v37 = vsel %vm339_vm5, %v1850_v19, %v1848_v24 }
 0x120   :  { %v1813_v61 = vmul.f32 %v1809_v33, %v4124_v44  ;;  %v1814_v27 = vmul.f32 %v1810_v34, %v4124_v44  ;;  %v1819_v41 = vmul.f32 %v1809_v33, %v4127_v52  ;;  %v1820_v39 = vmul.f32 %v1810_v34, %v4127_v52 }
 0x121   :  { %v1825_v25 = vmul.f32 %v1809_v33, %v4130_v53  ;;  %v1826_v13 = vmul.f32 %v1810_v34, %v4130_v53  ;;  %v1831_v16 = vmul.f32 %v1809_v33, %v4147_v56  ;;  %v1832_v15 = vmul.f32 %v1810_v34, %v4147_v56  ;;  %v1934_v29 = vpop.permute.xlu1 %1933  ;;  %v1932_v19 = vpop.permute.xlu0 %1931 }
 0x122   :  { %v1815_v20 = vadd.f32 %v1813_v61, %v1773_v12  ;;  %v1816_v59 = vadd.f32 %v1814_v27, %v1774_v51  ;;  %v1821_v49 = vadd.f32 %v1819_v41, %v1779_v48  ;;  %v1822_v3 = vadd.f32 %v1820_v39, %v1780_v14  ;;  %v7742_v27 = vld [vmem:[#allocation67_spill] sm:$0xff] }
 0x123   :  { %v1827_v50 = vadd.f32 %v1825_v25, %v1785_v11  ;;  %v1828_v47 = vadd.f32 %v1826_v13, %v1786_v63  ;;  %v1833_v5 = vadd.f32 %v1831_v16, %v1791_v21  ;;  %v1834_v44 = vadd.f32 %v1832_v15, %v1792_v17  ;;  %v7743_v25 = vld [vmem:[#allocation68_spill] sm:$0xff] }
 0x124   :  { %v1837_v52 = vmul.f32 %v1809_v33, %v4150_v57  ;;  %v1838_v9 = vmul.f32 %v1810_v34, %v4150_v57  ;;  %v1843_v53 = vmul.f32 %v1809_v33, %v4157_v60  ;;  %v1844_v6 = vmul.f32 %v1810_v34, %v4157_v60 }
 0x125   :  { %v1855_v56 = vmul.f32 %v1851_v43, %v4160_v4  ;;  %v1856_v31 = vmul.f32 %v1852_v37, %v4160_v4  ;;  %v1861_v40 = vmul.f32 %v1851_v43, %v4163_v8  ;;  %v1862_v2 = vmul.f32 %v1852_v37, %v4163_v8 }
 0x126   :  { %v1839_v55 = vadd.f32 %v1837_v52, %v1797_v26  ;;  %v1840_v12 = vadd.f32 %v1838_v9, %v1798_v32  ;;  %v1845_v51 = vadd.f32 %v1843_v53, %v1803_v54  ;;  %v1846_v48 = vadd.f32 %v1844_v6, %v1804_v18  ;;  %v7740_v18 = vld [vmem:[#allocation65_spill] sm:$0xff]  ;;  %v7745_v52 = vld [vmem:[#allocation70_spill] sm:$0xff]  ;;  %v7746_v6 = vld [vmem:[#allocation71_spill] sm:$0xff] }
 0x127   :  { %v1857_v14 = vadd.f32 %v1855_v56, %v1815_v20  ;;  %v1858_v7 = vadd.f32 %v1856_v31, %v1816_v59  ;;  %v1863_v10 = vadd.f32 %v1861_v40, %v1821_v49  ;;  %v1864_v57 = vadd.f32 %v1862_v2, %v1822_v3  ;;  %v7747_v40 = vld [vmem:[#allocation72_spill] sm:$0xff] }
 0x128   :  { %v1867_v30 = vmul.f32 %v1851_v43, %v4166_v35  ;;  %v1868_v60 = vmul.f32 %v1852_v37, %v4166_v35  ;;  %v1873_v22 = vmul.f32 %v1851_v43, %v4173_v58  ;;  %v1874_v4 = vmul.f32 %v1852_v37, %v4173_v58 }
 0x129   :  { %v1879_v36 = vmul.f32 %v1851_v43, %v7629_v1  ;;  %v1880_v8 = vmul.f32 %v1852_v37, %v7629_v1  ;;  %v1885_v23 = vmul.f32 %v1851_v43, %v7630_v0  ;;  %v1886_v45 = vmul.f32 %v1852_v37, %v7630_v0  ;;  %v7741_v43 = vld [vmem:[#allocation66_spill] sm:$0xff] }
 0x12a   :  { %v1869_v24 = vadd.f32 %v1867_v30, %v1827_v50  ;;  %v1870_v11 = vadd.f32 %v1868_v60, %v1828_v47  ;;  %v1875_v63 = vadd.f32 %v1873_v22, %v1833_v5  ;;  %v1876_v21 = vadd.f32 %v1874_v4, %v1834_v44  ;;  %v7744_v44 = vld [vmem:[#allocation69_spill] sm:$0xff] }
 0x12b   :  { %v1881_v17 = vadd.f32 %v1879_v36, %v1839_v55  ;;  %v1882_v35 = vadd.f32 %v1880_v8, %v1840_v12  ;;  %v1887_v26 = vadd.f32 %v1885_v23, %v1845_v51  ;;  %v1888_v32 = vadd.f32 %v1886_v45, %v1846_v48  ;;  %v7748_v4 = vld [vmem:[#allocation73_spill] sm:$0xff]  ;;  %v7749_v23 = vld [vmem:[#allocation74_spill] sm:$0xff] }
 0x12c   :  { %v1893_v58 = vsel %vm382_vm6, %v1890_v42, %v1892_v62  ;;  %v1894_v1 = vsel %vm382_vm6, %v1892_v62, %v1890_v42  ;;  %v1935_v54 = vsel %vm425_vm7, %v1932_v19, %v1934_v29  ;;  %v1936_v0 = vsel %vm425_vm7, %v1934_v29, %v1932_v19  ;;  %v7750_v19 = vld [vmem:[#allocation75_spill] sm:$0xff] }
 0x12d   :  { %v1897_v33 = vmul.f32 %v1893_v58, %v7740_v18  ;;  %v1898_v34 = vmul.f32 %v1894_v1, %v7740_v18  ;;  %v1903_v37 = vmul.f32 %v1893_v58, %v7741_v43  ;;  %v1904_v61 = vmul.f32 %v1894_v1, %v7741_v43  ;;  %v7752_v43 = vld [vmem:[#allocation95_spill] sm:$0xff] }
 0x12e   :  { %v1909_v41 = vmul.f32 %v1893_v58, %v7742_v27  ;;  %v1910_v39 = vmul.f32 %v1894_v1, %v7742_v27  ;;  %v1915_v13 = vmul.f32 %v1893_v58, %v7743_v25  ;;  %v1916_v16 = vmul.f32 %v1894_v1, %v7743_v25  ;;  %v7755_v25 = vld [vmem:[#allocation98_spill] sm:$0xff] }
 0x12f   :  { %v1899_v15 = vadd.f32 %v1897_v33, %v1857_v14  ;;  %v1900_v20 = vadd.f32 %v1898_v34, %v1858_v7  ;;  %v1905_v59 = vadd.f32 %v1903_v37, %v1863_v10  ;;  %v1906_v49 = vadd.f32 %v1904_v61, %v1864_v57  ;;  %v2014_v7 = vpop.permute.xlu1 %2013  ;;  %v2012_v10 = vpop.permute.xlu0 %2011  ;;  %v7753_v61 = vld [vmem:[#allocation96_spill] sm:$0xff] }
 0x130   :  { %v1911_v3 = vadd.f32 %v1909_v41, %v1869_v24  ;;  %v1912_v50 = vadd.f32 %v1910_v39, %v1870_v11  ;;  %v1917_v47 = vadd.f32 %v1915_v13, %v1875_v63  ;;  %v1918_v5 = vadd.f32 %v1916_v16, %v1876_v21  ;;  %v7751_v63 = vld [vmem:[#allocation76_spill] sm:$0xff]  ;;  %v7754_v41 = vld [vmem:[#allocation97_spill] sm:$0xff]  ;;  %v7758_v16 = vld [vmem:[#allocation99_spill] sm:$0xff] }
 0x131   :  { %v1921_v62 = vmul.f32 %v1893_v58, %v7744_v44  ;;  %v1922_v42 = vmul.f32 %v1894_v1, %v7744_v44  ;;  %v1927_v9 = vmul.f32 %v1893_v58, %v7745_v52  ;;  %v1928_v53 = vmul.f32 %v1894_v1, %v7745_v52  ;;  %v7766_v52 = vld [vmem:[#allocation105_spill] sm:$0xff] }
 0x132   :  { %v1939_v56 = vmul.f32 %v1935_v54, %v7746_v6  ;;  %v1940_v31 = vmul.f32 %v1936_v0, %v7746_v6  ;;  %v1945_v2 = vmul.f32 %v1935_v54, %v7747_v40  ;;  %v1946_v55 = vmul.f32 %v1936_v0, %v7747_v40 }
 0x133   :  { %v1923_v12 = vadd.f32 %v1921_v62, %v1881_v17  ;;  %v1924_v51 = vadd.f32 %v1922_v42, %v1882_v35  ;;  %v1929_v48 = vadd.f32 %v1927_v9, %v1887_v26  ;;  %v1930_v14 = vadd.f32 %v1928_v53, %v1888_v32  ;;  %v7765_v62 = vld [vmem:[#allocation104_spill] sm:$0xff]  ;;  %v7767_v53 = vld [vmem:[#allocation106_spill] sm:$0xff] }
 0x134   :  { %v1941_v57 = vadd.f32 %v1939_v56, %v1899_v15  ;;  %v1942_v30 = vadd.f32 %v1940_v31, %v1900_v20  ;;  %v1947_v60 = vadd.f32 %v1945_v2, %v1905_v59  ;;  %v1948_v22 = vadd.f32 %v1946_v55, %v1906_v49  ;;  %v7759_v20 = vld [vmem:[#allocation100_spill] sm:$0xff]  ;;  %v7761_v49 = vld [vmem:[#allocation101_spill] sm:$0xff] }
 0x135   :  { %v1951_v36 = vmul.f32 %v1935_v54, %v7748_v4  ;;  %v1952_v8 = vmul.f32 %v1936_v0, %v7748_v4  ;;  %v1957_v45 = vmul.f32 %v1935_v54, %v7749_v23  ;;  %v1958_v29 = vmul.f32 %v1936_v0, %v7749_v23 }
 0x136   :  { %v1963_v24 = vmul.f32 %v1935_v54, %v7750_v19  ;;  %v1964_v11 = vmul.f32 %v1936_v0, %v7750_v19  ;;  %v1969_v21 = vmul.f32 %v1935_v54, %v7751_v63  ;;  %v1970_v17 = vmul.f32 %v1936_v0, %v7751_v63  ;;  %v2056_v54 = vpop.permute.xlu1 %2055  ;;  %v2054_v0 = vpop.permute.xlu0 %2053 }
 0x137   :  { %v1953_v35 = vadd.f32 %v1951_v36, %v1911_v3  ;;  %v1954_v26 = vadd.f32 %v1952_v8, %v1912_v50  ;;  %v1959_v32 = vadd.f32 %v1957_v45, %v1917_v47  ;;  %v1960_v58 = vadd.f32 %v1958_v29, %v1918_v5  ;;  %v7762_v50 = vld [vmem:[#allocation102_spill] sm:$0xff]  ;;  %v7764_v5 = vld [vmem:[#allocation103_spill] sm:$0xff] }
 0x138   :  { %v1965_v1 = vadd.f32 %v1963_v24, %v1923_v12  ;;  %v1966_v18 = vadd.f32 %v1964_v11, %v1924_v51  ;;  %v1971_v33 = vadd.f32 %v1969_v21, %v1929_v48  ;;  %v1972_v34 = vadd.f32 %v1970_v17, %v1930_v14 }
 0x139   :  { %v1979_v37 = vadd.f32 %v7752_v43, %v1941_v57  ;;  %v1980_v27 = vadd.f32 %v7753_v61, %v1942_v30  ;;  %v1985_v39 = vadd.f32 %v7754_v41, %v1947_v60  ;;  %v1986_v13 = vadd.f32 %v7755_v25, %v1948_v22 }
 0x13a   :  { %v1991_v15 = vadd.f32 %v7758_v16, %v1953_v35  ;;  %v1992_v59 = vadd.f32 %v7759_v20, %v1954_v26  ;;  %v1997_v3 = vadd.f32 %v7761_v49, %v1959_v32  ;;  %v1998_v47 = vadd.f32 %v7762_v50, %v1960_v58  ;;  %v7782_v49 = vld [vmem:[#allocation87_spill] sm:$0xff]  ;;  %v7783_v50 = vld [vmem:[#allocation90_spill] sm:$0xff] }
 0x13b   :  { %v2003_v44 = vadd.f32 %v7764_v5, %v1965_v1  ;;  %v2004_v42 = vadd.f32 %v7765_v62, %v1966_v18  ;;  %v2009_v9 = vadd.f32 %v7766_v52, %v1971_v33  ;;  %v2010_v6 = vadd.f32 %v7767_v53, %v1972_v34  ;;  %v7785_v52 = vld [vmem:[#allocation92_spill] sm:$0xff] }
 0x13c   :  { %v2015_v56 = vsel %vm124_vm1, %v2012_v10, %v2014_v7  ;;  %v2016_v31 = vsel %vm124_vm1, %v2014_v7, %v2012_v10  ;;  %v2057_v40 = vsel %vm167_vm0, %v2054_v0, %v2056_v54  ;;  %v2058_v2 = vsel %vm167_vm0, %v2056_v54, %v2054_v0 }
 0x13d   :  { %v7768_v55 = vstv %s7756_s4  ;;  %v7770_v14 = vstv %s7757_s11  ;;  %v7773_v22 = vstv %s7760_s5  ;;  %v7776_v10 = vstv %s7763_s16  ;;  %s5386_s4 = sld [smem:[#allocation2 + $0x84]]  ;;  %s5388_s11 = sld [smem:[#allocation2 + $0x85]] }
 0x13e   :  { %v2019_v12 = vmul.f32 %v7768_v55, %v2015_v56  ;;  %v7769_v51 = vmov %v7768_v55  ;;  %v2025_v57 = vmul.f32 %v7770_v14, %v2015_v56  ;;  %v7771_v30 = vmov %v7770_v14  ;;  %s5390_s5 = sld [smem:[#allocation2 + $0x86]]  ;;  %s5392_s16 = sld [smem:[#allocation2 + $0x87]] }
 0x13f   :  { %v2020_v48 = vmul.f32 %v7769_v51, %v2016_v31  ;;  %v2026_v60 = vmul.f32 %v7771_v30, %v2016_v31  ;;  %v2031_v4 = vmul.f32 %v7773_v22, %v2015_v56  ;;  %v7774_v36 = vmov %v7773_v22 }
 0x140   :  { %v2032_v7 = vmul.f32 %v7774_v36, %v2016_v31  ;;  %v2037_v8 = vmul.f32 %v7776_v10, %v2015_v56  ;;  %v7777_v23 = vmov %v7776_v10  ;;  %v2021_v29 = vadd.f32 %v2019_v12, %v1979_v37 }
 0x141   :  { %v2038_v45 = vmul.f32 %v7777_v23, %v2016_v31  ;;  %v2022_v19 = vadd.f32 %v2020_v48, %v1980_v27  ;;  %v2027_v24 = vadd.f32 %v2025_v57, %v1985_v39  ;;  %v2028_v11 = vadd.f32 %v2026_v60, %v1986_v13 }
 0x142   :  { %v2033_v63 = vadd.f32 %v2031_v4, %v1991_v15  ;;  %v2034_v21 = vadd.f32 %v2032_v7, %v1992_v59  ;;  %v2039_v17 = vadd.f32 %v2037_v8, %v1997_v3  ;;  %v7778_v26 = vstv %s7772_s19  ;;  %v587_v59 = vpop.permute.xlu0 %586  ;;  %s5398_s19 = sld [smem:[#allocation2 + $0x88]] }
 0x143   :  { %v2040_v35 = vadd.f32 %v2038_v45, %v1998_v47  ;;  %v2043_v32 = vmul.f32 %v7778_v26, %v2015_v56  ;;  %v7779_v58 = vmov %v7778_v26  ;;  %v7780_v18 = vstv %s7775_s30  ;;  %s5400_s30 = sld [smem:[#allocation2 + $0x89]] }
 0x144   :  { %v2044_v1 = vmul.f32 %v7779_v58, %v2016_v31  ;;  %v2049_v33 = vmul.f32 %v7780_v18, %v2015_v56  ;;  %v7781_v34 = vmov %v7780_v18  ;;  %v2061_v37 = vmul.f32 %v2057_v40, %v7669_v38 }
 0x145   :  { %v2050_v43 = vmul.f32 %v7781_v34, %v2016_v31  ;;  %v2062_v61 = vmul.f32 %v2058_v2, %v7669_v38  ;;  %v2067_v27 = vmul.f32 %v2057_v40, %v7670_v28  ;;  %v2068_v41 = vmul.f32 %v2058_v2, %v7670_v28  ;;  %v589_v38 = vpop.permute.xlu1 %588 }
 0x146   :  { %v2045_v39 = vadd.f32 %v2043_v32, %v2003_v44  ;;  %v2046_v25 = vadd.f32 %v2044_v1, %v2004_v42  ;;  %v2051_v13 = vadd.f32 %v2049_v33, %v2009_v9  ;;  %v5042_v0 = vadd.f32 %v2061_v37, %v2021_v29  ;;  %v7784_v44 = vld [vmem:[#allocation91_spill] sm:$0xff]  ;;  %v2096_v10 = vpop.permute.xlu0 %2095  ;;  %v7788_v32 = vld [vmem:[#allocation77_spill] sm:$0xff]  ;;  %v7789_v1 = vld [vmem:[#allocation78_spill] sm:$0xff] }
 0x147   :  { %v2052_v54 = vadd.f32 %v2050_v43, %v2010_v6  ;;  %v5044_v16 = vadd.f32 %v2062_v61, %v2022_v19  ;;  %v5046_v15 = vadd.f32 %v2067_v27, %v2027_v24  ;;  %v5048_v20 = vadd.f32 %v2068_v41, %v2028_v11  ;;  %v7790_v33 = vld [vmem:[#allocation79_spill] sm:$0xff]  ;;  %v7791_v43 = vld [vmem:[#allocation80_spill] sm:$0xff]  ;;  %v7792_v61 = vld [vmem:[#allocation81_spill] sm:$0xff] }
 0x148   :  { %v2073_v28 = vmul.f32 %v2057_v40, %v7782_v49  ;;  %v2074_v3 = vmul.f32 %v2058_v2, %v7782_v49  ;;  %v2079_v47 = vmul.f32 %v2057_v40, %v7783_v50  ;;  %v2080_v5 = vmul.f32 %v2058_v2, %v7783_v50  ;;  %v7793_v41 = vld [vmem:[#allocation82_spill] sm:$0xff] }
 0x149   :  { %v2085_v62 = vmul.f32 %v2057_v40, %v7784_v44  ;;  %v2086_v42 = vmul.f32 %v2058_v2, %v7784_v44  ;;  %v2091_v9 = vmul.f32 %v2057_v40, %v7785_v52  ;;  %v2092_v53 = vmul.f32 %v2058_v2, %v7785_v52  ;;  %v2098_v7 = vpop.permute.xlu1 %2097  ;;  %v7796_v52 = vld [vmem:[#allocation88_spill] sm:$0xff] }
 0x14a   :  { %v5058_v6 = vadd.f32 %v2073_v28, %v2033_v63  ;;  %v5060_v56 = vadd.f32 %v2074_v3, %v2034_v21  ;;  %v5062_v31 = vadd.f32 %v2079_v47, %v2039_v17  ;;  %v5064_v55 = vadd.f32 %v2080_v5, %v2040_v35  ;;  %v7786_v21 = vld [vmem:[#allocation63_spill] sm:$0xff]  ;;  %v7787_v35 = vld [vmem:[#allocation64_spill] sm:$0xff]  ;;  %v629_v47 = vpop.permute.xlu0 %628 }
 0x14b   :  { %v5066_v12 = vadd.f32 %v2085_v62, %v2045_v39  ;;  %v5068_v51 = vadd.f32 %v2086_v42, %v2046_v25  ;;  %v5070_v48 = vadd.f32 %v2091_v9, %v2051_v13  ;;  %v5072_v14 = vadd.f32 %v2092_v53, %v2052_v54  ;;  %v7794_v5 = vld [vmem:[#allocation83_spill] sm:$0xff]  ;;  %v7795_v62 = vld [vmem:[#allocation84_spill] sm:$0xff]  ;;  %v7797_v53 = vld [vmem:[#allocation89_spill] sm:$0xff] }
 0x14c   :  { %v593_v40 = vstv %s5018_s12  ;;  %v599_v2 = vstv %s5020_s6  ;;  %v605_v57 = vstv %s5030_s18  ;;  %v611_v30 = vstv %s5032_s20  ;;  %s5442_s12 = sld [smem:[#allocation2 + $0x96]]  ;;  %s5444_s6 = sld [smem:[#allocation2 + $0x97]] }
 0x14d   :  { %v617_v60 = vstv %s5038_s24  ;;  %v623_v22 = vstv %s5040_s15  ;;  %v590_v4 = vsel %vm210_vm2, %v587_v59, %v589_v38  ;;  %v591_v36 = vsel %vm210_vm2, %v589_v38, %v587_v59  ;;  %v631_v28 = vpop.permute.xlu1 %630  ;;  %s5480_s18 = sld [smem:[#allocation2 + $0x98]]  ;;  %s5482_s20 = sld [smem:[#allocation2 + $0x99]] }
 0x14e   :  { %v594_v8 = vmul.f32 %v593_v40, %v590_v4  ;;  %v595_v23 = vmul.f32 %v593_v40, %v591_v36  ;;  %v600_v45 = vmul.f32 %v599_v2, %v590_v4  ;;  %v601_v29 = vmul.f32 %v599_v2, %v591_v36  ;;  %s5484_s24 = sld [smem:[#allocation2 + $0x9a]]  ;;  %s5486_s15 = sld [smem:[#allocation2 + $0x9b]] }
 0x14f   :  { %v606_v19 = vmul.f32 %v605_v57, %v590_v4  ;;  %v607_v24 = vmul.f32 %v605_v57, %v591_v36  ;;  %v612_v11 = vmul.f32 %v611_v30, %v590_v4  ;;  %v613_v63 = vmul.f32 %v611_v30, %v591_v36 }
 0x150   :  { %v5089_v17 = vadd.f32 %v594_v8, %v7786_v21  ;;  %v5092_v26 = vadd.f32 %v595_v23, %v7787_v35  ;;  %v5095_v58 = vadd.f32 %v600_v45, %v7788_v32  ;;  %v5098_v18 = vadd.f32 %v601_v29, %v7789_v1 }
 0x151   :  { %v5101_v34 = vadd.f32 %v606_v19, %v7790_v33  ;;  %v5104_v37 = vadd.f32 %v607_v24, %v7791_v43  ;;  %v5107_v27 = vadd.f32 %v612_v11, %v7792_v61  ;;  %v5110_v39 = vadd.f32 %v613_v63, %v7793_v41  ;;  %v2140_v1 = vpop.permute.xlu1 %2139 }
 0x152   :  { %v618_v25 = vmul.f32 %v617_v60, %v590_v4  ;;  %v619_v13 = vmul.f32 %v617_v60, %v591_v36  ;;  %v624_v54 = vmul.f32 %v623_v22, %v590_v4  ;;  %v625_v38 = vmul.f32 %v623_v22, %v591_v36 }
 0x153   :  { %v2099_v59 = vsel %vm210_vm2, %v2096_v10, %v2098_v7  ;;  %v2100_v49 = vsel %vm210_vm2, %v2098_v7, %v2096_v10  ;;  %v5125_v3 = vstv %s5074_s13  ;;  %v5128_v50 = vstv %s5076_s17  ;;  %s5578_s13 = sld [smem:[#allocation2 + $0xc]]  ;;  %s5580_s17 = sld [smem:[#allocation2 + $0xd]] }
 0x154   :  { %v5131_v44 = vadd.f32 %v618_v25, %v7794_v5  ;;  %v5134_v42 = vadd.f32 %v619_v13, %v7795_v62  ;;  %v5137_v9 = vadd.f32 %v624_v54, %v7796_v52  ;;  %v5140_v4 = vadd.f32 %v625_v38, %v7797_v53 }
 0x155   :  { %v2103_v36 = vmul.f32 %v2099_v59, %v593_v40  ;;  %v2104_v7 = vmul.f32 %v2100_v49, %v593_v40  ;;  %v2109_v10 = vmul.f32 %v2099_v59, %v599_v2  ;;  %v2110_v8 = vmul.f32 %v2100_v49, %v599_v2 }
 0x156   :  { %v2115_v23 = vmul.f32 %v2099_v59, %v605_v57  ;;  %v2116_v45 = vmul.f32 %v2100_v49, %v605_v57  ;;  %v2121_v29 = vmul.f32 %v2099_v59, %v611_v30  ;;  %v2122_v19 = vmul.f32 %v2100_v49, %v611_v30 }
 0x157   :  { %v2105_v24 = vadd.f32 %v2103_v36, %v5042_v0  ;;  %v2106_v11 = vadd.f32 %v2104_v7, %v5044_v16  ;;  %v2111_v63 = vadd.f32 %v2109_v10, %v5046_v15  ;;  %v2112_v21 = vadd.f32 %v2110_v8, %v5048_v20  ;;  %v2138_v15 = vpop.permute.xlu0 %2137 }
 0x158   :  { %v5147_v40 = vadd.f32 %v2115_v23, %v5058_v6  ;;  %v5150_v2 = vadd.f32 %v2116_v45, %v5060_v56  ;;  %v5153_v57 = vadd.f32 %v2121_v29, %v5062_v31  ;;  %v5156_v30 = vadd.f32 %v2122_v19, %v5064_v55  ;;  %v673_v19 = vpop.permute.xlu1 %672 }
 0x159   :  { %v2127_v0 = vmul.f32 %v2099_v59, %v617_v60  ;;  %v2128_v35 = vmul.f32 %v2100_v49, %v617_v60  ;;  %v2133_v16 = vmul.f32 %v2099_v59, %v623_v22  ;;  %v2134_v32 = vmul.f32 %v2100_v49, %v623_v22 }
 0x15a   :  { %v647_v33 = vstv %s5112_s28  ;;  %v653_v20 = vstv %s5114_s8  ;;  %v659_v43 = vstv %s5116_s7  ;;  %v665_v6 = vstv %s5118_s9  ;;  %s5582_s28 = sld [smem:[#allocation2 + $0xe]]  ;;  %s5584_s8 = sld [smem:[#allocation2 + $0xf]] }
 0x15b   :  { %v2129_v61 = vadd.f32 %v2127_v0, %v5066_v12  ;;  %v2130_v56 = vadd.f32 %v2128_v35, %v5068_v51  ;;  %v2135_v31 = vadd.f32 %v2133_v16, %v5070_v48  ;;  %v2136_v41 = vadd.f32 %v2134_v32, %v5072_v14  ;;  %s5602_s7 = sld [smem:[#allocation2 + $0x10]]  ;;  %s5604_s9 = sld [smem:[#allocation2 + $0x11]] }
 0x15c   :  { %v632_v55 = vsel %vm253_vm3, %v629_v47, %v631_v28  ;;  %v633_v60 = vsel %vm253_vm3, %v631_v28, %v629_v47  ;;  %v2141_v22 = vsel %vm253_vm3, %v2138_v15, %v2140_v1  ;;  %v2142_v25 = vsel %vm253_vm3, %v2140_v1, %v2138_v15 }
 0x15d   :  { %v636_v12 = vmul.f32 %v5125_v3, %v632_v55  ;;  %v637_v51 = vmul.f32 %v5125_v3, %v633_v60  ;;  %v642_v48 = vmul.f32 %v5128_v50, %v632_v55  ;;  %v643_v14 = vmul.f32 %v5128_v50, %v633_v60 }
 0x15e   :  { %v648_v13 = vmul.f32 %v647_v33, %v632_v55  ;;  %v649_v54 = vmul.f32 %v647_v33, %v633_v60  ;;  %v654_v38 = vmul.f32 %v653_v20, %v632_v55  ;;  %v655_v59 = vmul.f32 %v653_v20, %v633_v60 }
 0x15f   :  { %v5179_v49 = vadd.f32 %v636_v12, %v5089_v17  ;;  %v5182_v28 = vadd.f32 %v637_v51, %v5092_v26  ;;  %v5185_v47 = vadd.f32 %v642_v48, %v5095_v58  ;;  %v5188_v5 = vadd.f32 %v643_v14, %v5098_v18 }
 0x160   :  { %v5191_v62 = vadd.f32 %v648_v13, %v5101_v34  ;;  %v5194_v52 = vadd.f32 %v649_v54, %v5104_v37  ;;  %v5197_v53 = vadd.f32 %v654_v38, %v5107_v27  ;;  %v5200_v17 = vadd.f32 %v655_v59, %v5110_v39 }
 0x161   :  { %v660_v26 = vmul.f32 %v659_v43, %v632_v55  ;;  %v661_v58 = vmul.f32 %v659_v43, %v633_v60  ;;  %v666_v18 = vmul.f32 %v665_v6, %v632_v55  ;;  %v667_v36 = vmul.f32 %v665_v6, %v633_v60 }
 0x162   :  { %v2145_v34 = vmul.f32 %v2141_v22, %v5125_v3  ;;  %v2146_v37 = vmul.f32 %v2142_v25, %v5125_v3  ;;  %v2151_v27 = vmul.f32 %v2141_v22, %v5128_v50  ;;  %v2152_v39 = vmul.f32 %v2142_v25, %v5128_v50 }
 0x163   :  { %v5219_v7 = vadd.f32 %v660_v26, %v5131_v44  ;;  %v5222_v10 = vadd.f32 %v661_v58, %v5134_v42  ;;  %v5225_v8 = vadd.f32 %v666_v18, %v5137_v9  ;;  %v5228_v23 = vadd.f32 %v667_v36, %v5140_v4  ;;  %v671_v44 = vpop.permute.xlu0 %670 }
 0x164   :  { %v5230_v3 = vadd.f32 %v2145_v34, %v2105_v24  ;;  %v5232_v45 = vadd.f32 %v2146_v37, %v2106_v11  ;;  %v5234_v50 = vadd.f32 %v2151_v27, %v2111_v63  ;;  %v5236_v29 = vadd.f32 %v2152_v39, %v2112_v21 }
 0x165   :  { %v2157_v0 = vmul.f32 %v2141_v22, %v647_v33  ;;  %v2158_v35 = vmul.f32 %v2142_v25, %v647_v33  ;;  %v2163_v42 = vmul.f32 %v2141_v22, %v653_v20  ;;  %v2164_v16 = vmul.f32 %v2142_v25, %v653_v20 }
 0x166   :  { %v2169_v9 = vmul.f32 %v2141_v22, %v659_v43  ;;  %v2170_v4 = vmul.f32 %v2142_v25, %v659_v43  ;;  %v2175_v24 = vmul.f32 %v2141_v22, %v665_v6  ;;  %v2176_v11 = vmul.f32 %v2142_v25, %v665_v6 }
 0x167   :  { %v5239_v63 = vadd.f32 %v2157_v0, %v5147_v40  ;;  %v5242_v21 = vadd.f32 %v2158_v35, %v5150_v2  ;;  %v5245_v32 = vadd.f32 %v2163_v42, %v5153_v57  ;;  %v5248_v1 = vadd.f32 %v2164_v16, %v5156_v30 }
 0x168   :  { %v5250_v15 = vadd.f32 %v2169_v9, %v2129_v61  ;;  %v5252_v33 = vadd.f32 %v2170_v4, %v2130_v56  ;;  %v5254_v20 = vadd.f32 %v2175_v24, %v2135_v31  ;;  %v5256_v43 = vadd.f32 %v2176_v11, %v2136_v41  ;;  %v2182_v56 = vpop.permute.xlu1 %2181  ;;  %v2180_v31 = vpop.permute.xlu0 %2179 }
 0x169   :  { %v677_v40 = vstv %s5202_s29  ;;  %v683_v2 = vstv %s5204_s14  ;;  %v689_v6 = vstv %s5206_s3  ;;  %v695_v57 = vstv %s5208_s27  ;;  %s5614_s29 = sld [smem:[#allocation2 + $0x1e]]  ;;  %s5616_s14 = sld [smem:[#allocation2 + $0x1f]] }
 0x16a   :  { %v701_v55 = vstv %s5214_s0  ;;  %v707_v60 = vstv %s5216_s21  ;;  %v674_v30 = vsel %vm296_vm4, %v671_v44, %v673_v19  ;;  %v675_v61 = vsel %vm296_vm4, %v673_v19, %v671_v44  ;;  %s5618_s3 = sld [smem:[#allocation2 + $0x20]]  ;;  %s5620_s27 = sld [smem:[#allocation2 + $0x21]] }
 0x16b   :  { %v678_v41 = vmul.f32 %v677_v40, %v674_v30  ;;  %v679_v22 = vmul.f32 %v677_v40, %v675_v61  ;;  %v684_v25 = vmul.f32 %v683_v2, %v674_v30  ;;  %v685_v12 = vmul.f32 %v683_v2, %v675_v61  ;;  %s5622_s0 = sld [smem:[#allocation2 + $0x22]]  ;;  %s5624_s21 = sld [smem:[#allocation2 + $0x23]] }
 0x16c   :  { %v690_v51 = vmul.f32 %v689_v6, %v674_v30  ;;  %v691_v48 = vmul.f32 %v689_v6, %v675_v61  ;;  %v696_v14 = vmul.f32 %v695_v57, %v674_v30  ;;  %v697_v13 = vmul.f32 %v695_v57, %v675_v61  ;;  %v713_v27 = vpop.permute.xlu0 %712 }
 0x16d   :  { %v5273_v54 = vadd.f32 %v678_v41, %v5179_v49  ;;  %v5276_v38 = vadd.f32 %v679_v22, %v5182_v28  ;;  %v5279_v59 = vadd.f32 %v684_v25, %v5185_v47  ;;  %v5282_v26 = vadd.f32 %v685_v12, %v5188_v5 }
 0x16e   :  { %v5285_v58 = vadd.f32 %v690_v51, %v5191_v62  ;;  %v5288_v18 = vadd.f32 %v691_v48, %v5194_v52  ;;  %v5291_v49 = vadd.f32 %v696_v14, %v5197_v53  ;;  %v5294_v28 = vadd.f32 %v697_v13, %v5200_v17  ;;  %v715_v53 = vpop.permute.xlu1 %714 }
 0x16f   :  { %v702_v47 = vmul.f32 %v701_v55, %v674_v30  ;;  %v703_v5 = vmul.f32 %v701_v55, %v675_v61  ;;  %v708_v36 = vmul.f32 %v707_v60, %v674_v30  ;;  %v709_v34 = vmul.f32 %v707_v60, %v675_v61 }
 0x170   :  { %v2183_v62 = vsel %vm296_vm4, %v2180_v31, %v2182_v56  ;;  %v2184_v52 = vsel %vm296_vm4, %v2182_v56, %v2180_v31  ;;  %v5309_v17 = vstv %s5258_s23  ;;  %v5312_v37 = vstv %s5260_s22  ;;  %s6060_s23 = sld [smem:[#allocation2 + $0x6b]]  ;;  %s6144_s22 = sld [smem:[#allocation2 + $0x78]] }
 0x171   :  { %v5315_v39 = vadd.f32 %v702_v47, %v5219_v7  ;;  %v5318_v19 = vadd.f32 %v703_v5, %v5222_v10  ;;  %v5321_v44 = vadd.f32 %v708_v36, %v5225_v8  ;;  %v5324_v0 = vadd.f32 %v709_v34, %v5228_v23 }
 0x172   :  { %v2187_v35 = vmul.f32 %v2183_v62, %v677_v40  ;;  %v2188_v42 = vmul.f32 %v2184_v52, %v677_v40  ;;  %v2193_v16 = vmul.f32 %v2183_v62, %v683_v2  ;;  %v2194_v9 = vmul.f32 %v2184_v52, %v683_v2  ;;  %v2224_v31 = vpop.permute.xlu1 %2223 }
 0x173   :  { %v2199_v4 = vmul.f32 %v2183_v62, %v689_v6  ;;  %v2200_v24 = vmul.f32 %v2184_v52, %v689_v6  ;;  %v2205_v11 = vmul.f32 %v2183_v62, %v695_v57  ;;  %v2206_v30 = vmul.f32 %v2184_v52, %v695_v57 }
 0x174   :  { %v2189_v7 = vadd.f32 %v2187_v35, %v5230_v3  ;;  %v2190_v10 = vadd.f32 %v2188_v42, %v5232_v45  ;;  %v2195_v8 = vadd.f32 %v2193_v16, %v5234_v50  ;;  %v2196_v23 = vadd.f32 %v2194_v9, %v5236_v29  ;;  %v2222_v50 = vpop.permute.xlu0 %2221 }
 0x175   :  { %v5331_v40 = vadd.f32 %v2199_v4, %v5239_v63  ;;  %v5334_v2 = vadd.f32 %v2200_v24, %v5242_v21  ;;  %v5337_v6 = vadd.f32 %v2205_v11, %v5245_v32  ;;  %v5340_v57 = vadd.f32 %v2206_v30, %v5248_v1 }
 0x176   :  { %v2211_v3 = vmul.f32 %v2183_v62, %v701_v55  ;;  %v2212_v61 = vmul.f32 %v2184_v52, %v701_v55  ;;  %v2217_v45 = vmul.f32 %v2183_v62, %v707_v60  ;;  %v2218_v56 = vmul.f32 %v2184_v52, %v707_v60  ;;  %v757_v30 = vpop.permute.xlu1 %756 }
 0x177   :  { %v731_v41 = vstv %s5296_s25  ;;  %v737_v29 = vstv %s5298_s26  ;;  %v743_v22 = vstv %s5300_s1  ;;  %v749_v63 = vstv %s5302_s10  ;;  %s6146_s25 = sld [smem:[#allocation2 + $0x79]]  ;;  %s6148_s26 = sld [smem:[#allocation2 + $0x7a]] }
 0x178   :  { %v2213_v25 = vadd.f32 %v2211_v3, %v5250_v15  ;;  %v2214_v21 = vadd.f32 %v2212_v61, %v5252_v33  ;;  %v2219_v32 = vadd.f32 %v2217_v45, %v5254_v20  ;;  %v2220_v12 = vadd.f32 %v2218_v56, %v5256_v43  ;;  %s6150_s1 = sld [smem:[#allocation2 + $0x7b]]  ;;  %s6156_s10 = sld [smem:[#allocation2 + $0x7c]] }
 0x179   :  { %v716_v1 = vsel %vm339_vm5, %v713_v27, %v715_v53  ;;  %v717_v55 = vsel %vm339_vm5, %v715_v53, %v713_v27  ;;  %v2225_v60 = vsel %vm339_vm5, %v2222_v50, %v2224_v31  ;;  %v2226_v51 = vsel %vm339_vm5, %v2224_v31, %v2222_v50 }
 0x17a   :  { %v720_v15 = vmul.f32 %v5309_v17, %v716_v1  ;;  %v721_v33 = vmul.f32 %v5309_v17, %v717_v55  ;;  %v726_v20 = vmul.f32 %v5312_v37, %v716_v1  ;;  %v727_v43 = vmul.f32 %v5312_v37, %v717_v55 }
 0x17b   :  { %v732_v48 = vmul.f32 %v731_v41, %v716_v1  ;;  %v733_v14 = vmul.f32 %v731_v41, %v717_v55  ;;  %v738_v13 = vmul.f32 %v737_v29, %v716_v1  ;;  %v739_v47 = vmul.f32 %v737_v29, %v717_v55 }
 0x17c   :  { %v5363_v5 = vadd.f32 %v720_v15, %v5273_v54  ;;  %v5366_v36 = vadd.f32 %v721_v33, %v5276_v38  ;;  %v5369_v34 = vadd.f32 %v726_v20, %v5279_v59  ;;  %v5372_v62 = vadd.f32 %v727_v43, %v5282_v26 }
 0x17d   :  { %v5375_v52 = vadd.f32 %v732_v48, %v5285_v58  ;;  %v5378_v53 = vadd.f32 %v733_v14, %v5288_v18  ;;  %v5381_v27 = vadd.f32 %v738_v13, %v5291_v49  ;;  %v5384_v54 = vadd.f32 %v739_v47, %v5294_v28 }
 0x17e   :  { %v744_v38 = vmul.f32 %v743_v22, %v716_v1  ;;  %v745_v59 = vmul.f32 %v743_v22, %v717_v55  ;;  %v750_v26 = vmul.f32 %v749_v63, %v716_v1  ;;  %v751_v35 = vmul.f32 %v749_v63, %v717_v55 }
 0x17f   :  { %v2229_v58 = vmul.f32 %v2225_v60, %v5309_v17  ;;  %v2230_v18 = vmul.f32 %v2226_v51, %v5309_v17  ;;  %v2235_v49 = vmul.f32 %v2225_v60, %v5312_v37  ;;  %v2236_v28 = vmul.f32 %v2226_v51, %v5312_v37 }
 0x180   :  { %v5403_v42 = vadd.f32 %v744_v38, %v5315_v39  ;;  %v5406_v16 = vadd.f32 %v745_v59, %v5318_v19  ;;  %v5409_v9 = vadd.f32 %v750_v26, %v5321_v44  ;;  %v5412_v4 = vadd.f32 %v751_v35, %v5324_v0  ;;  %v755_v39 = vpop.permute.xlu0 %754 }
 0x181   :  { %v5414_v17 = vadd.f32 %v2229_v58, %v2189_v7  ;;  %v5416_v24 = vadd.f32 %v2230_v18, %v2190_v10  ;;  %v5418_v37 = vadd.f32 %v2235_v49, %v2195_v8  ;;  %v5420_v11 = vadd.f32 %v2236_v28, %v2196_v23 }
 0x182   :  { %v2241_v3 = vmul.f32 %v2225_v60, %v731_v41  ;;  %v2242_v61 = vmul.f32 %v2226_v51, %v731_v41  ;;  %v2247_v19 = vmul.f32 %v2225_v60, %v737_v29  ;;  %v2248_v45 = vmul.f32 %v2226_v51, %v737_v29 }
 0x183   :  { %v2253_v44 = vmul.f32 %v2225_v60, %v743_v22  ;;  %v2254_v0 = vmul.f32 %v2226_v51, %v743_v22  ;;  %v2259_v7 = vmul.f32 %v2225_v60, %v749_v63  ;;  %v2260_v10 = vmul.f32 %v2226_v51, %v749_v63 }
 0x184   :  { %v5423_v8 = vadd.f32 %v2241_v3, %v5331_v40  ;;  %v5426_v23 = vadd.f32 %v2242_v61, %v5334_v2  ;;  %v5429_v56 = vadd.f32 %v2247_v19, %v5337_v6  ;;  %v5432_v31 = vadd.f32 %v2248_v45, %v5340_v57 }
 0x185   :  { %v5434_v50 = vadd.f32 %v2253_v44, %v2213_v25  ;;  %v5436_v41 = vadd.f32 %v2254_v0, %v2214_v21  ;;  %v5438_v29 = vadd.f32 %v2259_v7, %v2219_v32  ;;  %v5440_v22 = vadd.f32 %v2260_v10, %v2220_v12  ;;  %v2266_v21 = vpop.permute.xlu1 %2265  ;;  %v2264_v32 = vpop.permute.xlu0 %2263 }
 0x186   :  { %v761_v40 = vstv %s5386_s4  ;;  %v767_v2 = vstv %s5388_s11  ;;  %v773_v63 = vstv %s5390_s5  ;;  %v779_v6 = vstv %s5392_s16  ;;  %s5772_s5 = sld [smem:[#allocation2 + $0x31]]  ;;  %s5778_s16 = sld [smem:[#allocation2 + $0x32]] }
 0x187   :  { %v785_v1 = vstv %s5398_s19  ;;  %v791_v55 = vstv %s5400_s30  ;;  %v758_v57 = vsel %vm382_vm6, %v755_v39, %v757_v30  ;;  %v759_v25 = vsel %vm382_vm6, %v757_v30, %v755_v39  ;;  %s5780_s19 = sld [smem:[#allocation2 + $0x33]]  ;;  %s5792_s30 = sld [smem:[#allocation2 + $0x34]] }
 0x188   :  { %v762_v12 = vmul.f32 %v761_v40, %v758_v57  ;;  %v763_v60 = vmul.f32 %v761_v40, %v759_v25  ;;  %v768_v51 = vmul.f32 %v767_v2, %v758_v57  ;;  %v769_v15 = vmul.f32 %v767_v2, %v759_v25  ;;  %s6158_s4 = sld [smem:[#allocation2 + $0x7d]]  ;;  %s6200_s11 = sld [smem:[#allocation2 + $0x8a]] }
 0x189   :  { %v774_v33 = vmul.f32 %v773_v63, %v758_v57  ;;  %v775_v20 = vmul.f32 %v773_v63, %v759_v25  ;;  %v780_v43 = vmul.f32 %v779_v6, %v758_v57  ;;  %v781_v48 = vmul.f32 %v779_v6, %v759_v25  ;;  %v797_v49 = vpop.permute.xlu0 %796 }
 0x18a   :  { %v5457_v14 = vadd.f32 %v762_v12, %v5363_v5  ;;  %v5460_v13 = vadd.f32 %v763_v60, %v5366_v36  ;;  %v5463_v47 = vadd.f32 %v768_v51, %v5369_v34  ;;  %v5466_v38 = vadd.f32 %v769_v15, %v5372_v62 }
 0x18b   :  { %v5469_v59 = vadd.f32 %v774_v33, %v5375_v52  ;;  %v5472_v26 = vadd.f32 %v775_v20, %v5378_v53  ;;  %v5475_v5 = vadd.f32 %v780_v43, %v5381_v27  ;;  %v5478_v36 = vadd.f32 %v781_v48, %v5384_v54  ;;  %v799_v27 = vpop.permute.xlu1 %798 }
 0x18c   :  { %v786_v34 = vmul.f32 %v785_v1, %v758_v57  ;;  %v787_v62 = vmul.f32 %v785_v1, %v759_v25  ;;  %v792_v35 = vmul.f32 %v791_v55, %v758_v57  ;;  %v793_v58 = vmul.f32 %v791_v55, %v759_v25 }
 0x18d   :  { %v2267_v52 = vsel %vm382_vm6, %v2264_v32, %v2266_v21  ;;  %v2268_v53 = vsel %vm382_vm6, %v2266_v21, %v2264_v32  ;;  %v5493_v54 = vstv %s5442_s12  ;;  %v5496_v18 = vstv %s5444_s6  ;;  %s5794_s12 = sld [smem:[#allocation2 + $0x35]]  ;;  %s5828_s6 = sld [smem:[#allocation2 + $0x42]] }
 0x18e   :  { %v5499_v28 = vadd.f32 %v786_v34, %v5403_v42  ;;  %v5502_v30 = vadd.f32 %v787_v62, %v5406_v16  ;;  %v5505_v39 = vadd.f32 %v792_v35, %v5409_v9  ;;  %v5508_v3 = vadd.f32 %v793_v58, %v5412_v4 }
 0x18f   :  { %v2271_v61 = vmul.f32 %v2267_v52, %v761_v40  ;;  %v2272_v19 = vmul.f32 %v2268_v53, %v761_v40  ;;  %v2277_v45 = vmul.f32 %v2267_v52, %v767_v2  ;;  %v2278_v44 = vmul.f32 %v2268_v53, %v767_v2  ;;  %v2308_v32 = vpop.permute.xlu1 %2307 }
 0x190   :  { %v2283_v0 = vmul.f32 %v2267_v52, %v773_v63  ;;  %v2284_v7 = vmul.f32 %v2268_v53, %v773_v63  ;;  %v2289_v10 = vmul.f32 %v2267_v52, %v779_v6  ;;  %v2290_v57 = vmul.f32 %v2268_v53, %v779_v6 }
 0x191   :  { %v2273_v42 = vadd.f32 %v2271_v61, %v5414_v17  ;;  %v2274_v16 = vadd.f32 %v2272_v19, %v5416_v24  ;;  %v2279_v9 = vadd.f32 %v2277_v45, %v5418_v37  ;;  %v2280_v4 = vadd.f32 %v2278_v44, %v5420_v11  ;;  %v2306_v37 = vpop.permute.xlu0 %2305 }
 0x192   :  { %v5515_v40 = vadd.f32 %v2283_v0, %v5423_v8  ;;  %v5518_v2 = vadd.f32 %v2284_v7, %v5426_v23  ;;  %v5521_v63 = vadd.f32 %v2289_v10, %v5429_v56  ;;  %v5524_v6 = vadd.f32 %v2290_v57, %v5432_v31 }
 0x193   :  { %v2295_v17 = vmul.f32 %v2267_v52, %v785_v1  ;;  %v2296_v25 = vmul.f32 %v2268_v53, %v785_v1  ;;  %v2301_v24 = vmul.f32 %v2267_v52, %v791_v55  ;;  %v2302_v21 = vmul.f32 %v2268_v53, %v791_v55 }
 0x194   :  { %v815_v12 = vstv %s5480_s18  ;;  %v821_v11 = vstv %s5482_s20  ;;  %v827_v60 = vstv %s5484_s24  ;;  %v833_v8 = vstv %s5486_s15  ;;  %s5830_s18 = sld [smem:[#allocation2 + $0x43]]  ;;  %s5870_s20 = sld [smem:[#allocation2 + $0x44]] }
 0x195   :  { %v5531_v51 = vadd.f32 %v2295_v17, %v5434_v50  ;;  %v5534_v23 = vadd.f32 %v2296_v25, %v5436_v41  ;;  %v5537_v56 = vadd.f32 %v2301_v24, %v5438_v29  ;;  %v5540_v31 = vadd.f32 %v2302_v21, %v5440_v22  ;;  %s5872_s24 = sld [smem:[#allocation2 + $0x45]]  ;;  %s5874_s15 = sld [smem:[#allocation2 + $0x46]] }
 0x196   :  { %v800_v1 = vsel %vm425_vm7, %v797_v49, %v799_v27  ;;  %v801_v55 = vsel %vm425_vm7, %v799_v27, %v797_v49  ;;  %v2309_v15 = vsel %vm425_vm7, %v2306_v37, %v2308_v32  ;;  %v2310_v50 = vsel %vm425_vm7, %v2308_v32, %v2306_v37 }
 0x197   :  { %v804_v41 = vmul.f32 %v5493_v54, %v800_v1  ;;  %v805_v29 = vmul.f32 %v5493_v54, %v801_v55  ;;  %v810_v33 = vmul.f32 %v5496_v18, %v800_v1  ;;  %v811_v22 = vmul.f32 %v5496_v18, %v801_v55 }
 0x198   :  { %v816_v20 = vmul.f32 %v815_v12, %v800_v1  ;;  %v817_v43 = vmul.f32 %v815_v12, %v801_v55  ;;  %v822_v48 = vmul.f32 %v821_v11, %v800_v1  ;;  %v823_v34 = vmul.f32 %v821_v11, %v801_v55 }
 0x199   :  { %v5555_v62 = vadd.f32 %v804_v41, %v5457_v14  ;;  %v5558_v35 = vadd.f32 %v805_v29, %v5460_v13  ;;  %v5561_v58 = vadd.f32 %v810_v33, %v5463_v47  ;;  %v5564_v52 = vadd.f32 %v811_v22, %v5466_v38 }
 0x19a   :  { %v5567_v53 = vadd.f32 %v816_v20, %v5469_v59  ;;  %v5570_v27 = vadd.f32 %v817_v43, %v5472_v26  ;;  %v5573_v49 = vadd.f32 %v822_v48, %v5475_v5  ;;  %v5576_v14 = vadd.f32 %v823_v34, %v5478_v36 }
 0x19b   :  { %v828_v13 = vmul.f32 %v827_v60, %v800_v1  ;;  %v829_v47 = vmul.f32 %v827_v60, %v801_v55  ;;  %v834_v38 = vmul.f32 %v833_v8, %v800_v1  ;;  %v835_v61 = vmul.f32 %v833_v8, %v801_v55 }
 0x19c   :  { %v2313_v59 = vmul.f32 %v2309_v15, %v5493_v54  ;;  %v2314_v26 = vmul.f32 %v2310_v50, %v5493_v54  ;;  %v2319_v5 = vmul.f32 %v2309_v15, %v5496_v18  ;;  %v2320_v36 = vmul.f32 %v2310_v50, %v5496_v18 }
 0x19d   :  { %v5591_v19 = vadd.f32 %v828_v13, %v5499_v28  ;;  %v5594_v45 = vadd.f32 %v829_v47, %v5502_v30  ;;  %v5597_v44 = vadd.f32 %v834_v38, %v5505_v39  ;;  %v5600_v0 = vadd.f32 %v835_v61, %v5508_v3  ;;  %v879_v61 = vpop.permute.xlu1 %878 }
 0x19e   :  { %v5606_v54 = vadd.f32 %v2313_v59, %v2273_v42  ;;  %v5608_v7 = vadd.f32 %v2314_v26, %v2274_v16  ;;  %v5610_v18 = vadd.f32 %v2319_v5, %v2279_v9  ;;  %v5612_v28 = vadd.f32 %v2320_v36, %v2280_v4  ;;  %v877_v59 = vpop.permute.xlu0 %876 }
 0x19f   :  { %v2325_v30 = vmul.f32 %v2309_v15, %v815_v12  ;;  %v2326_v39 = vmul.f32 %v2310_v50, %v815_v12  ;;  %v2331_v3 = vmul.f32 %v2309_v15, %v821_v11  ;;  %v2332_v10 = vmul.f32 %v2310_v50, %v821_v11  ;;  %v3573_v11 = vld [vmem:[%s7602_s2 + $0x20] sm:$0xff] }
 0x1a0   :  { %v2337_v57 = vmul.f32 %v2309_v15, %v827_v60  ;;  %v2338_v42 = vmul.f32 %v2310_v50, %v827_v60  ;;  %v2343_v16 = vmul.f32 %v2309_v15, %v833_v8  ;;  %v2344_v9 = vmul.f32 %v2310_v50, %v833_v8  ;;  %v3574_v8 = vld [vmem:[%s7602_s2 + $0x28] sm:$0xff] }
 0x1a1   :  { %v5627_v4 = vadd.f32 %v2325_v30, %v5515_v40  ;;  %v5630_v17 = vadd.f32 %v2326_v39, %v5518_v2  ;;  %v5633_v25 = vadd.f32 %v2331_v3, %v5521_v63  ;;  %v5636_v24 = vadd.f32 %v2332_v10, %v5524_v6 }
 0x1a2   :  { %v5639_v21 = vadd.f32 %v2337_v57, %v5531_v51  ;;  %v5642_v32 = vadd.f32 %v2338_v42, %v5534_v23  ;;  %v5645_v37 = vadd.f32 %v2343_v16, %v5537_v56  ;;  %v5648_v40 = vadd.f32 %v2344_v9, %v5540_v31 }
 0x1a3   :  { %v841_v2 = vstv %s5578_s13  ;;  %v5652_v63 = vstv %s5580_s17  ;;  %v5655_v6 = vstv %s5582_s28  ;;  %v5658_v12 = vstv %s5584_s8  ;;  %s5876_s13 = sld [smem:[#allocation2 + $0x47]]  ;;  %s5960_s17 = sld [smem:[#allocation2 + $0x54]] }
 0x1a4   :  { %v842_v60 = vmul.f32 %v3573_v11, %v841_v2  ;;  %v843_v51 = vmul.f32 %v3574_v8, %v841_v2  ;;  %v848_v23 = vmul.f32 %v3573_v11, %v5652_v63  ;;  %v849_v56 = vmul.f32 %v3574_v8, %v5652_v63  ;;  %s5962_s28 = sld [smem:[#allocation2 + $0x55]]  ;;  %s5964_s8 = sld [smem:[#allocation2 + $0x56]] }
 0x1a5   :  { %v854_v31 = vmul.f32 %v3573_v11, %v5655_v6  ;;  %v855_v1 = vmul.f32 %v3574_v8, %v5655_v6  ;;  %v860_v55 = vmul.f32 %v3573_v11, %v5658_v12  ;;  %v861_v15 = vmul.f32 %v3574_v8, %v5658_v12 }
 0x1a6   :  { %v5673_v50 = vstv %s5602_s7  ;;  %v5676_v41 = vstv %s5604_s9  ;;  %v5679_v29 = vstv %s5614_s29  ;;  %v5682_v33 = vstv %s5616_s14  ;;  %s5966_s7 = sld [smem:[#allocation2 + $0x57]]  ;;  %s5972_s9 = sld [smem:[#allocation2 + $0x58]] }
 0x1a7   :  { %v866_v22 = vmul.f32 %v3573_v11, %v5673_v50  ;;  %v867_v20 = vmul.f32 %v3574_v8, %v5673_v50  ;;  %v872_v43 = vmul.f32 %v3573_v11, %v5676_v41  ;;  %v873_v48 = vmul.f32 %v3574_v8, %v5676_v41  ;;  %s5974_s29 = sld [smem:[#allocation2 + $0x59]]  ;;  %s6016_s14 = sld [smem:[#allocation2 + $0x66]] }
 0x1a8   :  { %v5689_v34 = vstv %s5618_s3  ;;  %v5692_v13 = vstv %s5620_s27  ;;  %v5695_v47 = vstv %s5622_s0  ;;  %v5698_v38 = vstv %s5624_s21  ;;  %s6018_s3 = sld [smem:[#allocation2 + $0x67]]  ;;  %s6054_s27 = sld [smem:[#allocation2 + $0x68]] }
 0x1a9   :  { %v844_v26 = vadd.f32 %v842_v60, %v5555_v62  ;;  %v845_v5 = vadd.f32 %v843_v51, %v5558_v35  ;;  %v850_v36 = vadd.f32 %v848_v23, %v5561_v58  ;;  %v851_v30 = vadd.f32 %v849_v56, %v5564_v52  ;;  %s6056_s0 = sld [smem:[#allocation2 + $0x69]]  ;;  %s6058_s21 = sld [smem:[#allocation2 + $0x6a]] }
 0x1aa   :  { %v856_v39 = vadd.f32 %v854_v31, %v5567_v53  ;;  %v857_v3 = vadd.f32 %v855_v1, %v5570_v27  ;;  %v862_v10 = vadd.f32 %v860_v55, %v5573_v49  ;;  %v863_v57 = vadd.f32 %v861_v15, %v5576_v14  ;;  %v3575_v53 = vld [vmem:[%s7602_s2 + $0x50] sm:$0xff]  ;;  %v3576_v49 = vld [vmem:[%s7602_s2 + $0x58] sm:$0xff]  ;;  %s5770_s2 = sld [smem:[#allocation2 + $0x30]] }
 0x1ab   :  { %v868_v42 = vadd.f32 %v866_v22, %v5591_v19  ;;  %v869_v16 = vadd.f32 %v867_v20, %v5594_v45  ;;  %v874_v62 = vadd.f32 %v872_v43, %v5597_v44  ;;  %v875_v35 = vadd.f32 %v873_v48, %v5600_v0 }
 0x1ac   :  { %v880_v58 = vsel %vm124_vm1, %v877_v59, %v879_v61  ;;  %v881_v52 = vsel %vm124_vm1, %v879_v61, %v877_v59  ;;  %v2351_v27 = vmul.f32 %v3575_v53, %v841_v2  ;;  %v2352_v14 = vmul.f32 %v3576_v49, %v841_v2 }
 0x1ad   :  { %v884_v19 = vmul.f32 %v5679_v29, %v880_v58  ;;  %v885_v45 = vmul.f32 %v5679_v29, %v881_v52  ;;  %v890_v44 = vmul.f32 %v5682_v33, %v880_v58  ;;  %v891_v0 = vmul.f32 %v5682_v33, %v881_v52 }
 0x1ae   :  { %v896_v9 = vmul.f32 %v5689_v34, %v880_v58  ;;  %v897_v11 = vmul.f32 %v5689_v34, %v881_v52  ;;  %v902_v60 = vmul.f32 %v5692_v13, %v880_v58  ;;  %v903_v8 = vmul.f32 %v5692_v13, %v881_v52 }
 0x1af   :  { %v5730_v51 = vadd.f32 %v884_v19, %v844_v26  ;;  %v5732_v23 = vadd.f32 %v885_v45, %v845_v5  ;;  %v5734_v2 = vadd.f32 %v890_v44, %v850_v36  ;;  %v5736_v56 = vadd.f32 %v891_v0, %v851_v30 }
 0x1b0   :  { %v5738_v31 = vadd.f32 %v896_v9, %v856_v39  ;;  %v5740_v1 = vadd.f32 %v897_v11, %v857_v3  ;;  %v5742_v55 = vadd.f32 %v902_v60, %v862_v10  ;;  %v5744_v15 = vadd.f32 %v903_v8, %v863_v57  ;;  %v2388_v10 = vpop.permute.xlu1 %2387 }
 0x1b1   :  { %v908_v22 = vmul.f32 %v5695_v47, %v880_v58  ;;  %v909_v20 = vmul.f32 %v5695_v47, %v881_v52  ;;  %v914_v43 = vmul.f32 %v5698_v38, %v880_v58  ;;  %v915_v48 = vmul.f32 %v5698_v38, %v881_v52  ;;  %v2386_v52 = vpop.permute.xlu0 %2385 }
 0x1b2   :  { %v2353_v61 = vadd.f32 %v2351_v27, %v5606_v54  ;;  %v2354_v59 = vadd.f32 %v2352_v14, %v5608_v7  ;;  %v2357_v26 = vmul.f32 %v3575_v53, %v5652_v63  ;;  %v2358_v5 = vmul.f32 %v3576_v49, %v5652_v63 }
 0x1b3   :  { %v5754_v36 = vadd.f32 %v908_v22, %v868_v42  ;;  %v5756_v30 = vadd.f32 %v909_v20, %v869_v16  ;;  %v5758_v39 = vadd.f32 %v914_v43, %v874_v62  ;;  %v5760_v3 = vadd.f32 %v915_v48, %v875_v35 }
 0x1b4   :  { %v2359_v57 = vadd.f32 %v2357_v26, %v5610_v18  ;;  %v2360_v58 = vadd.f32 %v2358_v5, %v5612_v28  ;;  %v2363_v54 = vmul.f32 %v3575_v53, %v5655_v6  ;;  %v2364_v7 = vmul.f32 %v3576_v49, %v5655_v6  ;;  %v921_v45 = vpop.permute.xlu1 %920 }
 0x1b5   :  { %v2369_v63 = vmul.f32 %v3575_v53, %v5658_v12  ;;  %v2370_v42 = vmul.f32 %v3576_v49, %v5658_v12  ;;  %v2375_v16 = vmul.f32 %v3575_v53, %v5673_v50  ;;  %v2376_v62 = vmul.f32 %v3576_v49, %v5673_v50  ;;  %v919_v44 = vpop.permute.xlu0 %918 }
 0x1b6   :  { %v2365_v18 = vadd.f32 %v2363_v54, %v5627_v4  ;;  %v2366_v28 = vadd.f32 %v2364_v7, %v5630_v17  ;;  %v2381_v35 = vmul.f32 %v3575_v53, %v5676_v41  ;;  %v2382_v6 = vmul.f32 %v3576_v49, %v5676_v41 }
 0x1b7   :  { %v2371_v12 = vadd.f32 %v2369_v63, %v5633_v25  ;;  %v2372_v50 = vadd.f32 %v2370_v42, %v5636_v24  ;;  %v2377_v27 = vadd.f32 %v2375_v16, %v5639_v21  ;;  %v2378_v14 = vadd.f32 %v2376_v62, %v5642_v32 }
 0x1b8   :  { %v2383_v4 = vadd.f32 %v2381_v35, %v5645_v37  ;;  %v2384_v17 = vadd.f32 %v2382_v6, %v5648_v40  ;;  %v2389_v53 = vsel %vm124_vm1, %v2386_v52, %v2388_v10  ;;  %v2390_v41 = vsel %vm124_vm1, %v2388_v10, %v2386_v52  ;;  %v2430_v52 = vpop.permute.xlu1 %2429 }
 0x1b9   :  { %v2393_v25 = vmul.f32 %v2389_v53, %v5679_v29  ;;  %v2394_v24 = vmul.f32 %v2390_v41, %v5679_v29  ;;  %v2399_v21 = vmul.f32 %v2389_v53, %v5682_v33  ;;  %v2400_v32 = vmul.f32 %v2390_v41, %v5682_v33  ;;  %v2428_v63 = vpop.permute.xlu0 %2427 }
 0x1ba   :  { %v2405_v37 = vmul.f32 %v2389_v53, %v5689_v34  ;;  %v2406_v40 = vmul.f32 %v2390_v41, %v5689_v34  ;;  %v2411_v49 = vmul.f32 %v2389_v53, %v5692_v13  ;;  %v2412_v19 = vmul.f32 %v2390_v41, %v5692_v13 }
 0x1bb   :  { %v5804_v0 = vadd.f32 %v2393_v25, %v2353_v61  ;;  %v5806_v29 = vadd.f32 %v2394_v24, %v2354_v59  ;;  %v5808_v9 = vadd.f32 %v2399_v21, %v2359_v57  ;;  %v5810_v33 = vadd.f32 %v2400_v32, %v2360_v58 }
 0x1bc   :  { %v5812_v11 = vadd.f32 %v2405_v37, %v2365_v18  ;;  %v5814_v34 = vadd.f32 %v2406_v40, %v2366_v28  ;;  %v5816_v60 = vadd.f32 %v2411_v49, %v2371_v12  ;;  %v5818_v13 = vadd.f32 %v2412_v19, %v2372_v50 }
 0x1bd   :  { %v2417_v8 = vmul.f32 %v2389_v53, %v5695_v47  ;;  %v2418_v22 = vmul.f32 %v2390_v41, %v5695_v47  ;;  %v2423_v20 = vmul.f32 %v2389_v53, %v5698_v38  ;;  %v2424_v43 = vmul.f32 %v2390_v41, %v5698_v38  ;;  %v961_v21 = vpop.permute.xlu0 %960 }
 0x1be   :  { %v925_v48 = vstv %s5770_s2  ;;  %v931_v61 = vstv %s5772_s5  ;;  %v937_v59 = vstv %s5778_s16  ;;  %v943_v26 = vstv %s5780_s19  ;;  %s6202_s2 = sld [smem:[#allocation2 + $0x8b]]  ;;  %s6218_s5 = sld [smem:[#allocation2 + $0x8c]] }
 0x1bf   :  { %v5832_v5 = vadd.f32 %v2417_v8, %v2377_v27  ;;  %v5834_v10 = vadd.f32 %v2418_v22, %v2378_v14  ;;  %v5836_v57 = vadd.f32 %v2423_v20, %v2383_v4  ;;  %v5838_v58 = vadd.f32 %v2424_v43, %v2384_v17  ;;  %s6232_s16 = sld [smem:[#allocation2 + $0x8d]]  ;;  %s6234_s19 = sld [smem:[#allocation2 + $0x8e]] }
 0x1c0   :  { %v949_v47 = vstv %s5792_s30  ;;  %v955_v54 = vstv %s5794_s12  ;;  %v922_v38 = vsel %vm167_vm0, %v919_v44, %v921_v45  ;;  %v923_v7 = vsel %vm167_vm0, %v921_v45, %v919_v44  ;;  %s6248_s30 = sld [smem:[#allocation2 + $0x8f]]  ;;  %s6250_s12 = sld [smem:[#allocation2 + $0x9c]] }
 0x1c1   :  { %v926_v42 = vmul.f32 %v925_v48, %v922_v38  ;;  %v927_v16 = vmul.f32 %v925_v48, %v923_v7  ;;  %v932_v62 = vmul.f32 %v931_v61, %v922_v38  ;;  %v933_v18 = vmul.f32 %v931_v61, %v923_v7 }
 0x1c2   :  { %v938_v28 = vmul.f32 %v937_v59, %v922_v38  ;;  %v939_v35 = vmul.f32 %v937_v59, %v923_v7  ;;  %v944_v6 = vmul.f32 %v943_v26, %v922_v38  ;;  %v945_v12 = vmul.f32 %v943_v26, %v923_v7 }
 0x1c3   :  { %v5847_v50 = vadd.f32 %v926_v42, %v5730_v51  ;;  %v5850_v27 = vadd.f32 %v927_v16, %v5732_v23  ;;  %v5853_v14 = vadd.f32 %v932_v62, %v5734_v2  ;;  %v5856_v4 = vadd.f32 %v933_v18, %v5736_v56 }
 0x1c4   :  { %v5859_v17 = vadd.f32 %v938_v28, %v5738_v31  ;;  %v5862_v53 = vadd.f32 %v939_v35, %v5740_v1  ;;  %v5865_v51 = vadd.f32 %v944_v6, %v5742_v55  ;;  %v5868_v23 = vadd.f32 %v945_v12, %v5744_v15  ;;  %v963_v55 = vpop.permute.xlu1 %962 }
 0x1c5   :  { %v950_v2 = vmul.f32 %v949_v47, %v922_v38  ;;  %v951_v56 = vmul.f32 %v949_v47, %v923_v7  ;;  %v956_v41 = vmul.f32 %v955_v54, %v922_v38  ;;  %v957_v25 = vmul.f32 %v955_v54, %v923_v7 }
 0x1c6   :  { %v2431_v31 = vsel %vm167_vm0, %v2428_v63, %v2430_v52  ;;  %v2432_v1 = vsel %vm167_vm0, %v2430_v52, %v2428_v63  ;;  %v5883_v15 = vstv %s5828_s6  ;;  %v5886_v24 = vstv %s5830_s18  ;;  %s6256_s6 = sld [smem:[#allocation2 + $0x9d]]  ;;  %s6258_s18 = sld [smem:[#allocation2 + $0x9e]] }
 0x1c7   :  { %v5889_v32 = vadd.f32 %v950_v2, %v5754_v36  ;;  %v5892_v37 = vadd.f32 %v951_v56, %v5756_v30  ;;  %v5895_v40 = vadd.f32 %v956_v41, %v5758_v39  ;;  %v5898_v49 = vadd.f32 %v957_v25, %v5760_v3 }
 0x1c8   :  { %v2435_v19 = vmul.f32 %v2431_v31, %v925_v48  ;;  %v2436_v45 = vmul.f32 %v2432_v1, %v925_v48  ;;  %v2441_v44 = vmul.f32 %v2431_v31, %v931_v61  ;;  %v2442_v8 = vmul.f32 %v2432_v1, %v931_v61  ;;  %v2472_v63 = vpop.permute.xlu1 %2471 }
 0x1c9   :  { %v2447_v22 = vmul.f32 %v2431_v31, %v937_v59  ;;  %v2448_v20 = vmul.f32 %v2432_v1, %v937_v59  ;;  %v2453_v43 = vmul.f32 %v2431_v31, %v943_v26  ;;  %v2454_v38 = vmul.f32 %v2432_v1, %v943_v26 }
 0x1ca   :  { %v2437_v36 = vadd.f32 %v2435_v19, %v5804_v0  ;;  %v2438_v30 = vadd.f32 %v2436_v45, %v5806_v29  ;;  %v2443_v39 = vadd.f32 %v2441_v44, %v5808_v9  ;;  %v2444_v3 = vadd.f32 %v2442_v8, %v5810_v33  ;;  %v2470_v9 = vpop.permute.xlu0 %2469 }
 0x1cb   :  { %v5905_v48 = vadd.f32 %v2447_v22, %v5812_v11  ;;  %v5908_v61 = vadd.f32 %v2448_v20, %v5814_v34  ;;  %v5911_v59 = vadd.f32 %v2453_v43, %v5816_v60  ;;  %v5914_v26 = vadd.f32 %v2454_v38, %v5818_v13 }
 0x1cc   :  { %v2459_v0 = vmul.f32 %v2431_v31, %v949_v47  ;;  %v2460_v7 = vmul.f32 %v2432_v1, %v949_v47  ;;  %v2465_v29 = vmul.f32 %v2431_v31, %v955_v54  ;;  %v2466_v52 = vmul.f32 %v2432_v1, %v955_v54  ;;  %v1005_v38 = vpop.permute.xlu1 %1004 }
 0x1cd   :  { %v979_v42 = vstv %s5870_s20  ;;  %v985_v33 = vstv %s5872_s24  ;;  %v991_v16 = vstv %s5874_s15  ;;  %v997_v11 = vstv %s5876_s13  ;;  %s6270_s20 = sld [smem:[#allocation2 + $0x9f]]  ;;  %s6272_s24 = sld [smem:[#allocation2 + $0xa0]] }
 0x1ce   :  { %v2461_v62 = vadd.f32 %v2459_v0, %v5832_v5  ;;  %v2462_v34 = vadd.f32 %v2460_v7, %v5834_v10  ;;  %v2467_v60 = vadd.f32 %v2465_v29, %v5836_v57  ;;  %v2468_v18 = vadd.f32 %v2466_v52, %v5838_v58  ;;  %s6286_s15 = sld [smem:[#allocation2 + $0xa1]]  ;;  %s6288_s13 = sld [smem:[#allocation7]] }
 0x1cf   :  { %v964_v13 = vsel %vm210_vm2, %v961_v21, %v963_v55  ;;  %v965_v47 = vsel %vm210_vm2, %v963_v55, %v961_v21  ;;  %v2473_v54 = vsel %vm210_vm2, %v2470_v9, %v2472_v63  ;;  %v2474_v28 = vsel %vm210_vm2, %v2472_v63, %v2470_v9 }
 0x1d0   :  { %v968_v5 = vmul.f32 %v5883_v15, %v964_v13  ;;  %v969_v10 = vmul.f32 %v5883_v15, %v965_v47  ;;  %v974_v57 = vmul.f32 %v5886_v24, %v964_v13  ;;  %v975_v58 = vmul.f32 %v5886_v24, %v965_v47 }
 0x1d1   :  { %v980_v35 = vmul.f32 %v979_v42, %v964_v13  ;;  %v981_v6 = vmul.f32 %v979_v42, %v965_v47  ;;  %v986_v12 = vmul.f32 %v985_v33, %v964_v13  ;;  %v987_v2 = vmul.f32 %v985_v33, %v965_v47 }
 0x1d2   :  { %v5937_v56 = vadd.f32 %v968_v5, %v5847_v50  ;;  %v5940_v41 = vadd.f32 %v969_v10, %v5850_v27  ;;  %v5943_v25 = vadd.f32 %v974_v57, %v5853_v14  ;;  %v5946_v31 = vadd.f32 %v975_v58, %v5856_v4 }
 0x1d3   :  { %v5949_v1 = vadd.f32 %v980_v35, %v5859_v17  ;;  %v5952_v55 = vadd.f32 %v981_v6, %v5862_v53  ;;  %v5955_v21 = vadd.f32 %v986_v12, %v5865_v51  ;;  %v5958_v50 = vadd.f32 %v987_v2, %v5868_v23 }
 0x1d4   :  { %v992_v27 = vmul.f32 %v991_v16, %v964_v13  ;;  %v993_v14 = vmul.f32 %v991_v16, %v965_v47  ;;  %v998_v4 = vmul.f32 %v997_v11, %v964_v13  ;;  %v999_v19 = vmul.f32 %v997_v11, %v965_v47 }
 0x1d5   :  { %v2477_v17 = vmul.f32 %v2473_v54, %v5883_v15  ;;  %v2478_v53 = vmul.f32 %v2474_v28, %v5883_v15  ;;  %v2483_v51 = vmul.f32 %v2473_v54, %v5886_v24  ;;  %v2484_v23 = vmul.f32 %v2474_v28, %v5886_v24 }
 0x1d6   :  { %v5977_v45 = vadd.f32 %v992_v27, %v5889_v32  ;;  %v5980_v44 = vadd.f32 %v993_v14, %v5892_v37  ;;  %v5983_v8 = vadd.f32 %v998_v4, %v5895_v40  ;;  %v5986_v22 = vadd.f32 %v999_v19, %v5898_v49  ;;  %v1003_v32 = vpop.permute.xlu0 %1002 }
 0x1d7   :  { %v5988_v15 = vadd.f32 %v2477_v17, %v2437_v36  ;;  %v5990_v20 = vadd.f32 %v2478_v53, %v2438_v30  ;;  %v5992_v24 = vadd.f32 %v2483_v51, %v2443_v39  ;;  %v5994_v43 = vadd.f32 %v2484_v23, %v2444_v3 }
 0x1d8   :  { %v2489_v0 = vmul.f32 %v2473_v54, %v979_v42  ;;  %v2490_v7 = vmul.f32 %v2474_v28, %v979_v42  ;;  %v2495_v37 = vmul.f32 %v2473_v54, %v985_v33  ;;  %v2496_v29 = vmul.f32 %v2474_v28, %v985_v33 }
 0x1d9   :  { %v2501_v40 = vmul.f32 %v2473_v54, %v991_v16  ;;  %v2502_v49 = vmul.f32 %v2474_v28, %v991_v16  ;;  %v2507_v36 = vmul.f32 %v2473_v54, %v997_v11  ;;  %v2508_v30 = vmul.f32 %v2474_v28, %v997_v11 }
 0x1da   :  { %v5997_v39 = vadd.f32 %v2489_v0, %v5905_v48  ;;  %v6000_v3 = vadd.f32 %v2490_v7, %v5908_v61  ;;  %v6003_v52 = vadd.f32 %v2495_v37, %v5911_v59  ;;  %v6006_v63 = vadd.f32 %v2496_v29, %v5914_v26 }
 0x1db   :  { %v6008_v9 = vadd.f32 %v2501_v40, %v2461_v62  ;;  %v6010_v42 = vadd.f32 %v2502_v49, %v2462_v34  ;;  %v6012_v33 = vadd.f32 %v2507_v36, %v2467_v60  ;;  %v6014_v16 = vadd.f32 %v2508_v30, %v2468_v18  ;;  %v2514_v34 = vpop.permute.xlu1 %2513  ;;  %v2512_v60 = vpop.permute.xlu0 %2511 }
 0x1dc   :  { %v1009_v48 = vstv %s5960_s17  ;;  %v1015_v61 = vstv %s5962_s28  ;;  %v1021_v11 = vstv %s5964_s8  ;;  %v1027_v59 = vstv %s5966_s7  ;;  %s6290_s17 = sld [smem:[#allocation7 + $0x1]]  ;;  %s6292_s28 = sld [smem:[#allocation7 + $0x2]] }
 0x1dd   :  { %v1033_v13 = vstv %s5972_s9  ;;  %v1039_v47 = vstv %s5974_s29  ;;  %v1006_v26 = vsel %vm253_vm3, %v1003_v32, %v1005_v38  ;;  %v1007_v62 = vsel %vm253_vm3, %v1005_v38, %v1003_v32  ;;  %s6294_s8 = sld [smem:[#allocation6]]  ;;  %s6296_s7 = sld [smem:[#allocation6 + $0x1]] }
 0x1de   :  { %v1010_v18 = vmul.f32 %v1009_v48, %v1006_v26  ;;  %v1011_v54 = vmul.f32 %v1009_v48, %v1007_v62  ;;  %v1016_v28 = vmul.f32 %v1015_v61, %v1006_v26  ;;  %v1017_v5 = vmul.f32 %v1015_v61, %v1007_v62  ;;  %s6310_s9 = sld [smem:[#allocation6 + $0x2]]  ;;  %s6312_s29 = sld [smem:[#allocation6 + $0x3]] }
 0x1df   :  { %v1022_v10 = vmul.f32 %v1021_v11, %v1006_v26  ;;  %v1023_v57 = vmul.f32 %v1021_v11, %v1007_v62  ;;  %v1028_v58 = vmul.f32 %v1027_v59, %v1006_v26  ;;  %v1029_v35 = vmul.f32 %v1027_v59, %v1007_v62  ;;  %v1045_v51 = vpop.permute.xlu0 %1044 }
 0x1e0   :  { %v6031_v6 = vadd.f32 %v1010_v18, %v5937_v56  ;;  %v6034_v12 = vadd.f32 %v1011_v54, %v5940_v41  ;;  %v6037_v2 = vadd.f32 %v1016_v28, %v5943_v25  ;;  %v6040_v27 = vadd.f32 %v1017_v5, %v5946_v31 }
 0x1e1   :  { %v6043_v14 = vadd.f32 %v1022_v10, %v5949_v1  ;;  %v6046_v4 = vadd.f32 %v1023_v57, %v5952_v55  ;;  %v6049_v56 = vadd.f32 %v1028_v58, %v5955_v21  ;;  %v6052_v41 = vadd.f32 %v1029_v35, %v5958_v50  ;;  %v1047_v21 = vpop.permute.xlu1 %1046 }
 0x1e2   :  { %v1034_v25 = vmul.f32 %v1033_v13, %v1006_v26  ;;  %v1035_v31 = vmul.f32 %v1033_v13, %v1007_v62  ;;  %v1040_v19 = vmul.f32 %v1039_v47, %v1006_v26  ;;  %v1041_v17 = vmul.f32 %v1039_v47, %v1007_v62 }
 0x1e3   :  { %v2515_v1 = vsel %vm253_vm3, %v2512_v60, %v2514_v34  ;;  %v2516_v55 = vsel %vm253_vm3, %v2514_v34, %v2512_v60  ;;  %v6067_v50 = vstv %s6016_s14  ;;  %v6070_v53 = vstv %s6018_s3  ;;  %s6326_s14 = sld [smem:[#allocation6 + $0x4]]  ;;  %s6328_s3 = sld [smem:[#allocation6 + $0x5]] }
 0x1e4   :  { %v6073_v23 = vadd.f32 %v1034_v25, %v5977_v45  ;;  %v6076_v38 = vadd.f32 %v1035_v31, %v5980_v44  ;;  %v6079_v32 = vadd.f32 %v1040_v19, %v5983_v8  ;;  %v6082_v0 = vadd.f32 %v1041_v17, %v5986_v22 }
 0x1e5   :  { %v2519_v7 = vmul.f32 %v2515_v1, %v1009_v48  ;;  %v2520_v37 = vmul.f32 %v2516_v55, %v1009_v48  ;;  %v2525_v29 = vmul.f32 %v2515_v1, %v1015_v61  ;;  %v2526_v40 = vmul.f32 %v2516_v55, %v1015_v61  ;;  %v2556_v60 = vpop.permute.xlu1 %2555 }
 0x1e6   :  { %v2531_v49 = vmul.f32 %v2515_v1, %v1021_v11  ;;  %v2532_v36 = vmul.f32 %v2516_v55, %v1021_v11  ;;  %v2537_v30 = vmul.f32 %v2515_v1, %v1027_v59  ;;  %v2538_v26 = vmul.f32 %v2516_v55, %v1027_v59 }
 0x1e7   :  { %v2521_v45 = vadd.f32 %v2519_v7, %v5988_v15  ;;  %v2522_v44 = vadd.f32 %v2520_v37, %v5990_v20  ;;  %v2527_v8 = vadd.f32 %v2525_v29, %v5992_v24  ;;  %v2528_v22 = vadd.f32 %v2526_v40, %v5994_v43  ;;  %v2554_v24 = vpop.permute.xlu0 %2553 }
 0x1e8   :  { %v6089_v48 = vadd.f32 %v2531_v49, %v5997_v39  ;;  %v6092_v61 = vadd.f32 %v2532_v36, %v6000_v3  ;;  %v6095_v11 = vadd.f32 %v2537_v30, %v6003_v52  ;;  %v6098_v59 = vadd.f32 %v2538_v26, %v6006_v63 }
 0x1e9   :  { %v2543_v15 = vmul.f32 %v2515_v1, %v1033_v13  ;;  %v2544_v62 = vmul.f32 %v2516_v55, %v1033_v13  ;;  %v2549_v20 = vmul.f32 %v2515_v1, %v1039_v47  ;;  %v2550_v34 = vmul.f32 %v2516_v55, %v1039_v47  ;;  %v1089_v26 = vpop.permute.xlu1 %1088 }
 0x1ea   :  { %v1063_v18 = vstv %s6054_s27  ;;  %v1069_v43 = vstv %s6056_s0  ;;  %v1075_v54 = vstv %s6058_s21  ;;  %v1081_v39 = vstv %s6060_s23  ;;  %s6334_s27 = sld [smem:[#allocation6 + $0x6]]  ;;  %s6336_s0 = sld [smem:[#allocation6 + $0x7]] }
 0x1eb   :  { %v2545_v28 = vadd.f32 %v2543_v15, %v6008_v9  ;;  %v2546_v3 = vadd.f32 %v2544_v62, %v6010_v42  ;;  %v2551_v52 = vadd.f32 %v2549_v20, %v6012_v33  ;;  %v2552_v5 = vadd.f32 %v2550_v34, %v6014_v16  ;;  %s6350_s21 = sld [smem:[#allocation6 + $0x8]]  ;;  %s6352_s23 = sld [smem:[#allocation6 + $0x9]] }
 0x1ec   :  { %v1048_v63 = vsel %vm296_vm4, %v1045_v51, %v1047_v21  ;;  %v1049_v13 = vsel %vm296_vm4, %v1047_v21, %v1045_v51  ;;  %v2557_v47 = vsel %vm296_vm4, %v2554_v24, %v2556_v60  ;;  %v2558_v10 = vsel %vm296_vm4, %v2556_v60, %v2554_v24 }
 0x1ed   :  { %v1052_v9 = vmul.f32 %v6067_v50, %v1048_v63  ;;  %v1053_v42 = vmul.f32 %v6067_v50, %v1049_v13  ;;  %v1058_v33 = vmul.f32 %v6070_v53, %v1048_v63  ;;  %v1059_v16 = vmul.f32 %v6070_v53, %v1049_v13 }
 0x1ee   :  { %v1064_v57 = vmul.f32 %v1063_v18, %v1048_v63  ;;  %v1065_v58 = vmul.f32 %v1063_v18, %v1049_v13  ;;  %v1070_v35 = vmul.f32 %v1069_v43, %v1048_v63  ;;  %v1071_v25 = vmul.f32 %v1069_v43, %v1049_v13 }
 0x1ef   :  { %v6121_v31 = vadd.f32 %v1052_v9, %v6031_v6  ;;  %v6124_v19 = vadd.f32 %v1053_v42, %v6034_v12  ;;  %v6127_v17 = vadd.f32 %v1058_v33, %v6037_v2  ;;  %v6130_v1 = vadd.f32 %v1059_v16, %v6040_v27 }
 0x1f0   :  { %v6133_v55 = vadd.f32 %v1064_v57, %v6043_v14  ;;  %v6136_v21 = vadd.f32 %v1065_v58, %v6046_v4  ;;  %v6139_v51 = vadd.f32 %v1070_v35, %v6049_v56  ;;  %v6142_v6 = vadd.f32 %v1071_v25, %v6052_v41 }
 0x1f1   :  { %v1076_v12 = vmul.f32 %v1075_v54, %v1048_v63  ;;  %v1077_v2 = vmul.f32 %v1075_v54, %v1049_v13  ;;  %v1082_v27 = vmul.f32 %v1081_v39, %v1048_v63  ;;  %v1083_v7 = vmul.f32 %v1081_v39, %v1049_v13 }
 0x1f2   :  { %v2561_v14 = vmul.f32 %v2557_v47, %v6067_v50  ;;  %v2562_v4 = vmul.f32 %v2558_v10, %v6067_v50  ;;  %v2567_v56 = vmul.f32 %v2557_v47, %v6070_v53  ;;  %v2568_v41 = vmul.f32 %v2558_v10, %v6070_v53 }
 0x1f3   :  { %v6161_v37 = vadd.f32 %v1076_v12, %v6073_v23  ;;  %v6164_v29 = vadd.f32 %v1077_v2, %v6076_v38  ;;  %v6167_v40 = vadd.f32 %v1082_v27, %v6079_v32  ;;  %v6170_v49 = vadd.f32 %v1083_v7, %v6082_v0  ;;  %v1087_v23 = vpop.permute.xlu0 %1086 }
 0x1f4   :  { %v6172_v50 = vadd.f32 %v2561_v14, %v2521_v45  ;;  %v6174_v36 = vadd.f32 %v2562_v4, %v2522_v44  ;;  %v6176_v53 = vadd.f32 %v2567_v56, %v2527_v8  ;;  %v6178_v30 = vadd.f32 %v2568_v41, %v2528_v22 }
 0x1f5   :  { %v2573_v15 = vmul.f32 %v2557_v47, %v1063_v18  ;;  %v2574_v62 = vmul.f32 %v2558_v10, %v1063_v18  ;;  %v2579_v38 = vmul.f32 %v2557_v47, %v1069_v43  ;;  %v2580_v20 = vmul.f32 %v2558_v10, %v1069_v43 }
 0x1f6   :  { %v2585_v32 = vmul.f32 %v2557_v47, %v1075_v54  ;;  %v2586_v0 = vmul.f32 %v2558_v10, %v1075_v54  ;;  %v2591_v45 = vmul.f32 %v2557_v47, %v1081_v39  ;;  %v2592_v44 = vmul.f32 %v2558_v10, %v1081_v39 }
 0x1f7   :  { %v6181_v8 = vadd.f32 %v2573_v15, %v6089_v48  ;;  %v6184_v22 = vadd.f32 %v2574_v62, %v6092_v61  ;;  %v6187_v34 = vadd.f32 %v2579_v38, %v6095_v11  ;;  %v6190_v60 = vadd.f32 %v2580_v20, %v6098_v59 }
 0x1f8   :  { %v6192_v24 = vadd.f32 %v2585_v32, %v2545_v28  ;;  %v6194_v18 = vadd.f32 %v2586_v0, %v2546_v3  ;;  %v6196_v43 = vadd.f32 %v2591_v45, %v2551_v52  ;;  %v6198_v54 = vadd.f32 %v2592_v44, %v2552_v5  ;;  %v2598_v52 = vpop.permute.xlu1 %2597  ;;  %v2596_v5 = vpop.permute.xlu0 %2595 }
 0x1f9   :  { %v1093_v48 = vstv %s6144_s22  ;;  %v1099_v61 = vstv %s6146_s25  ;;  %v1105_v39 = vstv %s6148_s26  ;;  %v1111_v11 = vstv %s6150_s1  ;;  %s6366_s22 = sld [smem:[#allocation6 + $0xa]]  ;;  %s6368_s25 = sld [smem:[#allocation6 + $0xb]] }
 0x1fa   :  { %v6209_v63 = vstv %s6156_s10  ;;  %v6212_v59 = vstv %s6158_s4  ;;  %v1090_v28 = vsel %vm339_vm5, %v1087_v23, %v1089_v26  ;;  %v1091_v3 = vsel %vm339_vm5, %v1089_v26, %v1087_v23  ;;  %s6378_s26 = sld [smem:[#allocation6 + $0xc]]  ;;  %s6380_s1 = sld [smem:[#allocation6 + $0xd]] }
 0x1fb   :  { %v1094_v13 = vmul.f32 %v1093_v48, %v1090_v28  ;;  %v1095_v47 = vmul.f32 %v1093_v48, %v1091_v3  ;;  %v1100_v10 = vmul.f32 %v1099_v61, %v1090_v28  ;;  %v1101_v9 = vmul.f32 %v1099_v61, %v1091_v3  ;;  %s6386_s10 = sld [smem:[#allocation6 + $0xe]]  ;;  %s6388_s4 = sld [smem:[#allocation6 + $0xf]] }
 0x1fc   :  { %v1106_v42 = vmul.f32 %v1105_v39, %v1090_v28  ;;  %v1107_v33 = vmul.f32 %v1105_v39, %v1091_v3  ;;  %v1112_v16 = vmul.f32 %v1111_v11, %v1090_v28  ;;  %v1113_v57 = vmul.f32 %v1111_v11, %v1091_v3  ;;  %v1129_v56 = vpop.permute.xlu0 %1128 }
 0x1fd   :  { %v6221_v58 = vadd.f32 %v1094_v13, %v6121_v31  ;;  %v6224_v35 = vadd.f32 %v1095_v47, %v6124_v19  ;;  %v6227_v25 = vadd.f32 %v1100_v10, %v6127_v17  ;;  %v6230_v12 = vadd.f32 %v1101_v9, %v6130_v1 }
 0x1fe   :  { %v6237_v2 = vadd.f32 %v1106_v42, %v6133_v55  ;;  %v6240_v31 = vadd.f32 %v1107_v33, %v6136_v21  ;;  %v6243_v19 = vadd.f32 %v1112_v16, %v6139_v51  ;;  %v6246_v17 = vadd.f32 %v1113_v57, %v6142_v6  ;;  %v1131_v6 = vpop.permute.xlu1 %1130 }
 0x1ff   :  { %v1118_v1 = vmul.f32 %v6209_v63, %v1090_v28  ;;  %v1119_v27 = vmul.f32 %v6209_v63, %v1091_v3  ;;  %v1124_v55 = vmul.f32 %v6212_v59, %v1090_v28  ;;  %v1125_v7 = vmul.f32 %v6212_v59, %v1091_v3 }
 0x200   :  { %v2599_v21 = vsel %vm339_vm5, %v2596_v5, %v2598_v52  ;;  %v2600_v51 = vsel %vm339_vm5, %v2598_v52, %v2596_v5  ;;  %v6265_v14 = vstv %s6200_s11  ;;  %v6268_v4 = vstv %s6202_s2  ;;  %v2638_v28 = vpop.permute.xlu0 %2637  ;;  %s6394_s11 = sld [smem:[#allocation6 + $0x10]]  ;;  %s6396_s2 = sld [smem:[#allocation6 + $0x11]] }
 0x201   :  { %v6275_v41 = vadd.f32 %v1118_v1, %v6161_v37  ;;  %v6278_v26 = vadd.f32 %v1119_v27, %v6164_v29  ;;  %v6281_v23 = vadd.f32 %v1124_v55, %v6167_v40  ;;  %v6284_v15 = vadd.f32 %v1125_v7, %v6170_v49 }
 0x202   :  { %v2603_v62 = vmul.f32 %v2599_v21, %v1093_v48  ;;  %v2604_v38 = vmul.f32 %v2600_v51, %v1093_v48  ;;  %v2609_v20 = vmul.f32 %v2599_v21, %v1099_v61  ;;  %v2610_v32 = vmul.f32 %v2600_v51, %v1099_v61 }
 0x203   :  { %v2615_v37 = vmul.f32 %v2599_v21, %v1105_v39  ;;  %v2616_v29 = vmul.f32 %v2600_v51, %v1105_v39  ;;  %v2621_v0 = vmul.f32 %v2599_v21, %v1111_v11  ;;  %v2622_v40 = vmul.f32 %v2600_v51, %v1111_v11  ;;  %v2640_v11 = vpop.permute.xlu1 %2639 }
 0x204   :  { %v6299_v49 = vadd.f32 %v2603_v62, %v6172_v50  ;;  %v6302_v45 = vadd.f32 %v2604_v38, %v6174_v36  ;;  %v6305_v44 = vadd.f32 %v2609_v20, %v6176_v53  ;;  %v6308_v48 = vadd.f32 %v2610_v32, %v6178_v30 }
 0x205   :  { %v6315_v61 = vadd.f32 %v2615_v37, %v6181_v8  ;;  %v6318_v50 = vadd.f32 %v2616_v29, %v6184_v22  ;;  %v6321_v36 = vadd.f32 %v2621_v0, %v6187_v34  ;;  %v6324_v53 = vadd.f32 %v2622_v40, %v6190_v60 }
 0x206   :  { %v2627_v30 = vmul.f32 %v2599_v21, %v6209_v63  ;;  %v2628_v8 = vmul.f32 %v2600_v51, %v6209_v63  ;;  %v2633_v39 = vmul.f32 %v2599_v21, %v6212_v59  ;;  %v2634_v22 = vmul.f32 %v2600_v51, %v6212_v59 }
 0x207   :  { %v6339_v34 = vstv %s6218_s5  ;;  %v6342_v60 = vstv %s6232_s16  ;;  %v6345_v3 = vstv %s6234_s19  ;;  %v6348_v52 = vstv %s6248_s30  ;;  %s6410_s5 = sld [smem:[#allocation6 + $0x12]]  ;;  %s6412_s16 = sld [smem:[#allocation6 + $0x13]] }
 0x208   :  { %v6355_v63 = vadd.f32 %v2627_v30, %v6192_v24  ;;  %v6358_v59 = vadd.f32 %v2628_v8, %v6194_v18  ;;  %v6361_v5 = vadd.f32 %v2633_v39, %v6196_v43  ;;  %v6364_v13 = vadd.f32 %v2634_v22, %v6198_v54  ;;  %s6426_s19 = sld [smem:[#allocation6 + $0x14]]  ;;  %s6428_s30 = sld [smem:[#allocation6 + $0x15]] }
 0x209   :  { %v1132_v47 = vsel %vm382_vm6, %v1129_v56, %v1131_v6  ;;  %v1133_v24 = vsel %vm382_vm6, %v1131_v6, %v1129_v56  ;;  %v2641_v18 = vsel %vm382_vm6, %v2638_v28, %v2640_v11  ;;  %v2642_v43 = vsel %vm382_vm6, %v2640_v11, %v2638_v28 }
 0x20a   :  { %v1136_v54 = vmul.f32 %v6265_v14, %v1132_v47  ;;  %v1137_v10 = vmul.f32 %v6265_v14, %v1133_v24  ;;  %v1142_v9 = vmul.f32 %v6268_v4, %v1132_v47  ;;  %v1143_v42 = vmul.f32 %v6268_v4, %v1133_v24 }
 0x20b   :  { %v1148_v33 = vmul.f32 %v6339_v34, %v1132_v47  ;;  %v1149_v16 = vmul.f32 %v6339_v34, %v1133_v24  ;;  %v1154_v57 = vmul.f32 %v6342_v60, %v1132_v47  ;;  %v1155_v1 = vmul.f32 %v6342_v60, %v1133_v24 }
 0x20c   :  { %v6399_v27 = vadd.f32 %v1136_v54, %v6221_v58  ;;  %v6402_v55 = vadd.f32 %v1137_v10, %v6224_v35  ;;  %v6405_v7 = vadd.f32 %v1142_v9, %v6227_v25  ;;  %v6408_v21 = vadd.f32 %v1143_v42, %v6230_v12 }
 0x20d   :  { %7798 = sst [smem:[#allocation55_spill]] %s6410_s5  ;;  %v6415_v51 = vadd.f32 %v1148_v33, %v6237_v2  ;;  %v6418_v6 = vadd.f32 %v1149_v16, %v6240_v31  ;;  %v6421_v58 = vadd.f32 %v1154_v57, %v6243_v19  ;;  %v6424_v35 = vadd.f32 %v1155_v1, %v6246_v17  ;;  %s6436_s5 = sld [smem:[#allocation6 + $0x17]] }
 0x20e   :  { %7799 = sst [smem:[#allocation56_spill]] %s6412_s16  ;;  %v1160_v25 = vmul.f32 %v6345_v3, %v1132_v47  ;;  %v1161_v12 = vmul.f32 %v6345_v3, %v1133_v24  ;;  %v1166_v2 = vmul.f32 %v6348_v52, %v1132_v47  ;;  %v1167_v56 = vmul.f32 %v6348_v52, %v1133_v24  ;;  %s6434_s16 = sld [smem:[#allocation6 + $0x16]] }
 0x20f   :  { %7800 = sst [smem:[#allocation57_spill]] %s6426_s19  ;;  %v2645_v31 = vmul.f32 %v2641_v18, %v6265_v14  ;;  %v2646_v19 = vmul.f32 %v2642_v43, %v6265_v14  ;;  %v2651_v17 = vmul.f32 %v2641_v18, %v6268_v4  ;;  %v2652_v62 = vmul.f32 %v2642_v43, %v6268_v4  ;;  %s6444_s19 = sld [smem:[#allocation6 + $0x19]] }
 0x210   :  { %7801 = sst [smem:[#allocation59_spill]] %s6428_s30  ;;  %s6442_s30 = sld [smem:[#allocation6 + $0x18]]  ;;  %v6447_v38 = vadd.f32 %v1160_v25, %v6275_v41  ;;  %v6450_v20 = vadd.f32 %v1161_v12, %v6278_v26  ;;  %v6453_v32 = vadd.f32 %v1166_v2, %v6281_v23  ;;  %v6456_v37 = vadd.f32 %v1167_v56, %v6284_v15 }
 0x211   :  { %v6463_v14 = vadd.f32 %v2645_v31, %v6299_v49  ;;  %v6466_v4 = vadd.f32 %v2646_v19, %v6302_v45  ;;  %v6469_v41 = vadd.f32 %v2651_v17, %v6305_v44  ;;  %v6472_v26 = vadd.f32 %v2652_v62, %v6308_v48 }
 0x212   :  { %v2657_v23 = vmul.f32 %v2641_v18, %v6339_v34  ;;  %v2658_v15 = vmul.f32 %v2642_v43, %v6339_v34  ;;  %v2663_v29 = vmul.f32 %v2641_v18, %v6342_v60  ;;  %v2664_v0 = vmul.f32 %v2642_v43, %v6342_v60 }
 0x213   :  { %7803 = sst [smem:[#allocation60_spill]] %s6436_s5  ;;  %s6458_s5 = sld [smem:[#allocation6 + $0x1a]]  ;;  %7808 = vst [vmem:[#allocation93_spill] sm:$0xff] %v6463_v14  ;;  %7809 = vst [vmem:[#allocation94_spill] sm:$0xff] %v6466_v4  ;;  %v2669_v40 = vmul.f32 %v2641_v18, %v6345_v3  ;;  %v2670_v49 = vmul.f32 %v2642_v43, %v6345_v3  ;;  %v2675_v45 = vmul.f32 %v2641_v18, %v6348_v52  ;;  %v6527_v22 = vstv %s6250_s12 }
 0x214   :  { %7802 = sst [smem:[#allocation58_spill]] %s6434_s16  ;;  %s6460_s16 = sld [smem:[#allocation6 + $0x1b]]  ;;  %7810 = vst [vmem:[#allocation85_spill] sm:$0xff] %v6469_v41  ;;  %7811 = vst [vmem:[#allocation86_spill] sm:$0xff] %v6472_v26  ;;  %v2676_v44 = vmul.f32 %v2642_v43, %v6348_v52  ;;  %v6495_v48 = vadd.f32 %v2657_v23, %v6315_v61  ;;  %v6498_v30 = vadd.f32 %v2658_v15, %v6318_v50  ;;  %v6530_v11 = vstv %s6256_s6  ;;  %v1173_v41 = vpop.permute.xlu1 %1172 }
 0x215   :  { %7805 = sst [smem:[#allocation42_spill]] %s6444_s19  ;;  %s6474_s19 = sld [smem:[#allocation6 + $0x1c]]  ;;  %v6501_v8 = vadd.f32 %v2663_v29, %v6321_v36  ;;  %v6504_v39 = vadd.f32 %v2664_v0, %v6324_v53  ;;  %v6511_v61 = vadd.f32 %v2669_v40, %v6355_v63  ;;  %v6514_v50 = vadd.f32 %v2670_v49, %v6358_v59  ;;  %7828 = vst [vmem:[#allocation21_spill] sm:$0xff] %v6527_v22 }
 0x216   :  { %7804 = sst [smem:[#allocation61_spill]] %s6442_s30  ;;  %s6476_s30 = sld [smem:[#allocation6 + $0x1d]]  ;;  %7818 = vst [vmem:[#allocation12_spill] sm:$0xff] %v6495_v48  ;;  %7819 = vst [vmem:[#allocation13_spill] sm:$0xff] %v6498_v30  ;;  %v6517_v36 = vadd.f32 %v2675_v45, %v6361_v5  ;;  %v6520_v53 = vadd.f32 %v2676_v44, %v6364_v13  ;;  %v6533_v28 = vstv %s6258_s18  ;;  %v6536_v34 = vstv %s6270_s20 }
 0x217   :  { %7820 = vst [vmem:[#allocation14_spill] sm:$0xff] %v6501_v8  ;;  %7821 = vst [vmem:[#allocation15_spill] sm:$0xff] %v6504_v39  ;;  %v6543_v60 = vstv %s6272_s24  ;;  %v6546_v3 = vstv %s6286_s15  ;;  %v6549_v52 = vstv %s6288_s13  ;;  %v6552_v63 = vstv %s6290_s17  ;;  %s6554_s12 = sld [smem:[#allocation6 + $0x28]]  ;;  %s6556_s6 = sld [smem:[#allocation6 + $0x29]] }
 0x218   :  { %7824 = vst [vmem:[#allocation16_spill] sm:$0xff] %v6511_v61  ;;  %7825 = vst [vmem:[#allocation17_spill] sm:$0xff] %v6514_v50  ;;  %v6559_v59 = vstv %s6292_s28  ;;  %v6562_v5 = vstv %s6294_s8  ;;  %v6565_v13 = vstv %s6296_s7  ;;  %v6568_v47 = vstv %s6310_s9  ;;  %s6570_s18 = sld [smem:[#allocation6 + $0x2a]]  ;;  %s6572_s20 = sld [smem:[#allocation6 + $0x2b]] }
 0x219   :  { %7806 = sst [smem:[#allocation20_spill]] %s6458_s5  ;;  %s6484_s5 = sld [smem:[#allocation6 + $0x1f]]  ;;  %7826 = vst [vmem:[#allocation18_spill] sm:$0xff] %v6517_v36  ;;  %7827 = vst [vmem:[#allocation19_spill] sm:$0xff] %v6520_v53  ;;  %v6575_v24 = vstv %s6312_s29  ;;  %v6578_v18 = vstv %s6326_s14  ;;  %v6581_v43 = vstv %s6328_s3  ;;  %v6584_v54 = vstv %s6334_s27 }
 0x21a   :  { %7807 = sst [smem:[#allocation24_spill]] %s6460_s16  ;;  %s6482_s16 = sld [smem:[#allocation6 + $0x1e]]  ;;  %7829 = vst [vmem:[#allocation22_spill] sm:$0xff] %v6530_v11  ;;  %7830 = vst [vmem:[#allocation23_spill] sm:$0xff] %v6533_v28  ;;  %v6591_v10 = vstv %s6336_s0  ;;  %v6594_v9 = vstv %s6350_s21  ;;  %v6597_v42 = vstv %s6352_s23  ;;  %v6600_v33 = vstv %s6366_s22 }
 0x21b   :  { %7812 = sst [smem:[#allocation25_spill]] %s6474_s19  ;;  %s6492_s19 = sld [smem:[#allocation6 + $0x21]]  ;;  %7831 = vst [vmem:[#allocation26_spill] sm:$0xff] %v6559_v59  ;;  %7832 = vst [vmem:[#allocation65_spill] sm:$0xff] %v6578_v18  ;;  %v6607_v16 = vstv %s6368_s25  ;;  %v6610_v57 = vstv %s6378_s26  ;;  %v6613_v1 = vstv %s6380_s1  ;;  %v6616_v25 = vstv %s6386_s10 }
 0x21c   :  { %7813 = sst [smem:[#allocation27_spill]] %s6476_s30  ;;  %s6490_s30 = sld [smem:[#allocation6 + $0x20]]  ;;  %7833 = vst [vmem:[#allocation66_spill] sm:$0xff] %v6581_v43  ;;  %7841 = vst [vmem:[#allocation67_spill] sm:$0xff] %v6613_v1  ;;  %v6623_v12 = vstv %s6388_s4  ;;  %v6626_v2 = vstv %s6394_s11  ;;  %v6629_v56 = vstv %s6396_s2 }
 0x21d   :  { %s6586_s24 = sld [smem:[#allocation6 + $0x2c]]  ;;  %s6588_s15 = sld [smem:[#allocation6 + $0x2d]]  ;;  %7843 = vst [vmem:[#allocation68_spill] sm:$0xff] %v6616_v25  ;;  %7848 = vst [vmem:[#allocation69_spill] sm:$0xff] %v6623_v12  ;;  %v6706_v14 = vstv %s6554_s12 }
 0x21e   :  { %s7834_s13 = sld [smem:[#allocation55_spill]]  ;;  %s7835_s17 = sld [smem:[#allocation56_spill]]  ;;  %7850 = vst [vmem:[#allocation70_spill] sm:$0xff] %v6626_v2  ;;  %7852 = vst [vmem:[#allocation71_spill] sm:$0xff] %v6629_v56 }
 0x21f   :  { %7815 = sst [smem:[#allocation29_spill]] %s6484_s5  ;;  %s6506_s5 = sld [smem:[#allocation6 + $0x22]]  ;;  %7884 = vst [vmem:[#allocation91_spill] sm:$0xff] %v6706_v14 }
 0x220   :  { %7814 = sst [smem:[#allocation28_spill]] %s6482_s16  ;;  %s6540_s16 = sld [smem:[#allocation6 + $0x27]] }
 0x221   :  { %7817 = sst [smem:[#allocation31_spill]] %s6492_s19  ;;  %s6522_s19 = sld [smem:[#allocation6 + $0x24]] }
 0x222   :  { %7816 = sst [smem:[#allocation30_spill]] %s6490_s30  ;;  %s6508_s30 = sld [smem:[#allocation6 + $0x23]] }
 0x223   :  { %s7836_s28 = sld [smem:[#allocation57_spill]]  ;;  %s6602_s8 = sld [smem:[#allocation6 + $0x2e]] }
 0x224   :  { %s7838_s7 = sld [smem:[#allocation59_spill]]  ;;  %s6604_s9 = sld [smem:[#allocation6 + $0x2f]]  ;;  %v6632_v31 = vstv %s7834_s13  ;;  %v6639_v19 = vstv %s7835_s17 }
 0x225   :  { %7822 = sst [smem:[#allocation32_spill]] %s6506_s5  ;;  %s6524_s5 = sld [smem:[#allocation6 + $0x25]]  ;;  %7854 = vst [vmem:[#allocation72_spill] sm:$0xff] %v6632_v31  ;;  %7859 = vst [vmem:[#allocation73_spill] sm:$0xff] %v6639_v19 }
 0x226   :  { %s7840_s29 = sld [smem:[#allocation58_spill]]  ;;  %s7842_s14 = sld [smem:[#allocation60_spill]]  ;;  %v6703_v4 = vstv %s6540_s16 }
 0x227   :  { %s7844_s3 = sld [smem:[#allocation61_spill]]  ;;  %s6618_s27 = sld [smem:[#allocation6 + $0x30]]  ;;  %v6694_v30 = vstv %s6522_s19  ;;  %7883 = vst [vmem:[#allocation90_spill] sm:$0xff] %v6703_v4 }
 0x228   :  { %7823 = sst [smem:[#allocation33_spill]] %s6508_s30  ;;  %s6538_s30 = sld [smem:[#allocation6 + $0x26]]  ;;  %7879 = vst [vmem:[#allocation105_spill] sm:$0xff] %v6694_v30  ;;  %v6718_v30 = vstv %s6586_s24 }
 0x229   :  { %7837 = sst [smem:[#allocation34_spill]] %s6602_s8  ;;  %s6620_s21 = sld [smem:[#allocation6 + $0x31]]  ;;  %v6642_v17 = vstv %s7836_s28  ;;  %7888 = vst [vmem:[#allocation77_spill] sm:$0xff] %v6718_v30 }
 0x22a   :  { %7839 = sst [smem:[#allocation35_spill]] %s6604_s9  ;;  %s7846_s0 = sld [smem:[#allocation42_spill]]  ;;  %v6645_v62 = vstv %s7838_s7 }
 0x22b   :  { %s7847_s23 = sld [smem:[#allocation20_spill]]  ;;  %s7849_s22 = sld [smem:[#allocation24_spill]]  ;;  %v6697_v48 = vstv %s6524_s5 }
 0x22c   :  { %s7851_s25 = sld [smem:[#allocation25_spill]]  ;;  %s7853_s26 = sld [smem:[#allocation27_spill]]  ;;  %v6648_v23 = vstv %s7840_s29  ;;  %v6655_v15 = vstv %s7842_s14  ;;  %7881 = vst [vmem:[#allocation106_spill] sm:$0xff] %v6697_v48  ;;  %v6721_v48 = vstv %s6588_s15 }
 0x22d   :  { %7845 = sst [smem:[#allocation36_spill]] %s6618_s27  ;;  %s6634_s10 = sld [smem:[#allocation6 + $0x32]]  ;;  %7863 = vst [vmem:[#allocation74_spill] sm:$0xff] %v6655_v15  ;;  %v6658_v29 = vstv %s7844_s3  ;;  %7889 = vst [vmem:[#allocation78_spill] sm:$0xff] %v6721_v48 }
 0x22e   :  { %s7855_s1 = sld [smem:[#allocation28_spill]]  ;;  %s7857_s9 = sld [smem:[#allocation29_spill]]  ;;  %7864 = vst [vmem:[#allocation75_spill] sm:$0xff] %v6658_v29  ;;  %v6700_v26 = vstv %s6538_s30 }
 0x22f   :  { %s6636_s27 = sld [smem:[#allocation6 + $0x33]]  ;;  %s7858_s8 = sld [smem:[#allocation30_spill]]  ;;  %7882 = vst [vmem:[#allocation87_spill] sm:$0xff] %v6700_v26  ;;  %v6733_v4 = vstv %s6620_s21 }
 0x230   :  { %s7860_s4 = sld [smem:[#allocation31_spill]]  ;;  %s7861_s11 = sld [smem:[#allocation32_spill]]  ;;  %v6661_v0 = vstv %s7846_s0  ;;  %7893 = vst [vmem:[#allocation82_spill] sm:$0xff] %v6733_v4 }
 0x231   :  { %s7862_s2 = sld [smem:[#allocation33_spill]]  ;;  %s6650_s13 = sld [smem:[#allocation6 + $0x34]]  ;;  %7865 = vst [vmem:[#allocation76_spill] sm:$0xff] %v6661_v0  ;;  %v6664_v40 = vstv %s7847_s23  ;;  %v6667_v49 = vstv %s7849_s22 }
 0x232   :  { %7866 = vst [vmem:[#allocation95_spill] sm:$0xff] %v6664_v40  ;;  %7867 = vst [vmem:[#allocation96_spill] sm:$0xff] %v6667_v49  ;;  %v6670_v45 = vstv %s7851_s25  ;;  %v6673_v44 = vstv %s7853_s26  ;;  %s7873_s17 = sld [smem:[#allocation34_spill]]  ;;  %s7875_s28 = sld [smem:[#allocation35_spill]] }
 0x233   :  { %7856 = sst [smem:[#allocation37_spill]] %s6634_s10  ;;  %7868 = vst [vmem:[#allocation97_spill] sm:$0xff] %v6670_v45  ;;  %7869 = vst [vmem:[#allocation98_spill] sm:$0xff] %v6673_v44  ;;  %s7877_s7 = sld [smem:[#allocation36_spill]] }
 0x234   :  { %s6652_s10 = sld [smem:[#allocation6 + $0x35]]  ;;  %v6676_v53 = vstv %s7855_s1  ;;  %v6679_v36 = vstv %s7857_s9  ;;  %s7926_s19 = sld [smem:[#allocation108_spill]] }
 0x235   :  { %7870 = vst [vmem:[#allocation99_spill] sm:$0xff] %v6676_v53  ;;  %7871 = vst [vmem:[#allocation100_spill] sm:$0xff] %v6679_v36  ;;  %v6682_v50 = vstv %s7858_s8  ;;  %s7880_s29 = sld [smem:[#allocation37_spill]] }
 0x236   :  { %7872 = vst [vmem:[#allocation101_spill] sm:$0xff] %v6682_v50  ;;  %v6685_v61 = vstv %s7860_s4  ;;  %v6688_v39 = vstv %s7861_s11  ;;  %v6715_v50 = vstv %s6572_s20 }
 0x237   :  { %7874 = vst [vmem:[#allocation102_spill] sm:$0xff] %v6685_v61  ;;  %7876 = vst [vmem:[#allocation103_spill] sm:$0xff] %v6688_v39  ;;  %v6691_v8 = vstv %s7862_s2  ;;  %v6709_v39 = vstv %s6556_s6  ;;  %v6712_v61 = vstv %s6570_s18 }
 0x238   :  { %7878 = vst [vmem:[#allocation104_spill] sm:$0xff] %v6691_v8  ;;  %7885 = vst [vmem:[#allocation92_spill] sm:$0xff] %v6709_v39  ;;  %v1171_v8 = vpop.permute.xlu0 %1170  ;;  %v6724_v36 = vstv %s7873_s17  ;;  %v6727_v26 = vstv %s7875_s28  ;;  %v6739_v39 = vstv %s6636_s27 }
 0x239   :  { %7886 = vst [vmem:[#allocation63_spill] sm:$0xff] %v6712_v61  ;;  %7887 = vst [vmem:[#allocation64_spill] sm:$0xff] %v6715_v50  ;;  %v6730_v53 = vstv %s7877_s7  ;;  %v6742_v61 = vstv %s6650_s13  ;;  %v1174_v30 = vsel %vm425_vm7, %v1171_v8, %v1173_v41 }
 0x23a   :  { %7890 = vst [vmem:[#allocation79_spill] sm:$0xff] %v6724_v36  ;;  %7891 = vst [vmem:[#allocation80_spill] sm:$0xff] %v6727_v26  ;;  %v6745_v44 = vstv %s6652_s10  ;;  %v1175_v36 = vsel %vm425_vm7, %v1173_v41, %v1171_v8  ;;  %v1178_v26 = vmul.f32 %v6527_v22, %v1174_v30  ;;  %v1190_v4 = vmul.f32 %v6533_v28, %v1174_v30 }
 0x23b   :  { %7892 = vst [vmem:[#allocation81_spill] sm:$0xff] %v6730_v53  ;;  %v6736_v14 = vstv %s7880_s29  ;;  %7895 = vst [vmem:[#allocation84_spill] sm:$0xff] %v6739_v39  ;;  %v1184_v53 = vmul.f32 %v6530_v11, %v1174_v30  ;;  %v1185_v39 = vmul.f32 %v6530_v11, %v1175_v36  ;;  %v1197_v8 = vmul.f32 %v6536_v34, %v1175_v36 }
 0x23c   :  { %7894 = vst [vmem:[#allocation83_spill] sm:$0xff] %v6736_v14  ;;  %7896 = vst [vmem:[#allocation88_spill] sm:$0xff] %v6742_v61  ;;  %v1179_v14 = vmul.f32 %v6527_v22, %v1175_v36  ;;  %v1191_v61 = vmul.f32 %v6533_v28, %v1175_v36  ;;  %v1180_v48 = vadd.f32 %v1178_v26, %v6399_v27 }
 0x23d   :  { %7897 = vst [vmem:[#allocation89_spill] sm:$0xff] %v6745_v44  ;;  %v1196_v44 = vmul.f32 %v6536_v34, %v1174_v30  ;;  %v1186_v50 = vadd.f32 %v1184_v53, %v6405_v7  ;;  %v1192_v41 = vadd.f32 %v1190_v4, %v6415_v51  ;;  %v1187_v45 = vadd.f32 %v1185_v39, %v6408_v21 }
 0x23e   :  { %v1181_v46 = vadd.f32 %v1179_v14, %v6402_v55  ;;  %v1193_v22 = vadd.f32 %v1191_v61, %v6418_v6  ;;  %v1199_v28 = vadd.f32 %v1197_v8, %v6424_v35  ;;  %v1202_v49 = vmul.f32 %v6543_v60, %v1174_v30 }
 0x23f   :  { %v1198_v11 = vadd.f32 %v1196_v44, %v6421_v58  ;;  %v1203_v27 = vmul.f32 %v6543_v60, %v1175_v36  ;;  %v1208_v7 = vmul.f32 %v6546_v3, %v1174_v30  ;;  %v1209_v51 = vmul.f32 %v6546_v3, %v1175_v36 }
 0x240   :  { %v6771_v4 = vmax.f32 %v1180_v48, 0.0  ;;  %v6773_v26 = vmax.f32 %v1181_v46, 0.0  ;;  %v6775_v55 = vmax.f32 %v1186_v50, 0.0  ;;  %v1204_v21 = vadd.f32 %v1202_v49, %v6447_v38 }
 0x241   :  { %v1205_v6 = vadd.f32 %v1203_v27, %v6450_v20  ;;  %v1210_v58 = vadd.f32 %v1208_v7, %v6453_v32  ;;  %v6780_v35 = vmax.f32 %v1187_v45, 0.0  ;;  %v1211_v14 = vadd.f32 %v1209_v51, %v6456_v37 }
 0x242   :  { %v6783_v39 = vmax.f32 %v1192_v41, 0.0  ;;  %v6785_v30 = vmax.f32 %v1193_v22, 0.0  ;;  %v6787_v48 = vmax.f32 %v1198_v11, 0.0  ;;  %v6789_v46 = vmax.f32 %v1199_v28, 0.0 }
 0x243   :  { %v6791_v61 = vmax.f32 %v1204_v21, 0.0  ;;  %v6793_v50 = vmax.f32 %v1205_v6, 0.0  ;;  %v6795_v38 = vmax.f32 %v1210_v58, 0.0  ;;  %v6797_v20 = vmax.f32 %v1211_v14, 0.0 }
 0x244   :  { %v1232_v32 = vmul.f32 %v6562_v5, %v6771_v4  ;;  %v1233_v37 = vmul.f32 %v6562_v5, %v6773_v26  ;;  %v1238_v36 = vmul.f32 %v6565_v13, %v6771_v4  ;;  %v1239_v53 = vmul.f32 %v6565_v13, %v6773_v26 }
 0x245   :  { %v1244_v22 = vmul.f32 %v6568_v47, %v6771_v4  ;;  %v1245_v11 = vmul.f32 %v6568_v47, %v6773_v26  ;;  %v1250_v28 = vmul.f32 %v6575_v24, %v6775_v55  ;;  %v1251_v41 = vmul.f32 %v6575_v24, %v6780_v35 }
 0x246   :  { %v1234_v49 = vadd.f32 %v1232_v32, %v6549_v52  ;;  %v1235_v45 = vadd.f32 %v1233_v37, %v6549_v52  ;;  %v1240_v44 = vadd.f32 %v1238_v36, %v6552_v63  ;;  %v1241_v8 = vadd.f32 %v1239_v53, %v6552_v63 }
 0x247   :  { %v1246_v27 = vadd.f32 %v1244_v22, %v6559_v59  ;;  %v1247_v7 = vadd.f32 %v1245_v11, %v6559_v59  ;;  %v1256_v51 = vmul.f32 %v6578_v18, %v6775_v55  ;;  %v1257_v58 = vmul.f32 %v6578_v18, %v6780_v35 }
 0x248   :  { %v1252_v21 = vadd.f32 %v1250_v28, %v1234_v49  ;;  %v1253_v6 = vadd.f32 %v1251_v41, %v1235_v45  ;;  %v1262_v14 = vmul.f32 %v6581_v43, %v6775_v55  ;;  %v1263_v37 = vmul.f32 %v6581_v43, %v6780_v35 }
 0x249   :  { %v1258_v32 = vadd.f32 %v1256_v51, %v1240_v44  ;;  %v1268_v36 = vmul.f32 %v6584_v54, %v6783_v39  ;;  %v1269_v53 = vmul.f32 %v6584_v54, %v6785_v30  ;;  %v1259_v22 = vadd.f32 %v1257_v58, %v1241_v8 }
 0x24a   :  { %v1264_v11 = vadd.f32 %v1262_v14, %v1246_v27  ;;  %v1274_v28 = vmul.f32 %v6591_v10, %v6783_v39  ;;  %v1275_v49 = vmul.f32 %v6591_v10, %v6785_v30  ;;  %v1265_v45 = vadd.f32 %v1263_v37, %v1247_v7 }
 0x24b   :  { %v1270_v41 = vadd.f32 %v1268_v36, %v1252_v21  ;;  %v1271_v44 = vadd.f32 %v1269_v53, %v1253_v6  ;;  %v1280_v51 = vmul.f32 %v6594_v9, %v6783_v39  ;;  %v1281_v59 = vmul.f32 %v6594_v9, %v6785_v30 }
 0x24c   :  { %v1276_v43 = vadd.f32 %v1274_v28, %v1258_v32  ;;  %v1277_v18 = vadd.f32 %v1275_v49, %v1259_v22  ;;  %v1286_v8 = vmul.f32 %v6597_v42, %v6787_v48  ;;  %v1287_v58 = vmul.f32 %v6597_v42, %v6789_v46 }
 0x24d   :  { %v1282_v27 = vadd.f32 %v1280_v51, %v1264_v11  ;;  %v1292_v7 = vmul.f32 %v6600_v33, %v6787_v48  ;;  %v1293_v21 = vmul.f32 %v6600_v33, %v6789_v46  ;;  %v1283_v6 = vadd.f32 %v1281_v59, %v1265_v45 }
 0x24e   :  { %v1288_v14 = vadd.f32 %v1286_v8, %v1270_v41  ;;  %v1298_v32 = vmul.f32 %v6607_v16, %v6787_v48  ;;  %v1299_v37 = vmul.f32 %v6607_v16, %v6789_v46  ;;  %v1289_v36 = vadd.f32 %v1287_v58, %v1271_v44 }
 0x24f   :  { %v1294_v53 = vadd.f32 %v1292_v7, %v1276_v43  ;;  %v1295_v22 = vadd.f32 %v1293_v21, %v1277_v18  ;;  %v1304_v11 = vmul.f32 %v6610_v57, %v6791_v61  ;;  %v1305_v51 = vmul.f32 %v6610_v57, %v6793_v50 }
 0x250   :  { %v1300_v28 = vadd.f32 %v1298_v32, %v1282_v27  ;;  %v1301_v49 = vadd.f32 %v1299_v37, %v1283_v6  ;;  %v1310_v59 = vmul.f32 %v6613_v1, %v6791_v61  ;;  %v1311_v41 = vmul.f32 %v6613_v1, %v6793_v50 }
 0x251   :  { %v1306_v45 = vadd.f32 %v1304_v11, %v1288_v14  ;;  %v1316_v44 = vmul.f32 %v6616_v25, %v6791_v61  ;;  %v1317_v18 = vmul.f32 %v6616_v25, %v6793_v50  ;;  %v1307_v43 = vadd.f32 %v1305_v51, %v1289_v36 }
 0x252   :  { %v1312_v8 = vadd.f32 %v1310_v59, %v1294_v53  ;;  %v1322_v27 = vmul.f32 %v6623_v12, %v6795_v38  ;;  %v1323_v58 = vmul.f32 %v6623_v12, %v6797_v20  ;;  %v1313_v7 = vadd.f32 %v1311_v41, %v1295_v22 }
 0x253   :  { %v1318_v21 = vadd.f32 %v1316_v44, %v1300_v28  ;;  %v1319_v6 = vadd.f32 %v1317_v18, %v1301_v49  ;;  %v1328_v14 = vmul.f32 %v6626_v2, %v6795_v38  ;;  %v1329_v11 = vmul.f32 %v6626_v2, %v6797_v20 }
 0x254   :  { %v1324_v32 = vadd.f32 %v1322_v27, %v1306_v45  ;;  %v1325_v37 = vadd.f32 %v1323_v58, %v1307_v43  ;;  %v1334_v36 = vmul.f32 %v6629_v56, %v6795_v38  ;;  %v1335_v51 = vmul.f32 %v6629_v56, %v6797_v20 }
 0x255   :  { %v1330_v53 = vadd.f32 %v1328_v14, %v1312_v8  ;;  %v1338_v59 = vrot.slane %v6771_v4, 1  ;;  %v1339_v22 = vrot.slane %v6773_v26, 1  ;;  %v1331_v28 = vadd.f32 %v1329_v11, %v1313_v7 }
 0x256   :  { %v1336_v49 = vadd.f32 %v1334_v36, %v1318_v21  ;;  %v1358_v41 = vrot.slane %v6775_v55, 1  ;;  %v1359_v45 = vrot.slane %v6780_v35, 1  ;;  %v1337_v44 = vadd.f32 %v1335_v51, %v1319_v6 }
 0x257   :  { %v1342_v18 = vmul.f32 %v6632_v31, %v1338_v59  ;;  %v1343_v43 = vmul.f32 %v6632_v31, %v1339_v22  ;;  %v1348_v8 = vmul.f32 %v6639_v19, %v1338_v59  ;;  %v1349_v27 = vmul.f32 %v6639_v19, %v1339_v22 }
 0x258   :  { %v1354_v58 = vmul.f32 %v6642_v17, %v1338_v59  ;;  %v1355_v14 = vmul.f32 %v6642_v17, %v1339_v22  ;;  %v1362_v7 = vmul.f32 %v6645_v62, %v1358_v41  ;;  %v1363_v56 = vmul.f32 %v6645_v62, %v1359_v45 }
 0x259   :  { %v1344_v21 = vadd.f32 %v1342_v18, %v1324_v32  ;;  %v1345_v11 = vadd.f32 %v1343_v43, %v1325_v37  ;;  %v1350_v36 = vadd.f32 %v1348_v8, %v1330_v53  ;;  %v1351_v6 = vadd.f32 %v1349_v27, %v1331_v28  ;;  %v7898_v27 = vld [vmem:[#allocation96_spill] sm:$0xff] }
 0x25a   :  { %v1356_v51 = vadd.f32 %v1354_v58, %v1336_v49  ;;  %v1357_v2 = vadd.f32 %v1355_v14, %v1337_v44  ;;  %v1368_v31 = vmul.f32 %v6648_v23, %v1358_v41  ;;  %v1369_v19 = vmul.f32 %v6648_v23, %v1359_v45 }
 0x25b   :  { %v1364_v12 = vadd.f32 %v1362_v7, %v1344_v21  ;;  %v1365_v25 = vadd.f32 %v1363_v56, %v1345_v11  ;;  %v1374_v59 = vmul.f32 %v6655_v15, %v1358_v41  ;;  %v1375_v22 = vmul.f32 %v6655_v15, %v1359_v45 }
 0x25c   :  { %v1370_v1 = vadd.f32 %v1368_v31, %v1350_v36  ;;  %v1378_v32 = vrot.slane %v6783_v39, 1  ;;  %v1379_v37 = vrot.slane %v6785_v30, 1  ;;  %v1371_v53 = vadd.f32 %v1369_v19, %v1351_v6  ;;  %v7899_v6 = vld [vmem:[#allocation97_spill] sm:$0xff] }
 0x25d   :  { %v1376_v18 = vadd.f32 %v1374_v59, %v1356_v51  ;;  %v1398_v28 = vrot.slane %v6787_v48, 1  ;;  %v1399_v49 = vrot.slane %v6789_v46, 1  ;;  %v1377_v44 = vadd.f32 %v1375_v22, %v1357_v2 }
 0x25e   :  { %v1382_v56 = vmul.f32 %v6658_v29, %v1378_v32  ;;  %v1383_v43 = vmul.f32 %v6658_v29, %v1379_v37  ;;  %v1388_v41 = vmul.f32 %v6661_v0, %v1378_v32  ;;  %v1389_v31 = vmul.f32 %v6661_v0, %v1379_v37  ;;  %v7900_v29 = vld [vmem:[#allocation98_spill] sm:$0xff] }
 0x25f   :  { %v1394_v45 = vmul.f32 %v6664_v40, %v1378_v32  ;;  %v1395_v8 = vmul.f32 %v6664_v40, %v1379_v37  ;;  %v1402_v19 = vmul.f32 %v7898_v27, %v1398_v28  ;;  %v1403_v21 = vmul.f32 %v7898_v27, %v1399_v49  ;;  %v7906_v27 = vld [vmem:[#allocation104_spill] sm:$0xff] }
 0x260   :  { %v1384_v58 = vadd.f32 %v1382_v56, %v1364_v12  ;;  %v1385_v14 = vadd.f32 %v1383_v43, %v1365_v25  ;;  %v1390_v7 = vadd.f32 %v1388_v41, %v1370_v1  ;;  %v1391_v2 = vadd.f32 %v1389_v31, %v1371_v53  ;;  %v7901_v43 = vld [vmem:[#allocation99_spill] sm:$0xff] }
 0x261   :  { %v1396_v11 = vadd.f32 %v1394_v45, %v1376_v18  ;;  %v1397_v36 = vadd.f32 %v1395_v8, %v1377_v44  ;;  %v1408_v51 = vmul.f32 %v7899_v6, %v1398_v28  ;;  %v1409_v0 = vmul.f32 %v7899_v6, %v1399_v49  ;;  %v7902_v45 = vld [vmem:[#allocation100_spill] sm:$0xff] }
 0x262   :  { %v1404_v59 = vadd.f32 %v1402_v19, %v1384_v58  ;;  %v1405_v22 = vadd.f32 %v1403_v21, %v1385_v14  ;;  %v1414_v32 = vmul.f32 %v7900_v29, %v1398_v28  ;;  %v1415_v37 = vmul.f32 %v7900_v29, %v1399_v49  ;;  %v7903_v49 = vld [vmem:[#allocation101_spill] sm:$0xff]  ;;  %v7904_v14 = vld [vmem:[#allocation102_spill] sm:$0xff] }
 0x263   :  { %v1410_v15 = vadd.f32 %v1408_v51, %v1390_v7  ;;  %v1418_v12 = vrot.slane %v6791_v61, 1  ;;  %v1419_v1 = vrot.slane %v6793_v50, 1  ;;  %v1411_v25 = vadd.f32 %v1409_v0, %v1391_v2 }
 0x264   :  { %v1416_v56 = vadd.f32 %v1414_v32, %v1396_v11  ;;  %v1438_v53 = vrot.slane %v6795_v38, 1  ;;  %v1439_v18 = vrot.slane %v6797_v20, 1  ;;  %v1417_v44 = vadd.f32 %v1415_v37, %v1397_v36  ;;  %v7905_v37 = vld [vmem:[#allocation103_spill] sm:$0xff] }
 0x265   :  { %v1422_v41 = vmul.f32 %v7901_v43, %v1418_v12  ;;  %v1423_v31 = vmul.f32 %v7901_v43, %v1419_v1  ;;  %v1428_v28 = vmul.f32 %v7902_v45, %v1418_v12  ;;  %v1429_v8 = vmul.f32 %v7902_v45, %v1419_v1 }
 0x266   :  { %v1434_v19 = vmul.f32 %v7903_v49, %v1418_v12  ;;  %v1435_v58 = vmul.f32 %v7903_v49, %v1419_v1  ;;  %v1442_v0 = vmul.f32 %v7904_v14, %v1438_v53  ;;  %v1443_v11 = vmul.f32 %v7904_v14, %v1439_v18 }
 0x267   :  { %v1424_v7 = vadd.f32 %v1422_v41, %v1404_v59  ;;  %v1425_v21 = vadd.f32 %v1423_v31, %v1405_v22  ;;  %v1430_v2 = vadd.f32 %v1428_v28, %v1410_v15  ;;  %v1431_v36 = vadd.f32 %v1429_v8, %v1411_v25  ;;  %v7907_v31 = vld [vmem:[#allocation105_spill] sm:$0xff] }
 0x268   :  { %v1436_v51 = vadd.f32 %v1434_v19, %v1416_v56  ;;  %v1437_v32 = vadd.f32 %v1435_v58, %v1417_v44  ;;  %v1448_v43 = vmul.f32 %v7905_v37, %v1438_v53  ;;  %v1449_v45 = vmul.f32 %v7905_v37, %v1439_v18  ;;  %v7908_v19 = vld [vmem:[#allocation106_spill] sm:$0xff] }
 0x269   :  { %v1444_v29 = vadd.f32 %v1442_v0, %v1424_v7  ;;  %v1445_v6 = vadd.f32 %v1443_v11, %v1425_v21  ;;  %v1454_v12 = vmul.f32 %v7906_v27, %v1438_v53  ;;  %v1455_v1 = vmul.f32 %v7906_v27, %v1439_v18  ;;  %v7909_v18 = vld [vmem:[#allocation87_spill] sm:$0xff] }
 0x26a   :  { %v1450_v40 = vadd.f32 %v1448_v43, %v1430_v2  ;;  %v1458_v59 = vrot.slane %v6771_v4, 2  ;;  %v1459_v15 = vrot.slane %v6773_v26, 2  ;;  %v1451_v22 = vadd.f32 %v1449_v45, %v1431_v36  ;;  %v7910_v26 = vld [vmem:[#allocation90_spill] sm:$0xff]  ;;  %v7911_v36 = vld [vmem:[#allocation91_spill] sm:$0xff] }
 0x26b   :  { %v1456_v41 = vadd.f32 %v1454_v12, %v1436_v51  ;;  %v1478_v25 = vrot.slane %v6775_v55, 2  ;;  %v1479_v56 = vrot.slane %v6780_v35, 2  ;;  %v1457_v44 = vadd.f32 %v1455_v1, %v1437_v32 }
 0x26c   :  { %v1462_v28 = vmul.f32 %v7907_v31, %v1458_v59  ;;  %v1463_v8 = vmul.f32 %v7907_v31, %v1459_v15  ;;  %v1468_v53 = vmul.f32 %v7908_v19, %v1458_v59  ;;  %v1469_v43 = vmul.f32 %v7908_v19, %v1459_v15  ;;  %v7912_v19 = vld [vmem:[#allocation92_spill] sm:$0xff] }
 0x26d   :  { %v1474_v58 = vmul.f32 %v7909_v18, %v1458_v59  ;;  %v1475_v4 = vmul.f32 %v7909_v18, %v1459_v15  ;;  %v1482_v45 = vmul.f32 %v7910_v26, %v1478_v25  ;;  %v1483_v35 = vmul.f32 %v7910_v26, %v1479_v56 }
 0x26e   :  { %v1464_v0 = vadd.f32 %v1462_v28, %v1444_v29  ;;  %v1465_v7 = vadd.f32 %v1463_v8, %v1445_v6  ;;  %v1470_v55 = vadd.f32 %v1468_v53, %v1450_v40  ;;  %v1471_v21 = vadd.f32 %v1469_v43, %v1451_v22  ;;  %v7913_v8 = vld [vmem:[#allocation63_spill] sm:$0xff] }
 0x26f   :  { %v1476_v2 = vadd.f32 %v1474_v58, %v1456_v41  ;;  %v1477_v11 = vadd.f32 %v1475_v4, %v1457_v44  ;;  %v1488_v51 = vmul.f32 %v7911_v36, %v1478_v25  ;;  %v1489_v1 = vmul.f32 %v7911_v36, %v1479_v56  ;;  %v7914_v58 = vld [vmem:[#allocation64_spill] sm:$0xff] }
 0x270   :  { %v1484_v32 = vadd.f32 %v1482_v45, %v1464_v0  ;;  %v1485_v12 = vadd.f32 %v1483_v35, %v1465_v7  ;;  %v1494_v59 = vmul.f32 %v7912_v19, %v1478_v25  ;;  %v1495_v15 = vmul.f32 %v7912_v19, %v1479_v56  ;;  %v7915_v56 = vld [vmem:[#allocation77_spill] sm:$0xff] }
 0x271   :  { %v1490_v31 = vadd.f32 %v1488_v51, %v1470_v55  ;;  %v1498_v29 = vrot.slane %v6783_v39, 2  ;;  %v1499_v40 = vrot.slane %v6785_v30, 2  ;;  %v1491_v6 = vadd.f32 %v1489_v1, %v1471_v21  ;;  %v7916_v30 = vld [vmem:[#allocation78_spill] sm:$0xff] }
 0x272   :  { %v1496_v28 = vadd.f32 %v1494_v59, %v1476_v2  ;;  %v1518_v22 = vrot.slane %v6787_v48, 2  ;;  %v1519_v41 = vrot.slane %v6789_v46, 2  ;;  %v1497_v44 = vadd.f32 %v1495_v15, %v1477_v11  ;;  %v7917_v11 = vld [vmem:[#allocation79_spill] sm:$0xff] }
 0x273   :  { %v1502_v53 = vmul.f32 %v7913_v8, %v1498_v29  ;;  %v1503_v43 = vmul.f32 %v7913_v8, %v1499_v40  ;;  %v1508_v25 = vmul.f32 %v7914_v58, %v1498_v29  ;;  %v1509_v4 = vmul.f32 %v7914_v58, %v1499_v40  ;;  %v7918_v58 = vld [vmem:[#allocation80_spill] sm:$0xff] }
 0x274   :  { %v1514_v45 = vmul.f32 %v7915_v56, %v1498_v29  ;;  %v1515_v39 = vmul.f32 %v7915_v56, %v1499_v40  ;;  %v1522_v0 = vmul.f32 %v7916_v30, %v1518_v22  ;;  %v1523_v46 = vmul.f32 %v7916_v30, %v1519_v41 }
 0x275   :  { %v1504_v7 = vadd.f32 %v1502_v53, %v1484_v32  ;;  %v1505_v55 = vadd.f32 %v1503_v43, %v1485_v12  ;;  %v1510_v48 = vadd.f32 %v1508_v25, %v1490_v31  ;;  %v1511_v35 = vadd.f32 %v1509_v4, %v1491_v6  ;;  %v7919_v43 = vld [vmem:[#allocation81_spill] sm:$0xff] }
 0x276   :  { %v1516_v21 = vadd.f32 %v1514_v45, %v1496_v28  ;;  %v1517_v2 = vadd.f32 %v1515_v39, %v1497_v44  ;;  %v1528_v51 = vmul.f32 %v7917_v11, %v1518_v22  ;;  %v1529_v15 = vmul.f32 %v7917_v11, %v1519_v41  ;;  %v7920_v45 = vld [vmem:[#allocation82_spill] sm:$0xff] }
 0x277   :  { %v1524_v1 = vadd.f32 %v1522_v0, %v1504_v7  ;;  %v1525_v59 = vadd.f32 %v1523_v46, %v1505_v55  ;;  %v1534_v29 = vmul.f32 %v7918_v58, %v1518_v22  ;;  %v1535_v40 = vmul.f32 %v7918_v58, %v1519_v41  ;;  %v7921_v41 = vld [vmem:[#allocation83_spill] sm:$0xff]  ;;  %v2682_v46 = vpop.permute.xlu1 %2681 }
 0x278   :  { %v1530_v8 = vadd.f32 %v1528_v51, %v1510_v48  ;;  %v1538_v32 = vrot.slane %v6791_v61, 2  ;;  %v1539_v31 = vrot.slane %v6793_v50, 2  ;;  %v1531_v12 = vadd.f32 %v1529_v15, %v1511_v35  ;;  %v7922_v50 = vld [vmem:[#allocation84_spill] sm:$0xff]  ;;  %v2680_v35 = vpop.permute.xlu0 %2679 }
 0x279   :  { %v1536_v53 = vadd.f32 %v1534_v29, %v1516_v21  ;;  %v1558_v6 = vrot.slane %v6795_v38, 2  ;;  %v1559_v28 = vrot.slane %v6797_v20, 2  ;;  %v1537_v44 = vadd.f32 %v1535_v40, %v1517_v2  ;;  %v7923_v15 = vld [vmem:[#allocation88_spill] sm:$0xff] }
 0x27a   :  { %v1542_v25 = vmul.f32 %v7919_v43, %v1538_v32  ;;  %v1543_v4 = vmul.f32 %v7919_v43, %v1539_v31  ;;  %v1548_v22 = vmul.f32 %v7920_v45, %v1538_v32  ;;  %v1549_v39 = vmul.f32 %v7920_v45, %v1539_v31  ;;  %v7924_v43 = vld [vmem:[#allocation89_spill] sm:$0xff] }
 0x27b   :  { %v1554_v0 = vmul.f32 %v7921_v41, %v1538_v32  ;;  %v1555_v61 = vmul.f32 %v7921_v41, %v1539_v31  ;;  %v1562_v7 = vmul.f32 %v7922_v50, %v1558_v6  ;;  %v1563_v20 = vmul.f32 %v7922_v50, %v1559_v28 }
 0x27c   :  { %v1544_v55 = vadd.f32 %v1542_v25, %v1524_v1  ;;  %v1545_v48 = vadd.f32 %v1543_v4, %v1525_v59  ;;  %v1550_v38 = vadd.f32 %v1548_v22, %v1530_v8  ;;  %v1551_v21 = vadd.f32 %v1549_v39, %v1531_v12  ;;  %v7928_v22 = vld [vmem:[#allocation22_spill] sm:$0xff] }
 0x27d   :  { %v1556_v2 = vadd.f32 %v1554_v0, %v1536_v53  ;;  %v1557_v51 = vadd.f32 %v1555_v61, %v1537_v44  ;;  %v1568_v29 = vmul.f32 %v7923_v15, %v1558_v6  ;;  %v1569_v32 = vmul.f32 %v7923_v15, %v1559_v28  ;;  %v7929_v61 = vld [vmem:[#allocation23_spill] sm:$0xff] }
 0x27e   :  { %v1564_v40 = vadd.f32 %v1562_v7, %v1544_v55  ;;  %v1565_v45 = vadd.f32 %v1563_v20, %v1545_v48  ;;  %v1574_v31 = vmul.f32 %v7924_v43, %v1558_v6  ;;  %v1575_v1 = vmul.f32 %v7924_v43, %v1559_v28  ;;  %v7927_v6 = vld [vmem:[#allocation21_spill] sm:$0xff] }
 0x27f   :  { %v1570_v41 = vadd.f32 %v1568_v29, %v1550_v38  ;;  %v2683_v8 = vsel %vm425_vm7, %v2680_v35, %v2682_v46  ;;  %v2684_v25 = vsel %vm425_vm7, %v2682_v46, %v2680_v35  ;;  %v1571_v12 = vadd.f32 %v1569_v32, %v1551_v21  ;;  %v7931_v48 = vld [vmem:[#allocation94_spill] sm:$0xff]  ;;  %v7932_v46 = vld [vmem:[#allocation85_spill] sm:$0xff]  ;;  %v7935_v32 = vld [vmem:[#allocation13_spill] sm:$0xff] }
 0x280   :  { %v1576_v53 = vadd.f32 %v1574_v31, %v1556_v2  ;;  %1578 = vst [vmem:[%s7926_s19] sm:$0xff] %v1564_v40  ;;  %1579 = vst [vmem:[%s7926_s19 + $0x8] sm:$0xff] %v1565_v45  ;;  %v2687_v44 = vmul.f32 %v2683_v8, %v7927_v6  ;;  %v2688_v28 = vmul.f32 %v2684_v25, %v7927_v6  ;;  %v7930_v45 = vld [vmem:[#allocation93_spill] sm:$0xff]  ;;  %v7933_v21 = vld [vmem:[#allocation86_spill] sm:$0xff] }
 0x281   :  { %v1577_v4 = vadd.f32 %v1575_v1, %v1557_v51  ;;  %3324 = vst [vmem:[%s7926_s19 + $0x10] sm:$0xff] %v1570_v41  ;;  %v2693_v39 = vmul.f32 %v2683_v8, %v7928_v22  ;;  %v2694_v0 = vmul.f32 %v2684_v25, %v7928_v22  ;;  %v2699_v7 = vmul.f32 %v2683_v8, %v7929_v61  ;;  %v7934_v51 = vld [vmem:[#allocation12_spill] sm:$0xff]  ;;  %v7936_v1 = vld [vmem:[#allocation14_spill] sm:$0xff]  ;;  %v7937_v6 = vld [vmem:[#allocation15_spill] sm:$0xff] }
 0x282   :  { %3325 = vst [vmem:[%s7926_s19 + $0x18] sm:$0xff] %v1571_v12  ;;  %3326 = vst [vmem:[%s7926_s19 + $0x20] sm:$0xff] %v1576_v53  ;;  %v2689_v55 = vadd.f32 %v2687_v44, %v7930_v45  ;;  %v2690_v38 = vadd.f32 %v2688_v28, %v7931_v48  ;;  %v2700_v41 = vmul.f32 %v2684_v25, %v7929_v61  ;;  %v7939_v61 = vld [vmem:[#allocation17_spill] sm:$0xff]  ;;  %v7940_v48 = vld [vmem:[#allocation18_spill] sm:$0xff] }
 0x283   :  { %v2705_v20 = vmul.f32 %v2683_v8, %v6536_v34  ;;  %3327 = vst [vmem:[%s7926_s19 + $0x28] sm:$0xff] %v1577_v4  ;;  %v2695_v35 = vadd.f32 %v2693_v39, %v7932_v46  ;;  %v2696_v2 = vadd.f32 %v2694_v0, %v7933_v21  ;;  %v2701_v29 = vadd.f32 %v2699_v7, %v7934_v51  ;;  %v7938_v39 = vld [vmem:[#allocation16_spill] sm:$0xff] }
 0x284   :  { %v2706_v40 = vmul.f32 %v2684_v25, %v6536_v34  ;;  %v2702_v31 = vadd.f32 %v2700_v41, %v7935_v32  ;;  %v2711_v12 = vmul.f32 %v2683_v8, %v6543_v60  ;;  %v2712_v53 = vmul.f32 %v2684_v25, %v6543_v60 }
 0x285   :  { %v2707_v59 = vadd.f32 %v2705_v20, %v7936_v1  ;;  %v2717_v28 = vmul.f32 %v2683_v8, %v6546_v3  ;;  %v2718_v4 = vmul.f32 %v2684_v25, %v6546_v3  ;;  %v7015_v22 = vmax.f32 %v2689_v55, 0.0  ;;  %v7941_v20 = vld [vmem:[#allocation19_spill] sm:$0xff] }
 0x286   :  { %v2708_v44 = vadd.f32 %v2706_v40, %v7937_v6  ;;  %v2713_v0 = vadd.f32 %v2711_v12, %v7938_v39  ;;  %v2714_v34 = vadd.f32 %v2712_v53, %v7939_v61  ;;  %v7019_v7 = vmax.f32 %v2690_v38, 0.0 }
 0x287   :  { %v7021_v45 = vmax.f32 %v2695_v35, 0.0  ;;  %v2719_v41 = vadd.f32 %v2717_v28, %v7940_v48  ;;  %v2720_v60 = vadd.f32 %v2718_v4, %v7941_v20  ;;  %v7025_v46 = vmax.f32 %v2696_v2, 0.0  ;;  %v7944_v48 = vld [vmem:[#allocation66_spill] sm:$0xff] }
 0x288   :  { %v7027_v21 = vmax.f32 %v2701_v29, 0.0  ;;  %v7029_v8 = vmax.f32 %v2702_v31, 0.0  ;;  %v7031_v3 = vmax.f32 %v2707_v59, 0.0  ;;  %v7033_v25 = vmax.f32 %v2708_v44, 0.0  ;;  %v7942_v44 = vld [vmem:[#allocation26_spill] sm:$0xff] }
 0x289   :  { %v7035_v55 = vmax.f32 %v2713_v0, 0.0  ;;  %v7037_v38 = vmax.f32 %v2714_v34, 0.0  ;;  %v7039_v35 = vmax.f32 %v2719_v41, 0.0  ;;  %v7041_v51 = vmax.f32 %v2720_v60, 0.0  ;;  %v7943_v0 = vld [vmem:[#allocation65_spill] sm:$0xff] }
 0x28a   :  { %v2741_v2 = vmul.f32 %v7015_v22, %v6562_v5  ;;  %v2742_v29 = vmul.f32 %v7019_v7, %v6562_v5  ;;  %v2747_v40 = vmul.f32 %v7015_v22, %v6565_v13  ;;  %v2748_v32 = vmul.f32 %v7019_v7, %v6565_v13 }
 0x28b   :  { %v2753_v31 = vmul.f32 %v7015_v22, %v6568_v47  ;;  %v2754_v59 = vmul.f32 %v7019_v7, %v6568_v47  ;;  %v2759_v12 = vmul.f32 %v7021_v45, %v6575_v24  ;;  %v2760_v5 = vmul.f32 %v7025_v46, %v6575_v24 }
 0x28c   :  { %v2743_v1 = vadd.f32 %v2741_v2, %v6549_v52  ;;  %v2744_v53 = vadd.f32 %v2742_v29, %v6549_v52  ;;  %v2749_v6 = vadd.f32 %v2747_v40, %v6552_v63  ;;  %v2750_v13 = vadd.f32 %v2748_v32, %v6552_v63 }
 0x28d   :  { %v2755_v28 = vadd.f32 %v2753_v31, %v7942_v44  ;;  %v2756_v4 = vadd.f32 %v2754_v59, %v7942_v44  ;;  %v2765_v47 = vmul.f32 %v7021_v45, %v7943_v0  ;;  %v2766_v61 = vmul.f32 %v7025_v46, %v7943_v0 }
 0x28e   :  { %v2761_v39 = vadd.f32 %v2759_v12, %v2743_v1  ;;  %v2762_v34 = vadd.f32 %v2760_v5, %v2744_v53  ;;  %v2771_v24 = vmul.f32 %v7021_v45, %v7944_v48  ;;  %v2772_v52 = vmul.f32 %v7025_v46, %v7944_v48 }
 0x28f   :  { %v2777_v63 = vmul.f32 %v7027_v21, %v6584_v54  ;;  %v2767_v41 = vadd.f32 %v2765_v47, %v2749_v6  ;;  %v2768_v20 = vadd.f32 %v2766_v61, %v2750_v13  ;;  %v2778_v60 = vmul.f32 %v7029_v8, %v6584_v54 }
 0x290   :  { %v2783_v2 = vmul.f32 %v7027_v21, %v6591_v10  ;;  %v2773_v29 = vadd.f32 %v2771_v24, %v2755_v28  ;;  %v2774_v40 = vadd.f32 %v2772_v52, %v2756_v4  ;;  %v2784_v31 = vmul.f32 %v7029_v8, %v6591_v10  ;;  %v7945_v52 = vld [vmem:[#allocation67_spill] sm:$0xff] }
 0x291   :  { %v2779_v32 = vadd.f32 %v2777_v63, %v2761_v39  ;;  %v2780_v1 = vadd.f32 %v2778_v60, %v2762_v34  ;;  %v2789_v12 = vmul.f32 %v7027_v21, %v6594_v9  ;;  %v2790_v5 = vmul.f32 %v7029_v8, %v6594_v9 }
 0x292   :  { %v2785_v59 = vadd.f32 %v2783_v2, %v2767_v41  ;;  %v2786_v53 = vadd.f32 %v2784_v31, %v2768_v20  ;;  %v2795_v54 = vmul.f32 %v7031_v3, %v6597_v42  ;;  %v2796_v6 = vmul.f32 %v7033_v25, %v6597_v42  ;;  %v7946_v41 = vld [vmem:[#allocation68_spill] sm:$0xff] }
 0x293   :  { %v2801_v13 = vmul.f32 %v7031_v3, %v6600_v33  ;;  %v2791_v44 = vadd.f32 %v2789_v12, %v2773_v29  ;;  %v2792_v10 = vadd.f32 %v2790_v5, %v2774_v40  ;;  %v2802_v28 = vmul.f32 %v7033_v25, %v6600_v33  ;;  %v7947_v29 = vld [vmem:[#allocation69_spill] sm:$0xff]  ;;  %v7948_v5 = vld [vmem:[#allocation70_spill] sm:$0xff] }
 0x294   :  { %v2807_v4 = vmul.f32 %v7031_v3, %v6607_v16  ;;  %v2797_v39 = vadd.f32 %v2795_v54, %v2779_v32  ;;  %v2798_v9 = vadd.f32 %v2796_v6, %v2780_v1  ;;  %v2808_v47 = vmul.f32 %v7033_v25, %v6607_v16 }
 0x295   :  { %v2803_v0 = vadd.f32 %v2801_v13, %v2785_v59  ;;  %v2804_v61 = vadd.f32 %v2802_v28, %v2786_v53  ;;  %v2813_v42 = vmul.f32 %v7035_v55, %v6610_v57  ;;  %v2814_v48 = vmul.f32 %v7037_v38, %v6610_v57  ;;  %v7949_v13 = vld [vmem:[#allocation71_spill] sm:$0xff] }
 0x296   :  { %v2809_v34 = vadd.f32 %v2807_v4, %v2791_v44  ;;  %v2810_v24 = vadd.f32 %v2808_v47, %v2792_v10  ;;  %v2819_v33 = vmul.f32 %v7035_v55, %v7945_v52  ;;  %v2820_v63 = vmul.f32 %v7037_v38, %v7945_v52 }
 0x297   :  { %v2825_v20 = vmul.f32 %v7035_v55, %v7946_v41  ;;  %v2815_v60 = vadd.f32 %v2813_v42, %v2797_v39  ;;  %v2816_v16 = vadd.f32 %v2814_v48, %v2798_v9  ;;  %v2826_v2 = vmul.f32 %v7037_v38, %v7946_v41  ;;  %v7951_v48 = vld [vmem:[#allocation73_spill] sm:$0xff] }
 0x298   :  { %v2831_v40 = vmul.f32 %v7039_v35, %v7947_v29  ;;  %v2821_v32 = vadd.f32 %v2819_v33, %v2803_v0  ;;  %v2822_v57 = vadd.f32 %v2820_v63, %v2804_v61  ;;  %v2832_v1 = vmul.f32 %v7041_v51, %v7947_v29 }
 0x299   :  { %v2827_v31 = vadd.f32 %v2825_v20, %v2809_v34  ;;  %v2828_v59 = vadd.f32 %v2826_v2, %v2810_v24  ;;  %v2837_v53 = vmul.f32 %v7039_v35, %v7948_v5  ;;  %v2838_v54 = vmul.f32 %v7041_v51, %v7948_v5  ;;  %v7950_v34 = vld [vmem:[#allocation72_spill] sm:$0xff] }
 0x29a   :  { %v2833_v12 = vadd.f32 %v2831_v40, %v2815_v60  ;;  %v2834_v6 = vadd.f32 %v2832_v1, %v2816_v16  ;;  %v2843_v44 = vmul.f32 %v7039_v35, %v7949_v13  ;;  %v2844_v10 = vmul.f32 %v7041_v51, %v7949_v13 }
 0x29b   :  { %v2847_v28 = vrot.slane %v7015_v22, 1  ;;  %v2839_v4 = vadd.f32 %v2837_v53, %v2821_v32  ;;  %v2840_v39 = vadd.f32 %v2838_v54, %v2822_v57  ;;  %v2848_v9 = vrot.slane %v7019_v7, 1  ;;  %v7952_v53 = vld [vmem:[#allocation74_spill] sm:$0xff] }
 0x29c   :  { %v2867_v0 = vrot.slane %v7021_v45, 1  ;;  %v2845_v47 = vadd.f32 %v2843_v44, %v2827_v31  ;;  %v2846_v61 = vadd.f32 %v2844_v10, %v2828_v59  ;;  %v2868_v16 = vrot.slane %v7025_v46, 1 }
 0x29d   :  { %v2851_v42 = vmul.f32 %v2847_v28, %v7950_v34  ;;  %v2857_v24 = vmul.f32 %v2847_v28, %v7951_v48  ;;  %v2852_v52 = vmul.f32 %v2848_v9, %v7950_v34  ;;  %v2858_v33 = vmul.f32 %v2848_v9, %v7951_v48  ;;  %v7955_v34 = vld [vmem:[#allocation95_spill] sm:$0xff] }
 0x29e   :  { %v2863_v63 = vmul.f32 %v2847_v28, %v6642_v17  ;;  %v2864_v41 = vmul.f32 %v2848_v9, %v6642_v17  ;;  %v2871_v2 = vmul.f32 %v2867_v0, %v6645_v62  ;;  %v2872_v31 = vmul.f32 %v2868_v16, %v6645_v62 }
 0x29f   :  { %v2853_v20 = vadd.f32 %v2851_v42, %v2833_v12  ;;  %v2859_v60 = vadd.f32 %v2857_v24, %v2839_v4  ;;  %v2854_v29 = vadd.f32 %v2852_v52, %v2834_v6  ;;  %v2860_v40 = vadd.f32 %v2858_v33, %v2840_v39  ;;  %v7953_v39 = vld [vmem:[#allocation75_spill] sm:$0xff] }
 0x2a0   :  { %v2865_v32 = vadd.f32 %v2863_v63, %v2845_v47  ;;  %v2866_v57 = vadd.f32 %v2864_v41, %v2846_v61  ;;  %v2877_v59 = vmul.f32 %v2867_v0, %v6648_v23  ;;  %v2878_v5 = vmul.f32 %v2868_v16, %v6648_v23  ;;  %v7954_v23 = vld [vmem:[#allocation76_spill] sm:$0xff] }
 0x2a1   :  { %v2873_v1 = vadd.f32 %v2871_v2, %v2853_v20  ;;  %v2883_v54 = vmul.f32 %v2867_v0, %v7952_v53  ;;  %v2884_v17 = vmul.f32 %v2868_v16, %v7952_v53  ;;  %v2887_v12 = vrot.slane %v7027_v21, 1  ;;  %v7956_v63 = vld [vmem:[#allocation96_spill] sm:$0xff] }
 0x2a2   :  { %v2888_v13 = vrot.slane %v7029_v8, 1  ;;  %v2874_v44 = vadd.f32 %v2872_v31, %v2854_v29  ;;  %v2879_v6 = vadd.f32 %v2877_v59, %v2859_v60  ;;  %v2880_v10 = vadd.f32 %v2878_v5, %v2860_v40  ;;  %v7958_v59 = vld [vmem:[#allocation98_spill] sm:$0xff] }
 0x2a3   :  { %v2907_v28 = vrot.slane %v7031_v3, 1  ;;  %v2885_v4 = vadd.f32 %v2883_v54, %v2865_v32  ;;  %v2886_v62 = vadd.f32 %v2884_v17, %v2866_v57  ;;  %v2891_v9 = vmul.f32 %v2887_v12, %v7953_v39  ;;  %v7957_v32 = vld [vmem:[#allocation97_spill] sm:$0xff] }
 0x2a4   :  { %v2892_v47 = vmul.f32 %v2888_v13, %v7953_v39  ;;  %v2897_v61 = vmul.f32 %v2887_v12, %v7954_v23  ;;  %v2898_v0 = vmul.f32 %v2888_v13, %v7954_v23  ;;  %v2903_v42 = vmul.f32 %v2887_v12, %v7955_v34 }
 0x2a5   :  { %v2904_v48 = vmul.f32 %v2888_v13, %v7955_v34  ;;  %v2893_v24 = vadd.f32 %v2891_v9, %v2873_v1  ;;  %v2908_v33 = vrot.slane %v7033_v25, 1  ;;  %v2911_v41 = vmul.f32 %v2907_v28, %v7956_v63  ;;  %v7960_v9 = vld [vmem:[#allocation100_spill] sm:$0xff] }
 0x2a6   :  { %v2894_v52 = vadd.f32 %v2892_v47, %v2874_v44  ;;  %v2899_v20 = vadd.f32 %v2897_v61, %v2879_v6  ;;  %v2900_v60 = vadd.f32 %v2898_v0, %v2880_v10  ;;  %v2905_v16 = vadd.f32 %v2903_v42, %v2885_v4  ;;  %v7959_v4 = vld [vmem:[#allocation99_spill] sm:$0xff] }
 0x2a7   :  { %v2906_v2 = vadd.f32 %v2904_v48, %v2886_v62  ;;  %v2912_v29 = vmul.f32 %v2908_v33, %v7956_v63  ;;  %v2913_v40 = vadd.f32 %v2911_v41, %v2893_v24  ;;  %v2917_v57 = vmul.f32 %v2907_v28, %v7957_v32 }
 0x2a8   :  { %v2918_v31 = vmul.f32 %v2908_v33, %v7957_v32  ;;  %v2923_v5 = vmul.f32 %v2907_v28, %v7958_v59  ;;  %v2924_v1 = vmul.f32 %v2908_v33, %v7958_v59  ;;  %v2927_v53 = vrot.slane %v7035_v55, 1 }
 0x2a9   :  { %v2928_v54 = vrot.slane %v7037_v38, 1  ;;  %v2914_v17 = vadd.f32 %v2912_v29, %v2894_v52  ;;  %v2919_v12 = vadd.f32 %v2917_v57, %v2899_v20  ;;  %v2947_v44 = vrot.slane %v7039_v35, 1 }
 0x2aa   :  { %v2920_v13 = vadd.f32 %v2918_v31, %v2900_v60  ;;  %v2925_v6 = vadd.f32 %v2923_v5, %v2905_v16  ;;  %v2926_v10 = vadd.f32 %v2924_v1, %v2906_v2  ;;  %v2931_v62 = vmul.f32 %v2927_v53, %v7959_v4  ;;  %v7961_v1 = vld [vmem:[#allocation105_spill] sm:$0xff] }
 0x2ab   :  { %v2932_v39 = vmul.f32 %v2928_v54, %v7959_v4  ;;  %v2937_v47 = vmul.f32 %v2927_v53, %v7960_v9  ;;  %v2938_v28 = vmul.f32 %v2928_v54, %v7960_v9  ;;  %v2943_v23 = vmul.f32 %v2927_v53, %v7903_v49 }
 0x2ac   :  { %v2944_v61 = vmul.f32 %v2928_v54, %v7903_v49  ;;  %v2933_v0 = vadd.f32 %v2931_v62, %v2913_v40  ;;  %v2948_v42 = vrot.slane %v7041_v51, 1  ;;  %v2951_v48 = vmul.f32 %v2947_v44, %v7904_v14 }
 0x2ad   :  { %v2934_v34 = vadd.f32 %v2932_v39, %v2914_v17  ;;  %v2939_v24 = vadd.f32 %v2937_v47, %v2919_v12  ;;  %v2940_v52 = vadd.f32 %v2938_v28, %v2920_v13  ;;  %v2945_v33 = vadd.f32 %v2943_v23, %v2925_v6 }
 0x2ae   :  { %v2946_v63 = vadd.f32 %v2944_v61, %v2926_v10  ;;  %v2952_v41 = vmul.f32 %v2948_v42, %v7904_v14  ;;  %v2953_v20 = vadd.f32 %v2951_v48, %v2933_v0  ;;  %v2957_v60 = vmul.f32 %v2947_v44, %v7905_v37 }
 0x2af   :  { %v2958_v16 = vmul.f32 %v2948_v42, %v7905_v37  ;;  %v2963_v2 = vmul.f32 %v2947_v44, %v7906_v27  ;;  %v2964_v49 = vmul.f32 %v2948_v42, %v7906_v27  ;;  %v2967_v29 = vrot.slane %v7015_v22, 2  ;;  %v7962_v37 = vld [vmem:[#allocation106_spill] sm:$0xff] }
 0x2b0   :  { %v2968_v40 = vrot.slane %v7019_v7, 2  ;;  %v2954_v32 = vadd.f32 %v2952_v41, %v2934_v34  ;;  %v2959_v57 = vadd.f32 %v2957_v60, %v2939_v24  ;;  %v2987_v59 = vrot.slane %v7021_v45, 2 }
 0x2b1   :  { %v2960_v31 = vadd.f32 %v2958_v16, %v2940_v52  ;;  %v2965_v5 = vadd.f32 %v2963_v2, %v2945_v33  ;;  %v2966_v14 = vadd.f32 %v2964_v49, %v2946_v63  ;;  %v2971_v53 = vmul.f32 %v2967_v29, %v7961_v1  ;;  %v7963_v52 = vld [vmem:[#allocation63_spill] sm:$0xff] }
 0x2b2   :  { %v2972_v54 = vmul.f32 %v2968_v40, %v7961_v1  ;;  %v2977_v17 = vmul.f32 %v2967_v29, %v7962_v37  ;;  %v2978_v12 = vmul.f32 %v2968_v40, %v7962_v37  ;;  %v2983_v27 = vmul.f32 %v2967_v29, %v7909_v18 }
 0x2b3   :  { %v2984_v22 = vmul.f32 %v2968_v40, %v7909_v18  ;;  %v2973_v7 = vadd.f32 %v2971_v53, %v2953_v20  ;;  %v2988_v44 = vrot.slane %v7025_v46, 2  ;;  %v2991_v45 = vmul.f32 %v2987_v59, %v7910_v26 }
 0x2b4   :  { %v2974_v13 = vadd.f32 %v2972_v54, %v2954_v32  ;;  %v2979_v6 = vadd.f32 %v2977_v17, %v2959_v57  ;;  %v2980_v10 = vadd.f32 %v2978_v12, %v2960_v31  ;;  %v2985_v4 = vadd.f32 %v2983_v27, %v2965_v5  ;;  %v7965_v12 = vld [vmem:[#allocation81_spill] sm:$0xff] }
 0x2b5   :  { %v2986_v62 = vadd.f32 %v2984_v22, %v2966_v14  ;;  %v2992_v39 = vmul.f32 %v2988_v44, %v7910_v26  ;;  %v2993_v9 = vadd.f32 %v2991_v45, %v2973_v7  ;;  %v2997_v47 = vmul.f32 %v2987_v59, %v7911_v36 }
 0x2b6   :  { %v2998_v28 = vmul.f32 %v2988_v44, %v7911_v36  ;;  %v3003_v23 = vmul.f32 %v2987_v59, %v7912_v19  ;;  %v3004_v18 = vmul.f32 %v2988_v44, %v7912_v19  ;;  %v3007_v61 = vrot.slane %v7027_v21, 2  ;;  %v7964_v36 = vld [vmem:[#allocation64_spill] sm:$0xff] }
 0x2b7   :  { %v3008_v46 = vrot.slane %v7029_v8, 2  ;;  %v2994_v0 = vadd.f32 %v2992_v39, %v2974_v13  ;;  %v2999_v34 = vadd.f32 %v2997_v47, %v2979_v6  ;;  %v3027_v48 = vrot.slane %v7031_v3, 2 }
 0x2b8   :  { %v3000_v42 = vadd.f32 %v2998_v28, %v2980_v10  ;;  %v3005_v24 = vadd.f32 %v3003_v23, %v2985_v4  ;;  %v3006_v26 = vadd.f32 %v3004_v18, %v2986_v62  ;;  %v3011_v33 = vmul.f32 %v3007_v61, %v7963_v52 }
 0x2b9   :  { %v3012_v63 = vmul.f32 %v3008_v46, %v7963_v52  ;;  %v3017_v41 = vmul.f32 %v3007_v61, %v7964_v36  ;;  %v3018_v20 = vmul.f32 %v3008_v46, %v7964_v36  ;;  %v3023_v19 = vmul.f32 %v3007_v61, %v7915_v56 }
 0x2ba   :  { %v3024_v21 = vmul.f32 %v3008_v46, %v7915_v56  ;;  %v3013_v8 = vadd.f32 %v3011_v33, %v2993_v9  ;;  %v3028_v16 = vrot.slane %v7033_v25, 2  ;;  %v3031_v3 = vmul.f32 %v3027_v48, %v7916_v30 }
 0x2bb   :  { %v3014_v60 = vadd.f32 %v3012_v63, %v2994_v0  ;;  %v3019_v2 = vadd.f32 %v3017_v41, %v2999_v34  ;;  %v3020_v49 = vadd.f32 %v3018_v20, %v3000_v42  ;;  %v3025_v29 = vadd.f32 %v3023_v19, %v3005_v24 }
 0x2bc   :  { %v3026_v40 = vadd.f32 %v3024_v21, %v3006_v26  ;;  %v3032_v32 = vmul.f32 %v3028_v16, %v7916_v30  ;;  %v3033_v57 = vadd.f32 %v3031_v3, %v3013_v8  ;;  %v3037_v31 = vmul.f32 %v3027_v48, %v7917_v11 }
 0x2bd   :  { %v3038_v59 = vmul.f32 %v3028_v16, %v7917_v11  ;;  %v3043_v5 = vmul.f32 %v3027_v48, %v7918_v58  ;;  %v3044_v56 = vmul.f32 %v3028_v16, %v7918_v58  ;;  %v3047_v14 = vrot.slane %v7035_v55, 2  ;;  %v7966_v11 = vld [vmem:[#allocation82_spill] sm:$0xff]  ;;  %v7967_v58 = vld [vmem:[#allocation83_spill] sm:$0xff] }
 0x2be   :  { %v3048_v25 = vrot.slane %v7037_v38, 2  ;;  %v3034_v1 = vadd.f32 %v3032_v32, %v3014_v60  ;;  %v3039_v53 = vadd.f32 %v3037_v31, %v3019_v2  ;;  %v3067_v37 = vrot.slane %v7039_v35, 2 }
 0x2bf   :  { %v3040_v54 = vadd.f32 %v3038_v59, %v3020_v49  ;;  %v3045_v17 = vadd.f32 %v3043_v5, %v3025_v29  ;;  %v3046_v30 = vadd.f32 %v3044_v56, %v3026_v40  ;;  %v3051_v27 = vmul.f32 %v3047_v14, %v7965_v12 }
 0x2c0   :  { %v3052_v22 = vmul.f32 %v3048_v25, %v7965_v12  ;;  %v3057_v7 = vmul.f32 %v3047_v14, %v7966_v11  ;;  %v3058_v13 = vmul.f32 %v3048_v25, %v7966_v11  ;;  %v3063_v44 = vmul.f32 %v3047_v14, %v7967_v58 }
 0x2c1   :  { %v3064_v55 = vmul.f32 %v3048_v25, %v7967_v58  ;;  %v3053_v38 = vadd.f32 %v3051_v27, %v3033_v57  ;;  %v3068_v6 = vrot.slane %v7041_v51, 2  ;;  %v3071_v35 = vmul.f32 %v3067_v37, %v7922_v50 }
 0x2c2   :  { %v3054_v45 = vadd.f32 %v3052_v22, %v3034_v1  ;;  %v3059_v10 = vadd.f32 %v3057_v7, %v3039_v53  ;;  %v3060_v4 = vadd.f32 %v3058_v13, %v3040_v54  ;;  %v3065_v62 = vadd.f32 %v3063_v44, %v3045_v17 }
 0x2c3   :  { %v3066_v39 = vadd.f32 %v3064_v55, %v3046_v30  ;;  %v3072_v9 = vmul.f32 %v3068_v6, %v7922_v50  ;;  %v3073_v47 = vadd.f32 %v3071_v35, %v3053_v38  ;;  %v3077_v28 = vmul.f32 %v3067_v37, %v7923_v15 }
 0x2c4   :  { %v3078_v23 = vmul.f32 %v3068_v6, %v7923_v15  ;;  %v3083_v18 = vmul.f32 %v3067_v37, %v7924_v43  ;;  %v3084_v61 = vmul.f32 %v3068_v6, %v7924_v43 }
 0x2c5   :  { %v3074_v46 = vadd.f32 %v3072_v9, %v3054_v45  ;;  %v3079_v0 = vadd.f32 %v3077_v28, %v3059_v10  ;;  %3555 = vst [vmem:[%s7926_s19 + $0x30] sm:$0xff] %v3073_v47 }
 0x2c6   :  { %v3080_v51 = vadd.f32 %v3078_v23, %v3060_v4  ;;  %v3085_v34 = vadd.f32 %v3083_v18, %v3065_v62  ;;  %v3086_v42 = vadd.f32 %v3084_v61, %v3066_v39 }
 0x2c7   :  { %3556 = vst [vmem:[%s7926_s19 + $0x38] sm:$0xff] %v3074_v46  ;;  %3557 = vst [vmem:[%s7926_s19 + $0x40] sm:$0xff] %v3079_v0 }
 0x2c8   :  { %3558 = vst [vmem:[%s7926_s19 + $0x48] sm:$0xff] %v3080_v51  ;;  %3559 = vst [vmem:[%s7926_s19 + $0x50] sm:$0xff] %v3085_v34 }
 0x2c9   :  { %3560 = vst [vmem:[%s7926_s19 + $0x58] sm:$0xff] %v3086_v42 }
 0x2ca   :  { %3100 = vsyncpa [#allocation3], 1 }
 0x2cb   :  { %3101 = vsyncpa [#allocation5], 1 }
 0x2cc   :  { %3102 = vsyncpa [#allocation8], 1 }

</bundles_post_ra>
